<compile_context>
chip_gen: v7x
topology: tpu7x:2x2x1
jax: 0.10.0
libtpu: 0.0.40
codegen_flags: <defaults>
</compile_context>

<pallas_src>
import jax
import jax.numpy as jnp
from jax.experimental import pallas as pl
from jax.experimental.pallas import tpu as pltpu


_LANE = 128


def _round_up(x, m):
    return ((x + m - 1) // m) * m


def _largest_divisor_leq(n, cap, *, even=False):
    cap = max(1, min(n, cap))
    for d in range(cap, 0, -1):
        if n % d == 0 and (not even or d % 2 == 0):
            return d
    return 2 if even else 1


def _vmem_limit_bytes():
    """~48 MiB on v7x (64 MiB physical), ~100 MiB on v5e/v6e (128 MiB physical)."""
    cap = 64 * 1024 * 1024
    try:
        cap = int(pltpu.get_tpu_info().vmem_capacity_bytes)
    except Exception:
        pass
    limit = min(cap - 16 * 1024 * 1024, 100 * 1024 * 1024)
    return int(max(limit, 32 * 1024 * 1024))


# ----------------------------------------------------------------------------
# Pallas kernels
# ----------------------------------------------------------------------------
def _make_conv_kernel(th, w_out, cin_p, cp, fuse_pool):
    """3x3 / stride-1 / pad-1 conv + bias + ReLU (optionally fused 2x2 max pool).

    Refs per grid step:
      xm_ref : (1, th, W+2, Cin_p)   main rows of the padded band
      xh0/1  : (1, 1, W+2, Cin_p)    the two halo rows below the band
      w_ref  : (9*Cin_p, Cp)         im2col-ordered weights
      b_ref  : (1, Cp)               bias (f32)
      o_ref  : conv output block; p_ref (fused only): pooled output block
      band_ref: (th+2, W+2, Cin_p)   VMEM band assembly
      col_ref : (th*W, 9*Cin_p)      VMEM im2col (never leaves the chip)
      vmax_ref: (th//2, W, Cp)       fused-pool vertical-pair max (fused only)
    """
    mt = th * w_out

    def kernel(xm_ref, xh0_ref, xh1_ref, w_ref, b_ref, *rest):
        if fuse_pool:
            o_ref, p_ref, band_ref, col_ref, vmax_ref = rest
        else:
            o_ref, band_ref, col_ref = rest

        # Assemble the (th+2)-row spatially padded band in VMEM.  The two halo
        # rows come from 1-row Blocked views of the same HBM array, so nothing
        # is duplicated or restacked in HBM.
        band_ref[pl.ds(0, th), :, :] = xm_ref[0]
        band_ref[pl.ds(th, 1), :, :] = xh0_ref[0]
        band_ref[pl.ds(th + 1, 1), :, :] = xh1_ref[0]

        # im2col in VMEM: one (th*W, 9*Cin_p) LHS.
        for kh in range(3):
            for kw in range(3):
                tap = kh * 3 + kw
                patch = band_ref[pl.ds(kh, th), pl.ds(kw, w_out), :]
                col_ref[:, pl.ds(tap * cin_p, cin_p)] = patch.reshape(mt, cin_p)

        # Single MXU matmul (K = 9*Cin_p), f32 accumulate, bias + ReLU in f32.
        y = jnp.dot(col_ref[...], w_ref[...], preferred_element_type=jnp.float32)
        y = jnp.maximum(y + b_ref[...], 0.0)

        if not fuse_pool:
            o_ref[0] = y.reshape(th, w_out, cp).astype(o_ref.dtype)
        else:
            # Conv output with H split into (row-pair, 2) so the fused pool can
            # address vertical pairs with static indices.
            o_ref[0] = y.reshape(th // 2, 2, w_out, cp).astype(o_ref.dtype)
            wo = w_out // 2
            vmax_ref[...] = jnp.maximum(o_ref[0, :, 0, :, :], o_ref[0, :, 1, :, :])
            p_ref[0] = jnp.maximum(vmax_ref[:, pl.ds(0, wo, stride=2), :],
                                   vmax_ref[:, pl.ds(1, wo, stride=2), :])

    return kernel


def _maxpool2x2_kernel(x_ref, o_ref):
    """Scratch-free 2x2 / stride-2 max pool (fallback when pooling is not fused).

    x_ref : (1, tph, 2, 2*Wo, C)  -- H split into (row-pair, 2) by a free reshape
    o_ref : (1, tph, Wo, C)
    """
    wo = o_ref.shape[2]
    c00 = x_ref[0, :, 0, pl.ds(0, wo, stride=2), :]
    c01 = x_ref[0, :, 0, pl.ds(1, wo, stride=2), :]
    c10 = x_ref[0, :, 1, pl.ds(0, wo, stride=2), :]
    c11 = x_ref[0, :, 1, pl.ds(1, wo, stride=2), :]
    o_ref[0] = jnp.maximum(jnp.maximum(c00, c01), jnp.maximum(c10, c11))


# ----------------------------------------------------------------------------
# Wrappers
# ----------------------------------------------------------------------------
def conv3x3_bias_relu(x_nhwc, w_oihw, b, *, out_dtype=None,
                      compute_dtype=jnp.bfloat16, fuse_pool=False, target_m=None):
    """3x3 conv (stride 1, pad 1) + bias + ReLU on NHWC, optional fused 2x2 pool.

    Output channels are padded to a multiple of 128 only when Cout >= 128
    (lane-dense stores); small Cout is stored unpadded.  Padded channels (when
    present) are exactly zero and can be carried into the next layer.
    """
    B, H, W, Cin = x_nhwc.shape
    Cout, Cin_w = int(w_oihw.shape[0]), int(w_oihw.shape[1])
    assert Cin_w <= Cin, "logical input channels must be a prefix of x's channels"
    cin_p = _round_up(Cin, 8)
    cp = _round_up(Cout, _LANE) if Cout >= _LANE else Cout
    out_dtype = x_nhwc.dtype if out_dtype is None else out_dtype

    # Weights: OIHW -> (kh, kw, ci, co) -> single (9*Cin_p, Cp) matrix whose row
    # order matches the im2col column order; zero-pad both channel dims.
    w = jnp.transpose(w_oihw, (2, 3, 1, 0))
    w = jnp.pad(w, ((0, 0), (0, 0), (0, cin_p - Cin_w), (0, cp - Cout)))
    w = w.reshape(9 * cin_p, cp).astype(compute_dtype)
    b_row = jnp.pad(b.astype(jnp.float32), (0, cp - Cout)).reshape(1, cp)

    # Input: 1-pixel spatial halo + channel pad to a sublane multiple (glue).
    xp = jnp.pad(x_nhwc.astype(compute_dtype),
                 ((0, 0), (1, 1), (1, 1), (0, cin_p - Cin)))

    if target_m is None:
        target_m = 1024 if max(cin_p, cp) >= 256 else 2048
    th = _largest_divisor_leq(H, max(1, target_m // max(W, 1)), even=fuse_pool)
    # TODO(synk): a prime H with a small target_m degrades to th=1 bands; a masked
    #             remainder band would avoid that but is not needed here.
    nb = H // th
    mt = th * W

    in_specs = [
        pl.BlockSpec((1, th, W + 2, cin_p), lambda bi, i: (bi, i, 0, 0)),
        pl.BlockSpec((1, 1, W + 2, cin_p), lambda bi, i: (bi, (i + 1) * th, 0, 0)),
        pl.BlockSpec((1, 1, W + 2, cin_p), lambda bi, i: (bi, (i + 1) * th + 1, 0, 0)),
        # Constant index maps -> weights / bias are DMA'd once, not per band.
        pl.BlockSpec((9 * cin_p, cp), lambda bi, i: (0, 0)),
        pl.BlockSpec((1, cp), lambda bi, i: (0, 0)),
    ]
    scratch = [pltpu.VMEM((th + 2, W + 2, cin_p), compute_dtype),
               pltpu.VMEM((mt, 9 * cin_p), compute_dtype)]

    flops = 2 * B * H * W * 9 * cin_p * cp
    out_bytes = B * H * W * cp * jnp.dtype(out_dtype).itemsize
    bytes_accessed = int(xp.size * xp.dtype.itemsize + w.size * w.dtype.itemsize
                         + b_row.size * 4 + out_bytes)
    params = pltpu.CompilerParams(dimension_semantics=("parallel", "parallel"),
                                  vmem_limit_bytes=_vmem_limit_bytes())

    if not fuse_pool:
        return pl.pallas_call(
            _make_conv_kernel(th, W, cin_p, cp, False),
            out_shape=jax.ShapeDtypeStruct((B, H, W, cp), out_dtype),
            grid=(B, nb),
            in_specs=in_specs,
            out_specs=pl.BlockSpec((1, th, W, cp), lambda bi, i: (bi, i, 0, 0)),
            scratch_shapes=scratch,
            compiler_params=params,
            cost_estimate=pl.CostEstimate(flops=flops, transcendentals=0,
                                          bytes_accessed=bytes_accessed),
        )(xp, xp, xp, w, b_row)

    assert H % 2 == 0 and W % 2 == 0 and th % 2 == 0
    ho, wo = H // 2, W // 2
    scratch = scratch + [pltpu.VMEM((th // 2, W, cp), out_dtype)]
    conv5, pool = pl.pallas_call(
        _make_conv_kernel(th, W, cin_p, cp, True),
        out_shape=(jax.ShapeDtypeStruct((B, ho, 2, W, cp), out_dtype),
                   jax.ShapeDtypeStruct((B, ho, wo, cp), out_dtype)),
        grid=(B, nb),
        in_specs=in_specs,
        out_specs=[pl.BlockSpec((1, th // 2, 2, W, cp), lambda bi, i: (bi, i, 0, 0, 0)),
                   pl.BlockSpec((1, th // 2, wo, cp), lambda bi, i: (bi, i, 0, 0))],
        scratch_shapes=scratch,
        compiler_params=params,
        cost_estimate=pl.CostEstimate(
            flops=flops, transcendentals=0,
            bytes_accessed=int(bytes_accessed
                               + B * ho * wo * cp * jnp.dtype(out_dtype).itemsize)),
    )(xp, xp, xp, w, b_row)
    # (B, H/2, 2, W, Cp) -> (B, H, W, Cp): pure adjacent-dim merge, free in XLA.
    return conv5.reshape(B, H, W, cp), pool


def maxpool2x2(x_nhwc, *, target_rows=4096):
    """nn.MaxPool2d(2) fallback (used only when the pool cannot be fused)."""
    B, H, W, C = x_nhwc.shape
    ho, wo = H // 2, W // 2
    x = x_nhwc[:, :2 * ho, :2 * wo, :]            # no-op for even H, W
    xr = x.reshape(B, ho, 2, 2 * wo, C)           # free: splits the (major) H dim
    tph = _largest_divisor_leq(ho, max(1, target_rows // max(2 * wo, 1)))
    return pl.pallas_call(
        _maxpool2x2_kernel,
        out_shape=jax.ShapeDtypeStruct((B, ho, wo, C), x_nhwc.dtype),
        grid=(B, ho // tph),
        in_specs=[pl.BlockSpec((1, tph, 2, 2 * wo, C),
                               lambda bi, hi: (bi, hi, 0, 0, 0))],
        out_specs=pl.BlockSpec((1, tph, wo, C), lambda bi, hi: (bi, hi, 0, 0)),
        compiler_params=pltpu.CompilerParams(
            dimension_semantics=("parallel", "parallel"),
            vmem_limit_bytes=_vmem_limit_bytes()),
    )(xr)


# ----------------------------------------------------------------------------
# Encode module (forward + deterministic param init)
# ----------------------------------------------------------------------------
def init_encode_params(key, in_channel, out_channel, block_number=1):
    params = []
    cin = in_channel
    for _ in range(block_number):
        key, kw_, kb_ = jax.random.split(key, 3)
        fan_in = cin * 9
        w = jax.random.normal(kw_, (out_channel, cin, 3, 3), jnp.float32) * (2.0 / fan_in) ** 0.5
        b = jax.random.normal(kb_, (out_channel,), jnp.float32) * 0.01
        params.append((w, b))
        cin = out_channel
    return params


def encode_forward(x_nchw, params):
    """Returns (x_conv, x_pool), both NCHW, matching Encode.forward."""
    cout = int(params[-1][0].shape[0])
    n_layers = len(params)
    x = jnp.transpose(x_nchw, (0, 2, 3, 1))              # NCHW -> NHWC (glue)
    H, W = x.shape[1], x.shape[2]
    can_fuse = (H % 2 == 0) and (W % 2 == 0)
    x_pool = None
    for idx, (w, b) in enumerate(params):                 # RC block (see TODO above)
        is_last = idx == n_layers - 1
        # First layer in f32 (tiny K, avoids bf16 compounding); rest bf16 on MXU.
        compute_dtype = jnp.float32 if idx == 0 else jnp.bfloat16
        out_dtype = x_nchw.dtype if is_last else jnp.bfloat16
        if is_last and can_fuse:
            x, x_pool = conv3x3_bias_relu(x, w, b, out_dtype=out_dtype,
                                          compute_dtype=compute_dtype, fuse_pool=True)
        else:
            x = conv3x3_bias_relu(x, w, b, out_dtype=out_dtype,
                                  compute_dtype=compute_dtype, fuse_pool=False)
    if x_pool is None:                                    # odd H or W: standalone pool
        x_pool = maxpool2x2(x)
    if x.shape[-1] != cout:                               # drop lane padding (glue)
        x = x[..., :cout]
        x_pool = x_pool[..., :cout]
    # TODO(synk): keep NHWC if the consumer allows it; the transposes below only
    #             reproduce the PyTorch module's NCHW layout.
    return (jnp.transpose(x, (0, 3, 1, 2)),
            jnp.transpose(x_pool, (0, 3, 1, 2)))


# Pure-JAX reference (for correctness check only)
def _ref_forward(x_nchw, params):
    x = x_nchw
    for w, b in params:
        x = jax.lax.conv_general_dilated(
            x, w, window_strides=(1, 1), padding=((1, 1), (1, 1)),
            dimension_numbers=("NCHW", "OIHW", "NCHW"))
        x = jnp.maximum(x + b[None, :, None, None], 0.0)
    xp = jax.lax.reduce_window(x, -jnp.inf, jax.lax.max,
                               (1, 1, 2, 2), (1, 1, 2, 2), "VALID")
    return x, xp


if __name__ == "__main__":
    B, Cin, H, W = 2, 4, 16, 16
    Cout, block_number = 8, 2

    key = jax.random.PRNGKey(0)
    key, kx = jax.random.split(key)
    x = jax.random.normal(kx, (B, Cin, H, W), jnp.float32)
    params = init_encode_params(key, Cin, Cout, block_number=block_number)

    x_conv, x_pool = jax.jit(encode_forward)(x, params)
    jax.block_until_ready((x_conv, x_pool))

    ref_conv, ref_pool = _ref_forward(x, params)
    assert x_conv.shape == (B, Cout, H, W)
    assert x_pool.shape == (B, Cout, H // 2, W // 2)
    # Layer 1 computed in f32; layer 2 uses bf16 MXU inputs -> modest tolerance.
    assert jnp.allclose(x_conv, ref_conv, atol=1e-1, rtol=5e-2), (
        float(jnp.max(jnp.abs(x_conv - ref_conv))))
    assert jnp.allclose(x_pool, ref_pool, atol=1e-1, rtol=5e-2), (
        float(jnp.max(jnp.abs(x_pool - ref_pool))))

    print("KERNEL_OK")
</pallas_src>

<mosaic_0001>
module attributes {stable_mosaic.version = 11 : i64} {
  func.func @kernel(%arg0: i32, %arg1: i32, %arg2: memref<1x16x18x8xf32, #tpu.memory_space<vmem>>, %arg3: memref<1x1x18x8xf32, #tpu.memory_space<vmem>>, %arg4: memref<1x1x18x8xf32, #tpu.memory_space<vmem>>, %arg5: memref<72x8xf32, #tpu.memory_space<vmem>>, %arg6: memref<1x8xf32, #tpu.memory_space<vmem>>, %arg7: memref<1x16x16x8xbf16, #tpu.memory_space<vmem>>, %arg8: memref<18x18x8xf32, #tpu.memory_space<vmem>>, %arg9: memref<256x72xf32, #tpu.memory_space<vmem>>) attributes {dimension_semantics = [#tpu.dimension_semantics<parallel>, #tpu.dimension_semantics<parallel>], iteration_bounds = array<i64: 2, 1>, scalar_prefetch = 0 : i64, scratch_operands = 2 : i64, tpu.core_type = #tpu.core_type<tc>, window_params = [{transform_indices = @transform_0, window_bounds = array<i64: 1, 16, 18, 8>}, {transform_indices = @transform_1, window_bounds = array<i64: 1, 1, 18, 8>}, {transform_indices = @transform_2, window_bounds = array<i64: 1, 1, 18, 8>}, {pipeline_mode = #tpu.pipeline_mode<synchronous>, transform_indices = @transform_3, window_bounds = array<i64: 72, 8>}, {pipeline_mode = #tpu.pipeline_mode<synchronous>, transform_indices = @transform_4, window_bounds = array<i64: 1, 8>}, {transform_indices = @transform_5, window_bounds = array<i64: 1, 16, 16, 8>}]} {
    %c0 = arith.constant 0 : index
    %c0_0 = arith.constant 0 : index
    %c0_1 = arith.constant 0 : index
    %c0_2 = arith.constant 0 : index
    %0 = vector.load %arg2[%c0, %c0_0, %c0_1, %c0_2] : memref<1x16x18x8xf32, #tpu.memory_space<vmem>>, vector<1x16x18x8xf32>
    %1 = vector.shape_cast %0 : vector<1x16x18x8xf32> to vector<16x18x8xf32>
    %c0_3 = arith.constant 0 : index
    %c0_4 = arith.constant 0 : index
    %c0_5 = arith.constant 0 : index
    %2 = vector.load %arg8[%c0_3, %c0_4, %c0_5] : memref<18x18x8xf32, #tpu.memory_space<vmem>>, vector<16x18x8xf32>
    tpu.vector_store %arg8[%c0_3, %c0_4, %c0_5], %1 {strides = array<i32>} : memref<18x18x8xf32, #tpu.memory_space<vmem>>, vector<16x18x8xf32>,
    %c0_6 = arith.constant 0 : index
    %c0_7 = arith.constant 0 : index
    %c0_8 = arith.constant 0 : index
    %c0_9 = arith.constant 0 : index
    %3 = vector.load %arg3[%c0_6, %c0_7, %c0_8, %c0_9] : memref<1x1x18x8xf32, #tpu.memory_space<vmem>>, vector<1x1x18x8xf32>
    %4 = vector.shape_cast %3 : vector<1x1x18x8xf32> to vector<1x18x8xf32>
    %c16 = arith.constant 16 : index
    %c0_10 = arith.constant 0 : index
    %c0_11 = arith.constant 0 : index
    %5 = vector.load %arg8[%c16, %c0_10, %c0_11] : memref<18x18x8xf32, #tpu.memory_space<vmem>>, vector<1x18x8xf32>
    tpu.vector_store %arg8[%c16, %c0_10, %c0_11], %4 {strides = array<i32>} : memref<18x18x8xf32, #tpu.memory_space<vmem>>, vector<1x18x8xf32>,
    %c0_12 = arith.constant 0 : index
    %c0_13 = arith.constant 0 : index
    %c0_14 = arith.constant 0 : index
    %c0_15 = arith.constant 0 : index
    %6 = vector.load %arg4[%c0_12, %c0_13, %c0_14, %c0_15] : memref<1x1x18x8xf32, #tpu.memory_space<vmem>>, vector<1x1x18x8xf32>
    %7 = vector.shape_cast %6 : vector<1x1x18x8xf32> to vector<1x18x8xf32>
    %c17 = arith.constant 17 : index
    %c0_16 = arith.constant 0 : index
    %c0_17 = arith.constant 0 : index
    %8 = vector.load %arg8[%c17, %c0_16, %c0_17] : memref<18x18x8xf32, #tpu.memory_space<vmem>>, vector<1x18x8xf32>
    tpu.vector_store %arg8[%c17, %c0_16, %c0_17], %7 {strides = array<i32>} : memref<18x18x8xf32, #tpu.memory_space<vmem>>, vector<1x18x8xf32>,
    %c0_18 = arith.constant 0 : index
    %c0_19 = arith.constant 0 : index
    %c0_20 = arith.constant 0 : index
    %9 = vector.load %arg8[%c0_18, %c0_19, %c0_20] : memref<18x18x8xf32, #tpu.memory_space<vmem>>, vector<16x16x8xf32>
    %10 = vector.shape_cast %9 : vector<16x16x8xf32> to vector<256x8xf32>
    %c0_21 = arith.constant 0 : index
    %c0_22 = arith.constant 0 : index
    %11 = vector.load %arg9[%c0_21, %c0_22] : memref<256x72xf32, #tpu.memory_space<vmem>>, vector<256x8xf32>
    tpu.vector_store %arg9[%c0_21, %c0_22], %10 {strides = array<i32>} : memref<256x72xf32, #tpu.memory_space<vmem>>, vector<256x8xf32>,
    %c0_23 = arith.constant 0 : index
    %c1 = arith.constant 1 : index
    %c0_24 = arith.constant 0 : index
    %12 = vector.load %arg8[%c0_23, %c1, %c0_24] : memref<18x18x8xf32, #tpu.memory_space<vmem>>, vector<16x16x8xf32>
    %13 = vector.shape_cast %12 : vector<16x16x8xf32> to vector<256x8xf32>
    %c0_25 = arith.constant 0 : index
    %c8 = arith.constant 8 : index
    %14 = vector.load %arg9[%c0_25, %c8] : memref<256x72xf32, #tpu.memory_space<vmem>>, vector<256x8xf32>
    tpu.vector_store %arg9[%c0_25, %c8], %13 {strides = array<i32>} : memref<256x72xf32, #tpu.memory_space<vmem>>, vector<256x8xf32>,
    %c0_26 = arith.constant 0 : index
    %c2 = arith.constant 2 : index
    %c0_27 = arith.constant 0 : index
    %15 = vector.load %arg8[%c0_26, %c2, %c0_27] : memref<18x18x8xf32, #tpu.memory_space<vmem>>, vector<16x16x8xf32>
    %16 = vector.shape_cast %15 : vector<16x16x8xf32> to vector<256x8xf32>
    %c0_28 = arith.constant 0 : index
    %c16_29 = arith.constant 16 : index
    %17 = vector.load %arg9[%c0_28, %c16_29] : memref<256x72xf32, #tpu.memory_space<vmem>>, vector<256x8xf32>
    tpu.vector_store %arg9[%c0_28, %c16_29], %16 {strides = array<i32>} : memref<256x72xf32, #tpu.memory_space<vmem>>, vector<256x8xf32>,
    %c1_30 = arith.constant 1 : index
    %c0_31 = arith.constant 0 : index
    %c0_32 = arith.constant 0 : index
    %18 = vector.load %arg8[%c1_30, %c0_31, %c0_32] : memref<18x18x8xf32, #tpu.memory_space<vmem>>, vector<16x16x8xf32>
    %19 = vector.shape_cast %18 : vector<16x16x8xf32> to vector<256x8xf32>
    %c0_33 = arith.constant 0 : index
    %c24 = arith.constant 24 : index
    %20 = vector.load %arg9[%c0_33, %c24] : memref<256x72xf32, #tpu.memory_space<vmem>>, vector<256x8xf32>
    tpu.vector_store %arg9[%c0_33, %c24], %19 {strides = array<i32>} : memref<256x72xf32, #tpu.memory_space<vmem>>, vector<256x8xf32>,
    %c1_34 = arith.constant 1 : index
    %c1_35 = arith.constant 1 : index
    %c0_36 = arith.constant 0 : index
    %21 = vector.load %arg8[%c1_34, %c1_35, %c0_36] : memref<18x18x8xf32, #tpu.memory_space<vmem>>, vector<16x16x8xf32>
    %22 = vector.shape_cast %21 : vector<16x16x8xf32> to vector<256x8xf32>
    %c0_37 = arith.constant 0 : index
    %c32 = arith.constant 32 : index
    %23 = vector.load %arg9[%c0_37, %c32] : memref<256x72xf32, #tpu.memory_space<vmem>>, vector<256x8xf32>
    tpu.vector_store %arg9[%c0_37, %c32], %22 {strides = array<i32>} : memref<256x72xf32, #tpu.memory_space<vmem>>, vector<256x8xf32>,
    %c1_38 = arith.constant 1 : index
    %c2_39 = arith.constant 2 : index
    %c0_40 = arith.constant 0 : index
    %24 = vector.load %arg8[%c1_38, %c2_39, %c0_40] : memref<18x18x8xf32, #tpu.memory_space<vmem>>, vector<16x16x8xf32>
    %25 = vector.shape_cast %24 : vector<16x16x8xf32> to vector<256x8xf32>
    %c0_41 = arith.constant 0 : index
    %c40 = arith.constant 40 : index
    %26 = vector.load %arg9[%c0_41, %c40] : memref<256x72xf32, #tpu.memory_space<vmem>>, vector<256x8xf32>
    tpu.vector_store %arg9[%c0_41, %c40], %25 {strides = array<i32>} : memref<256x72xf32, #tpu.memory_space<vmem>>, vector<256x8xf32>,
    %c2_42 = arith.constant 2 : index
    %c0_43 = arith.constant 0 : index
    %c0_44 = arith.constant 0 : index
    %27 = vector.load %arg8[%c2_42, %c0_43, %c0_44] : memref<18x18x8xf32, #tpu.memory_space<vmem>>, vector<16x16x8xf32>
    %28 = vector.shape_cast %27 : vector<16x16x8xf32> to vector<256x8xf32>
    %c0_45 = arith.constant 0 : index
    %c48 = arith.constant 48 : index
    %29 = vector.load %arg9[%c0_45, %c48] : memref<256x72xf32, #tpu.memory_space<vmem>>, vector<256x8xf32>
    tpu.vector_store %arg9[%c0_45, %c48], %28 {strides = array<i32>} : memref<256x72xf32, #tpu.memory_space<vmem>>, vector<256x8xf32>,
    %c2_46 = arith.constant 2 : index
    %c1_47 = arith.constant 1 : index
    %c0_48 = arith.constant 0 : index
    %30 = vector.load %arg8[%c2_46, %c1_47, %c0_48] : memref<18x18x8xf32, #tpu.memory_space<vmem>>, vector<16x16x8xf32>
    %31 = vector.shape_cast %30 : vector<16x16x8xf32> to vector<256x8xf32>
    %c0_49 = arith.constant 0 : index
    %c56 = arith.constant 56 : index
    %32 = vector.load %arg9[%c0_49, %c56] : memref<256x72xf32, #tpu.memory_space<vmem>>, vector<256x8xf32>
    tpu.vector_store %arg9[%c0_49, %c56], %31 {strides = array<i32>} : memref<256x72xf32, #tpu.memory_space<vmem>>, vector<256x8xf32>,
    %c2_50 = arith.constant 2 : index
    %c2_51 = arith.constant 2 : index
    %c0_52 = arith.constant 0 : index
    %33 = vector.load %arg8[%c2_50, %c2_51, %c0_52] : memref<18x18x8xf32, #tpu.memory_space<vmem>>, vector<16x16x8xf32>
    %34 = vector.shape_cast %33 : vector<16x16x8xf32> to vector<256x8xf32>
    %c0_53 = arith.constant 0 : index
    %c64 = arith.constant 64 : index
    %35 = vector.load %arg9[%c0_53, %c64] : memref<256x72xf32, #tpu.memory_space<vmem>>, vector<256x8xf32>
    tpu.vector_store %arg9[%c0_53, %c64], %34 {strides = array<i32>} : memref<256x72xf32, #tpu.memory_space<vmem>>, vector<256x8xf32>,
    %c0_54 = arith.constant 0 : index
    %c0_55 = arith.constant 0 : index
    %36 = vector.load %arg9[%c0_54, %c0_55] : memref<256x72xf32, #tpu.memory_space<vmem>>, vector<256x72xf32>
    %c0_56 = arith.constant 0 : index
    %c0_57 = arith.constant 0 : index
    %37 = vector.load %arg5[%c0_56, %c0_57] : memref<72x8xf32, #tpu.memory_space<vmem>>, vector<72x8xf32>
    %cst = arith.constant dense<0.000000e+00> : vector<256x8xf32>
    %38 = tpu.matmul %36, %37, %cst {dimension_numbers = #tpu.dot_dimension_numbers<[1], [0], [0], [1], [0, 0, 1, 1], [], []>} : vector<256x72xf32>, vector<72x8xf32>, vector<256x8xf32> -> vector<256x8xf32>
    %c0_58 = arith.constant 0 : index
    %c0_59 = arith.constant 0 : index
    %39 = vector.load %arg6[%c0_58, %c0_59] : memref<1x8xf32, #tpu.memory_space<vmem>>, vector<1x8xf32>
    %40 = vector.broadcast %39 : vector<1x8xf32> to vector<256x8xf32>
    %41 = arith.addf %38, %40 : vector<256x8xf32>
    %cst_60 = arith.constant 0.000000e+00 : f32
    %42 = vector.broadcast %cst_60 : f32 to vector<256x8xf32>
    %43 = arith.maximumf %41, %42 : vector<256x8xf32>
    %44 = vector.shape_cast %43 : vector<256x8xf32> to vector<16x16x8xf32>
    %45 = arith.truncf %44 : vector<16x16x8xf32> to vector<16x16x8xbf16>
    %c0_61 = arith.constant 0 : index
    %c0_62 = arith.constant 0 : index
    %c0_63 = arith.constant 0 : index
    %c0_64 = arith.constant 0 : index
    %46 = vector.load %arg7[%c0_61, %c0_62, %c0_63, %c0_64] : memref<1x16x16x8xbf16, #tpu.memory_space<vmem>>, vector<1x16x16x8xbf16>
    %47 = vector.shape_cast %46 : vector<1x16x16x8xbf16> to vector<16x16x8xbf16>
    %48 = vector.shape_cast %45 : vector<16x16x8xbf16> to vector<1x16x16x8xbf16>
    tpu.vector_store %arg7[%c0_61, %c0_62, %c0_63, %c0_64], %48 {strides = array<i32>} : memref<1x16x16x8xbf16, #tpu.memory_space<vmem>>, vector<1x16x16x8xbf16>,
    return
  }
  func.func @transform_0(%arg0: i32, %arg1: i32) -> (i32, i32, i32, i32) {
    %c0_i32 = arith.constant 0 : i32
    %c0_i32_0 = arith.constant 0 : i32
    %c0_i32_1 = arith.constant 0 : i32
    return %arg0, %arg1, %c0_i32, %c0_i32_0 : i32, i32, i32, i32
  }
  func.func @transform_1(%arg0: i32, %arg1: i32) -> (i32, i32, i32, i32) {
    %c1_i32 = arith.constant 1 : i32
    %0 = arith.addi %arg1, %c1_i32 : i32
    %c16_i32 = arith.constant 16 : i32
    %1 = arith.muli %0, %c16_i32 : i32
    %c0_i32 = arith.constant 0 : i32
    %c0_i32_0 = arith.constant 0 : i32
    %c0_i32_1 = arith.constant 0 : i32
    return %arg0, %1, %c0_i32, %c0_i32_0 : i32, i32, i32, i32
  }
  func.func @transform_2(%arg0: i32, %arg1: i32) -> (i32, i32, i32, i32) {
    %c1_i32 = arith.constant 1 : i32
    %0 = arith.addi %arg1, %c1_i32 : i32
    %c16_i32 = arith.constant 16 : i32
    %1 = arith.muli %0, %c16_i32 : i32
    %c1_i32_0 = arith.constant 1 : i32
    %2 = arith.addi %1, %c1_i32_0 : i32
    %c0_i32 = arith.constant 0 : i32
    %c0_i32_1 = arith.constant 0 : i32
    %c0_i32_2 = arith.constant 0 : i32
    return %arg0, %2, %c0_i32, %c0_i32_1 : i32, i32, i32, i32
  }
  func.func @transform_3(%arg0: i32, %arg1: i32) -> (i32, i32) {
    %c0_i32 = arith.constant 0 : i32
    %c0_i32_0 = arith.constant 0 : i32
    %c0_i32_1 = arith.constant 0 : i32
    return %c0_i32, %c0_i32_0 : i32, i32
  }
  func.func @transform_4(%arg0: i32, %arg1: i32) -> (i32, i32) {
    %c0_i32 = arith.constant 0 : i32
    %c0_i32_0 = arith.constant 0 : i32
    %c0_i32_1 = arith.constant 0 : i32
    return %c0_i32, %c0_i32_0 : i32, i32
  }
  func.func @transform_5(%arg0: i32, %arg1: i32) -> (i32, i32, i32, i32) {
    %c0_i32 = arith.constant 0 : i32
    %c0_i32_0 = arith.constant 0 : i32
    %c0_i32_1 = arith.constant 0 : i32
    return %arg0, %arg1, %c0_i32, %c0_i32_0 : i32, i32, i32, i32
  }
}

module attributes {stable_mosaic.version = 11 : i64} {
  func.func @kernel(%arg0: i32, %arg1: i32, %arg2: memref<1x16x18x8xbf16, #tpu.memory_space<vmem>>, %arg3: memref<1x1x18x8xbf16, #tpu.memory_space<vmem>>, %arg4: memref<1x1x18x8xbf16, #tpu.memory_space<vmem>>, %arg5: memref<72x8xbf16, #tpu.memory_space<vmem>>, %arg6: memref<1x8xf32, #tpu.memory_space<vmem>>, %arg7: memref<1x8x2x16x8xf32, #tpu.memory_space<vmem>>, %arg8: memref<1x8x8x8xf32, #tpu.memory_space<vmem>>, %arg9: memref<18x18x8xbf16, #tpu.memory_space<vmem>>, %arg10: memref<256x72xbf16, #tpu.memory_space<vmem>>, %arg11: memref<8x16x8xf32, #tpu.memory_space<vmem>>) attributes {dimension_semantics = [#tpu.dimension_semantics<parallel>, #tpu.dimension_semantics<parallel>], iteration_bounds = array<i64: 2, 1>, scalar_prefetch = 0 : i64, scratch_operands = 3 : i64, tpu.core_type = #tpu.core_type<tc>, window_params = [{transform_indices = @transform_0, window_bounds = array<i64: 1, 16, 18, 8>}, {transform_indices = @transform_1, window_bounds = array<i64: 1, 1, 18, 8>}, {transform_indices = @transform_2, window_bounds = array<i64: 1, 1, 18, 8>}, {pipeline_mode = #tpu.pipeline_mode<synchronous>, transform_indices = @transform_3, window_bounds = array<i64: 72, 8>}, {pipeline_mode = #tpu.pipeline_mode<synchronous>, transform_indices = @transform_4, window_bounds = array<i64: 1, 8>}, {transform_indices = @transform_5, window_bounds = array<i64: 1, 8, 2, 16, 8>}, {transform_indices = @transform_6, window_bounds = array<i64: 1, 8, 8, 8>}]} {
    %c0 = arith.constant 0 : index
    %c0_0 = arith.constant 0 : index
    %c0_1 = arith.constant 0 : index
    %c0_2 = arith.constant 0 : index
    %0 = vector.load %arg2[%c0, %c0_0, %c0_1, %c0_2] : memref<1x16x18x8xbf16, #tpu.memory_space<vmem>>, vector<1x16x18x8xbf16>
    %1 = vector.shape_cast %0 : vector<1x16x18x8xbf16> to vector<16x18x8xbf16>
    %c0_3 = arith.constant 0 : index
    %c0_4 = arith.constant 0 : index
    %c0_5 = arith.constant 0 : index
    %2 = vector.load %arg9[%c0_3, %c0_4, %c0_5] : memref<18x18x8xbf16, #tpu.memory_space<vmem>>, vector<16x18x8xbf16>
    tpu.vector_store %arg9[%c0_3, %c0_4, %c0_5], %1 {strides = array<i32>} : memref<18x18x8xbf16, #tpu.memory_space<vmem>>, vector<16x18x8xbf16>,
    %c0_6 = arith.constant 0 : index
    %c0_7 = arith.constant 0 : index
    %c0_8 = arith.constant 0 : index
    %c0_9 = arith.constant 0 : index
    %3 = vector.load %arg3[%c0_6, %c0_7, %c0_8, %c0_9] : memref<1x1x18x8xbf16, #tpu.memory_space<vmem>>, vector<1x1x18x8xbf16>
    %4 = vector.shape_cast %3 : vector<1x1x18x8xbf16> to vector<1x18x8xbf16>
    %c16 = arith.constant 16 : index
    %c0_10 = arith.constant 0 : index
    %c0_11 = arith.constant 0 : index
    %5 = vector.load %arg9[%c16, %c0_10, %c0_11] : memref<18x18x8xbf16, #tpu.memory_space<vmem>>, vector<1x18x8xbf16>
    tpu.vector_store %arg9[%c16, %c0_10, %c0_11], %4 {strides = array<i32>} : memref<18x18x8xbf16, #tpu.memory_space<vmem>>, vector<1x18x8xbf16>,
    %c0_12 = arith.constant 0 : index
    %c0_13 = arith.constant 0 : index
    %c0_14 = arith.constant 0 : index
    %c0_15 = arith.constant 0 : index
    %6 = vector.load %arg4[%c0_12, %c0_13, %c0_14, %c0_15] : memref<1x1x18x8xbf16, #tpu.memory_space<vmem>>, vector<1x1x18x8xbf16>
    %7 = vector.shape_cast %6 : vector<1x1x18x8xbf16> to vector<1x18x8xbf16>
    %c17 = arith.constant 17 : index
    %c0_16 = arith.constant 0 : index
    %c0_17 = arith.constant 0 : index
    %8 = vector.load %arg9[%c17, %c0_16, %c0_17] : memref<18x18x8xbf16, #tpu.memory_space<vmem>>, vector<1x18x8xbf16>
    tpu.vector_store %arg9[%c17, %c0_16, %c0_17], %7 {strides = array<i32>} : memref<18x18x8xbf16, #tpu.memory_space<vmem>>, vector<1x18x8xbf16>,
    %c0_18 = arith.constant 0 : index
    %c0_19 = arith.constant 0 : index
    %c0_20 = arith.constant 0 : index
    %9 = vector.load %arg9[%c0_18, %c0_19, %c0_20] : memref<18x18x8xbf16, #tpu.memory_space<vmem>>, vector<16x16x8xbf16>
    %10 = vector.shape_cast %9 : vector<16x16x8xbf16> to vector<256x8xbf16>
    %c0_21 = arith.constant 0 : index
    %c0_22 = arith.constant 0 : index
    %11 = vector.load %arg10[%c0_21, %c0_22] : memref<256x72xbf16, #tpu.memory_space<vmem>>, vector<256x8xbf16>
    tpu.vector_store %arg10[%c0_21, %c0_22], %10 {strides = array<i32>} : memref<256x72xbf16, #tpu.memory_space<vmem>>, vector<256x8xbf16>,
    %c0_23 = arith.constant 0 : index
    %c1 = arith.constant 1 : index
    %c0_24 = arith.constant 0 : index
    %12 = vector.load %arg9[%c0_23, %c1, %c0_24] : memref<18x18x8xbf16, #tpu.memory_space<vmem>>, vector<16x16x8xbf16>
    %13 = vector.shape_cast %12 : vector<16x16x8xbf16> to vector<256x8xbf16>
    %c0_25 = arith.constant 0 : index
    %c8 = arith.constant 8 : index
    %14 = vector.load %arg10[%c0_25, %c8] : memref<256x72xbf16, #tpu.memory_space<vmem>>, vector<256x8xbf16>
    tpu.vector_store %arg10[%c0_25, %c8], %13 {strides = array<i32>} : memref<256x72xbf16, #tpu.memory_space<vmem>>, vector<256x8xbf16>,
    %c0_26 = arith.constant 0 : index
    %c2 = arith.constant 2 : index
    %c0_27 = arith.constant 0 : index
    %15 = vector.load %arg9[%c0_26, %c2, %c0_27] : memref<18x18x8xbf16, #tpu.memory_space<vmem>>, vector<16x16x8xbf16>
    %16 = vector.shape_cast %15 : vector<16x16x8xbf16> to vector<256x8xbf16>
    %c0_28 = arith.constant 0 : index
    %c16_29 = arith.constant 16 : index
    %17 = vector.load %arg10[%c0_28, %c16_29] : memref<256x72xbf16, #tpu.memory_space<vmem>>, vector<256x8xbf16>
    tpu.vector_store %arg10[%c0_28, %c16_29], %16 {strides = array<i32>} : memref<256x72xbf16, #tpu.memory_space<vmem>>, vector<256x8xbf16>,
    %c1_30 = arith.constant 1 : index
    %c0_31 = arith.constant 0 : index
    %c0_32 = arith.constant 0 : index
    %18 = vector.load %arg9[%c1_30, %c0_31, %c0_32] : memref<18x18x8xbf16, #tpu.memory_space<vmem>>, vector<16x16x8xbf16>
    %19 = vector.shape_cast %18 : vector<16x16x8xbf16> to vector<256x8xbf16>
    %c0_33 = arith.constant 0 : index
    %c24 = arith.constant 24 : index
    %20 = vector.load %arg10[%c0_33, %c24] : memref<256x72xbf16, #tpu.memory_space<vmem>>, vector<256x8xbf16>
    tpu.vector_store %arg10[%c0_33, %c24], %19 {strides = array<i32>} : memref<256x72xbf16, #tpu.memory_space<vmem>>, vector<256x8xbf16>,
    %c1_34 = arith.constant 1 : index
    %c1_35 = arith.constant 1 : index
    %c0_36 = arith.constant 0 : index
    %21 = vector.load %arg9[%c1_34, %c1_35, %c0_36] : memref<18x18x8xbf16, #tpu.memory_space<vmem>>, vector<16x16x8xbf16>
    %22 = vector.shape_cast %21 : vector<16x16x8xbf16> to vector<256x8xbf16>
    %c0_37 = arith.constant 0 : index
    %c32 = arith.constant 32 : index
    %23 = vector.load %arg10[%c0_37, %c32] : memref<256x72xbf16, #tpu.memory_space<vmem>>, vector<256x8xbf16>
    tpu.vector_store %arg10[%c0_37, %c32], %22 {strides = array<i32>} : memref<256x72xbf16, #tpu.memory_space<vmem>>, vector<256x8xbf16>,
    %c1_38 = arith.constant 1 : index
    %c2_39 = arith.constant 2 : index
    %c0_40 = arith.constant 0 : index
    %24 = vector.load %arg9[%c1_38, %c2_39, %c0_40] : memref<18x18x8xbf16, #tpu.memory_space<vmem>>, vector<16x16x8xbf16>
    %25 = vector.shape_cast %24 : vector<16x16x8xbf16> to vector<256x8xbf16>
    %c0_41 = arith.constant 0 : index
    %c40 = arith.constant 40 : index
    %26 = vector.load %arg10[%c0_41, %c40] : memref<256x72xbf16, #tpu.memory_space<vmem>>, vector<256x8xbf16>
    tpu.vector_store %arg10[%c0_41, %c40], %25 {strides = array<i32>} : memref<256x72xbf16, #tpu.memory_space<vmem>>, vector<256x8xbf16>,
    %c2_42 = arith.constant 2 : index
    %c0_43 = arith.constant 0 : index
    %c0_44 = arith.constant 0 : index
    %27 = vector.load %arg9[%c2_42, %c0_43, %c0_44] : memref<18x18x8xbf16, #tpu.memory_space<vmem>>, vector<16x16x8xbf16>
    %28 = vector.shape_cast %27 : vector<16x16x8xbf16> to vector<256x8xbf16>
    %c0_45 = arith.constant 0 : index
    %c48 = arith.constant 48 : index
    %29 = vector.load %arg10[%c0_45, %c48] : memref<256x72xbf16, #tpu.memory_space<vmem>>, vector<256x8xbf16>
    tpu.vector_store %arg10[%c0_45, %c48], %28 {strides = array<i32>} : memref<256x72xbf16, #tpu.memory_space<vmem>>, vector<256x8xbf16>,
    %c2_46 = arith.constant 2 : index
    %c1_47 = arith.constant 1 : index
    %c0_48 = arith.constant 0 : index
    %30 = vector.load %arg9[%c2_46, %c1_47, %c0_48] : memref<18x18x8xbf16, #tpu.memory_space<vmem>>, vector<16x16x8xbf16>
    %31 = vector.shape_cast %30 : vector<16x16x8xbf16> to vector<256x8xbf16>
    %c0_49 = arith.constant 0 : index
    %c56 = arith.constant 56 : index
    %32 = vector.load %arg10[%c0_49, %c56] : memref<256x72xbf16, #tpu.memory_space<vmem>>, vector<256x8xbf16>
    tpu.vector_store %arg10[%c0_49, %c56], %31 {strides = array<i32>} : memref<256x72xbf16, #tpu.memory_space<vmem>>, vector<256x8xbf16>,
    %c2_50 = arith.constant 2 : index
    %c2_51 = arith.constant 2 : index
    %c0_52 = arith.constant 0 : index
    %33 = vector.load %arg9[%c2_50, %c2_51, %c0_52] : memref<18x18x8xbf16, #tpu.memory_space<vmem>>, vector<16x16x8xbf16>
    %34 = vector.shape_cast %33 : vector<16x16x8xbf16> to vector<256x8xbf16>
    %c0_53 = arith.constant 0 : index
    %c64 = arith.constant 64 : index
    %35 = vector.load %arg10[%c0_53, %c64] : memref<256x72xbf16, #tpu.memory_space<vmem>>, vector<256x8xbf16>
    tpu.vector_store %arg10[%c0_53, %c64], %34 {strides = array<i32>} : memref<256x72xbf16, #tpu.memory_space<vmem>>, vector<256x8xbf16>,
    %c0_54 = arith.constant 0 : index
    %c0_55 = arith.constant 0 : index
    %36 = vector.load %arg10[%c0_54, %c0_55] : memref<256x72xbf16, #tpu.memory_space<vmem>>, vector<256x72xbf16>
    %c0_56 = arith.constant 0 : index
    %c0_57 = arith.constant 0 : index
    %37 = vector.load %arg5[%c0_56, %c0_57] : memref<72x8xbf16, #tpu.memory_space<vmem>>, vector<72x8xbf16>
    %cst = arith.constant dense<0.000000e+00> : vector<256x8xf32>
    %38 = tpu.matmul %36, %37, %cst {dimension_numbers = #tpu.dot_dimension_numbers<[1], [0], [0], [1], [0, 0, 1, 1], [], []>} : vector<256x72xbf16>, vector<72x8xbf16>, vector<256x8xf32> -> vector<256x8xf32>
    %c0_58 = arith.constant 0 : index
    %c0_59 = arith.constant 0 : index
    %39 = vector.load %arg6[%c0_58, %c0_59] : memref<1x8xf32, #tpu.memory_space<vmem>>, vector<1x8xf32>
    %40 = vector.broadcast %39 : vector<1x8xf32> to vector<256x8xf32>
    %41 = arith.addf %38, %40 : vector<256x8xf32>
    %cst_60 = arith.constant 0.000000e+00 : f32
    %42 = vector.broadcast %cst_60 : f32 to vector<256x8xf32>
    %43 = arith.maximumf %41, %42 : vector<256x8xf32>
    %44 = vector.shape_cast %43 : vector<256x8xf32> to vector<8x2x16x8xf32>
    %c0_61 = arith.constant 0 : index
    %c0_62 = arith.constant 0 : index
    %c0_63 = arith.constant 0 : index
    %c0_64 = arith.constant 0 : index
    %c0_65 = arith.constant 0 : index
    %45 = vector.load %arg7[%c0_61, %c0_62, %c0_63, %c0_64, %c0_65] : memref<1x8x2x16x8xf32, #tpu.memory_space<vmem>>, vector<1x8x2x16x8xf32>
    %46 = vector.shape_cast %45 : vector<1x8x2x16x8xf32> to vector<8x2x16x8xf32>
    %47 = vector.shape_cast %44 : vector<8x2x16x8xf32> to vector<1x8x2x16x8xf32>
    tpu.vector_store %arg7[%c0_61, %c0_62, %c0_63, %c0_64, %c0_65], %47 {strides = array<i32>} : memref<1x8x2x16x8xf32, #tpu.memory_space<vmem>>, vector<1x8x2x16x8xf32>,
    %c0_66 = arith.constant 0 : index
    %c0_67 = arith.constant 0 : index
    %c0_68 = arith.constant 0 : index
    %c0_69 = arith.constant 0 : index
    %c0_70 = arith.constant 0 : index
    %48 = vector.load %arg7[%c0_66, %c0_67, %c0_68, %c0_69, %c0_70] : memref<1x8x2x16x8xf32, #tpu.memory_space<vmem>>, vector<1x8x1x16x8xf32>
    %49 = vector.shape_cast %48 : vector<1x8x1x16x8xf32> to vector<8x16x8xf32>
    %c0_71 = arith.constant 0 : index
    %c0_72 = arith.constant 0 : index
    %c1_73 = arith.constant 1 : index
    %c0_74 = arith.constant 0 : index
    %c0_75 = arith.constant 0 : index
    %50 = vector.load %arg7[%c0_71, %c0_72, %c1_73, %c0_74, %c0_75] : memref<1x8x2x16x8xf32, #tpu.memory_space<vmem>>, vector<1x8x1x16x8xf32>
    %51 = vector.shape_cast %50 : vector<1x8x1x16x8xf32> to vector<8x16x8xf32>
    %52 = arith.maximumf %49, %51 : vector<8x16x8xf32>
    %c0_76 = arith.constant 0 : index
    %c0_77 = arith.constant 0 : index
    %c0_78 = arith.constant 0 : index
    %53 = vector.load %arg11[%c0_76, %c0_77, %c0_78] : memref<8x16x8xf32, #tpu.memory_space<vmem>>, vector<8x16x8xf32>
    tpu.vector_store %arg11[%c0_76, %c0_77, %c0_78], %52 {strides = array<i32>} : memref<8x16x8xf32, #tpu.memory_space<vmem>>, vector<8x16x8xf32>,
    %c0_79 = arith.constant 0 : index
    %c0_80 = arith.constant 0 : index
    %c0_81 = arith.constant 0 : index
    %54 = tpu.strided_load %arg11[%c0_79, %c0_80, %c0_81] {strides = array<i32: 1, 2, 1>} : memref<8x16x8xf32, #tpu.memory_space<vmem>>, vector<8x8x8xf32>
    %c0_82 = arith.constant 0 : index
    %c1_83 = arith.constant 1 : index
    %c0_84 = arith.constant 0 : index
    %55 = tpu.strided_load %arg11[%c0_82, %c1_83, %c0_84] {strides = array<i32: 1, 2, 1>} : memref<8x16x8xf32, #tpu.memory_space<vmem>>, vector<8x8x8xf32>
    %56 = arith.maximumf %54, %55 : vector<8x8x8xf32>
    %c0_85 = arith.constant 0 : index
    %c0_86 = arith.constant 0 : index
    %c0_87 = arith.constant 0 : index
    %c0_88 = arith.constant 0 : index
    %57 = vector.load %arg8[%c0_85, %c0_86, %c0_87, %c0_88] : memref<1x8x8x8xf32, #tpu.memory_space<vmem>>, vector<1x8x8x8xf32>
    %58 = vector.shape_cast %57 : vector<1x8x8x8xf32> to vector<8x8x8xf32>
    %59 = vector.shape_cast %56 : vector<8x8x8xf32> to vector<1x8x8x8xf32>
    tpu.vector_store %arg8[%c0_85, %c0_86, %c0_87, %c0_88], %59 {strides = array<i32>} : memref<1x8x8x8xf32, #tpu.memory_space<vmem>>, vector<1x8x8x8xf32>,
    return
  }
  func.func @transform_0(%arg0: i32, %arg1: i32) -> (i32, i32, i32, i32) {
    %c0_i32 = arith.constant 0 : i32
    %c0_i32_0 = arith.constant 0 : i32
    %c0_i32_1 = arith.constant 0 : i32
    return %arg0, %arg1, %c0_i32, %c0_i32_0 : i32, i32, i32, i32
  }
  func.func @transform_1(%arg0: i32, %arg1: i32) -> (i32, i32, i32, i32) {
    %c1_i32 = arith.constant 1 : i32
    %0 = arith.addi %arg1, %c1_i32 : i32
    %c16_i32 = arith.constant 16 : i32
    %1 = arith.muli %0, %c16_i32 : i32
    %c0_i32 = arith.constant 0 : i32
    %c0_i32_0 = arith.constant 0 : i32
    %c0_i32_1 = arith.constant 0 : i32
    return %arg0, %1, %c0_i32, %c0_i32_0 : i32, i32, i32, i32
  }
  func.func @transform_2(%arg0: i32, %arg1: i32) -> (i32, i32, i32, i32) {
    %c1_i32 = arith.constant 1 : i32
    %0 = arith.addi %arg1, %c1_i32 : i32
    %c16_i32 = arith.constant 16 : i32
    %1 = arith.muli %0, %c16_i32 : i32
    %c1_i32_0 = arith.constant 1 : i32
    %2 = arith.addi %1, %c1_i32_0 : i32
    %c0_i32 = arith.constant 0 : i32
    %c0_i32_1 = arith.constant 0 : i32
    %c0_i32_2 = arith.constant 0 : i32
    return %arg0, %2, %c0_i32, %c0_i32_1 : i32, i32, i32, i32
  }
  func.func @transform_3(%arg0: i32, %arg1: i32) -> (i32, i32) {
    %c0_i32 = arith.constant 0 : i32
    %c0_i32_0 = arith.constant 0 : i32
    %c0_i32_1 = arith.constant 0 : i32
    return %c0_i32, %c0_i32_0 : i32, i32
  }
  func.func @transform_4(%arg0: i32, %arg1: i32) -> (i32, i32) {
    %c0_i32 = arith.constant 0 : i32
    %c0_i32_0 = arith.constant 0 : i32
    %c0_i32_1 = arith.constant 0 : i32
    return %c0_i32, %c0_i32_0 : i32, i32
  }
  func.func @transform_5(%arg0: i32, %arg1: i32) -> (i32, i32, i32, i32, i32) {
    %c0_i32 = arith.constant 0 : i32
    %c0_i32_0 = arith.constant 0 : i32
    %c0_i32_1 = arith.constant 0 : i32
    %c0_i32_2 = arith.constant 0 : i32
    return %arg0, %arg1, %c0_i32, %c0_i32_0, %c0_i32_1 : i32, i32, i32, i32, i32
  }
  func.func @transform_6(%arg0: i32, %arg1: i32) -> (i32, i32, i32, i32) {
    %c0_i32 = arith.constant 0 : i32
    %c0_i32_0 = arith.constant 0 : i32
    %c0_i32_1 = arith.constant 0 : i32
    return %arg0, %arg1, %c0_i32, %c0_i32_0 : i32, i32, i32, i32
  }
}

</mosaic_0001>

<bundles_post_ra>
// kernel: encode_forward.2
= control target key start
LH: loop header
LB: loop body
LE: loop exit
PB: predicated region body
PF: predicated region fallthrough
CT: control target
= control target key end

     0   :  { %s3164_s18 = smov 0   ;;  %s3166_s19 = smov 0   ;;  %s4286_s0 = inlined_call_operand.vmem [shape: f32[2,18,18,8], index: 0, kind: input, shape index: {}, may-alias: {0,1,2}]   ;;  %s4287_s1 = inlined_call_operand.vmem [shape: f32[2,18,18,8], index: 1, kind: input, shape index: {}, may-alias: {0,1,2}]   ;;  %s4288_s2 = inlined_call_operand.vmem [shape: f32[2,18,18,8], index: 2, kind: input, shape index: {}, may-alias: {0,1,2}]   ;;  %s4289_s3 = inlined_call_operand.vmem [shape: f32[72,8], index: 3, kind: input, shape index: {}]   ;;  %s4290_s4 = inlined_call_operand.vmem [shape: f32[1,8], index: 4, kind: input, shape index: {}]   ;;  %s4291_s5 = inlined_call_operand.vmem [shape: bf16[2,16,16,8], index: 5, kind: output, shape index: {}]  }
   0x1   :  { %s3168_s20 = smov 0  }
   0x2 LB: > { %s27_s21 = sadd.s32 1, %s3120_s19  ;;  %p2824_p0 = scmp.ge.s32.totalorder %s3124_s20, 1  ;;  %s3124_s20 = sphi %s3168_s20, %s15_s20   ;;  %s3120_s19 = sphi %s3166_s19, %s4297_s19   ;;  %s3116_s18 = sphi %s3164_s18, %s4296_s18  }
   0x3   : > { %p29_p1 = scmp.ge.s32.totalorder %s27_s21, 2  ;;  %p271_p2 = scmp.lt.s32.totalorder %s3124_s20, 3 }
   0x5   : > { %s4299_s21 = smov (%p29_p1, %s27_s21), 0  ;;  %p272_p3 = pnand %p2824_p0, %p271_p2 }
   0x7   : > { %275 = sbr.rel (%p272_p3) target bundleno = 886 (0x376), region = 40 }
   0xe   : > { %p343_p4 = scmp.lt.s32.totalorder %s3116_s18, 1  ;;  %vm445_vm0 = vcmask 64512   ;;  %vm448_vm1 = vcmask 58368   ;;  %s3126_s26 = smov 8   ;;  %vm733_vm2 = vcmask 130112   ;;  %vm926_vm3 = vcmask 195712  }
   0xf   : > { %s3127_s6 = smov 16   ;;  %s3128_s7 = smov 24   ;;  %vm1120_vm4 = vcmask 261312   ;;  %vm1313_vm5 = vcmask 326912   ;;  %vm1506_vm6 = vcmask 392512   ;;  %vm1700_vm7 = vcmask 458112  }
  0x10   : > { %s4301_s18 = smov (!%p343_p4, %s3116_s18), 1  ;;  %s3129_s8 = smov 32   ;;  %vm1893_vm8 = vcmask 523712   ;;  %vm2086_vm9 = vcmask 589312   ;;  %vm2167_vm10 = vcmask 588800   ;;  %vm2649_vm11 = vcmask 60416  }
  0x11   : > { %s3185_s22 = smul.u32 432, %s4301_s18  ;;  %s3130_s9 = smov 40  }
  0x12   : > { %s3131_s10 = smov 48   ;;  %s3132_s15 = smov 56  }
  0x13   : > { %s3191_s25 = scalar_lea.vmem %s4286_s0, %s3185_s22  ;;  %s2898_s27 = sadd.s32 384, %s3185_s22 }
  0x14   : > { %v400_v0 = vld [vmem:[%s3191_s25 + $0x18] sm:$0xff]  ;;  %v401_v1 = vld [vmem:[%s3191_s25 + $0x20] sm:$0xff]  ;;  %v398_v3 = vld [vmem:[%s3191_s25 + $0x8] sm:$0xff]  ;;  %s3471_s30 = scalar_lea.vmem %s4287_s1, %s2898_s27  ;;  %s3133_s12 = smov 64  }
  0x15   : > { %v397_v2 = vld [vmem:[%s3191_s25] sm:$0xff]  ;;  %450 = vst.msk [vmem:[#allocation2 + $0x18] sm:$0xff] %vm445_vm0, %v400_v0  ;;  %451 = vst.msk [vmem:[#allocation2 + $0x20] sm:$0xff] %vm445_vm0, %v401_v1  ;;  %v402_v4 = vld [vmem:[%s3191_s25 + $0x28] sm:$0x3] }
  0x16   : > { %446 = vst.msk [vmem:[#allocation2] sm:$0xff] %vm445_vm0, %v397_v2  ;;  %v399_v5 = vld [vmem:[%s3191_s25 + $0x10] sm:$0x3]  ;;  %447 = vst.msk [vmem:[#allocation2 + $0x8] sm:$0xff] %vm445_vm0, %v398_v3  ;;  %v404_v6 = vld [vmem:[%s3191_s25 + $0x38] sm:$0xff] }
  0x17   : > { %452 = vst.msk [vmem:[#allocation2 + $0x28] sm:$0x3] %vm448_vm1, %v402_v4  ;;  %449 = vst.msk [vmem:[#allocation2 + $0x10] sm:$0x3] %vm448_vm1, %v399_v5  ;;  %v405_v7 = vld [vmem:[%s3191_s25 + $0x40] sm:$0x3] }
  0x18   : > { %v403_v8 = vld [vmem:[%s3191_s25 + $0x30] sm:$0xff]  ;;  %454 = vst.msk [vmem:[#allocation2 + $0x38] sm:$0xff] %vm445_vm0, %v404_v6  ;;  %v408_v10 = vld [vmem:[%s3191_s25 + $0x58] sm:$0x3]  ;;  %v406_v11 = vld [vmem:[%s3191_s25 + $0x48] sm:$0xff] }
  0x19   : > { %455 = vst.msk [vmem:[#allocation2 + $0x40] sm:$0x3] %vm448_vm1, %v405_v7  ;;  %v407_v9 = vld [vmem:[%s3191_s25 + $0x50] sm:$0xff]  ;;  %458 = vst.msk [vmem:[#allocation2 + $0x58] sm:$0x3] %vm448_vm1, %v408_v10  ;;  %v410_v12 = vld [vmem:[%s3191_s25 + $0x68] sm:$0xff] }
  0x1a   : > { %453 = vst.msk [vmem:[#allocation2 + $0x30] sm:$0xff] %vm445_vm0, %v403_v8  ;;  %457 = vst.msk [vmem:[#allocation2 + $0x50] sm:$0xff] %vm445_vm0, %v407_v9  ;;  %v411_v13 = vld [vmem:[%s3191_s25 + $0x70] sm:$0x3]  ;;  %v409_v14 = vld [vmem:[%s3191_s25 + $0x60] sm:$0xff] }
  0x1b   : > { %456 = vst.msk [vmem:[#allocation2 + $0x48] sm:$0xff] %vm445_vm0, %v406_v11  ;;  %460 = vst.msk [vmem:[#allocation2 + $0x68] sm:$0xff] %vm445_vm0, %v410_v12  ;;  %v413_v15 = vld [vmem:[%s3191_s25 + $0x80] sm:$0xff]  ;;  %v414_v16 = vld [vmem:[%s3191_s25 + $0x88] sm:$0x3] }
  0x1c   : > { %461 = vst.msk [vmem:[#allocation2 + $0x70] sm:$0x3] %vm448_vm1, %v411_v13  ;;  %v412_v17 = vld [vmem:[%s3191_s25 + $0x78] sm:$0xff]  ;;  %464 = vst.msk [vmem:[#allocation2 + $0x88] sm:$0x3] %vm448_vm1, %v414_v16  ;;  %v415_v20 = vld [vmem:[%s3191_s25 + $0x90] sm:$0xff] }
  0x1d   : > { %459 = vst.msk [vmem:[#allocation2 + $0x60] sm:$0xff] %vm445_vm0, %v409_v14  ;;  %463 = vst.msk [vmem:[#allocation2 + $0x80] sm:$0xff] %vm445_vm0, %v413_v15  ;;  %v416_v18 = vld [vmem:[%s3191_s25 + $0x98] sm:$0xff]  ;;  %v417_v19 = vld [vmem:[%s3191_s25 + $0xa0] sm:$0x3] }
  0x1e   : > { %462 = vst.msk [vmem:[#allocation2 + $0x78] sm:$0xff] %vm445_vm0, %v412_v17  ;;  %466 = vst.msk [vmem:[#allocation2 + $0x98] sm:$0xff] %vm445_vm0, %v416_v18  ;;  %v419_v21 = vld [vmem:[%s3191_s25 + $0xb0] sm:$0xff]  ;;  %v420_v22 = vld [vmem:[%s3191_s25 + $0xb8] sm:$0x3] }
  0x1f   : > { %467 = vst.msk [vmem:[#allocation2 + $0xa0] sm:$0x3] %vm448_vm1, %v417_v19  ;;  %v418_v23 = vld [vmem:[%s3191_s25 + $0xa8] sm:$0xff]  ;;  %v3238_v24 = vld [vmem:[#allocation2 + $0x19] sm:$0xff]  ;;  %470 = vst.msk [vmem:[#allocation2 + $0xb8] sm:$0x3] %vm448_vm1, %v420_v22 }
  0x20   : > { %465 = vst.msk [vmem:[#allocation2 + $0x90] sm:$0xff] %vm445_vm0, %v415_v20  ;;  %469 = vst.msk [vmem:[#allocation2 + $0xb0] sm:$0xff] %vm445_vm0, %v419_v21  ;;  %v422_v25 = vld [vmem:[%s3191_s25 + $0xc8] sm:$0xff]  ;;  %v423_v26 = vld [vmem:[%s3191_s25 + $0xd0] sm:$0x3]  ;;  %641 = vrot.lane.b32.xlu1 %v3238_v24, %s3126_s26 }
  0x21   : > { %468 = vst.msk [vmem:[#allocation2 + $0xa8] sm:$0xff] %vm445_vm0, %v418_v23  ;;  %v573_v27 = vld [vmem:[#allocation2 + $0x1] sm:$0xff]  ;;  %472 = vst.msk [vmem:[#allocation2 + $0xc8] sm:$0xff] %vm445_vm0, %v422_v25  ;;  %v574_v30 = vld [vmem:[#allocation2 + $0x9] sm:$0xff] }
  0x22   : > { %473 = vst.msk [vmem:[#allocation2 + $0xd0] sm:$0x3] %vm448_vm1, %v423_v26  ;;  %637 = vrot.lane.b32.xlu0 %v573_v27, %s3126_s26  ;;  %v3250_v28 = vld [vmem:[#allocation2 + $0x21] sm:$0xff]  ;;  %v424_v33 = vld [vmem:[%s3191_s25 + $0xd8] sm:$0xff]  ;;  %v427_v39 = vld [vmem:[%s3191_s25 + $0xf0] sm:$0xff] }
  0x23   : > { %v421_v29 = vld [vmem:[%s3191_s25 + $0xc0] sm:$0xff]  ;;  %v426_v32 = vld [vmem:[%s3191_s25 + $0xe8] sm:$0x3]  ;;  %474 = vst.msk [vmem:[#allocation2 + $0xd8] sm:$0xff] %vm445_vm0, %v424_v33  ;;  %v428_v35 = vld [vmem:[%s3191_s25 + $0xf8] sm:$0xff] }
  0x24   : > { %471 = vst.msk [vmem:[#allocation2 + $0xc0] sm:$0xff] %vm445_vm0, %v421_v29  ;;  %v425_v31 = vld [vmem:[%s3191_s25 + $0xe0] sm:$0xff]  ;;  %643 = vrot.lane.b32.xlu1 %v3250_v28, %s3126_s26  ;;  %v3266_v36 = vld [vmem:[#allocation2 + $0x31] sm:$0xff]  ;;  %478 = vst.msk [vmem:[#allocation2 + $0xf8] sm:$0xff] %vm445_vm0, %v428_v35 }
  0x25   : > { %475 = vst.msk [vmem:[#allocation2 + $0xe0] sm:$0xff] %vm445_vm0, %v425_v31  ;;  %v3262_v34 = vld [vmem:[#allocation2 + $0x39] sm:$0xff]  ;;  %v580_v38 = vld [vmem:[#allocation2 + $0x51] sm:$0xff]  ;;  %477 = vst.msk [vmem:[#allocation2 + $0xf0] sm:$0xff] %vm445_vm0, %v427_v39 }
  0x26   : > { %476 = vst.msk [vmem:[#allocation2 + $0xe8] sm:$0x3] %vm448_vm1, %v426_v32  ;;  %639 = vrot.lane.b32.xlu0 %v574_v30, %s3126_s26  ;;  %v429_v37 = vld [vmem:[%s3191_s25 + $0x100] sm:$0x3]  ;;  %v431_v40 = vld [vmem:[%s3191_s25 + $0x110] sm:$0xff]  ;;  %v430_v42 = vld [vmem:[%s3191_s25 + $0x108] sm:$0xff] }
  0x27   : > { %479 = vst.msk [vmem:[#allocation2 + $0x100] sm:$0x3] %vm448_vm1, %v429_v37  ;;  %v432_v41 = vld [vmem:[%s3191_s25 + $0x118] sm:$0x3]  ;;  %v434_v43 = vld [vmem:[%s3191_s25 + $0x128] sm:$0xff]  ;;  %v433_v46 = vld [vmem:[%s3191_s25 + $0x120] sm:$0xff] }
  0x28   : > { %647 = vrot.lane.b32.xlu1 %v3262_v34, %s3126_s26  ;;  %481 = vst.msk [vmem:[#allocation2 + $0x110] sm:$0xff] %vm445_vm0, %v431_v40  ;;  %v579_v44 = vld [vmem:[#allocation2 + $0x49] sm:$0xff]  ;;  %480 = vst.msk [vmem:[#allocation2 + $0x108] sm:$0xff] %vm445_vm0, %v430_v42  ;;  %v437_v47 = vld [vmem:[%s3191_s25 + $0x140] sm:$0xff] }
  0x29   : > { %482 = vst.msk [vmem:[#allocation2 + $0x118] sm:$0x3] %vm448_vm1, %v432_v41  ;;  %v435_v45 = vld [vmem:[%s3191_s25 + $0x130] sm:$0x3]  ;;  %v438_v48 = vld [vmem:[%s3191_s25 + $0x148] sm:$0x3] }
  0x2a   : > { %645 = vrot.lane.b32.xlu0 %v3266_v36, %s3126_s26  ;;  %484 = vst.msk [vmem:[#allocation2 + $0x128] sm:$0xff] %vm445_vm0, %v434_v43  ;;  %483 = vst.msk [vmem:[#allocation2 + $0x120] sm:$0xff] %vm445_vm0, %v433_v46  ;;  %v436_v49 = vld [vmem:[%s3191_s25 + $0x138] sm:$0xff]  ;;  %v441_v51 = vld [vmem:[%s3191_s25 + $0x160] sm:$0x3] }
  0x2b   : > { %485 = vst.msk [vmem:[#allocation2 + $0x130] sm:$0x3] %vm448_vm1, %v435_v45  ;;  %488 = vst.msk [vmem:[#allocation2 + $0x148] sm:$0x3] %vm448_vm1, %v438_v48  ;;  %v440_v50 = vld [vmem:[%s3191_s25 + $0x158] sm:$0xff]  ;;  %v439_v52 = vld [vmem:[%s3191_s25 + $0x150] sm:$0xff] }
  0x2c   : > { %487 = vst.msk [vmem:[#allocation2 + $0x140] sm:$0xff] %vm445_vm0, %v437_v47  ;;  %486 = vst.msk [vmem:[#allocation2 + $0x138] sm:$0xff] %vm445_vm0, %v436_v49  ;;  %651 = vrot.lane.b32.xlu1 %v580_v38, %s3126_s26  ;;  %v443_v53 = vld [vmem:[%s3191_s25 + $0x170] sm:$0xff]  ;;  %v444_v55 = vld [vmem:[%s3191_s25 + $0x178] sm:$0x3] }
  0x2d   : > { %490 = vst.msk [vmem:[#allocation2 + $0x158] sm:$0xff] %vm445_vm0, %v440_v50  ;;  %v582_v54 = vld [vmem:[#allocation2 + $0x69] sm:$0xff]  ;;  %489 = vst.msk [vmem:[#allocation2 + $0x150] sm:$0xff] %vm445_vm0, %v439_v52  ;;  %v581_v57 = vld [vmem:[#allocation2 + $0x61] sm:$0xff] }
  0x2e   : > { %491 = vst.msk [vmem:[#allocation2 + $0x160] sm:$0x3] %vm448_vm1, %v441_v51  ;;  %649 = vrot.lane.b32.xlu0 %v579_v44, %s3126_s26  ;;  %v442_v56 = vld [vmem:[%s3191_s25 + $0x168] sm:$0xff]  ;;  %494 = vst.msk [vmem:[#allocation2 + $0x178] sm:$0x3] %vm448_vm1, %v444_v55  ;;  %v583_v59 = vld [vmem:[#allocation2 + $0x79] sm:$0xff] }
  0x2f   : > { %493 = vst.msk [vmem:[#allocation2 + $0x170] sm:$0xff] %vm445_vm0, %v443_v53  ;;  %492 = vst.msk [vmem:[#allocation2 + $0x168] sm:$0xff] %vm445_vm0, %v442_v56  ;;  %v584_v58 = vld [vmem:[#allocation2 + $0x81] sm:$0xff]  ;;  %v586_v60 = vld [vmem:[#allocation2 + $0x99] sm:$0xff] }
  0x30   : > { %655 = vrot.lane.b32.xlu1 %v582_v54, %s3126_s26  ;;  %v585_v61 = vld [vmem:[#allocation2 + $0x91] sm:$0xff]  ;;  %v587_v63 = vld [vmem:[#allocation2 + $0xa9] sm:$0xff]  ;;  %v509_v1 = vld [vmem:[#allocation2] sm:$0xff] }
  0x31   : > { %v588_v62 = vld [vmem:[#allocation2 + $0xb1] sm:$0xff]  ;;  %541 = vst.msk [vmem:[#allocation3] sm:$0xff] %vm445_vm0, %v509_v1  ;;  %v3320_v2 = vld [vmem:[#allocation2 + $0x20] sm:$0xff]  ;;  %v510_v3 = vld [vmem:[#allocation2 + $0x8] sm:$0xff] }
  0x32   : > { %653 = vrot.lane.b32.xlu0 %v581_v57, %s3126_s26  ;;  %v3315_v0 = vld [vmem:[#allocation2 + $0x18] sm:$0xff]  ;;  %544 = vst.msk [vmem:[#allocation3 + $0x18] sm:$0xff] %vm445_vm0, %v3320_v2  ;;  %v590_v4 = vld [vmem:[#allocation2 + $0xc9] sm:$0xff]  ;;  %542 = vst.msk [vmem:[#allocation3 + $0x8] sm:$0xff] %vm445_vm0, %v510_v3 }
  0x33   : > { %543 = vst.msk [vmem:[#allocation3 + $0x10] sm:$0xff] %vm445_vm0, %v3315_v0  ;;  %v3327_v5 = vld [vmem:[#allocation2 + $0x38] sm:$0xff]  ;;  %v3329_v6 = vld [vmem:[#allocation2 + $0x30] sm:$0xff]  ;;  %v589_v7 = vld [vmem:[#allocation2 + $0xc1] sm:$0xff] }
  0x34   : > { %659 = vrot.lane.b32.xlu1 %v584_v58, %s3126_s26  ;;  %546 = vst.msk [vmem:[#allocation3 + $0x28] sm:$0xff] %vm445_vm0, %v3327_v5  ;;  %545 = vst.msk [vmem:[#allocation3 + $0x20] sm:$0xff] %vm445_vm0, %v3329_v6  ;;  %v3335_v8 = vld [vmem:[#allocation2 + $0x50] sm:$0xff]  ;;  %v3337_v9 = vld [vmem:[#allocation2 + $0x48] sm:$0xff] }
  0x35   : > { %v3339_v10 = vld [vmem:[#allocation2 + $0xe1] sm:$0xff]  ;;  %548 = vst.msk [vmem:[#allocation3 + $0x38] sm:$0xff] %vm445_vm0, %v3335_v8  ;;  %547 = vst.msk [vmem:[#allocation3 + $0x30] sm:$0xff] %vm445_vm0, %v3337_v9  ;;  %v3352_v14 = vld [vmem:[#allocation2 + $0xd9] sm:$0xff] }
  0x36   : > { %657 = vrot.lane.b32.xlu0 %v583_v59, %s3126_s26  ;;  %v3345_v11 = vld [vmem:[#allocation2 + $0x68] sm:$0xff]  ;;  %v3347_v12 = vld [vmem:[#allocation2 + $0x60] sm:$0xff]  ;;  %v3360_v15 = vld [vmem:[#allocation2 + $0x78] sm:$0xff] }
  0x37   : > { %v3349_v13 = vld [vmem:[#allocation2 + $0x80] sm:$0xff]  ;;  %550 = vst.msk [vmem:[#allocation3 + $0x48] sm:$0xff] %vm445_vm0, %v3345_v11  ;;  %549 = vst.msk [vmem:[#allocation3 + $0x40] sm:$0xff] %vm445_vm0, %v3347_v12  ;;  %v3362_v16 = vld [vmem:[#allocation2 + $0x98] sm:$0xff] }
  0x38   : > { %663 = vrot.lane.b32.xlu1 %v586_v60, %s3126_s26  ;;  %552 = vst.msk [vmem:[#allocation3 + $0x58] sm:$0xff] %vm445_vm0, %v3349_v13  ;;  %v3364_v17 = vld [vmem:[#allocation2 + $0x90] sm:$0xff]  ;;  %551 = vst.msk [vmem:[#allocation3 + $0x50] sm:$0xff] %vm445_vm0, %v3360_v15  ;;  %v3375_v19 = vld [vmem:[#allocation2 + $0xa8] sm:$0xff] }
  0x39   : > { %554 = vst.msk [vmem:[#allocation3 + $0x68] sm:$0xff] %vm445_vm0, %v3362_v16  ;;  %553 = vst.msk [vmem:[#allocation3 + $0x60] sm:$0xff] %vm445_vm0, %v3364_v17  ;;  %v3373_v18 = vld [vmem:[#allocation2 + $0xb0] sm:$0xff]  ;;  %v3377_v20 = vld [vmem:[#allocation2 + $0xc8] sm:$0xff] }
  0x3a   : > { %661 = vrot.lane.b32.xlu0 %v585_v61, %s3126_s26  ;;  %556 = vst.msk [vmem:[#allocation3 + $0x78] sm:$0xff] %vm445_vm0, %v3373_v18  ;;  %555 = vst.msk [vmem:[#allocation3 + $0x70] sm:$0xff] %vm445_vm0, %v3375_v19  ;;  %v3385_v21 = vld [vmem:[#allocation2 + $0xc0] sm:$0xff]  ;;  %v3389_v23 = vld [vmem:[#allocation2 + $0xd8] sm:$0xff] }
  0x3b   : > { %558 = vst.msk [vmem:[#allocation3 + $0x88] sm:$0xff] %vm445_vm0, %v3377_v20  ;;  %v3387_v22 = vld [vmem:[#allocation2 + $0xe0] sm:$0xff]  ;;  %557 = vst.msk [vmem:[#allocation3 + $0x80] sm:$0xff] %vm445_vm0, %v3385_v21  ;;  %v3397_v25 = vld [vmem:[#allocation2 + $0xf8] sm:$0xff] }
  0x3c   : > { %667 = vrot.lane.b32.xlu1 %v588_v62, %s3126_s26  ;;  %560 = vst.msk [vmem:[#allocation3 + $0x98] sm:$0xff] %vm445_vm0, %v3387_v22  ;;  %559 = vst.msk [vmem:[#allocation3 + $0x90] sm:$0xff] %vm445_vm0, %v3389_v23  ;;  %v3399_v26 = vld [vmem:[#allocation2 + $0xf0] sm:$0xff]  ;;  %v3411_v29 = vld [vmem:[#allocation2 + $0x108] sm:$0xff] }
  0x3d   : > { %v3401_v27 = vld [vmem:[#allocation2 + $0x110] sm:$0xff]  ;;  %562 = vst.msk [vmem:[#allocation3 + $0xa8] sm:$0xff] %vm445_vm0, %v3397_v25  ;;  %561 = vst.msk [vmem:[#allocation3 + $0xa0] sm:$0xff] %vm445_vm0, %v3399_v26  ;;  %v3413_v30 = vld [vmem:[#allocation2 + $0x128] sm:$0xff] }
  0x3e   : > { %665 = vrot.lane.b32.xlu0 %v587_v63, %s3126_s26  ;;  %564 = vst.msk [vmem:[#allocation3 + $0xb8] sm:$0xff] %vm445_vm0, %v3401_v27  ;;  %v3415_v31 = vld [vmem:[#allocation2 + $0x120] sm:$0xff]  ;;  %563 = vst.msk [vmem:[#allocation3 + $0xb0] sm:$0xff] %vm445_vm0, %v3411_v29  ;;  %v3429_v35 = vld [vmem:[#allocation2 + $0xf1] sm:$0xff] }
  0x3f   : > { %v3419_v32 = vld [vmem:[#allocation2 + $0xf9] sm:$0xff]  ;;  %566 = vst.msk [vmem:[#allocation3 + $0xc8] sm:$0xff] %vm445_vm0, %v3413_v30  ;;  %565 = vst.msk [vmem:[#allocation3 + $0xc0] sm:$0xff] %vm445_vm0, %v3415_v31  ;;  %v3441_v38 = vld [vmem:[#allocation2 + $0x111] sm:$0xff] }
  0x40   : > { %671 = vrot.lane.b32.xlu1 %v590_v4, %s3126_s26  ;;  %v3427_v33 = vld [vmem:[#allocation2 + $0x140] sm:$0xff]  ;;  %v3433_v37 = vld [vmem:[#allocation2 + $0x138] sm:$0xff]  ;;  %v3445_v40 = vld [vmem:[#allocation2 + $0x109] sm:$0xff] }
  0x41   : > { %568 = vst.msk [vmem:[#allocation3 + $0xd8] sm:$0xff] %vm445_vm0, %v3427_v33  ;;  %567 = vst.msk [vmem:[#allocation3 + $0xd0] sm:$0xff] %vm445_vm0, %v3433_v37  ;;  %v3443_v39 = vld [vmem:[#allocation2 + $0x158] sm:$0xff]  ;;  %v3449_v41 = vld [vmem:[#allocation2 + $0x150] sm:$0xff] }
  0x42   : > { %669 = vrot.lane.b32.xlu0 %v589_v7, %s3126_s26  ;;  %570 = vst.msk [vmem:[#allocation3 + $0xe8] sm:$0xff] %vm445_vm0, %v3443_v39  ;;  %569 = vst.msk [vmem:[#allocation3 + $0xe0] sm:$0xff] %vm445_vm0, %v3449_v41  ;;  %v598_v42 = vld [vmem:[#allocation2 + $0x129] sm:$0xff]  ;;  %v597_v44 = vld [vmem:[#allocation2 + $0x121] sm:$0xff] }
  0x43   : > { %v3457_v43 = vld [vmem:[#allocation2 + $0x170] sm:$0xff]  ;;  %v3461_v45 = vld [vmem:[#allocation2 + $0x168] sm:$0xff]  ;;  %v599_v47 = vld [vmem:[#allocation2 + $0x139] sm:$0xff] }
  0x44   : > { %675 = vrot.lane.b32.xlu1 %v3339_v10, %s3126_s26  ;;  %572 = vst.msk [vmem:[#allocation3 + $0xf8] sm:$0xff] %vm445_vm0, %v3457_v43  ;;  %571 = vst.msk [vmem:[#allocation3 + $0xf0] sm:$0xff] %vm445_vm0, %v3461_v45  ;;  %v600_v46 = vld [vmem:[#allocation2 + $0x141] sm:$0xff]  ;;  %v602_v50 = vld [vmem:[#allocation2 + $0x159] sm:$0xff] }
  0x45   : > { %v496_v48 = vld [vmem:[%s3471_s30 + $0x8] sm:$0xff]  ;;  %v495_v49 = vld [vmem:[%s3471_s30] sm:$0xff]  ;;  %v601_v51 = vld [vmem:[#allocation2 + $0x151] sm:$0xff] }
  0x46   : > { %673 = vrot.lane.b32.xlu0 %v3352_v14, %s3126_s26  ;;  %500 = vst.msk [vmem:[#allocation2 + $0x188] sm:$0xff] %vm445_vm0, %v496_v48  ;;  %499 = vst.msk [vmem:[#allocation2 + $0x180] sm:$0xff] %vm445_vm0, %v495_v49  ;;  %v604_v52 = vld [vmem:[#allocation2 + $0x171] sm:$0xff]  ;;  %v603_v53 = vld [vmem:[#allocation2 + $0x169] sm:$0xff] }
  0x47   : > { %v767_v54 = vld [vmem:[#allocation2 + $0xa] sm:$0xff]  ;;  %v766_v55 = vld [vmem:[#allocation2 + $0x2] sm:$0xff]  ;;  %v3487_v57 = vld [vmem:[#allocation2 + $0x1a] sm:$0xff] }
  0x48   : > { %679 = vrot.lane.b32.xlu1 %v3419_v32, %s3126_s26  ;;  %v3485_v56 = vld [vmem:[#allocation2 + $0x22] sm:$0xff]  ;;  %v3493_v58 = vld [vmem:[#allocation2 + $0x3a] sm:$0xff]  ;;  %v3495_v59 = vld [vmem:[#allocation2 + $0x32] sm:$0xff] }
  0x49   : > { %v3501_v60 = vld [vmem:[#allocation2 + $0x52] sm:$0xff]  ;;  %v3503_v61 = vld [vmem:[#allocation2 + $0x4a] sm:$0xff]  ;;  %v3509_v63 = vld [vmem:[#allocation2 + $0x62] sm:$0xff] }
  0x4a   : > { %677 = vrot.lane.b32.xlu0 %v3429_v35, %s3126_s26  ;;  %v775_v62 = vld [vmem:[#allocation2 + $0x6a] sm:$0xff]  ;;  %v777_v1 = vld [vmem:[#allocation2 + $0x82] sm:$0xff]  ;;  %v776_v3 = vld [vmem:[#allocation2 + $0x7a] sm:$0xff] }
  0x4b   : > { %v779_v4 = vld [vmem:[#allocation2 + $0x9a] sm:$0xff]  ;;  %v778_v7 = vld [vmem:[#allocation2 + $0x92] sm:$0xff]  ;;  %v3522_v48 = vld [vmem:[#allocation2 + $0xe2] sm:$0xff] }
  0x4c   : > { %683 = vrot.lane.b32.xlu1 %v3441_v38, %s3126_s26  ;;  %v3524_v49 = vld [vmem:[#allocation2 + $0xda] sm:$0xff] }
  0x4e   : > { %681 = vrot.lane.b32.xlu0 %v3445_v40, %s3126_s26 }
  0x50   : > { %687 = vrot.lane.b32.xlu1 %v598_v42, %s3126_s26  ;;  %v781_v42 = vld [vmem:[#allocation2 + $0xb2] sm:$0xff] }
  0x52   : > { %685 = vrot.lane.b32.xlu0 %v597_v44, %s3126_s26  ;;  %v780_v44 = vld [vmem:[#allocation2 + $0xaa] sm:$0xff] }
  0x54   : > { %691 = vrot.lane.b32.xlu1 %v600_v46, %s3126_s26  ;;  %v783_v46 = vld [vmem:[#allocation2 + $0xca] sm:$0xff] }
  0x56   : > { %689 = vrot.lane.b32.xlu0 %v599_v47, %s3126_s26  ;;  %v782_v47 = vld [vmem:[#allocation2 + $0xc2] sm:$0xff] }
  0x58   : > { %695 = vrot.lane.b32.xlu1 %v602_v50, %s3126_s26  ;;  %v3530_v50 = vld [vmem:[#allocation2 + $0xfa] sm:$0xff] }
  0x5a   : > { %693 = vrot.lane.b32.xlu0 %v601_v51, %s3126_s26  ;;  %v3532_v51 = vld [vmem:[#allocation2 + $0xf2] sm:$0xff] }
  0x5c   : > { %699 = vrot.lane.b32.xlu1 %v604_v52, %s3126_s26  ;;  %v3538_v52 = vld [vmem:[#allocation2 + $0x112] sm:$0xff] }
  0x5e   : > { %697 = vrot.lane.b32.xlu0 %v603_v53, %s3126_s26  ;;  %v3540_v53 = vld [vmem:[#allocation2 + $0x10a] sm:$0xff] }
  0x60   : > { %832 = vrot.lane.b32.xlu1 %v767_v54, %s3127_s6  ;;  %v3546_v54 = vld [vmem:[#allocation2 + $0x12a] sm:$0xff] }
  0x61   : > { %4294 = vst [vmem:[#allocation4_spill] sm:$0xff] %v3546_v54 }
  0x62   : > { %830 = vrot.lane.b32.xlu0 %v766_v55, %s3127_s6  ;;  %v3548_v55 = vld [vmem:[#allocation2 + $0x122] sm:$0xff] }
  0x64   : > { %836 = vrot.lane.b32.xlu1 %v3485_v56, %s3127_s6 }
  0x66   : > { %834 = vrot.lane.b32.xlu0 %v3487_v57, %s3127_s6 }
  0x68   : > { %840 = vrot.lane.b32.xlu1 %v3493_v58, %s3127_s6 }
  0x6a   : > { %838 = vrot.lane.b32.xlu0 %v3495_v59, %s3127_s6 }
  0x6c   : > { %844 = vrot.lane.b32.xlu1 %v3501_v60, %s3127_s6 }
  0x6e   : > { %842 = vrot.lane.b32.xlu0 %v3503_v61, %s3127_s6 }
  0x70   : > { %848 = vrot.lane.b32.xlu1 %v775_v62, %s3127_s6  ;;  %v793_v62 = vld [vmem:[#allocation2 + $0x142] sm:$0xff] }
  0x72   : > { %846 = vrot.lane.b32.xlu0 %v3509_v63, %s3127_s6 }
  0x74   : > { %852 = vrot.lane.b32.xlu1 %v777_v1, %s3127_s6 }
  0x76   : > { %850 = vrot.lane.b32.xlu0 %v776_v3, %s3127_s6  ;;  %v792_v3 = vld [vmem:[#allocation2 + $0x13a] sm:$0xff] }
  0x78   : > { %856 = vrot.lane.b32.xlu1 %v779_v4, %s3127_s6 }
  0x7a   : > { %854 = vrot.lane.b32.xlu0 %v778_v7, %s3127_s6  ;;  %v795_v7 = vld [vmem:[#allocation2 + $0x15a] sm:$0xff] }
  0x7c   : > { %860 = vrot.lane.b32.xlu1 %v781_v42, %s3127_s6 }
  0x7e   : > { %858 = vrot.lane.b32.xlu0 %v780_v44, %s3127_s6  ;;  %v794_v44 = vld [vmem:[#allocation2 + $0x152] sm:$0xff] }
  0x80   : > { %864 = vrot.lane.b32.xlu1 %v783_v46, %s3127_s6 }
  0x82   : > { %862 = vrot.lane.b32.xlu0 %v782_v47, %s3127_s6  ;;  %v797_v47 = vld [vmem:[#allocation2 + $0x172] sm:$0xff] }
  0x84   : > { %868 = vrot.lane.b32.xlu1 %v3522_v48, %s3127_s6 }
  0x86   : > { %866 = vrot.lane.b32.xlu0 %v3524_v49, %s3127_s6 }
  0x88   : > { %872 = vrot.lane.b32.xlu1 %v3530_v50, %s3127_s6 }
  0x8a   : > { %870 = vrot.lane.b32.xlu0 %v3532_v51, %s3127_s6 }
  0x8c   : > { %876 = vrot.lane.b32.xlu1 %v3538_v52, %s3127_s6 }
  0x8e   : > { %874 = vrot.lane.b32.xlu0 %v3540_v53, %s3127_s6 }
  0x90   : > { %880 = vrot.lane.b32.xlu1 %v3546_v54, %s3127_s6  ;;  %v796_v54 = vld [vmem:[#allocation2 + $0x16a] sm:$0xff] }
  0x92   : > { %878 = vrot.lane.b32.xlu0 %v3548_v55, %s3127_s6  ;;  %v642_v1 = vpop.permute.xlu1 %641 }
  0x93   : > { %736 = vst.msk [vmem:[#allocation3 + $0x10] sm:$0xff] %vm733_vm2, %v642_v1 }
  0x94   : > { %v638_v4 = vpop.permute.xlu0 %637  ;;  %884 = vrot.lane.b32.xlu1 %v793_v62, %s3127_s6 }
  0x95   : > { %734 = vst.msk [vmem:[#allocation3] sm:$0xff] %vm733_vm2, %v638_v4 }
  0x96   : > { %882 = vrot.lane.b32.xlu0 %v792_v3, %s3127_s6  ;;  %v644_v42 = vpop.permute.xlu1 %643 }
  0x97   : > { %737 = vst.msk [vmem:[#allocation3 + $0x18] sm:$0xff] %vm733_vm2, %v644_v42 }
  0x98   : > { %v640_v46 = vpop.permute.xlu0 %639  ;;  %888 = vrot.lane.b32.xlu1 %v795_v7, %s3127_s6 }
  0x99   : > { %735 = vst.msk [vmem:[#allocation3 + $0x8] sm:$0xff] %vm733_vm2, %v640_v46 }
  0x9a   : > { %886 = vrot.lane.b32.xlu0 %v794_v44, %s3127_s6  ;;  %v648_v1 = vpop.permute.xlu1 %647 }
  0x9b   : > { %739 = vst.msk [vmem:[#allocation3 + $0x28] sm:$0xff] %vm733_vm2, %v648_v1 }
  0x9c   : > { %v646_v62 = vpop.permute.xlu0 %645  ;;  %892 = vrot.lane.b32.xlu1 %v797_v47, %s3127_s6 }
  0x9d   : > { %738 = vst.msk [vmem:[#allocation3 + $0x20] sm:$0xff] %vm733_vm2, %v646_v62 }
  0x9e   : > { %890 = vrot.lane.b32.xlu0 %v796_v54, %s3127_s6  ;;  %v652_v3 = vpop.permute.xlu1 %651 }
  0x9f   : > { %741 = vst.msk [vmem:[#allocation3 + $0x38] sm:$0xff] %vm733_vm2, %v652_v3 }
  0xa0   : > { %v650_v4 = vpop.permute.xlu0 %649  ;;  %1026 = vrot.lane.b32.xlu1 %v3320_v2, %s3128_s7 }
  0xa1   : > { %740 = vst.msk [vmem:[#allocation3 + $0x30] sm:$0xff] %vm733_vm2, %v650_v4 }
  0xa2   : > { %1024 = vrot.lane.b32.xlu0 %v3315_v0, %s3128_s7  ;;  %v656_v7 = vpop.permute.xlu1 %655 }
  0xa3   : > { %743 = vst.msk [vmem:[#allocation3 + $0x48] sm:$0xff] %vm733_vm2, %v656_v7 }
  0xa4   : > { %v654_v42 = vpop.permute.xlu0 %653  ;;  %1030 = vrot.lane.b32.xlu1 %v3327_v5, %s3128_s7 }
  0xa5   : > { %742 = vst.msk [vmem:[#allocation3 + $0x40] sm:$0xff] %vm733_vm2, %v654_v42 }
  0xa6   : > { %1028 = vrot.lane.b32.xlu0 %v3329_v6, %s3128_s7  ;;  %v660_v54 = vpop.permute.xlu1 %659 }
  0xa7   : > { %745 = vst.msk [vmem:[#allocation3 + $0x58] sm:$0xff] %vm733_vm2, %v660_v54 }
  0xa8   : > { %v658_v44 = vpop.permute.xlu0 %657  ;;  %1034 = vrot.lane.b32.xlu1 %v3335_v8, %s3128_s7 }
  0xa9   : > { %744 = vst.msk [vmem:[#allocation3 + $0x50] sm:$0xff] %vm733_vm2, %v658_v44 }
  0xaa   : > { %1032 = vrot.lane.b32.xlu0 %v3337_v9, %s3128_s7  ;;  %v664_v0 = vpop.permute.xlu1 %663 }
  0xab   : > { %747 = vst.msk [vmem:[#allocation3 + $0x68] sm:$0xff] %vm733_vm2, %v664_v0 }
  0xac   : > { %v662_v2 = vpop.permute.xlu0 %661  ;;  %1038 = vrot.lane.b32.xlu1 %v3345_v11, %s3128_s7 }
  0xad   : > { %746 = vst.msk [vmem:[#allocation3 + $0x60] sm:$0xff] %vm733_vm2, %v662_v2 }
  0xae   : > { %1036 = vrot.lane.b32.xlu0 %v3347_v12, %s3128_s7  ;;  %v668_v46 = vpop.permute.xlu1 %667 }
  0xaf   : > { %749 = vst.msk [vmem:[#allocation3 + $0x78] sm:$0xff] %vm733_vm2, %v668_v46 }
  0xb0   : > { %v666_v47 = vpop.permute.xlu0 %665  ;;  %1042 = vrot.lane.b32.xlu1 %v3349_v13, %s3128_s7 }
  0xb1   : > { %748 = vst.msk [vmem:[#allocation3 + $0x70] sm:$0xff] %vm733_vm2, %v666_v47 }
  0xb2   : > { %1040 = vrot.lane.b32.xlu0 %v3360_v15, %s3128_s7  ;;  %v672_v1 = vpop.permute.xlu1 %671 }
  0xb3   : > { %751 = vst.msk [vmem:[#allocation3 + $0x88] sm:$0xff] %vm733_vm2, %v672_v1  ;;  %v991_v1 = vld [vmem:[#allocation2 + $0x188] sm:$0xff] }
  0xb4   : > { %v670_v62 = vpop.permute.xlu0 %669  ;;  %1046 = vrot.lane.b32.xlu1 %v3362_v16, %s3128_s7 }
  0xb5   : > { %750 = vst.msk [vmem:[#allocation3 + $0x80] sm:$0xff] %vm733_vm2, %v670_v62 }
  0xb6   : > { %1044 = vrot.lane.b32.xlu0 %v3364_v17, %s3128_s7  ;;  %v676_v3 = vpop.permute.xlu1 %675 }
  0xb7   : > { %753 = vst.msk [vmem:[#allocation3 + $0x98] sm:$0xff] %vm733_vm2, %v676_v3  ;;  %v990_v3 = vld [vmem:[#allocation2 + $0x180] sm:$0xff] }
  0xb8   : > { %v674_v4 = vpop.permute.xlu0 %673  ;;  %1050 = vrot.lane.b32.xlu1 %v3373_v18, %s3128_s7 }
  0xb9   : > { %752 = vst.msk [vmem:[#allocation3 + $0x90] sm:$0xff] %vm733_vm2, %v674_v4 }
  0xba   : > { %1048 = vrot.lane.b32.xlu0 %v3375_v19, %s3128_s7  ;;  %v680_v7 = vpop.permute.xlu1 %679 }
  0xbb   : > { %755 = vst.msk [vmem:[#allocation3 + $0xa8] sm:$0xff] %vm733_vm2, %v680_v7 }
  0xbc   : > { %v678_v42 = vpop.permute.xlu0 %677  ;;  %1054 = vrot.lane.b32.xlu1 %v3377_v20, %s3128_s7 }
  0xbd   : > { %754 = vst.msk [vmem:[#allocation3 + $0xa0] sm:$0xff] %vm733_vm2, %v678_v42 }
  0xbe   : > { %1052 = vrot.lane.b32.xlu0 %v3385_v21, %s3128_s7  ;;  %v684_v16 = vpop.permute.xlu1 %683 }
  0xbf   : > { %757 = vst.msk [vmem:[#allocation3 + $0xb8] sm:$0xff] %vm733_vm2, %v684_v16 }
  0xc0   : > { %v682_v17 = vpop.permute.xlu0 %681  ;;  %1058 = vrot.lane.b32.xlu1 %v3387_v22, %s3128_s7 }
  0xc1   : > { %756 = vst.msk [vmem:[#allocation3 + $0xb0] sm:$0xff] %vm733_vm2, %v682_v17 }
  0xc2   : > { %1056 = vrot.lane.b32.xlu0 %v3389_v23, %s3128_s7  ;;  %v688_v18 = vpop.permute.xlu1 %687 }
  0xc3   : > { %759 = vst.msk [vmem:[#allocation3 + $0xc8] sm:$0xff] %vm733_vm2, %v688_v18 }
  0xc4   : > { %v686_v19 = vpop.permute.xlu0 %685  ;;  %1062 = vrot.lane.b32.xlu1 %v3397_v25, %s3128_s7 }
  0xc5   : > { %758 = vst.msk [vmem:[#allocation3 + $0xc0] sm:$0xff] %vm733_vm2, %v686_v19  ;;  %v2153_v19 = vld [vmem:[%s4289_s3 + $0x10] sm:$0xff] }
  0xc6   : > { %1060 = vrot.lane.b32.xlu0 %v3399_v26, %s3128_s7  ;;  %v692_v20 = vpop.permute.xlu1 %691 }
  0xc7   : > { %761 = vst.msk [vmem:[#allocation3 + $0xd8] sm:$0xff] %vm733_vm2, %v692_v20  ;;  %v2154_v20 = vld [vmem:[%s4289_s3 + $0x18] sm:$0xff] }
  0xc8   : > { %v690_v21 = vpop.permute.xlu0 %689  ;;  %1066 = vrot.lane.b32.xlu1 %v3401_v27, %s3128_s7 }
  0xc9   : > { %760 = vst.msk [vmem:[#allocation3 + $0xd0] sm:$0xff] %vm733_vm2, %v690_v21  ;;  %v3045_v21 = vpack.c.bf16 %v2154_v20, %v2153_v19  ;;  %v1738_v19 = vld [vmem:[#allocation2 + $0x69] sm:$0xff] }
  0xca   : > { %1064 = vrot.lane.b32.xlu0 %v3411_v29, %s3128_s7  ;;  %v696_v22 = vpop.permute.xlu1 %695 }
  0xcb   : > { %763 = vst.msk [vmem:[#allocation3 + $0xe8] sm:$0xff] %vm733_vm2, %v696_v22 }
  0xcc   : > { %v694_v23 = vpop.permute.xlu0 %693  ;;  %1070 = vrot.lane.b32.xlu1 %v3413_v30, %s3128_s7 }
  0xcd   : > { %762 = vst.msk [vmem:[#allocation3 + $0xe0] sm:$0xff] %vm733_vm2, %v694_v23 }
  0xce   : > { %1068 = vrot.lane.b32.xlu0 %v3415_v31, %s3128_s7  ;;  %v700_v54 = vpop.permute.xlu1 %699 }
  0xcf   : > { %765 = vst.msk [vmem:[#allocation3 + $0xf8] sm:$0xff] %vm733_vm2, %v700_v54  ;;  %v2155_v54 = vld [vmem:[%s4289_s3 + $0x20] sm:$0xff] }
  0xd0   : > { %v698_v44 = vpop.permute.xlu0 %697  ;;  %1074 = vrot.lane.b32.xlu1 %v3427_v33, %s3128_s7 }
  0xd1   : > { %764 = vst.msk [vmem:[#allocation3 + $0xf0] sm:$0xff] %vm733_vm2, %v698_v44 }
  0xd2   : > { %1072 = vrot.lane.b32.xlu0 %v3433_v37, %s3128_s7  ;;  %v833_v0 = vpop.permute.xlu1 %832 }
  0xd3   : > { %928 = vst.msk [vmem:[#allocation3 + $0x8] sm:$0xff] %vm926_vm3, %v833_v0 }
  0xd4   : > { %v831_v2 = vpop.permute.xlu0 %830  ;;  %1078 = vrot.lane.b32.xlu1 %v3443_v39, %s3128_s7 }
  0xd5   : > { %927 = vst.msk [vmem:[#allocation3] sm:$0xff] %vm926_vm3, %v831_v2  ;;  %v2157_v2 = vld [vmem:[%s4289_s3 + $0x30] sm:$0xff] }
  0xd6   : > { %1076 = vrot.lane.b32.xlu0 %v3449_v41, %s3128_s7  ;;  %v837_v46 = vpop.permute.xlu1 %836 }
  0xd7   : > { %930 = vst.msk [vmem:[#allocation3 + $0x18] sm:$0xff] %vm926_vm3, %v837_v46  ;;  %v2158_v46 = vld [vmem:[%s4289_s3 + $0x38] sm:$0xff] }
  0xd8   : > { %v835_v47 = vpop.permute.xlu0 %834  ;;  %1082 = vrot.lane.b32.xlu1 %v3457_v43, %s3128_s7 }
  0xd9   : > { %929 = vst.msk [vmem:[#allocation3 + $0x10] sm:$0xff] %vm926_vm3, %v835_v47  ;;  %v3053_v47 = vpack.c.bf16 %v2158_v46, %v2157_v2  ;;  %v4295_v46 = vld [vmem:[#allocation4_spill] sm:$0xff] }
  0xda   : > { %1080 = vrot.lane.b32.xlu0 %v3461_v45, %s3128_s7  ;;  %v841_v62 = vpop.permute.xlu1 %840 }
  0xdb   : > { %932 = vst.msk [vmem:[#allocation3 + $0x28] sm:$0xff] %vm926_vm3, %v841_v62 }
  0xdc   : > { %v839_v4 = vpop.permute.xlu0 %838  ;;  %1086 = vrot.lane.b32.xlu1 %v991_v1, %s3128_s7 }
  0xdd   : > { %931 = vst.msk [vmem:[#allocation3 + $0x20] sm:$0xff] %vm926_vm3, %v839_v4 }
  0xde   : > { %1084 = vrot.lane.b32.xlu0 %v990_v3, %s3128_s7  ;;  %v845_v7 = vpop.permute.xlu1 %844  ;;  %v2159_v3 = vld [vmem:[%s4289_s3 + $0x40] sm:$0xff] }
  0xdf   : > { %934 = vst.msk [vmem:[#allocation3 + $0x38] sm:$0xff] %vm926_vm3, %v845_v7 }
  0xe0   : > { %v843_v42 = vpop.permute.xlu0 %842  ;;  %1249 = vrot.lane.b32.xlu1 %v3352_v14, %s3129_s8 }
  0xe1   : > { %933 = vst.msk [vmem:[#allocation3 + $0x30] sm:$0xff] %vm926_vm3, %v843_v42 }
  0xe2   : > { %1217 = vrot.lane.b32.xlu0 %v3238_v24, %s3129_s8  ;;  %v849_v43 = vpop.permute.xlu1 %848 }
  0xe3   : > { %936 = vst.msk [vmem:[#allocation3 + $0x48] sm:$0xff] %vm926_vm3, %v849_v43 }
  0xe4   : > { %v847_v45 = vpop.permute.xlu0 %846  ;;  %1251 = vrot.lane.b32.xlu1 %v3339_v10, %s3129_s8 }
  0xe5   : > { %935 = vst.msk [vmem:[#allocation3 + $0x40] sm:$0xff] %vm926_vm3, %v847_v45 }
  0xe6   : > { %1219 = vrot.lane.b32.xlu0 %v3250_v28, %s3129_s8  ;;  %v853_v16 = vpop.permute.xlu1 %852 }
  0xe7   : > { %938 = vst.msk [vmem:[#allocation3 + $0x58] sm:$0xff] %vm926_vm3, %v853_v16 }
  0xe8   : > { %v851_v17 = vpop.permute.xlu0 %850  ;;  %1442 = vrot.lane.b32.xlu1 %v3524_v49, %s3130_s9 }
  0xe9   : > { %937 = vst.msk [vmem:[#allocation3 + $0x50] sm:$0xff] %vm926_vm3, %v851_v17 }
  0xea   : > { %1410 = vrot.lane.b32.xlu0 %v3487_v57, %s3130_s9  ;;  %v857_v24 = vpop.permute.xlu1 %856 }
  0xeb   : > { %940 = vst.msk [vmem:[#allocation3 + $0x68] sm:$0xff] %vm926_vm3, %v857_v24 }
  0xec   : > { %v855_v10 = vpop.permute.xlu0 %854  ;;  %1444 = vrot.lane.b32.xlu1 %v3522_v48, %s3130_s9 }
  0xed   : > { %939 = vst.msk [vmem:[#allocation3 + $0x60] sm:$0xff] %vm926_vm3, %v855_v10 }
  0xee   : > { %1412 = vrot.lane.b32.xlu0 %v3485_v56, %s3130_s9  ;;  %v861_v28 = vpop.permute.xlu1 %860 }
  0xef   : > { %942 = vst.msk [vmem:[#allocation3 + $0x78] sm:$0xff] %vm926_vm3, %v861_v28 }
  0xf0   : > { %v859_v14 = vpop.permute.xlu0 %858  ;;  %1636 = vrot.lane.b32.xlu1 %v3399_v26, %s3131_s10  ;;  %v2152_v26 = vld [vmem:[%s4289_s3 + $0x8] sm:$0xff] }
  0xf1   : > { %941 = vst.msk [vmem:[#allocation3 + $0x70] sm:$0xff] %vm926_vm3, %v859_v14 }
  0xf2   : > { %1604 = vrot.lane.b32.xlu0 %v3329_v6, %s3131_s10  ;;  %v865_v57 = vpop.permute.xlu1 %864  ;;  %v2151_v6 = vld [vmem:[%s4289_s3] sm:$0xff] }
  0xf3   : > { %944 = vst.msk [vmem:[#allocation3 + $0x88] sm:$0xff] %vm926_vm3, %v865_v57 }
  0xf4   : > { %v863_v48 = vpop.permute.xlu0 %862  ;;  %1638 = vrot.lane.b32.xlu1 %v3397_v25, %s3131_s10  ;;  %v3041_v25 = vpack.c.bf16 %v2152_v26, %v2151_v6 }
  0xf5   : > { %943 = vst.msk [vmem:[#allocation3 + $0x80] sm:$0xff] %vm926_vm3, %v863_v48 }
  0xf6   : > { %1606 = vrot.lane.b32.xlu0 %v3327_v5, %s3131_s10  ;;  %v869_v56 = vpop.permute.xlu1 %868  ;;  %3042 = vmatprep.subr.bf16.mxu0 %v3041_v25 }
  0xf7   : > { %946 = vst.msk [vmem:[#allocation3 + $0x98] sm:$0xff] %vm926_vm3, %v869_v56  ;;  %3057 = vmatprep.subr.bf16.mxu1 %v3041_v25  ;;  %3044 = vmatpush3.bf16.msra.mxu0 %v3041_v25 }
  0xf8   : > { %v867_v49 = vpop.permute.xlu0 %866  ;;  %1829 = vrot.lane.b32.xlu1 %v3429_v35, %s3132_s15  ;;  %3062 = vmatpush3.bf16.msra.mxu1 %v3041_v25 }
  0xf9   : > { %945 = vst.msk [vmem:[#allocation3 + $0x90] sm:$0xff] %vm926_vm3, %v867_v49  ;;  %3046 = vmatprep.subr.bf16.mxu0 %v3045_v21  ;;  %3058 = vmatprep.subr.bf16.mxu1 %v3045_v21 }
  0xfa   : > { %1797 = vrot.lane.b32.xlu0 %v3266_v36, %s3132_s15  ;;  %v873_v5 = vpop.permute.xlu1 %872 }
  0xfb   : > { %948 = vst.msk [vmem:[#allocation3 + $0xa8] sm:$0xff] %vm926_vm3, %v873_v5  ;;  %3048 = vmatpush3.bf16.msra.mxu0 %v3045_v21  ;;  %v1737_v5 = vld [vmem:[#allocation2 + $0x61] sm:$0xff] }
  0xfc   : > { %v871_v18 = vpop.permute.xlu0 %870  ;;  %1253 = vrot.lane.b32.xlu1 %v3429_v35, %s3129_s8  ;;  %3063 = vmatpush3.bf16.msra.mxu1 %v3045_v21  ;;  %v2156_v35 = vld [vmem:[%s4289_s3 + $0x28] sm:$0xff] }
  0xfd   : > { %947 = vst.msk [vmem:[#allocation3 + $0xa0] sm:$0xff] %vm926_vm3, %v871_v18 }
  0xfe   : > { %1221 = vrot.lane.b32.xlu0 %v3266_v36, %s3129_s8  ;;  %v877_v22 = vpop.permute.xlu1 %876  ;;  %v3049_v36 = vpack.c.bf16 %v2156_v35, %v2155_v54 }
  0xff   : > { %950 = vst.msk [vmem:[#allocation3 + $0xb8] sm:$0xff] %vm926_vm3, %v877_v22 }
 0x100   : > { %v875_v23 = vpop.permute.xlu0 %874  ;;  %1831 = vrot.lane.b32.xlu1 %v3419_v32, %s3132_s15  ;;  %3050 = vmatprep.subr.bf16.mxu0 %v3049_v36 }
 0x101   : > { %949 = vst.msk [vmem:[#allocation3 + $0xb0] sm:$0xff] %vm926_vm3, %v875_v23  ;;  %3059 = vmatprep.subr.bf16.mxu1 %v3049_v36  ;;  %3052 = vmatpush3.bf16.msra.mxu0 %v3049_v36 }
 0x102   : > { %1799 = vrot.lane.b32.xlu0 %v3262_v34, %s3132_s15  ;;  %v881_v44 = vpop.permute.xlu1 %880  ;;  %3064 = vmatpush3.bf16.msra.mxu1 %v3049_v36  ;;  %v1352_v36 = vld [vmem:[#allocation2 + $0x62] sm:$0xff] }
 0x103   : > { %952 = vst.msk [vmem:[#allocation3 + $0xc8] sm:$0xff] %vm926_vm3, %v881_v44  ;;  %3054 = vmatprep.subr.bf16.mxu0 %v3053_v47  ;;  %3060 = vmatprep.subr.bf16.mxu1 %v3053_v47 }
 0x104   : > { %v879_v0 = vpop.permute.xlu0 %878  ;;  %2022 = vrot.lane.b32.xlu1 %v3532_v51, %s3133_s12 }
 0x105   : > { %951 = vst.msk [vmem:[#allocation3 + $0xc0] sm:$0xff] %vm926_vm3, %v879_v0  ;;  %3056 = vmatpush3.bf16.msra.mxu0 %v3053_v47  ;;  %v1931_v0 = vld [vmem:[#allocation2 + $0x6a] sm:$0xff] }
 0x106   : > { %1990 = vrot.lane.b32.xlu0 %v3495_v59, %s3133_s12  ;;  %v885_v1 = vpop.permute.xlu1 %884  ;;  %3065 = vmatpush3.bf16.msra.mxu1 %v3053_v47 }
 0x107   : > { %954 = vst.msk [vmem:[#allocation3 + $0xd8] sm:$0xff] %vm926_vm3, %v885_v1  ;;  %2991 = vmatprep.subr.mxu0 %v2159_v3  ;;  %3061 = vmatprep.subr.mxu1 %v2159_v3 }
 0x108   : > { %v883_v62 = vpop.permute.xlu0 %882  ;;  %1255 = vrot.lane.b32.xlu1 %v3419_v32, %s3129_s8 }
 0x109   : > { %953 = vst.msk [vmem:[#allocation3 + $0xd0] sm:$0xff] %vm926_vm3, %v883_v62  ;;  %2992 = vmatpush3.msra.mxu0 %v2159_v3 }
 0x10a   : > { %1223 = vrot.lane.b32.xlu0 %v3262_v34, %s3129_s8  ;;  %v889_v4 = vpop.permute.xlu1 %888  ;;  %3066 = vmatpush3.msra.mxu1 %v2159_v3  ;;  %v497_v3 = vld [vmem:[%s3471_s30 + $0x10] sm:$0x3]  ;;  %s2900_s30 = sadd.s32 408, %s3185_s22 }
 0x10b   : > { %956 = vst.msk [vmem:[#allocation3 + $0xe8] sm:$0xff] %vm926_vm3, %v889_v4  ;;  %s3912_s23 = scalar_lea.vmem %s4288_s2, %s2900_s30 }
 0x10c   : > { %v887_v7 = vpop.permute.xlu0 %886  ;;  %1446 = vrot.lane.b32.xlu1 %v3532_v51, %s3130_s9  ;;  %501 = vst.msk [vmem:[#allocation2 + $0x190] sm:$0x3] %vm448_vm1, %v497_v3 }
 0x10d   : > { %955 = vst.msk [vmem:[#allocation3 + $0xe0] sm:$0xff] %vm926_vm3, %v887_v7 }
 0x10e   : > { %1414 = vrot.lane.b32.xlu0 %v3495_v59, %s3130_s9  ;;  %v893_v34 = vpop.permute.xlu1 %892 }
 0x10f   : > { %958 = vst.msk [vmem:[#allocation3 + $0xf8] sm:$0xff] %vm926_vm3, %v893_v34 }
 0x110   : > { %v891_v32 = vpop.permute.xlu0 %890  ;;  %2024 = vrot.lane.b32.xlu1 %v3530_v50, %s3133_s12 }
 0x111   : > { %957 = vst.msk [vmem:[#allocation3 + $0xf0] sm:$0xff] %vm926_vm3, %v891_v32  ;;  %v1739_v32 = vld [vmem:[#allocation2 + $0x79] sm:$0xff] }
 0x112   : > { %1992 = vrot.lane.b32.xlu0 %v3493_v58, %s3133_s12  ;;  %v1027_v42 = vpop.permute.xlu1 %1026 }
 0x113   : > { %1122 = vst.msk [vmem:[#allocation3 + $0x8] sm:$0xff] %vm1120_vm4, %v1027_v42 }
 0x114   : > { %v1025_v51 = vpop.permute.xlu0 %1024  ;;  %1448 = vrot.lane.b32.xlu1 %v3530_v50, %s3130_s9  ;;  %v1735_v50 = vld [vmem:[#allocation2 + $0x49] sm:$0xff] }
 0x115   : > { %1121 = vst.msk [vmem:[#allocation3] sm:$0xff] %vm1120_vm4, %v1025_v51 }
 0x116   : > { %1416 = vrot.lane.b32.xlu0 %v3493_v58, %s3130_s9  ;;  %v1031_v59 = vpop.permute.xlu1 %1030 }
 0x117   : > { %1124 = vst.msk [vmem:[#allocation3 + $0x18] sm:$0xff] %vm1120_vm4, %v1031_v59  ;;  %v1740_v59 = vld [vmem:[#allocation2 + $0x81] sm:$0xff] }
 0x118   : > { %v1029_v43 = vpop.permute.xlu0 %1028  ;;  %1640 = vrot.lane.b32.xlu1 %v3411_v29, %s3131_s10 }
 0x119   : > { %1123 = vst.msk [vmem:[#allocation3 + $0x10] sm:$0xff] %vm1120_vm4, %v1029_v43 }
 0x11a   : > { %1608 = vrot.lane.b32.xlu0 %v3337_v9, %s3131_s10  ;;  %v1035_v45 = vpop.permute.xlu1 %1034 }
 0x11b   : > { %1126 = vst.msk [vmem:[#allocation3 + $0x28] sm:$0xff] %vm1120_vm4, %v1035_v45  ;;  %v1948_v45 = vld [vmem:[#allocation2 + $0x13a] sm:$0xff] }
 0x11c   : > { %v1033_v16 = vpop.permute.xlu0 %1032  ;;  %1642 = vrot.lane.b32.xlu1 %v3401_v27, %s3131_s10  ;;  %v1736_v27 = vld [vmem:[#allocation2 + $0x51] sm:$0xff] }
 0x11d   : > { %1125 = vst.msk [vmem:[#allocation3 + $0x20] sm:$0xff] %vm1120_vm4, %v1033_v16 }
 0x11e   : > { %1610 = vrot.lane.b32.xlu0 %v3335_v8, %s3131_s10  ;;  %v1039_v58 = vpop.permute.xlu1 %1038 }
 0x11f   : > { %1128 = vst.msk [vmem:[#allocation3 + $0x38] sm:$0xff] %vm1120_vm4, %v1039_v58  ;;  %v1932_v58 = vld [vmem:[#allocation2 + $0x7a] sm:$0xff] }
 0x120   : > { %v1037_v29 = vpop.permute.xlu0 %1036  ;;  %1833 = vrot.lane.b32.xlu1 %v3445_v40, %s3132_s15 }
 0x121   : > { %1127 = vst.msk [vmem:[#allocation3 + $0x30] sm:$0xff] %vm1120_vm4, %v1037_v29 }
 0x122   : > { %1801 = vrot.lane.b32.xlu0 %v1735_v50, %s3132_s15  ;;  %v1043_v9 = vpop.permute.xlu1 %1042 }
 0x123   : > { %1130 = vst.msk [vmem:[#allocation3 + $0x48] sm:$0xff] %vm1120_vm4, %v1043_v9 }
 0x124   : > { %v1041_v17 = vpop.permute.xlu0 %1040  ;;  %1257 = vrot.lane.b32.xlu1 %v3445_v40, %s3129_s8 }
 0x125   : > { %1129 = vst.msk [vmem:[#allocation3 + $0x40] sm:$0xff] %vm1120_vm4, %v1041_v17 }
 0x126   : > { %1225 = vrot.lane.b32.xlu0 %v1735_v50, %s3129_s8  ;;  %v1047_v8 = vpop.permute.xlu1 %1046 }
 0x127   : > { %1132 = vst.msk [vmem:[#allocation3 + $0x58] sm:$0xff] %vm1120_vm4, %v1047_v8 }
 0x128   : > { %v1045_v24 = vpop.permute.xlu0 %1044  ;;  %1835 = vrot.lane.b32.xlu1 %v3441_v38, %s3132_s15 }
 0x129   : > { %1131 = vst.msk [vmem:[#allocation3 + $0x50] sm:$0xff] %vm1120_vm4, %v1045_v24 }
 0x12a   : > { %1803 = vrot.lane.b32.xlu0 %v1736_v27, %s3132_s15  ;;  %v1051_v10 = vpop.permute.xlu1 %1050 }
 0x12b   : > { %1134 = vst.msk [vmem:[#allocation3 + $0x68] sm:$0xff] %vm1120_vm4, %v1051_v10 }
 0x12c   : > { %v1049_v28 = vpop.permute.xlu0 %1048  ;;  %2026 = vrot.lane.b32.xlu1 %v3540_v53, %s3133_s12 }
 0x12d   : > { %1133 = vst.msk [vmem:[#allocation3 + $0x60] sm:$0xff] %vm1120_vm4, %v1049_v28  ;;  %v503_v28 = vld [vmem:[%s3912_s23 + $0x8] sm:$0xff] }
 0x12e   : > { %1994 = vrot.lane.b32.xlu0 %v3503_v61, %s3133_s12  ;;  %v1055_v40 = vpop.permute.xlu1 %1054  ;;  %507 = vst.msk [vmem:[#allocation2 + $0x1a0] sm:$0xff] %vm445_vm0, %v503_v28  ;;  %v1936_v28 = vld [vmem:[#allocation2 + $0xaa] sm:$0xff] }
 0x12f   : > { %1136 = vst.msk [vmem:[#allocation3 + $0x78] sm:$0xff] %vm1120_vm4, %v1055_v40  ;;  %v1949_v40 = vld [vmem:[#allocation2 + $0x142] sm:$0xff] }
 0x130   : > { %v1053_v14 = vpop.permute.xlu0 %1052  ;;  %1259 = vrot.lane.b32.xlu1 %v3441_v38, %s3129_s8 }
 0x131   : > { %1135 = vst.msk [vmem:[#allocation3 + $0x70] sm:$0xff] %vm1120_vm4, %v1053_v14 }
 0x132   : > { %1227 = vrot.lane.b32.xlu0 %v1736_v27, %s3129_s8  ;;  %v1059_v57 = vpop.permute.xlu1 %1058  ;;  %v502_v27 = vld [vmem:[%s3912_s23] sm:$0xff] }
 0x133   : > { %1138 = vst.msk [vmem:[#allocation3 + $0x88] sm:$0xff] %vm1120_vm4, %v1059_v57  ;;  %v1933_v57 = vld [vmem:[#allocation2 + $0x82] sm:$0xff] }
 0x134   : > { %v1057_v48 = vpop.permute.xlu0 %1056  ;;  %1450 = vrot.lane.b32.xlu1 %v3540_v53, %s3130_s9  ;;  %506 = vst.msk [vmem:[#allocation2 + $0x198] sm:$0xff] %vm445_vm0, %v502_v27 }
 0x135   : > { %1137 = vst.msk [vmem:[#allocation3 + $0x80] sm:$0xff] %vm1120_vm4, %v1057_v48 }
 0x136   : > { %1418 = vrot.lane.b32.xlu0 %v3503_v61, %s3130_s9  ;;  %v1063_v56 = vpop.permute.xlu1 %1062 }
 0x137   : > { %1140 = vst.msk [vmem:[#allocation3 + $0x98] sm:$0xff] %vm1120_vm4, %v1063_v56 }
 0x138   : > { %v1061_v49 = vpop.permute.xlu0 %1060  ;;  %2028 = vrot.lane.b32.xlu1 %v3538_v52, %s3133_s12 }
 0x139   : > { %1139 = vst.msk [vmem:[#allocation3 + $0x90] sm:$0xff] %vm1120_vm4, %v1061_v49 }
 0x13a   : > { %1996 = vrot.lane.b32.xlu0 %v3501_v60, %s3133_s12  ;;  %v1067_v38 = vpop.permute.xlu1 %1066 }
 0x13b   : > { %1142 = vst.msk [vmem:[#allocation3 + $0xa8] sm:$0xff] %vm1120_vm4, %v1067_v38 }
 0x13c   : > { %v1065_v6 = vpop.permute.xlu0 %1064  ;;  %1452 = vrot.lane.b32.xlu1 %v3538_v52, %s3130_s9 }
 0x13d   : > { %1141 = vst.msk [vmem:[#allocation3 + $0xa0] sm:$0xff] %vm1120_vm4, %v1065_v6 }
 0x13e   : > { %1420 = vrot.lane.b32.xlu0 %v3501_v60, %s3130_s9  ;;  %v1071_v61 = vpop.permute.xlu1 %1070  ;;  %v1753_v60 = vld [vmem:[#allocation2 + $0x121] sm:$0xff] }
 0x13f   : > { %1144 = vst.msk [vmem:[#allocation3 + $0xb8] sm:$0xff] %vm1120_vm4, %v1071_v61  ;;  %v504_v61 = vld [vmem:[%s3912_s23 + $0x10] sm:$0x3] }
 0x140   : > { %v1069_v53 = vpop.permute.xlu0 %1068  ;;  %1644 = vrot.lane.b32.xlu1 %v3415_v31, %s3131_s10  ;;  %508 = vst.msk [vmem:[#allocation2 + $0x1a8] sm:$0x3] %vm448_vm1, %v504_v61 }
 0x141   : > { %1143 = vst.msk [vmem:[#allocation3 + $0xb0] sm:$0xff] %vm1120_vm4, %v1069_v53 }
 0x142   : > { %1612 = vrot.lane.b32.xlu0 %v3347_v12, %s3131_s10  ;;  %v1075_v26 = vpop.permute.xlu1 %1074 }
 0x143   : > { %1146 = vst.msk [vmem:[#allocation3 + $0xc8] sm:$0xff] %vm1120_vm4, %v1075_v26  ;;  %v1548_v26 = vld [vmem:[#allocation2 + $0x90] sm:$0xff] }
 0x144   : > { %v1073_v25 = vpop.permute.xlu0 %1072  ;;  %1646 = vrot.lane.b32.xlu1 %v3413_v30, %s3131_s10 }
 0x145   : > { %1145 = vst.msk [vmem:[#allocation3 + $0xc0] sm:$0xff] %vm1120_vm4, %v1073_v25 }
 0x146   : > { %1614 = vrot.lane.b32.xlu0 %v3345_v11, %s3131_s10  ;;  %v1079_v52 = vpop.permute.xlu1 %1078  ;;  %v1754_v11 = vld [vmem:[#allocation2 + $0x129] sm:$0xff] }
 0x147   : > { %1148 = vst.msk [vmem:[#allocation3 + $0xd8] sm:$0xff] %vm1120_vm4, %v1079_v52  ;;  %v1549_v52 = vld [vmem:[#allocation2 + $0x98] sm:$0xff] }
 0x148   : > { %v1077_v31 = vpop.permute.xlu0 %1076  ;;  %1837 = vrot.lane.b32.xlu1 %v1753_v60, %s3132_s15 }
 0x149   : > { %1147 = vst.msk [vmem:[#allocation3 + $0xd0] sm:$0xff] %vm1120_vm4, %v1077_v31  ;;  %v1757_v31 = vld [vmem:[#allocation2 + $0x151] sm:$0xff] }
 0x14a   : > { %1805 = vrot.lane.b32.xlu0 %v1737_v5, %s3132_s15  ;;  %v1083_v12 = vpop.permute.xlu1 %1082 }
 0x14b   : > { %1150 = vst.msk [vmem:[#allocation3 + $0xe8] sm:$0xff] %vm1120_vm4, %v1083_v12 }
 0x14c   : > { %v1081_v18 = vpop.permute.xlu0 %1080  ;;  %1261 = vrot.lane.b32.xlu1 %v1753_v60, %s3129_s8 }
 0x14d   : > { %1149 = vst.msk [vmem:[#allocation3 + $0xe0] sm:$0xff] %vm1120_vm4, %v1081_v18  ;;  %v1741_v18 = vld [vmem:[#allocation2 + $0x91] sm:$0xff] }
 0x14e   : > { %1229 = vrot.lane.b32.xlu0 %v1737_v5, %s3129_s8  ;;  %v1087_v30 = vpop.permute.xlu1 %1086 }
 0x14f   : > { %1152 = vst.msk [vmem:[#allocation3 + $0xf8] sm:$0xff] %vm1120_vm4, %v1087_v30 }
 0x150   : > { %v1085_v20 = vpop.permute.xlu0 %1084  ;;  %1839 = vrot.lane.b32.xlu1 %v1754_v11, %s3132_s15 }
 0x151   : > { %1151 = vst.msk [vmem:[#allocation3 + $0xf0] sm:$0xff] %vm1120_vm4, %v1085_v20  ;;  %v1742_v20 = vld [vmem:[#allocation2 + $0x99] sm:$0xff] }
 0x152   : > { %1807 = vrot.lane.b32.xlu0 %v1738_v19, %s3132_s15  ;;  %v1250_v21 = vpop.permute.xlu1 %1249 }
 0x153   : > { %1330 = vst.msk [vmem:[#allocation3 + $0x80] sm:$0xff] %vm1313_vm5, %v1250_v21 }
 0x154   : > { %v1218_v22 = vpop.permute.xlu0 %1217  ;;  %2030 = vrot.lane.b32.xlu1 %v3548_v55, %s3133_s12 }
 0x155   : > { %1314 = vst.msk [vmem:[#allocation3] sm:$0xff] %vm1313_vm5, %v1218_v22  ;;  %v1950_v22 = vld [vmem:[#allocation2 + $0x152] sm:$0xff] }
 0x156   : > { %1998 = vrot.lane.b32.xlu0 %v3509_v63, %s3133_s12  ;;  %v1252_v23 = vpop.permute.xlu1 %1251 }
 0x157   : > { %1331 = vst.msk [vmem:[#allocation3 + $0x88] sm:$0xff] %vm1313_vm5, %v1252_v23 }
 0x158   : > { %v1220_v54 = vpop.permute.xlu0 %1219  ;;  %1263 = vrot.lane.b32.xlu1 %v1754_v11, %s3129_s8 }
 0x159   : > { %1315 = vst.msk [vmem:[#allocation3 + $0x8] sm:$0xff] %vm1313_vm5, %v1220_v54  ;;  %v1934_v54 = vld [vmem:[#allocation2 + $0x92] sm:$0xff] }
 0x15a   : > { %1231 = vrot.lane.b32.xlu0 %v1738_v19, %s3129_s8  ;;  %v1443_v35 = vpop.permute.xlu1 %1442 }
 0x15b   : > { %1523 = vst.msk [vmem:[#allocation3 + $0x80] sm:$0xff] %vm1506_vm6, %v1443_v35 }
 0x15c   : > { %v1411_v44 = vpop.permute.xlu0 %1410  ;;  %1454 = vrot.lane.b32.xlu1 %v3548_v55, %s3130_s9 }
 0x15d   : > { %1507 = vst.msk [vmem:[#allocation3] sm:$0xff] %vm1506_vm6, %v1411_v44 }
 0x15e   : > { %1422 = vrot.lane.b32.xlu0 %v1352_v36, %s3130_s9  ;;  %v1445_v63 = vpop.permute.xlu1 %1444 }
 0x15f   : > { %1524 = vst.msk [vmem:[#allocation3 + $0x88] sm:$0xff] %vm1506_vm6, %v1445_v63 }
 0x160   : > { %v1413_v2 = vpop.permute.xlu0 %1412  ;;  %2032 = vrot.lane.b32.xlu1 %v4295_v46, %s3133_s12 }
 0x161   : > { %1508 = vst.msk [vmem:[#allocation3 + $0x8] sm:$0xff] %vm1506_vm6, %v1413_v2 }
 0x162   : > { %2000 = vrot.lane.b32.xlu0 %v1931_v0, %s3133_s12  ;;  %v1637_v47 = vpop.permute.xlu1 %1636 }
 0x163   : > { %1717 = vst.msk [vmem:[#allocation3 + $0x80] sm:$0xff] %vm1700_vm7, %v1637_v47  ;;  %v1951_v47 = vld [vmem:[#allocation2 + $0x15a] sm:$0xff] }
 0x164   : > { %v1605_v55 = vpop.permute.xlu0 %1604  ;;  %1456 = vrot.lane.b32.xlu1 %v4295_v46, %s3130_s9 }
 0x165   : > { %1701 = vst.msk [vmem:[#allocation3] sm:$0xff] %vm1700_vm7, %v1605_v55 }
 0x166   : > { %1424 = vrot.lane.b32.xlu0 %v1931_v0, %s3130_s9  ;;  %v1639_v1 = vpop.permute.xlu1 %1638 }
 0x167   : > { %1718 = vst.msk [vmem:[#allocation3 + $0x88] sm:$0xff] %vm1700_vm7, %v1639_v1  ;;  %v1935_v1 = vld [vmem:[#allocation2 + $0x9a] sm:$0xff] }
 0x168   : > { %v1607_v62 = vpop.permute.xlu0 %1606  ;;  %1648 = vrot.lane.b32.xlu1 %v3433_v37, %s3131_s10  ;;  %v1755_v37 = vld [vmem:[#allocation2 + $0x139] sm:$0xff] }
 0x169   : > { %1702 = vst.msk [vmem:[#allocation3 + $0x8] sm:$0xff] %vm1700_vm7, %v1607_v62 }
 0x16a   : > { %1616 = vrot.lane.b32.xlu0 %v3360_v15, %s3131_s10  ;;  %v1830_v4 = vpop.permute.xlu1 %1829 }
 0x16b   : > { %1910 = vst.msk [vmem:[#allocation3 + $0x80] sm:$0xff] %vm1893_vm8, %v1830_v4 }
 0x16c   : > { %v1798_v7 = vpop.permute.xlu0 %1797  ;;  %1650 = vrot.lane.b32.xlu1 %v3427_v33, %s3131_s10 }
 0x16d   : > { %1894 = vst.msk [vmem:[#allocation3] sm:$0xff] %vm1893_vm8, %v1798_v7 }
 0x16e   : > { %1618 = vrot.lane.b32.xlu0 %v3349_v13, %s3131_s10  ;;  %v1254_v34 = vpop.permute.xlu1 %1253  ;;  %v1756_v13 = vld [vmem:[#allocation2 + $0x141] sm:$0xff] }
 0x16f   : > { %1332 = vst.msk [vmem:[#allocation3 + $0x90] sm:$0xff] %vm1313_vm5, %v1254_v34  ;;  %v1566_v34 = vld [vmem:[#allocation2 + $0x168] sm:$0xff] }
 0x170   : > { %v1222_v15 = vpop.permute.xlu0 %1221  ;;  %1841 = vrot.lane.b32.xlu1 %v1755_v37, %s3132_s15 }
 0x171   : > { %1316 = vst.msk [vmem:[#allocation3 + $0x10] sm:$0xff] %vm1313_vm5, %v1222_v15  ;;  %v1550_v15 = vld [vmem:[#allocation2 + $0xa8] sm:$0xff] }
 0x172   : > { %1809 = vrot.lane.b32.xlu0 %v1739_v32, %s3132_s15  ;;  %v1832_v42 = vpop.permute.xlu1 %1831 }
 0x173   : > { %1911 = vst.msk [vmem:[#allocation3 + $0x88] sm:$0xff] %vm1893_vm8, %v1832_v42 }
 0x174   : > { %v1800_v51 = vpop.permute.xlu0 %1799  ;;  %1265 = vrot.lane.b32.xlu1 %v1755_v37, %s3129_s8 }
 0x175   : > { %1895 = vst.msk [vmem:[#allocation3 + $0x8] sm:$0xff] %vm1893_vm8, %v1800_v51  ;;  %v1567_v51 = vld [vmem:[#allocation2 + $0x170] sm:$0xff] }
 0x176   : > { %1233 = vrot.lane.b32.xlu0 %v1739_v32, %s3129_s8  ;;  %v2023_v33 = vpop.permute.xlu1 %2022 }
 0x177   : > { %2103 = vst.msk [vmem:[#allocation3 + $0x80] sm:$0xff] %vm2086_vm9, %v2023_v33  ;;  %v1551_v33 = vld [vmem:[#allocation2 + $0xb0] sm:$0xff] }
 0x178   : > { %v1991_v43 = vpop.permute.xlu0 %1990  ;;  %1843 = vrot.lane.b32.xlu1 %v1756_v13, %s3132_s15 }
 0x179   : > { %2087 = vst.msk [vmem:[#allocation3] sm:$0xff] %vm2086_vm9, %v1991_v43  ;;  %v1759_v43 = vld [vmem:[#allocation2 + $0x169] sm:$0xff] }
 0x17a   : > { %1811 = vrot.lane.b32.xlu0 %v1740_v59, %s3132_s15  ;;  %v1256_v16 = vpop.permute.xlu1 %1255 }
 0x17b   : > { %1333 = vst.msk [vmem:[#allocation3 + $0x98] sm:$0xff] %vm1313_vm5, %v1256_v16  ;;  %v1743_v16 = vld [vmem:[#allocation2 + $0xa9] sm:$0xff] }
 0x17c   : > { %v1224_v50 = vpop.permute.xlu0 %1223  ;;  %2034 = vrot.lane.b32.xlu1 %v1948_v45, %s3133_s12 }
 0x17d   : > { %1317 = vst.msk [vmem:[#allocation3 + $0x18] sm:$0xff] %vm1313_vm5, %v1224_v50 }
 0x17e   : > { %2002 = vrot.lane.b32.xlu0 %v1932_v58, %s3133_s12  ;;  %v1447_v29 = vpop.permute.xlu1 %1446  ;;  %v2135_v9 = vld [vmem:[#allocation3 + $0x80] sm:$0xff] }
 0x17f   : > { %1525 = vst.msk [vmem:[#allocation3 + $0x90] sm:$0xff] %vm1506_vm6, %v1447_v29  ;;  %3017 = vmatprep.mubr.msk.f32.mxu1 %vm2167_vm10, %v2135_v9  ;;  %v1760_v9 = vld [vmem:[#allocation2 + $0x171] sm:$0xff] }
 0x180   : > { %v1415_v17 = vpop.permute.xlu0 %1414  ;;  %v2119_v8 = vld [vmem:[#allocation3] sm:$0xff]  ;;  %1267 = vrot.lane.b32.xlu1 %v1756_v13, %s3129_s8 }
 0x181   : > { %1509 = vst.msk [vmem:[#allocation3 + $0x10] sm:$0xff] %vm1506_vm6, %v1415_v17  ;;  %2993 = vmatprep.mubr.msk.f32.mxu0 %vm2167_vm10, %v2119_v8  ;;  %v1744_v8 = vld [vmem:[#allocation2 + $0xb1] sm:$0xff] }
 0x182   : > { %1235 = vrot.lane.b32.xlu0 %v1740_v59, %s3129_s8  ;;  %v2025_v24 = vpop.permute.xlu1 %2024 }
 0x183   : > { %2104 = vst.msk [vmem:[#allocation3 + $0x88] sm:$0xff] %vm2086_vm9, %v2025_v24  ;;  %v1952_v24 = vld [vmem:[#allocation2 + $0x16a] sm:$0xff] }
 0x184   : > { %v1993_v10 = vpop.permute.xlu0 %1992  ;;  %1458 = vrot.lane.b32.xlu1 %v1948_v45, %s3130_s9 }
 0x185   : > { %2088 = vst.msk [vmem:[#allocation3 + $0x8] sm:$0xff] %vm2086_vm9, %v1993_v10 }
 0x186   : > { %1426 = vrot.lane.b32.xlu0 %v1932_v58, %s3130_s9  ;;  %v1449_v14 = vpop.permute.xlu1 %1448 }
 0x187   : > { %1526 = vst.msk [vmem:[#allocation3 + $0x98] sm:$0xff] %vm1506_vm6, %v1449_v14 }
 0x188   : > { %v1417_v48 = vpop.permute.xlu0 %1416  ;;  %2036 = vrot.lane.b32.xlu1 %v1949_v40, %s3133_s12 }
 0x189   : > { %1510 = vst.msk [vmem:[#allocation3 + $0x18] sm:$0xff] %vm1506_vm6, %v1417_v48 }
 0x18a   : > { %2004 = vrot.lane.b32.xlu0 %v1933_v57, %s3133_s12  ;;  %v1641_v56 = vpop.permute.xlu1 %1640  ;;  %v2136_v49 = vld [vmem:[#allocation3 + $0x88] sm:$0xff] }
 0x18b   : > { %1719 = vst.msk [vmem:[#allocation3 + $0x90] sm:$0xff] %vm1700_vm7, %v1641_v56  ;;  %3018 = vmatmul.mubr.msk.f32.vlgmr.msra.gmra.mrb[0].mxu1 %vm2167_vm10, %v2136_v49 }
 0x18c   : > { %v1609_v38 = vpop.permute.xlu0 %1608  ;;  %v2120_v6 = vld [vmem:[#allocation3 + $0x8] sm:$0xff]  ;;  %1460 = vrot.lane.b32.xlu1 %v1949_v40, %s3130_s9 }
 0x18d   : > { %1703 = vst.msk [vmem:[#allocation3 + $0x10] sm:$0xff] %vm1700_vm7, %v1609_v38  ;;  %2994 = vmatmul.mubr.msk.f32.vlgmr.msra.gmra.mrb[0].mxu0 %vm2167_vm10, %v2120_v6  ;;  %v1953_v6 = vld [vmem:[#allocation2 + $0x172] sm:$0xff] }
 0x18e   : > { %1428 = vrot.lane.b32.xlu0 %v1933_v57, %s3130_s9  ;;  %v1643_v53 = vpop.permute.xlu1 %1642 }
 0x18f   : > { %1720 = vst.msk [vmem:[#allocation3 + $0x98] sm:$0xff] %vm1700_vm7, %v1643_v53  ;;  %v1937_v53 = vld [vmem:[#allocation2 + $0xb2] sm:$0xff] }
 0x190   : > { %v1611_v25 = vpop.permute.xlu0 %1610  ;;  %1652 = vrot.lane.b32.xlu1 %v3449_v41, %s3131_s10 }
 0x191   : > { %1704 = vst.msk [vmem:[#allocation3 + $0x18] sm:$0xff] %vm1700_vm7, %v1611_v25 }
 0x192   : > { %1620 = vrot.lane.b32.xlu0 %v1548_v26, %s3131_s10  ;;  %v1834_v60 = vpop.permute.xlu1 %1833 }
 0x193   : > { %1912 = vst.msk [vmem:[#allocation3 + $0x90] sm:$0xff] %vm1893_vm8, %v1834_v60 }
 0x194   : > { %v1802_v5 = vpop.permute.xlu0 %1801  ;;  %1654 = vrot.lane.b32.xlu1 %v3443_v39, %s3131_s10  ;;  %v1758_v39 = vld [vmem:[#allocation2 + $0x159] sm:$0xff] }
 0x195   : > { %1896 = vst.msk [vmem:[#allocation3 + $0x10] sm:$0xff] %vm1893_vm8, %v1802_v5 }
 0x196   : > { %1622 = vrot.lane.b32.xlu0 %v1549_v52, %s3131_s10  ;;  %v1258_v12 = vpop.permute.xlu1 %1257 }
 0x197   : > { %1334 = vst.msk [vmem:[#allocation3 + $0xa0] sm:$0xff] %vm1313_vm5, %v1258_v12 }
 0x198   : > { %v1226_v41 = vpop.permute.xlu0 %1225  ;;  %1845 = vrot.lane.b32.xlu1 %v1757_v31, %s3132_s15 }
 0x199   : > { %1318 = vst.msk [vmem:[#allocation3 + $0x20] sm:$0xff] %vm1313_vm5, %v1226_v41 }
 0x19a   : > { %1813 = vrot.lane.b32.xlu0 %v1741_v18, %s3132_s15  ;;  %v1836_v11 = vpop.permute.xlu1 %1835 }
 0x19b   : > { %1913 = vst.msk [vmem:[#allocation3 + $0x98] sm:$0xff] %vm1893_vm8, %v1836_v11  ;;  %v1569_v11 = vld [vmem:[#allocation2 + $0x188] sm:$0xff] }
 0x19c   : > { %v1804_v30 = vpop.permute.xlu0 %1803  ;;  %1269 = vrot.lane.b32.xlu1 %v1757_v31, %s3129_s8  ;;  %v1568_v31 = vld [vmem:[#allocation2 + $0x180] sm:$0xff] }
 0x19d   : > { %1897 = vst.msk [vmem:[#allocation3 + $0x18] sm:$0xff] %vm1893_vm8, %v1804_v30 }
 0x19e   : > { %1237 = vrot.lane.b32.xlu0 %v1741_v18, %s3129_s8  ;;  %v2027_v19 = vpop.permute.xlu1 %2026  ;;  %v1552_v18 = vld [vmem:[#allocation2 + $0xc0] sm:$0xff] }
 0x19f   : > { %2105 = vst.msk [vmem:[#allocation3 + $0x90] sm:$0xff] %vm2086_vm9, %v2027_v19 }
 0x1a0   : > { %v1995_v21 = vpop.permute.xlu0 %1994  ;;  %1847 = vrot.lane.b32.xlu1 %v1758_v39, %s3132_s15 }
 0x1a1   : > { %2089 = vst.msk [vmem:[#allocation3 + $0x10] sm:$0xff] %vm2086_vm9, %v1995_v21 }
 0x1a2   : > { %1815 = vrot.lane.b32.xlu0 %v1742_v20, %s3132_s15  ;;  %v1260_v23 = vpop.permute.xlu1 %1259 }
 0x1a3   : > { %1335 = vst.msk [vmem:[#allocation3 + $0xa8] sm:$0xff] %vm1313_vm5, %v1260_v23 }
 0x1a4   : > { %v1228_v35 = vpop.permute.xlu0 %1227  ;;  %2038 = vrot.lane.b32.xlu1 %v1950_v22, %s3133_s12 }
 0x1a5   : > { %1319 = vst.msk [vmem:[#allocation3 + $0x28] sm:$0xff] %vm1313_vm5, %v1228_v35 }
 0x1a6   : > { %2006 = vrot.lane.b32.xlu0 %v1934_v54, %s3133_s12  ;;  %v1451_v36 = vpop.permute.xlu1 %1450  ;;  %v2137_v44 = vld [vmem:[#allocation3 + $0x90] sm:$0xff] }
 0x1a7   : > { %1527 = vst.msk [vmem:[#allocation3 + $0xa0] sm:$0xff] %vm1506_vm6, %v1451_v36  ;;  %3020 = vmatprep.mubr.msk.f32.mxu1 %vm2167_vm10, %v2137_v44  ;;  %v1762_v36 = vld [vmem:[#allocation2 + $0x189] sm:$0xff] }
 0x1a8   : > { %v1419_v63 = vpop.permute.xlu0 %1418  ;;  %v2121_v0 = vld [vmem:[#allocation3 + $0x10] sm:$0xff]  ;;  %1271 = vrot.lane.b32.xlu1 %v1758_v39, %s3129_s8  ;;  %v1553_v39 = vld [vmem:[#allocation2 + $0xc8] sm:$0xff] }
 0x1a9   : > { %1511 = vst.msk [vmem:[#allocation3 + $0x20] sm:$0xff] %vm1506_vm6, %v1419_v63  ;;  %2996 = vmatprep.mubr.msk.f32.mxu0 %vm2167_vm10, %v2121_v0  ;;  %v1746_v63 = vld [vmem:[#allocation2 + $0xc9] sm:$0xff] }
 0x1aa   : > { %1239 = vrot.lane.b32.xlu0 %v1742_v20, %s3129_s8  ;;  %v2029_v2 = vpop.permute.xlu1 %2028  ;;  %v1761_v20 = vld [vmem:[#allocation2 + $0x181] sm:$0xff] }
 0x1ab   : > { %2106 = vst.msk [vmem:[#allocation3 + $0x98] sm:$0xff] %vm2086_vm9, %v2029_v2  ;;  %v1954_v2 = vld [vmem:[#allocation2 + $0x182] sm:$0xff] }
 0x1ac   : > { %v1997_v46 = vpop.permute.xlu0 %1996  ;;  %1462 = vrot.lane.b32.xlu1 %v1950_v22, %s3130_s9  ;;  %v1745_v22 = vld [vmem:[#allocation2 + $0xc1] sm:$0xff] }
 0x1ad   : > { %2090 = vst.msk [vmem:[#allocation3 + $0x18] sm:$0xff] %vm2086_vm9, %v1997_v46 }
 0x1ae   : > { %1430 = vrot.lane.b32.xlu0 %v1934_v54, %s3130_s9  ;;  %v1453_v55 = vpop.permute.xlu1 %1452 }
 0x1af   : > { %1528 = vst.msk [vmem:[#allocation3 + $0xa8] sm:$0xff] %vm1506_vm6, %v1453_v55 }
 0x1b0   : > { %v1421_v62 = vpop.permute.xlu0 %1420  ;;  %2040 = vrot.lane.b32.xlu1 %v1951_v47, %s3133_s12 }
 0x1b1   : > { %1512 = vst.msk [vmem:[#allocation3 + $0x28] sm:$0xff] %vm1506_vm6, %v1421_v62 }
 0x1b2   : > { %2008 = vrot.lane.b32.xlu0 %v1935_v1, %s3133_s12  ;;  %v1645_v3 = vpop.permute.xlu1 %1644  ;;  %v2138_v4 = vld [vmem:[#allocation3 + $0x98] sm:$0xff] }
 0x1b3   : > { %1721 = vst.msk [vmem:[#allocation3 + $0xa0] sm:$0xff] %vm1700_vm7, %v1645_v3  ;;  %3021 = vmatmul.mubr.msk.f32.gmra.mrb[2].mxu1 %vm2167_vm10, %v2138_v4 }
 0x1b4   : > { %v1613_v7 = vpop.permute.xlu0 %1612  ;;  %v2122_v37 = vld [vmem:[#allocation3 + $0x18] sm:$0xff]  ;;  %1464 = vrot.lane.b32.xlu1 %v1951_v47, %s3130_s9 }
 0x1b5   : > { %1705 = vst.msk [vmem:[#allocation3 + $0x20] sm:$0xff] %vm1700_vm7, %v1613_v7  ;;  %2997 = vmatmul.mubr.msk.f32.gmra.mrb[2].mxu0 %vm2167_vm10, %v2122_v37  ;;  %v1938_v47 = vld [vmem:[#allocation2 + $0xc2] sm:$0xff] }
 0x1b6   : > { %1432 = vrot.lane.b32.xlu0 %v1935_v1, %s3130_s9  ;;  %v1647_v32 = vpop.permute.xlu1 %1646 }
 0x1b7   : > { %1722 = vst.msk [vmem:[#allocation3 + $0xa8] sm:$0xff] %vm1700_vm7, %v1647_v32 }
 0x1b8   : > { %v1615_v42 = vpop.permute.xlu0 %1614  ;;  %1656 = vrot.lane.b32.xlu1 %v1566_v34, %s3131_s10  ;;  %v1955_v34 = vld [vmem:[#allocation2 + $0x18a] sm:$0xff] }
 0x1b9   : > { %1706 = vst.msk [vmem:[#allocation3 + $0x28] sm:$0xff] %vm1700_vm7, %v1615_v42 }
 0x1ba   : > { %1624 = vrot.lane.b32.xlu0 %v1550_v15, %s3131_s10  ;;  %v1838_v13 = vpop.permute.xlu1 %1837  ;;  %v1939_v15 = vld [vmem:[#allocation2 + $0xca] sm:$0xff] }
 0x1bb   : > { %1914 = vst.msk [vmem:[#allocation3 + $0xa0] sm:$0xff] %vm1893_vm8, %v1838_v13 }
 0x1bc   : > { %v1806_v59 = vpop.permute.xlu0 %1805  ;;  %1658 = vrot.lane.b32.xlu1 %v1567_v51, %s3131_s10 }
 0x1bd   : > { %1898 = vst.msk [vmem:[#allocation3 + $0x20] sm:$0xff] %vm1893_vm8, %v1806_v59 }
 0x1be   : > { %1626 = vrot.lane.b32.xlu0 %v1551_v33, %s3131_s10  ;;  %v1262_v45 = vpop.permute.xlu1 %1261 }
 0x1bf   : > { %1336 = vst.msk [vmem:[#allocation3 + $0xb0] sm:$0xff] %vm1313_vm5, %v1262_v45 }
 0x1c0   : > { %v1230_v58 = vpop.permute.xlu0 %1229  ;;  %1849 = vrot.lane.b32.xlu1 %v1759_v43, %s3132_s15 }
 0x1c1   : > { %1320 = vst.msk [vmem:[#allocation3 + $0x30] sm:$0xff] %vm1313_vm5, %v1230_v58 }
 0x1c2   : > { %1817 = vrot.lane.b32.xlu0 %v1743_v16, %s3132_s15  ;;  %v1840_v50 = vpop.permute.xlu1 %1839 }
 0x1c3   : > { %1915 = vst.msk [vmem:[#allocation3 + $0xa8] sm:$0xff] %vm1893_vm8, %v1840_v50  ;;  %v1571_v50 = vld [vmem:[#allocation2 + $0x1a0] sm:$0xff] }
 0x1c4   : > { %v1808_v29 = vpop.permute.xlu0 %1807  ;;  %1273 = vrot.lane.b32.xlu1 %v1759_v43, %s3129_s8  ;;  %v1570_v43 = vld [vmem:[#allocation2 + $0x198] sm:$0xff] }
 0x1c5   : > { %1899 = vst.msk [vmem:[#allocation3 + $0x28] sm:$0xff] %vm1893_vm8, %v1808_v29 }
 0x1c6   : > { %1241 = vrot.lane.b32.xlu0 %v1743_v16, %s3129_s8  ;;  %v2031_v17 = vpop.permute.xlu1 %2030  ;;  %v1554_v16 = vld [vmem:[#allocation2 + $0xd8] sm:$0xff] }
 0x1c7   : > { %2107 = vst.msk [vmem:[#allocation3 + $0xa0] sm:$0xff] %vm2086_vm9, %v2031_v17 }
 0x1c8   : > { %v1999_v27 = vpop.permute.xlu0 %1998  ;;  %1851 = vrot.lane.b32.xlu1 %v1760_v9, %s3132_s15 }
 0x1c9   : > { %2091 = vst.msk [vmem:[#allocation3 + $0x20] sm:$0xff] %vm2086_vm9, %v1999_v27 }
 0x1ca   : > { %1819 = vrot.lane.b32.xlu0 %v1744_v8, %s3132_s15  ;;  %v1264_v10 = vpop.permute.xlu1 %1263 }
 0x1cb   : > { %1337 = vst.msk [vmem:[#allocation3 + $0xb8] sm:$0xff] %vm1313_vm5, %v1264_v10 }
 0x1cc   : > { %v1232_v40 = vpop.permute.xlu0 %1231  ;;  %2042 = vrot.lane.b32.xlu1 %v1952_v24, %s3133_s12 }
 0x1cd   : > { %1321 = vst.msk [vmem:[#allocation3 + $0x38] sm:$0xff] %vm1313_vm5, %v1232_v40 }
 0x1ce   : > { %2010 = vrot.lane.b32.xlu0 %v1936_v28, %s3133_s12  ;;  %v1455_v14 = vpop.permute.xlu1 %1454  ;;  %v2139_v57 = vld [vmem:[#allocation3 + $0xa0] sm:$0xff] }
 0x1cf   : > { %1529 = vst.msk [vmem:[#allocation3 + $0xb0] sm:$0xff] %vm1506_vm6, %v1455_v14  ;;  %3023 = vmatprep.mubr.msk.f32.mxu1 %vm2167_vm10, %v2139_v57  ;;  %v1748_v14 = vld [vmem:[#allocation2 + $0xe1] sm:$0xff] }
 0x1d0   : > { %v1423_v48 = vpop.permute.xlu0 %1422  ;;  %v2123_v56 = vld [vmem:[#allocation3 + $0x20] sm:$0xff]  ;;  %1275 = vrot.lane.b32.xlu1 %v1760_v9, %s3129_s8  ;;  %v1555_v9 = vld [vmem:[#allocation2 + $0xe0] sm:$0xff] }
 0x1d1   : > { %1513 = vst.msk [vmem:[#allocation3 + $0x30] sm:$0xff] %vm1506_vm6, %v1423_v48  ;;  %2999 = vmatprep.mubr.msk.f32.mxu0 %vm2167_vm10, %v2123_v56  ;;  %v1956_v48 = vld [vmem:[#allocation2 + $0x19a] sm:$0xff] }
 0x1d2   : > { %1243 = vrot.lane.b32.xlu0 %v1744_v8, %s3129_s8  ;;  %v2033_v49 = vpop.permute.xlu1 %2032  ;;  %v1763_v8 = vld [vmem:[#allocation2 + $0x199] sm:$0xff] }
 0x1d3   : > { %2108 = vst.msk [vmem:[#allocation3 + $0xa8] sm:$0xff] %vm2086_vm9, %v2033_v49  ;;  %v1940_v49 = vld [vmem:[#allocation2 + $0xda] sm:$0xff] }
 0x1d4   : > { %v2001_v38 = vpop.permute.xlu0 %2000  ;;  %1466 = vrot.lane.b32.xlu1 %v1952_v24, %s3130_s9  ;;  %v1747_v24 = vld [vmem:[#allocation2 + $0xd9] sm:$0xff] }
 0x1d5   : > { %2092 = vst.msk [vmem:[#allocation3 + $0x28] sm:$0xff] %vm2086_vm9, %v2001_v38 }
 0x1d6   : > { %1434 = vrot.lane.b32.xlu0 %v1936_v28, %s3130_s9  ;;  %v1457_v61 = vpop.permute.xlu1 %1456  ;;  %v1764_v28 = vld [vmem:[#allocation2 + $0x1a1] sm:$0xff] }
 0x1d7   : > { %1530 = vst.msk [vmem:[#allocation3 + $0xb8] sm:$0xff] %vm1506_vm6, %v1457_v61 }
 0x1d8   : > { %v1425_v26 = vpop.permute.xlu0 %1424  ;;  %2044 = vrot.lane.b32.xlu1 %v1953_v6, %s3133_s12 }
 0x1d9   : > { %1514 = vst.msk [vmem:[#allocation3 + $0x38] sm:$0xff] %vm1506_vm6, %v1425_v26 }
 0x1da   : > { %2012 = vrot.lane.b32.xlu0 %v1937_v53, %s3133_s12  ;;  %v1649_v25 = vpop.permute.xlu1 %1648  ;;  %v2140_v60 = vld [vmem:[#allocation3 + $0xa8] sm:$0xff] }
 0x1db   : > { %1723 = vst.msk [vmem:[#allocation3 + $0xb0] sm:$0xff] %vm1700_vm7, %v1649_v25  ;;  %3024 = vmatmul.mubr.msk.f32.gmra.mrb[4].mxu1 %vm2167_vm10, %v2140_v60 }
 0x1dc   : > { %v1617_v52 = vpop.permute.xlu0 %1616  ;;  %v2124_v5 = vld [vmem:[#allocation3 + $0x28] sm:$0xff]  ;;  %1468 = vrot.lane.b32.xlu1 %v1953_v6, %s3130_s9  ;;  %v1957_v6 = vld [vmem:[#allocation2 + $0x1a2] sm:$0xff] }
 0x1dd   : > { %1707 = vst.msk [vmem:[#allocation3 + $0x30] sm:$0xff] %vm1700_vm7, %v1617_v52  ;;  %3000 = vmatmul.mubr.msk.f32.gmra.mrb[4].mxu0 %vm2167_vm10, %v2124_v5 }
 0x1de   : > { %1436 = vrot.lane.b32.xlu0 %v1937_v53, %s3130_s9  ;;  %v1651_v12 = vpop.permute.xlu1 %1650  ;;  %v1941_v53 = vld [vmem:[#allocation2 + $0xe2] sm:$0xff] }
 0x1df   : > { %1724 = vst.msk [vmem:[#allocation3 + $0xb8] sm:$0xff] %vm1700_vm7, %v1651_v12 }
 0x1e0   : > { %v1619_v41 = vpop.permute.xlu0 %1618  ;;  %1660 = vrot.lane.b32.xlu1 %v1568_v31, %s3131_s10 }
 0x1e1   : > { %1708 = vst.msk [vmem:[#allocation3 + $0x38] sm:$0xff] %vm1700_vm7, %v1619_v41 }
 0x1e2   : > { %1628 = vrot.lane.b32.xlu0 %v1552_v18, %s3131_s10  ;;  %v1842_v30 = vpop.permute.xlu1 %1841 }
 0x1e3   : > { %1916 = vst.msk [vmem:[#allocation3 + $0xb0] sm:$0xff] %vm1893_vm8, %v1842_v30 }
 0x1e4   : > { %v1810_v19 = vpop.permute.xlu0 %1809  ;;  %1662 = vrot.lane.b32.xlu1 %v1569_v11, %s3131_s10 }
 0x1e5   : > { %1900 = vst.msk [vmem:[#allocation3 + $0x30] sm:$0xff] %vm1893_vm8, %v1810_v19 }
 0x1e6   : > { %1630 = vrot.lane.b32.xlu0 %v1553_v39, %s3131_s10  ;;  %v1266_v21 = vpop.permute.xlu1 %1265 }
 0x1e7   : > { %1338 = vst.msk [vmem:[#allocation3 + $0xc0] sm:$0xff] %vm1313_vm5, %v1266_v21 }
 0x1e8   : > { %v1234_v23 = vpop.permute.xlu0 %1233  ;;  %1853 = vrot.lane.b32.xlu1 %v1761_v20, %s3132_s15 }
 0x1e9   : > { %1322 = vst.msk [vmem:[#allocation3 + $0x40] sm:$0xff] %vm1313_vm5, %v1234_v23 }
 0x1ea   : > { %1821 = vrot.lane.b32.xlu0 %v1745_v22, %s3132_s15  ;;  %v1844_v54 = vpop.permute.xlu1 %1843 }
 0x1eb   : > { %1917 = vst.msk [vmem:[#allocation3 + $0xb8] sm:$0xff] %vm1893_vm8, %v1844_v54 }
 0x1ec   : > { %v1812_v35 = vpop.permute.xlu0 %1811  ;;  %1277 = vrot.lane.b32.xlu1 %v1761_v20, %s3129_s8 }
 0x1ed   : > { %1901 = vst.msk [vmem:[#allocation3 + $0x38] sm:$0xff] %vm1893_vm8, %v1812_v35 }
 0x1ee   : > { %1245 = vrot.lane.b32.xlu0 %v1745_v22, %s3129_s8  ;;  %v2035_v44 = vpop.permute.xlu1 %2034 }
 0x1ef   : > { %2109 = vst.msk [vmem:[#allocation3 + $0xb0] sm:$0xff] %vm2086_vm9, %v2035_v44 }
 0x1f0   : > { %v2003_v0 = vpop.permute.xlu0 %2002  ;;  %1855 = vrot.lane.b32.xlu1 %v1762_v36, %s3132_s15 }
 0x1f1   : > { %2093 = vst.msk [vmem:[#allocation3 + $0x30] sm:$0xff] %vm2086_vm9, %v2003_v0 }
 0x1f2   : > { %1823 = vrot.lane.b32.xlu0 %v1746_v63, %s3132_s15  ;;  %v1268_v46 = vpop.permute.xlu1 %1267 }
 0x1f3   : > { %1339 = vst.msk [vmem:[#allocation3 + $0xc8] sm:$0xff] %vm1313_vm5, %v1268_v46 }
 0x1f4   : > { %v1236_v55 = vpop.permute.xlu0 %1235  ;;  %2046 = vrot.lane.b32.xlu1 %v1954_v2, %s3133_s12 }
 0x1f5   : > { %1323 = vst.msk [vmem:[#allocation3 + $0x48] sm:$0xff] %vm1313_vm5, %v1236_v55 }
 0x1f6   : > { %2014 = vrot.lane.b32.xlu0 %v1938_v47, %s3133_s12  ;;  %v1459_v1 = vpop.permute.xlu1 %1458  ;;  %v2141_v62 = vld [vmem:[#allocation3 + $0xb0] sm:$0xff] }
 0x1f7   : > { %1531 = vst.msk [vmem:[#allocation3 + $0xc0] sm:$0xff] %vm1506_vm6, %v1459_v1  ;;  %3026 = vmatprep.mubr.msk.f32.mxu1 %vm2167_vm10, %v2141_v62 }
 0x1f8   : > { %v1427_v3 = vpop.permute.xlu0 %1426  ;;  %v2125_v4 = vld [vmem:[#allocation3 + $0x30] sm:$0xff]  ;;  %1279 = vrot.lane.b32.xlu1 %v1762_v36, %s3129_s8 }
 0x1f9   : > { %1515 = vst.msk [vmem:[#allocation3 + $0x40] sm:$0xff] %vm1506_vm6, %v1427_v3  ;;  %3002 = vmatprep.mubr.msk.f32.mxu0 %vm2167_vm10, %v2125_v4 }
 0x1fa   : > { %1247 = vrot.lane.b32.xlu0 %v1746_v63, %s3129_s8  ;;  %v2037_v7 = vpop.permute.xlu1 %2036 }
 0x1fb   : > { %2110 = vst.msk [vmem:[#allocation3 + $0xb8] sm:$0xff] %vm2086_vm9, %v2037_v7 }
 0x1fc   : > { %v2005_v37 = vpop.permute.xlu0 %2004  ;;  %1470 = vrot.lane.b32.xlu1 %v1954_v2, %s3130_s9 }
 0x1fd   : > { %2094 = vst.msk [vmem:[#allocation3 + $0x38] sm:$0xff] %vm2086_vm9, %v2005_v37 }
 0x1fe   : > { %1438 = vrot.lane.b32.xlu0 %v1938_v47, %s3130_s9  ;;  %v1461_v32 = vpop.permute.xlu1 %1460 }
 0x1ff   : > { %1532 = vst.msk [vmem:[#allocation3 + $0xc8] sm:$0xff] %vm1506_vm6, %v1461_v32 }
 0x200   : > { %v1429_v42 = vpop.permute.xlu0 %1428  ;;  %2048 = vrot.lane.b32.xlu1 %v1955_v34, %s3133_s12 }
 0x201   : > { %1516 = vst.msk [vmem:[#allocation3 + $0x48] sm:$0xff] %vm1506_vm6, %v1429_v42 }
 0x202   : > { %2016 = vrot.lane.b32.xlu0 %v1939_v15, %s3133_s12  ;;  %v1653_v51 = vpop.permute.xlu1 %1652  ;;  %v2142_v13 = vld [vmem:[#allocation3 + $0xb8] sm:$0xff] }
 0x203   : > { %1725 = vst.msk [vmem:[#allocation3 + $0xc0] sm:$0xff] %vm1700_vm7, %v1653_v51  ;;  %3027 = vmatmul.mubr.msk.f32.gmra.mrb[6].mxu1 %vm2167_vm10, %v2142_v13 }
 0x204   : > { %v1621_v33 = vpop.permute.xlu0 %1620  ;;  %v2126_v59 = vld [vmem:[#allocation3 + $0x38] sm:$0xff]  ;;  %1472 = vrot.lane.b32.xlu1 %v1955_v34, %s3130_s9 }
 0x205   : > { %1709 = vst.msk [vmem:[#allocation3 + $0x40] sm:$0xff] %vm1700_vm7, %v1621_v33  ;;  %3003 = vmatmul.mubr.msk.f32.gmra.mrb[6].mxu0 %vm2167_vm10, %v2126_v59 }
 0x206   : > { %1440 = vrot.lane.b32.xlu0 %v1939_v15, %s3130_s9  ;;  %v1655_v45 = vpop.permute.xlu1 %1654  ;;  %s2901_s9 = sshll.u32 %s4301_s18, 7 }
 0x207   : > { %1726 = vst.msk [vmem:[#allocation3 + $0xc8] sm:$0xff] %vm1700_vm7, %v1655_v45  ;;  %s4151_s24 = scalar_lea.vmem %s4291_s5, %s2901_s9 }
 0x208   : > { %v1623_v58 = vpop.permute.xlu0 %1622  ;;  %1664 = vrot.lane.b32.xlu1 %v1570_v43, %s3131_s10  ;;  %v4139_v43 = vld [vmem:[%s4290_s4] ss:$0 sm:$0xff] }
 0x209   : > { %1710 = vst.msk [vmem:[#allocation3 + $0x48] sm:$0xff] %vm1700_vm7, %v1623_v58 }
 0x20a   : > { %1632 = vrot.lane.b32.xlu0 %v1554_v16, %s3131_s10  ;;  %v1846_v29 = vpop.permute.xlu1 %1845 }
 0x20b   : > { %1918 = vst.msk [vmem:[#allocation3 + $0xc0] sm:$0xff] %vm1893_vm8, %v1846_v29 }
 0x20c   : > { %v1814_v17 = vpop.permute.xlu0 %1813  ;;  %1666 = vrot.lane.b32.xlu1 %v1571_v50, %s3131_s10 }
 0x20d   : > { %1902 = vst.msk [vmem:[#allocation3 + $0x40] sm:$0xff] %vm1893_vm8, %v1814_v17 }
 0x20e   : > { %1634 = vrot.lane.b32.xlu0 %v1555_v9, %s3131_s10  ;;  %v1270_v27 = vpop.permute.xlu1 %1269 }
 0x20f   : > { %1340 = vst.msk [vmem:[#allocation3 + $0xd0] sm:$0xff] %vm1313_vm5, %v1270_v27 }
 0x210   : > { %v1238_v10 = vpop.permute.xlu0 %1237  ;;  %1857 = vrot.lane.b32.xlu1 %v1763_v8, %s3132_s15 }
 0x211   : > { %1324 = vst.msk [vmem:[#allocation3 + $0x50] sm:$0xff] %vm1313_vm5, %v1238_v10 }
 0x212   : > { %1825 = vrot.lane.b32.xlu0 %v1747_v24, %s3132_s15  ;;  %v1848_v40 = vpop.permute.xlu1 %1847 }
 0x213   : > { %1919 = vst.msk [vmem:[#allocation3 + $0xc8] sm:$0xff] %vm1893_vm8, %v1848_v40 }
 0x214   : > { %v1816_v57 = vpop.permute.xlu0 %1815  ;;  %1859 = vrot.lane.b32.xlu1 %v1764_v28, %s3132_s15 }
 0x215   : > { %1903 = vst.msk [vmem:[#allocation3 + $0x48] sm:$0xff] %vm1893_vm8, %v1816_v57 }
 0x216   : > { %1827 = vrot.lane.b32.xlu0 %v1748_v14, %s3132_s15  ;;  %v2039_v56 = vpop.permute.xlu1 %2038 }
 0x217   : > { %2111 = vst.msk [vmem:[#allocation3 + $0xc0] sm:$0xff] %vm2086_vm9, %v2039_v56 }
 0x218   : > { %v2007_v38 = vpop.permute.xlu0 %2006  ;;  %2050 = vrot.lane.b32.xlu1 %v1956_v48, %s3133_s12 }
 0x219   : > { %2095 = vst.msk [vmem:[#allocation3 + $0x40] sm:$0xff] %vm2086_vm9, %v2007_v38 }
 0x21a   : > { %2018 = vrot.lane.b32.xlu0 %v1940_v49, %s3133_s12  ;;  %v1272_v61 = vpop.permute.xlu1 %1271 }
 0x21b   : > { %1341 = vst.msk [vmem:[#allocation3 + $0xd8] sm:$0xff] %vm1313_vm5, %v1272_v61 }
 0x21c   : > { %v1240_v26 = vpop.permute.xlu0 %1239  ;;  %2052 = vrot.lane.b32.xlu1 %v1957_v6, %s3133_s12 }
 0x21d   : > { %1325 = vst.msk [vmem:[#allocation3 + $0x58] sm:$0xff] %vm1313_vm5, %v1240_v26 }
 0x21e   : > { %2020 = vrot.lane.b32.xlu0 %v1941_v53, %s3133_s12  ;;  %v1463_v25 = vpop.permute.xlu1 %1462  ;;  %v2143_v60 = vld [vmem:[#allocation3 + $0xc0] sm:$0xff] }
 0x21f   : > { %1533 = vst.msk [vmem:[#allocation3 + $0xd0] sm:$0xff] %vm1506_vm6, %v1463_v25  ;;  %3029 = vmatprep.mubr.msk.f32.mxu1 %vm2167_vm10, %v2143_v60 }
 0x220   : > { %v1431_v52 = vpop.permute.xlu0 %1430  ;;  %v2127_v5 = vld [vmem:[#allocation3 + $0x40] sm:$0xff] }
 0x221   : > { %1517 = vst.msk [vmem:[#allocation3 + $0x50] sm:$0xff] %vm1506_vm6, %v1431_v52  ;;  %3005 = vmatprep.mubr.msk.f32.mxu0 %vm2167_vm10, %v2127_v5 }
 0x222   : > { %v2041_v31 = vpop.permute.xlu1 %2040 }
 0x223   : > { %2112 = vst.msk [vmem:[#allocation3 + $0xc8] sm:$0xff] %vm2086_vm9, %v2041_v31 }
 0x224   : > { %v2009_v12 = vpop.permute.xlu0 %2008 }
 0x225   : > { %2096 = vst.msk [vmem:[#allocation3 + $0x48] sm:$0xff] %vm2086_vm9, %v2009_v12 }
 0x226   : > { %v1465_v18 = vpop.permute.xlu1 %1464 }
 0x227   : > { %1534 = vst.msk [vmem:[#allocation3 + $0xd8] sm:$0xff] %vm1506_vm6, %v1465_v18 }
 0x228   : > { %v1433_v41 = vpop.permute.xlu0 %1432 }
 0x229   : > { %1518 = vst.msk [vmem:[#allocation3 + $0x58] sm:$0xff] %vm1506_vm6, %v1433_v41 }
 0x22a   : > { %v1657_v11 = vpop.permute.xlu1 %1656  ;;  %v2144_v30 = vld [vmem:[#allocation3 + $0xc8] sm:$0xff] }
 0x22b   : > { %1727 = vst.msk [vmem:[#allocation3 + $0xd0] sm:$0xff] %vm1700_vm7, %v1657_v11  ;;  %3030 = vmatmul.mubr.msk.f32.gmra.mrb[8].mxu1 %vm2167_vm10, %v2144_v30 }
 0x22c   : > { %v1625_v39 = vpop.permute.xlu0 %1624  ;;  %v2128_v19 = vld [vmem:[#allocation3 + $0x48] sm:$0xff] }
 0x22d   : > { %1711 = vst.msk [vmem:[#allocation3 + $0x50] sm:$0xff] %vm1700_vm7, %v1625_v39  ;;  %3006 = vmatmul.mubr.msk.f32.gmra.mrb[8].mxu0 %vm2167_vm10, %v2128_v19 }
 0x22e   : > { %v1659_v20 = vpop.permute.xlu1 %1658 }
 0x22f   : > { %1728 = vst.msk [vmem:[#allocation3 + $0xd8] sm:$0xff] %vm1700_vm7, %v1659_v20 }
 0x230   : > { %v1627_v21 = vpop.permute.xlu0 %1626 }
 0x231   : > { %1712 = vst.msk [vmem:[#allocation3 + $0x58] sm:$0xff] %vm1700_vm7, %v1627_v21 }
 0x232   : > { %v1850_v22 = vpop.permute.xlu1 %1849 }
 0x233   : > { %1920 = vst.msk [vmem:[#allocation3 + $0xd0] sm:$0xff] %vm1893_vm8, %v1850_v22 }
 0x234   : > { %v1818_v23 = vpop.permute.xlu0 %1817 }
 0x235   : > { %1904 = vst.msk [vmem:[#allocation3 + $0x50] sm:$0xff] %vm1893_vm8, %v1818_v23 }
 0x236   : > { %v1274_v54 = vpop.permute.xlu1 %1273 }
 0x237   : > { %1342 = vst.msk [vmem:[#allocation3 + $0xe0] sm:$0xff] %vm1313_vm5, %v1274_v54 }
 0x238   : > { %v1242_v35 = vpop.permute.xlu0 %1241 }
 0x239   : > { %1326 = vst.msk [vmem:[#allocation3 + $0x60] sm:$0xff] %vm1313_vm5, %v1242_v35 }
 0x23a   : > { %v1852_v36 = vpop.permute.xlu1 %1851 }
 0x23b   : > { %1921 = vst.msk [vmem:[#allocation3 + $0xd8] sm:$0xff] %vm1893_vm8, %v1852_v36 }
 0x23c   : > { %v1820_v44 = vpop.permute.xlu0 %1819 }
 0x23d   : > { %1905 = vst.msk [vmem:[#allocation3 + $0x58] sm:$0xff] %vm1893_vm8, %v1820_v44 }
 0x23e   : > { %v2043_v63 = vpop.permute.xlu1 %2042 }
 0x23f   : > { %2113 = vst.msk [vmem:[#allocation3 + $0xd0] sm:$0xff] %vm2086_vm9, %v2043_v63 }
 0x240   : > { %v2011_v0 = vpop.permute.xlu0 %2010 }
 0x241   : > { %2097 = vst.msk [vmem:[#allocation3 + $0x50] sm:$0xff] %vm2086_vm9, %v2011_v0 }
 0x242   : > { %v1276_v2 = vpop.permute.xlu1 %1275 }
 0x243   : > { %1343 = vst.msk [vmem:[#allocation3 + $0xe8] sm:$0xff] %vm1313_vm5, %v1276_v2 }
 0x244   : > { %v1244_v46 = vpop.permute.xlu0 %1243 }
 0x245   : > { %1327 = vst.msk [vmem:[#allocation3 + $0x68] sm:$0xff] %vm1313_vm5, %v1244_v46 }
 0x246   : > { %v1467_v47 = vpop.permute.xlu1 %1466  ;;  %v2145_v55 = vld [vmem:[#allocation3 + $0xd0] sm:$0xff] }
 0x247   : > { %1535 = vst.msk [vmem:[#allocation3 + $0xe0] sm:$0xff] %vm1506_vm6, %v1467_v47  ;;  %3032 = vmatprep.mubr.msk.f32.mxu1 %vm2167_vm10, %v2145_v55 }
 0x248   : > { %v1435_v1 = vpop.permute.xlu0 %1434  ;;  %v2129_v62 = vld [vmem:[#allocation3 + $0x50] sm:$0xff] }
 0x249   : > { %1519 = vst.msk [vmem:[#allocation3 + $0x60] sm:$0xff] %vm1506_vm6, %v1435_v1  ;;  %3008 = vmatprep.mubr.msk.f32.mxu0 %vm2167_vm10, %v2129_v62 }
 0x24a   : > { %v2045_v3 = vpop.permute.xlu1 %2044 }
 0x24b   : > { %2114 = vst.msk [vmem:[#allocation3 + $0xd8] sm:$0xff] %vm2086_vm9, %v2045_v3 }
 0x24c   : > { %v2013_v4 = vpop.permute.xlu0 %2012 }
 0x24d   : > { %2098 = vst.msk [vmem:[#allocation3 + $0x58] sm:$0xff] %vm2086_vm9, %v2013_v4 }
 0x24e   : > { %v1469_v7 = vpop.permute.xlu1 %1468 }
 0x24f   : > { %1536 = vst.msk [vmem:[#allocation3 + $0xe8] sm:$0xff] %vm1506_vm6, %v1469_v7 }
 0x250   : > { %v1437_v37 = vpop.permute.xlu0 %1436 }
 0x251   : > { %1520 = vst.msk [vmem:[#allocation3 + $0x68] sm:$0xff] %vm1506_vm6, %v1437_v37 }
 0x252   : > { %v1661_v34 = vpop.permute.xlu1 %1660  ;;  %v2146_v32 = vld [vmem:[#allocation3 + $0xd8] sm:$0xff] }
 0x253   : > { %1729 = vst.msk [vmem:[#allocation3 + $0xe0] sm:$0xff] %vm1700_vm7, %v1661_v34  ;;  %3033 = vmatmul.mubr.msk.f32.gmra.mrb[10].mxu1 %vm2167_vm10, %v2146_v32 }
 0x254   : > { %v1629_v15 = vpop.permute.xlu0 %1628  ;;  %v2130_v42 = vld [vmem:[#allocation3 + $0x58] sm:$0xff] }
 0x255   : > { %1713 = vst.msk [vmem:[#allocation3 + $0x60] sm:$0xff] %vm1700_vm7, %v1629_v15  ;;  %3009 = vmatmul.mubr.msk.f32.gmra.mrb[10].mxu0 %vm2167_vm10, %v2130_v42 }
 0x256   : > { %v1663_v51 = vpop.permute.xlu1 %1662 }
 0x257   : > { %1730 = vst.msk [vmem:[#allocation3 + $0xe8] sm:$0xff] %vm1700_vm7, %v1663_v51 }
 0x258   : > { %v1631_v13 = vpop.permute.xlu0 %1630 }
 0x259   : > { %1714 = vst.msk [vmem:[#allocation3 + $0x68] sm:$0xff] %vm1700_vm7, %v1631_v13 }
 0x25a   : > { %v1854_v33 = vpop.permute.xlu1 %1853 }
 0x25b   : > { %1922 = vst.msk [vmem:[#allocation3 + $0xe0] sm:$0xff] %vm1893_vm8, %v1854_v33 }
 0x25c   : > { %v1822_v59 = vpop.permute.xlu0 %1821 }
 0x25d   : > { %1906 = vst.msk [vmem:[#allocation3 + $0x60] sm:$0xff] %vm1893_vm8, %v1822_v59 }
 0x25e   : > { %v1278_v45 = vpop.permute.xlu1 %1277  ;;  %v3019_v16 = vpop.f32.mrb[0].mxu1 }
 0x25f   : > { %1344 = vst.msk [vmem:[#allocation3 + $0xf0] sm:$0xff] %vm1313_vm5, %v1278_v45  ;;  %v2416_v58 = vadd.f32 %v3019_v16, %v4139_v43  ;;  %v2410_v8 = vpop.f32.mrb[1].mxu1 }
 0x260   : > { %v1246_v50 = vpop.permute.xlu0 %1245  ;;  %v2995_v29 = vpop.f32.mrb[0].mxu0  ;;  %v2411_v10 = vadd.f32 %v4139_v43, %v2410_v8 }
 0x261   : > { %1328 = vst.msk [vmem:[#allocation3 + $0x70] sm:$0xff] %vm1313_vm5, %v1246_v50  ;;  %v2336_v9 = vadd.f32 %v2995_v29, %v4139_v43  ;;  %v2330_v17 = vpop.f32.mrb[1].mxu0  ;;  %v2506_v27 = vmax.f32 %v2416_v58, 0.0 }
 0x262   : > { %v2331_v24 = vadd.f32 %v4139_v43, %v2330_v17  ;;  %v1856_v40 = vpop.permute.xlu1 %1855  ;;  %v2505_v48 = vmax.f32 %v2411_v10, 0.0 }
 0x263   : > { %v2490_v28 = vmax.f32 %v2336_v9, 0.0  ;;  %v2919_v14 = vpack.c.bf16 %v2506_v27, %v2506_v27  ;;  %1923 = vst.msk [vmem:[#allocation3 + $0xe8] sm:$0xff] %vm1893_vm8, %v1856_v40 }
 0x264   : > { %v2489_v57 = vmax.f32 %v2331_v24, 0.0  ;;  %v1824_v56 = vpop.permute.xlu0 %1823  ;;  %v2918_v6 = vpack.c.bf16 %v2505_v48, %v2505_v48 }
 0x265   : > { %v2903_v49 = vpack.c.bf16 %v2490_v28, %v2490_v28  ;;  %1907 = vst.msk [vmem:[#allocation3 + $0x68] sm:$0xff] %vm1893_vm8, %v1824_v56 }
 0x266   : > { %2667 = vst.msk [vmem:[%s4151_s24 + $0x44] sm:$0xf] %vm2649_vm11, %v2919_v14  ;;  %v2902_v38 = vpack.c.bf16 %v2489_v57, %v2489_v57  ;;  %v2047_v61 = vpop.permute.xlu1 %2046  ;;  %2666 = vst.msk [vmem:[%s4151_s24 + $0x40] sm:$0xf] %vm2649_vm11, %v2918_v6 }
 0x267   : > { %2651 = vst.msk [vmem:[%s4151_s24 + $0x4] sm:$0xf] %vm2649_vm11, %v2903_v49 }
 0x268   : > { %2650 = vst.msk [vmem:[%s4151_s24] sm:$0xf] %vm2649_vm11, %v2902_v38  ;;  %v2015_v53 = vpop.permute.xlu0 %2014 }
 0x269   : > { %2115 = vst.msk [vmem:[#allocation3 + $0xe0] sm:$0xff] %vm2086_vm9, %v2047_v61  ;;  %2099 = vst.msk [vmem:[#allocation3 + $0x60] sm:$0xff] %vm2086_vm9, %v2015_v53 }
 0x26a   : > { %v1280_v26 = vpop.permute.xlu1 %1279 }
 0x26b   : > { %1345 = vst.msk [vmem:[#allocation3 + $0xf8] sm:$0xff] %vm1313_vm5, %v1280_v26 }
 0x26c   : > { %v1248_v25 = vpop.permute.xlu0 %1247 }
 0x26d   : > { %1329 = vst.msk [vmem:[#allocation3 + $0x78] sm:$0xff] %vm1313_vm5, %v1248_v25 }
 0x26e   : > { %v1471_v60 = vpop.permute.xlu1 %1470 }
 0x26f   : > { %1537 = vst.msk [vmem:[#allocation3 + $0xf0] sm:$0xff] %vm1506_vm6, %v1471_v60 }
 0x270   : > { %v2147_v52 = vld [vmem:[#allocation3 + $0xe0] sm:$0xff]  ;;  %v1439_v5 = vpop.permute.xlu0 %1438 }
 0x271   : > { %v2131_v31 = vld [vmem:[#allocation3 + $0x60] sm:$0xff]  ;;  %3035 = vmatprep.mubr.msk.f32.mxu1 %vm2167_vm10, %v2147_v52  ;;  %1521 = vst.msk [vmem:[#allocation3 + $0x70] sm:$0xff] %vm1506_vm6, %v1439_v5 }
 0x272   : > { %3011 = vmatprep.mubr.msk.f32.mxu0 %vm2167_vm10, %v2131_v31  ;;  %v2049_v12 = vpop.permute.xlu1 %2048 }
 0x273   : > { %2116 = vst.msk [vmem:[#allocation3 + $0xe8] sm:$0xff] %vm2086_vm9, %v2049_v12 }
 0x274   : > { %v2017_v18 = vpop.permute.xlu0 %2016 }
 0x275   : > { %2100 = vst.msk [vmem:[#allocation3 + $0x68] sm:$0xff] %vm2086_vm9, %v2017_v18 }
 0x276   : > { %v1473_v41 = vpop.permute.xlu1 %1472 }
 0x277   : > { %1538 = vst.msk [vmem:[#allocation3 + $0xf8] sm:$0xff] %vm1506_vm6, %v1473_v41 }
 0x278   : > { %v1441_v11 = vpop.permute.xlu0 %1440 }
 0x279   : > { %1522 = vst.msk [vmem:[#allocation3 + $0x78] sm:$0xff] %vm1506_vm6, %v1441_v11 }
 0x27a   : > { %v1665_v30 = vpop.permute.xlu1 %1664  ;;  %v2148_v39 = vld [vmem:[#allocation3 + $0xe8] sm:$0xff] }
 0x27b   : > { %1731 = vst.msk [vmem:[#allocation3 + $0xf0] sm:$0xff] %vm1700_vm7, %v1665_v30  ;;  %3036 = vmatmul.mubr.msk.f32.gmra.mrb[12].mxu1 %vm2167_vm10, %v2148_v39 }
 0x27c   : > { %v1633_v19 = vpop.permute.xlu0 %1632  ;;  %v2132_v20 = vld [vmem:[#allocation3 + $0x68] sm:$0xff] }
 0x27d   : > { %1715 = vst.msk [vmem:[#allocation3 + $0x70] sm:$0xff] %vm1700_vm7, %v1633_v19  ;;  %3012 = vmatmul.mubr.msk.f32.gmra.mrb[12].mxu0 %vm2167_vm10, %v2132_v20 }
 0x27e   : > { %v1667_v21 = vpop.permute.xlu1 %1666 }
 0x27f   : > { %1732 = vst.msk [vmem:[#allocation3 + $0xf8] sm:$0xff] %vm1700_vm7, %v1667_v21 }
 0x280   : > { %v1635_v22 = vpop.permute.xlu0 %1634 }
 0x281   : > { %1716 = vst.msk [vmem:[#allocation3 + $0x78] sm:$0xff] %vm1700_vm7, %v1635_v22 }
 0x282   : > { %v1858_v23 = vpop.permute.xlu1 %1857 }
 0x283   : > { %1924 = vst.msk [vmem:[#allocation3 + $0xf0] sm:$0xff] %vm1893_vm8, %v1858_v23 }
 0x284   : > { %v1826_v54 = vpop.permute.xlu0 %1825 }
 0x285   : > { %1908 = vst.msk [vmem:[#allocation3 + $0x70] sm:$0xff] %vm1893_vm8, %v1826_v54 }
 0x286   : > { %v1860_v35 = vpop.permute.xlu1 %1859  ;;  %v3022_v36 = vpop.f32.mrb[2].mxu1 }
 0x287   : > { %1925 = vst.msk [vmem:[#allocation3 + $0xf8] sm:$0xff] %vm1893_vm8, %v1860_v35  ;;  %v2426_v44 = vadd.f32 %v3022_v36, %v4139_v43  ;;  %v2420_v47 = vpop.f32.mrb[3].mxu1 }
 0x288   : > { %v1828_v63 = vpop.permute.xlu0 %1827  ;;  %v2998_v0 = vpop.f32.mrb[2].mxu0  ;;  %v2421_v62 = vadd.f32 %v4139_v43, %v2420_v47 }
 0x289   : > { %1909 = vst.msk [vmem:[#allocation3 + $0x78] sm:$0xff] %vm1893_vm8, %v1828_v63  ;;  %v2346_v2 = vadd.f32 %v2998_v0, %v4139_v43  ;;  %v2340_v46 = vpop.f32.mrb[3].mxu0  ;;  %v2508_v55 = vmax.f32 %v2426_v44, 0.0 }
 0x28a   : > { %v2341_v1 = vadd.f32 %v4139_v43, %v2340_v46  ;;  %v2051_v4 = vpop.permute.xlu1 %2050  ;;  %v2507_v34 = vmax.f32 %v2421_v62, 0.0 }
 0x28b   : > { %v2492_v3 = vmax.f32 %v2346_v2, 0.0  ;;  %v2921_v7 = vpack.c.bf16 %v2508_v55, %v2508_v55  ;;  %2117 = vst.msk [vmem:[#allocation3 + $0xf0] sm:$0xff] %vm2086_vm9, %v2051_v4 }
 0x28c   : > { %v2491_v37 = vmax.f32 %v2341_v1, 0.0  ;;  %v2019_v32 = vpop.permute.xlu0 %2018  ;;  %v2920_v51 = vpack.c.bf16 %v2507_v34, %v2507_v34 }
 0x28d   : > { %v2905_v15 = vpack.c.bf16 %v2492_v3, %v2492_v3  ;;  %2101 = vst.msk [vmem:[#allocation3 + $0x70] sm:$0xff] %vm2086_vm9, %v2019_v32 }
 0x28e   : > { %2669 = vst.msk [vmem:[%s4151_s24 + $0x4c] sm:$0xf] %vm2649_vm11, %v2921_v7  ;;  %v2904_v42 = vpack.c.bf16 %v2491_v37, %v2491_v37  ;;  %v2053_v13 = vpop.permute.xlu1 %2052  ;;  %2668 = vst.msk [vmem:[%s4151_s24 + $0x48] sm:$0xf] %vm2649_vm11, %v2920_v51 }
 0x28f   : > { %2653 = vst.msk [vmem:[%s4151_s24 + $0xc] sm:$0xf] %vm2649_vm11, %v2905_v15 }
 0x290   : > { %2652 = vst.msk [vmem:[%s4151_s24 + $0x8] sm:$0xf] %vm2649_vm11, %v2904_v42  ;;  %v2021_v33 = vpop.permute.xlu0 %2020 }
 0x291   : > { %2118 = vst.msk [vmem:[#allocation3 + $0xf8] sm:$0xff] %vm2086_vm9, %v2053_v13  ;;  %2102 = vst.msk [vmem:[#allocation3 + $0x78] sm:$0xff] %vm2086_vm9, %v2021_v33 }
 0x292   : > { %v2149_v59 = vld [vmem:[#allocation3 + $0xf0] sm:$0xff] }
 0x293   : > { %3038 = vmatprep.mubr.msk.f32.mxu1 %vm2167_vm10, %v2149_v59 }
 0x294   : > { %v2133_v45 = vld [vmem:[#allocation3 + $0x70] sm:$0xff] }
 0x295   : > { %3014 = vmatprep.mubr.msk.f32.mxu0 %vm2167_vm10, %v2133_v45 }
 0x298   : > { %v2150_v16 = vld [vmem:[#allocation3 + $0xf8] sm:$0xff] }
 0x299   : > { %v2134_v58 = vld [vmem:[#allocation3 + $0x78] sm:$0xff]  ;;  %3039 = vmatmul.mubr.msk.f32.gmra.mrb[14].mxu1 %vm2167_vm10, %v2150_v16 }
 0x29a   : > { %3015 = vmatmul.mubr.msk.f32.gmra.mrb[14].mxu0 %vm2167_vm10, %v2134_v58 }
 0x2ae   : > { %v3025_v50 = vpop.f32.mrb[4].mxu1 }
 0x2af   : > { %v2436_v9 = vadd.f32 %v3025_v50, %v4139_v43  ;;  %v2430_v17 = vpop.f32.mrb[5].mxu1 }
 0x2b0   : > { %v3001_v29 = vpop.f32.mrb[4].mxu0  ;;  %v2431_v24 = vadd.f32 %v4139_v43, %v2430_v17 }
 0x2b1   : > { %v2356_v8 = vadd.f32 %v3001_v29, %v4139_v43  ;;  %v2350_v27 = vpop.f32.mrb[5].mxu0  ;;  %v2510_v10 = vmax.f32 %v2436_v9, 0.0 }
 0x2b2   : > { %v2351_v28 = vadd.f32 %v4139_v43, %v2350_v27  ;;  %v2509_v14 = vmax.f32 %v2431_v24, 0.0 }
 0x2b3   : > { %v2494_v40 = vmax.f32 %v2356_v8, 0.0  ;;  %v2923_v57 = vpack.c.bf16 %v2510_v10, %v2510_v10 }
 0x2b4   : > { %v2493_v48 = vmax.f32 %v2351_v28, 0.0  ;;  %v2922_v49 = vpack.c.bf16 %v2509_v14, %v2509_v14 }
 0x2b5   : > { %v2907_v56 = vpack.c.bf16 %v2494_v40, %v2494_v40  ;;  %2671 = vst.msk [vmem:[%s4151_s24 + $0x54] sm:$0xf] %vm2649_vm11, %v2923_v57 }
 0x2b6   : > { %v2906_v38 = vpack.c.bf16 %v2493_v48, %v2493_v48  ;;  %2670 = vst.msk [vmem:[%s4151_s24 + $0x50] sm:$0xf] %vm2649_vm11, %v2922_v49 }
 0x2b7   : > { %2655 = vst.msk [vmem:[%s4151_s24 + $0x14] sm:$0xf] %vm2649_vm11, %v2907_v56 }
 0x2b8   : > { %2654 = vst.msk [vmem:[%s4151_s24 + $0x10] sm:$0xf] %vm2649_vm11, %v2906_v38 }
 0x2d6   : > { %v3028_v6 = vpop.f32.mrb[6].mxu1 }
 0x2d7   : > { %v2446_v53 = vadd.f32 %v3028_v6, %v4139_v43  ;;  %v2440_v26 = vpop.f32.mrb[7].mxu1 }
 0x2d8   : > { %v3004_v61 = vpop.f32.mrb[6].mxu0  ;;  %v2441_v52 = vadd.f32 %v4139_v43, %v2440_v26 }
 0x2d9   : > { %v2366_v25 = vadd.f32 %v3004_v61, %v4139_v43  ;;  %v2360_v60 = vpop.f32.mrb[7].mxu0  ;;  %v2512_v5 = vmax.f32 %v2446_v53, 0.0 }
 0x2da   : > { %v2361_v31 = vadd.f32 %v4139_v43, %v2360_v60  ;;  %v2511_v18 = vmax.f32 %v2441_v52, 0.0 }
 0x2db   : > { %v2496_v12 = vmax.f32 %v2366_v25, 0.0  ;;  %v2925_v41 = vpack.c.bf16 %v2512_v5, %v2512_v5 }
 0x2dc   : > { %v2495_v11 = vmax.f32 %v2361_v31, 0.0  ;;  %v2924_v39 = vpack.c.bf16 %v2511_v18, %v2511_v18 }
 0x2dd   : > { %v2909_v30 = vpack.c.bf16 %v2496_v12, %v2496_v12  ;;  %2673 = vst.msk [vmem:[%s4151_s24 + $0x5c] sm:$0xf] %vm2649_vm11, %v2925_v41 }
 0x2de   : > { %v2908_v19 = vpack.c.bf16 %v2495_v11, %v2495_v11  ;;  %2672 = vst.msk [vmem:[%s4151_s24 + $0x58] sm:$0xf] %vm2649_vm11, %v2924_v39 }
 0x2df   : > { %2657 = vst.msk [vmem:[%s4151_s24 + $0x1c] sm:$0xf] %vm2649_vm11, %v2909_v30 }
 0x2e0   : > { %2656 = vst.msk [vmem:[%s4151_s24 + $0x18] sm:$0xf] %vm2649_vm11, %v2908_v19 }
 0x2fe   : > { %v3031_v20 = vpop.f32.mrb[8].mxu1 }
 0x2ff   : > { %v2456_v22 = vadd.f32 %v3031_v20, %v4139_v43  ;;  %v2450_v23 = vpop.f32.mrb[9].mxu1 }
 0x300   : > { %v3007_v21 = vpop.f32.mrb[8].mxu0  ;;  %v2451_v36 = vadd.f32 %v4139_v43, %v2450_v23 }
 0x301   : > { %v2376_v54 = vadd.f32 %v3007_v21, %v4139_v43  ;;  %v2370_v35 = vpop.f32.mrb[9].mxu0  ;;  %v2514_v44 = vmax.f32 %v2456_v22, 0.0 }
 0x302   : > { %v2371_v63 = vadd.f32 %v4139_v43, %v2370_v35  ;;  %v2513_v2 = vmax.f32 %v2451_v36, 0.0 }
 0x303   : > { %v2498_v0 = vmax.f32 %v2376_v54, 0.0  ;;  %v2927_v46 = vpack.c.bf16 %v2514_v44, %v2514_v44 }
 0x304   : > { %v2497_v47 = vmax.f32 %v2371_v63, 0.0  ;;  %v2926_v1 = vpack.c.bf16 %v2513_v2, %v2513_v2 }
 0x305   : > { %v2911_v55 = vpack.c.bf16 %v2498_v0, %v2498_v0  ;;  %2675 = vst.msk [vmem:[%s4151_s24 + $0x64] sm:$0xf] %vm2649_vm11, %v2927_v46 }
 0x306   : > { %v2910_v62 = vpack.c.bf16 %v2497_v47, %v2497_v47  ;;  %2674 = vst.msk [vmem:[%s4151_s24 + $0x60] sm:$0xf] %vm2649_vm11, %v2926_v1 }
 0x307   : > { %2659 = vst.msk [vmem:[%s4151_s24 + $0x24] sm:$0xf] %vm2649_vm11, %v2911_v55 }
 0x308   : > { %2658 = vst.msk [vmem:[%s4151_s24 + $0x20] sm:$0xf] %vm2649_vm11, %v2910_v62 }
 0x326   : > { %v3034_v3 = vpop.f32.mrb[10].mxu1 }
 0x327   : > { %v2466_v7 = vadd.f32 %v3034_v3, %v4139_v43  ;;  %v2460_v37 = vpop.f32.mrb[11].mxu1 }
 0x328   : > { %v3010_v4 = vpop.f32.mrb[10].mxu0  ;;  %v2461_v15 = vadd.f32 %v4139_v43, %v2460_v37 }
 0x329   : > { %v2386_v34 = vadd.f32 %v3010_v4, %v4139_v43  ;;  %v2380_v32 = vpop.f32.mrb[11].mxu0  ;;  %v2516_v42 = vmax.f32 %v2466_v7, 0.0 }
 0x32a   : > { %v2381_v51 = vadd.f32 %v4139_v43, %v2380_v32  ;;  %v2515_v33 = vmax.f32 %v2461_v15, 0.0 }
 0x32b   : > { %v2500_v13 = vmax.f32 %v2386_v34, 0.0  ;;  %v2929_v59 = vpack.c.bf16 %v2516_v42, %v2516_v42 }
 0x32c   : > { %v2499_v45 = vmax.f32 %v2381_v51, 0.0  ;;  %v2928_v58 = vpack.c.bf16 %v2515_v33, %v2515_v33 }
 0x32d   : > { %v2913_v16 = vpack.c.bf16 %v2500_v13, %v2500_v13  ;;  %2677 = vst.msk [vmem:[%s4151_s24 + $0x6c] sm:$0xf] %vm2649_vm11, %v2929_v59 }
 0x32e   : > { %v2912_v50 = vpack.c.bf16 %v2499_v45, %v2499_v45  ;;  %2676 = vst.msk [vmem:[%s4151_s24 + $0x68] sm:$0xf] %vm2649_vm11, %v2928_v58 }
 0x32f   : > { %2661 = vst.msk [vmem:[%s4151_s24 + $0x2c] sm:$0xf] %vm2649_vm11, %v2913_v16 }
 0x330   : > { %2660 = vst.msk [vmem:[%s4151_s24 + $0x28] sm:$0xf] %vm2649_vm11, %v2912_v50 }
 0x34e   : > { %v3037_v29 = vpop.f32.mrb[12].mxu1 }
 0x34f   : > { %v2476_v17 = vadd.f32 %v3037_v29, %v4139_v43  ;;  %v2470_v8 = vpop.f32.mrb[13].mxu1 }
 0x350   : > { %v3013_v9 = vpop.f32.mrb[12].mxu0  ;;  %v2471_v10 = vadd.f32 %v4139_v43, %v2470_v8 }
 0x351   : > { %v2396_v27 = vadd.f32 %v3013_v9, %v4139_v43  ;;  %v2390_v24 = vpop.f32.mrb[13].mxu0  ;;  %v2518_v28 = vmax.f32 %v2476_v17, 0.0 }
 0x352   : > { %v2391_v40 = vadd.f32 %v4139_v43, %v2390_v24  ;;  %v2517_v57 = vmax.f32 %v2471_v10, 0.0 }
 0x353   : > { %v2502_v14 = vmax.f32 %v2396_v27, 0.0  ;;  %v2931_v48 = vpack.c.bf16 %v2518_v28, %v2518_v28 }
 0x354   : > { %v2501_v56 = vmax.f32 %v2391_v40, 0.0  ;;  %v2930_v38 = vpack.c.bf16 %v2517_v57, %v2517_v57 }
 0x355   : > { %v2915_v49 = vpack.c.bf16 %v2502_v14, %v2502_v14  ;;  %2679 = vst.msk [vmem:[%s4151_s24 + $0x74] sm:$0xf] %vm2649_vm11, %v2931_v48 }
 0x356   : > { %v2914_v6 = vpack.c.bf16 %v2501_v56, %v2501_v56  ;;  %2678 = vst.msk [vmem:[%s4151_s24 + $0x70] sm:$0xf] %vm2649_vm11, %v2930_v38 }
 0x357   : > { %2663 = vst.msk [vmem:[%s4151_s24 + $0x34] sm:$0xf] %vm2649_vm11, %v2915_v49 }
 0x358   : > { %2662 = vst.msk [vmem:[%s4151_s24 + $0x30] sm:$0xf] %vm2649_vm11, %v2914_v6 }
 0x36c   : > { %v3040_v61 = vpop.f32.mrb[14].mxu1 }
 0x36d   : > { %v3016_v53 = vpop.f32.mrb[14].mxu0  ;;  %v2486_v26 = vadd.f32 %v3040_v61, %v4139_v43  ;;  %v2480_v25 = vpop.f32.mrb[15].mxu1 }
 0x36e   : > { %v2406_v60 = vadd.f32 %v3016_v53, %v4139_v43  ;;  %v2400_v52 = vpop.f32.mrb[15].mxu0  ;;  %v2481_v5 = vadd.f32 %v4139_v43, %v2480_v25 }
 0x36f   : > { %v2520_v31 = vmax.f32 %v2486_v26, 0.0  ;;  %v2401_v12 = vadd.f32 %v4139_v43, %v2400_v52 }
 0x370   : > { %v2504_v18 = vmax.f32 %v2406_v60, 0.0  ;;  %v2519_v41 = vmax.f32 %v2481_v5, 0.0 }
 0x371   : > { %v2933_v11 = vpack.c.bf16 %v2520_v31, %v2520_v31  ;;  %v2503_v30 = vmax.f32 %v2401_v12, 0.0 }
 0x372   : > { %v2917_v39 = vpack.c.bf16 %v2504_v18, %v2504_v18  ;;  %v2932_v19 = vpack.c.bf16 %v2519_v41, %v2519_v41 }
 0x373   : > { %2681 = vst.msk [vmem:[%s4151_s24 + $0x7c] sm:$0xf] %vm2649_vm11, %v2933_v11  ;;  %v2916_v20 = vpack.c.bf16 %v2503_v30, %v2503_v30 }
 0x374   : > { %2665 = vst.msk [vmem:[%s4151_s24 + $0x3c] sm:$0xf] %vm2649_vm11, %v2917_v39  ;;  %2680 = vst.msk [vmem:[%s4151_s24 + $0x78] sm:$0xf] %vm2649_vm11, %v2932_v19 }
 0x375   : > { %2664 = vst.msk [vmem:[%s4151_s24 + $0x38] sm:$0xf] %vm2649_vm11, %v2916_v20 }
 0x376 PF: > { %s15_s20 = sadd.s32 1, %s3124_s20   ;;  %s4296_s18 = smov %s3120_s19 }
 0x377   : > { %p12_p5 = scmp.ge.s32.totalorder %s15_s20, 4   ;;  %s4297_s19 = smov %s4299_s21 }
 0x379   :  { %14 = sbr.rel (!%p12_p5) target bundleno = 2 (0x2), region = 80 }

// kernel: encode_forward.3
= control target key start
LH: loop header
LB: loop body
LE: loop exit
PB: predicated region body
PF: predicated region fallthrough
CT: control target
= control target key end

     0   :  { %s4783_s21 = smov 0   ;;  %s4785_s22 = smov 0   ;;  %s5898_s0 = inlined_call_operand.vmem [shape: bf16[2,18,18,8], index: 0, kind: input, shape index: {}, may-alias: {0,1,2}]   ;;  %s5899_s1 = inlined_call_operand.vmem [shape: bf16[2,18,18,8], index: 1, kind: input, shape index: {}, may-alias: {0,1,2}]   ;;  %s5900_s2 = inlined_call_operand.vmem [shape: bf16[2,18,18,8], index: 2, kind: input, shape index: {}, may-alias: {0,1,2}]   ;;  %s5901_s3 = inlined_call_operand.vmem [shape: bf16[72,8], index: 3, kind: input, shape index: {}]   ;;  %s5902_s4 = inlined_call_operand.vmem [shape: f32[1,8], index: 4, kind: input, shape index: {}]   ;;  %s5903_s5 = inlined_call_operand.vmem [shape: f32[2,8,2,16,8], index: 5, kind: output, shape index: {0}]   ;;  %s5904_s6 = inlined_call_operand.vmem [shape: f32[2,8,8,8], index: 6, kind: output, shape index: {1}]  }
   0x1   :  { %s4787_s23 = smov 0  }
   0x2 LB: > { %s29_s24 = sadd.s32 1, %s4734_s22  ;;  %p4307_p0 = scmp.ge.s32.totalorder %s4738_s23, 1  ;;  %s4738_s23 = sphi %s4787_s23, %s17_s23   ;;  %s4734_s22 = sphi %s4785_s22, %s5910_s22   ;;  %s4730_s21 = sphi %s4783_s21, %s5909_s21  }
   0x3   : > { %p31_p1 = scmp.ge.s32.totalorder %s29_s24, 2  ;;  %p301_p2 = scmp.lt.s32.totalorder %s4738_s23, 3 }
   0x5   : > { %s5912_s24 = smov (%p31_p1, %s29_s24), 0  ;;  %p302_p3 = pnand %p4307_p0, %p301_p2 }
   0x6   : > { %p384_p4 = scmp.lt.s32.totalorder (!%p302_p3), %s4730_s21, 1  ;;  %vm497_vm0 = vcmask (!%p302_p3), 60416   ;;  %vm500_vm1 = vcmask (!%p302_p3), 57344   ;;  %vm1350_vm2 = vcmask (!%p302_p3), 1042432   ;;  %vm1351_vm3 = vcmask (!%p302_p3), 1046532   ;;  %s4740_s29 = smov (!%p302_p3), 24  }
   0x7   : > { %305 = sbr.rel (%p302_p3) target bundleno = 701 (0x2bd), region = 40  ;;  %vm4853_vm4 = vmor (!%p302_p3), %vm1350_vm2, %vm1351_vm3  ;;  %vm754_vm5 = vsmask.f32 (!%p302_p3), 3328  ;;  %vm755_vm6 = vsmask.f32 (!%p302_p3), 7440  ;;  %s4741_s30 = smov (!%p302_p3), 16  }
   0x8   : > { %vm4890_vm7 = vmor (!%p302_p3), %vm754_vm5, %vm755_vm6  ;;  %s4742_s7 = smov (!%p302_p3), 8   ;;  %s4743_s8 = smov (!%p302_p3), 32   ;;  %vm689_vm8 = vcmask (!%p302_p3), 64512   ;;  %vm1237_vm9 = vcmask (!%p302_p3), 130112   ;;  %vm1561_vm10 = vcmask (!%p302_p3), 195712   ;;  %vm1739_vm11 = vcmask (!%p302_p3), 261312  }
   0x9   : > { %s4744_s9 = smov (!%p302_p3), 40   ;;  %s4745_s10 = smov (!%p302_p3), 48   ;;  %vm2284_vm12 = vcmask (!%p302_p3), 326912   ;;  %vm2605_vm13 = vcmask (!%p302_p3), 392512   ;;  %vm2783_vm14 = vcmask (!%p302_p3), 458112   ;;  %vm3328_vm15 = vcmask (!%p302_p3), 523712  }
   0xa   : > { %s4746_s11 = smov (!%p302_p3), 56   ;;  %s4747_s12 = smov (!%p302_p3), 64   ;;  %vm3649_vm2 = vcmask (!%p302_p3), 589312   ;;  %vm3725_vm3 = vcmask (!%p302_p3), 588800   ;;  %vm3774_vm5 = vcmask (!%p302_p3), 1043456  }
   0xe   : > { %s5914_s21 = smov (!%p384_p4, %s4730_s21), 1 }
   0xf   : > { %s4804_s25 = smul.u32 216, %s5914_s21 }
  0x11   : > { %s4810_s28 = scalar_lea.vmem %s5898_s0, %s4804_s25 }
  0x12   : > { %v476_v0 = vld [vmem:[%s4810_s28 + $0x6c] sm:$0xf]  ;;  %v477_v1 = vld [vmem:[%s4810_s28 + $0x70] sm:$0xf]  ;;  %v479_v4 = vld [vmem:[%s4810_s28 + $0x78] sm:$0xf] }
  0x13   : > { %v452_v2 = vld [vmem:[%s4810_s28 + $0xc] sm:$0xf]  ;;  %526 = vst.msk [vmem:[#allocation2 + $0x6c] sm:$0xf] %vm497_vm0, %v476_v0  ;;  %527 = vst.msk [vmem:[#allocation2 + $0x70] sm:$0xf] %vm497_vm0, %v477_v1 }
  0x14   : > { %v453_v3 = vld [vmem:[%s4810_s28 + $0x10] sm:$0xf]  ;;  %502 = vst.msk [vmem:[#allocation2 + $0xc] sm:$0xf] %vm497_vm0, %v452_v2  ;;  %v480_v5 = vld [vmem:[%s4810_s28 + $0x7c] sm:$0xf] }
  0x15   : > { %503 = vst.msk [vmem:[#allocation2 + $0x10] sm:$0xf] %vm497_vm0, %v453_v3  ;;  %529 = vst.msk [vmem:[#allocation2 + $0x78] sm:$0xf] %vm497_vm0, %v479_v4  ;;  %v455_v6 = vld [vmem:[%s4810_s28 + $0x18] sm:$0xf] }
  0x16   : > { %530 = vst.msk [vmem:[#allocation2 + $0x7c] sm:$0xf] %vm497_vm0, %v480_v5  ;;  %v456_v7 = vld [vmem:[%s4810_s28 + $0x1c] sm:$0xf]  ;;  %v473_v8 = vld [vmem:[%s4810_s28 + $0x60] sm:$0xf] }
  0x17   : > { %505 = vst.msk [vmem:[#allocation2 + $0x18] sm:$0xf] %vm497_vm0, %v455_v6  ;;  %506 = vst.msk [vmem:[#allocation2 + $0x1c] sm:$0xf] %vm497_vm0, %v456_v7  ;;  %v474_v9 = vld [vmem:[%s4810_s28 + $0x64] sm:$0xf] }
  0x18   : > { %v475_v10 = vld [vmem:[%s4810_s28 + $0x68] sm:$0x1]  ;;  %523 = vst.msk [vmem:[#allocation2 + $0x60] sm:$0xf] %vm497_vm0, %v473_v8  ;;  %v449_v11 = vld [vmem:[%s4810_s28] sm:$0xf] }
  0x19   : > { %524 = vst.msk [vmem:[#allocation2 + $0x64] sm:$0xf] %vm497_vm0, %v474_v9  ;;  %v450_v12 = vld [vmem:[%s4810_s28 + $0x4] sm:$0xf]  ;;  %v451_v13 = vld [vmem:[%s4810_s28 + $0x8] sm:$0x1] }
  0x1a   : > { %525 = vst.msk [vmem:[#allocation2 + $0x68] sm:$0x1] %vm500_vm1, %v475_v10  ;;  %v478_v14 = vld [vmem:[%s4810_s28 + $0x74] sm:$0x1]  ;;  %501 = vst.msk [vmem:[#allocation2 + $0x8] sm:$0x1] %vm500_vm1, %v451_v13 }
  0x1b   : > { %498 = vst.msk [vmem:[#allocation2] sm:$0xf] %vm497_vm0, %v449_v11  ;;  %499 = vst.msk [vmem:[#allocation2 + $0x4] sm:$0xf] %vm497_vm0, %v450_v12  ;;  %v454_v15 = vld [vmem:[%s4810_s28 + $0x14] sm:$0x1] }
  0x1c   : > { %528 = vst.msk [vmem:[#allocation2 + $0x74] sm:$0x1] %vm500_vm1, %v478_v14  ;;  %v481_v16 = vld [vmem:[%s4810_s28 + $0x80] sm:$0x1]  ;;  %504 = vst.msk [vmem:[#allocation2 + $0x14] sm:$0x1] %vm500_vm1, %v454_v15 }
  0x1d   : > { %v457_v17 = vld [vmem:[%s4810_s28 + $0x20] sm:$0x1]  ;;  %531 = vst.msk [vmem:[#allocation2 + $0x80] sm:$0x1] %vm500_vm1, %v481_v16  ;;  %v482_v18 = vld [vmem:[%s4810_s28 + $0x84] sm:$0xf] }
  0x1e   : > { %507 = vst.msk [vmem:[#allocation2 + $0x20] sm:$0x1] %vm500_vm1, %v457_v17  ;;  %v483_v19 = vld [vmem:[%s4810_s28 + $0x88] sm:$0xf]  ;;  %v458_v20 = vld [vmem:[%s4810_s28 + $0x24] sm:$0xf] }
  0x1f   : > { %532 = vst.msk [vmem:[#allocation2 + $0x84] sm:$0xf] %vm497_vm0, %v482_v18  ;;  %533 = vst.msk [vmem:[#allocation2 + $0x88] sm:$0xf] %vm497_vm0, %v483_v19  ;;  %v459_v22 = vld [vmem:[%s4810_s28 + $0x28] sm:$0xf] }
  0x20   : > { %508 = vst.msk [vmem:[#allocation2 + $0x24] sm:$0xf] %vm497_vm0, %v458_v20  ;;  %v484_v23 = vld [vmem:[%s4810_s28 + $0x8c] sm:$0x1]  ;;  %509 = vst.msk [vmem:[#allocation2 + $0x28] sm:$0xf] %vm497_vm0, %v459_v22 }
  0x21   : > { %v4663_v24 = vld [vmem:[#allocation2 + $0x6c] sm:$0xff]   ;;  %534 = vst.msk [vmem:[#allocation2 + $0x8c] sm:$0x1] %vm500_vm1, %v484_v23  ;;  %v4665_v26 = vld [vmem:[#allocation2 + $0x78] sm:$0xff]   ;;  %v1278_v28 = vld [vmem:[#allocation2 + $0x60] sm:$0xe] }
  0x22   : > { %v4664_v25 = vld [vmem:[#allocation2 + $0xc] sm:$0xff]   ;;  %1707 = vrot.lane.b32.xlu1 %v4663_v24, %s4740_s29  ;;  %v4666_v27 = vld [vmem:[#allocation2 + $0x18] sm:$0xff]   ;;  %v1279_v29 = vld [vmem:[#allocation2 + $0x64] sm:$0xf]  ;;  %v4355_v31 = vrot.slane %v1278_v28, 9 }
  0x23   : > { %1691 = vrot.lane.b32.xlu0 %v4664_v25, %s4740_s29  ;;  %v1280_v30 = vld [vmem:[#allocation2 + $0x68] sm:$0x1]  ;;  %v1411_v32 = vrot.slane %v1279_v29, 5  ;;  %v1254_v34 = vld [vmem:[#allocation2] sm:$0xe] }
  0x24   : > { %v1414_v33 = vrot.slane %v1280_v30, 5  ;;  %v1255_v35 = vld [vmem:[#allocation2 + $0x4] sm:$0xf]  ;;  %v1256_v36 = vld [vmem:[#allocation2 + $0x8] sm:$0x1]  ;;  %v4347_v37 = vrot.slane %v1254_v34, 9 }
  0x25   : > { %v1412_v38 = vsel %vm4853_vm4, %v4355_v31, %v1411_v32  ;;  %v1413_v39 = vrot.slane %v1411_v32, 4  ;;  %v1355_v40 = vrot.slane %v1255_v35, 5  ;;  %v1358_v41 = vrot.slane %v1256_v36, 5  ;;  %v1281_v42 = vld [vmem:[#allocation2 + $0x6c] sm:$0xe] }
  0x26   : > { %1709 = vrot.lane.b32.xlu1 %v4665_v26, %s4740_s29  ;;  %v1282_v43 = vld [vmem:[#allocation2 + $0x70] sm:$0xf]  ;;  %v1283_v44 = vld [vmem:[#allocation2 + $0x74] sm:$0x1]  ;;  %v4356_v45 = vrot.slane %v1281_v42, 9 }
  0x27   : > { %1693 = vrot.lane.b32.xlu0 %v4666_v27, %s4740_s29  ;;  %v1415_v46 = vsel %vm4853_vm4, %v1413_v39, %v1414_v33  ;;  %v1356_v47 = vsel %vm4853_vm4, %v4347_v37, %v1355_v40  ;;  %v1357_v48 = vrot.slane %v1355_v40, 4  ;;  %v1418_v49 = vrot.slane %v1282_v43, 5  ;;  %v1257_v50 = vld [vmem:[#allocation2 + $0xc] sm:$0xe]  ;;  %v1258_v51 = vld [vmem:[#allocation2 + $0x10] sm:$0xf] }
  0x28   : > { %v4371_v52 = vcombine.low %v1412_v38, %v1415_v46  ;;  %v1421_v53 = vrot.slane %v1283_v44, 5  ;;  %v1259_v54 = vld [vmem:[#allocation2 + $0x14] sm:$0x1]  ;;  %v4348_v55 = vrot.slane %v1257_v50, 9  ;;  %v1362_v56 = vrot.slane %v1258_v51, 5 }
  0x29   : > { %v1359_v57 = vsel %vm4853_vm4, %v1357_v48, %v1358_v41  ;;  %v1419_v58 = vsel %vm4853_vm4, %v4356_v45, %v1418_v49  ;;  %v1420_v59 = vrot.slane %v1418_v49, 4  ;;  %v1365_v60 = vrot.slane %v1259_v54, 5  ;;  %v709_v61 = vld [vmem:[#allocation2 + $0xc] sm:$0xf]  ;;  %v710_v62 = vld [vmem:[#allocation2 + $0x10] sm:$0xf] }
  0x2a   : > { %1529 = vrot.lane.b32.xlu1 %v4371_v52, %s4741_s30  ;;  %v4363_v63 = vcombine.low %v1356_v47, %v1359_v57  ;;  %v1363_v0 = vsel %vm4853_vm4, %v4348_v55, %v1362_v56  ;;  %v1364_v1 = vrot.slane %v1362_v56, 4  ;;  %v711_v2 = vld [vmem:[#allocation2 + $0x14] sm:$0x1]  ;;  %v782_v3 = vshrl.u32 %v709_v61, 16  ;;  %v706_v4 = vld [vmem:[#allocation2] sm:$0xf] }
  0x2b   : > { %v1422_v5 = vsel %vm4853_vm4, %v1420_v59, %v1421_v53  ;;  %v785_v6 = vshll.u32 %v709_v61, 16  ;;  %v791_v7 = vshll.u32 %v710_v62, 16  ;;  %v795_v8 = vshrl.u32 %v710_v62, 16  ;;  %v707_v9 = vld [vmem:[#allocation2 + $0x4] sm:$0xf] }
  0x2c   : > { %1513 = vrot.lane.b32.xlu0 %v4363_v63, %s4741_s30  ;;  %v4372_v10 = vcombine.low %v1419_v58, %v1422_v5  ;;  %v1366_v11 = vsel %vm4853_vm4, %v1364_v1, %v1365_v60  ;;  %v784_v12 = vrot.slane %v782_v3, 4  ;;  %v801_v13 = vshll.u32 %v711_v2, 16  ;;  %v708_v14 = vld [vmem:[#allocation2 + $0x8] sm:$0x1]  ;;  %v733_v19 = vld [vmem:[#allocation2 + $0x6c] sm:$0xf] }
  0x2d   : > { %v4364_v15 = vcombine.low %v1363_v0, %v1366_v11  ;;  %v787_v16 = vrot.slane %v785_v6, 5  ;;  %v793_v17 = vrot.slane %v791_v7, 5  ;;  %v797_v18 = vrot.slane %v795_v8, 4  ;;  %v734_v29 = vld [vmem:[#allocation2 + $0x70] sm:$0xf] }
  0x2e   : > { %1531 = vrot.lane.b32.xlu1 %v4372_v10, %s4741_s30  ;;  %v803_v20 = vrot.slane %v801_v13, 5  ;;  %v758_v22 = vshrl.u32 %v706_v4, 16  ;;  %v761_v23 = vshll.u32 %v706_v4, 16  ;;  %v767_v24 = vshll.u32 %v707_v9, 16  ;;  %v735_v39 = vld [vmem:[#allocation2 + $0x74] sm:$0x1] }
  0x2f   : > { %v788_v25 = vor.u32 %v787_v16, %v784_v12  ;;  %v798_v26 = vor.u32 %v797_v18, %v793_v17  ;;  %v771_v27 = vshrl.u32 %v707_v9, 16  ;;  %v777_v28 = vshll.u32 %v708_v14, 16  ;;  %v730_v44 = vld [vmem:[#allocation2 + $0x60] sm:$0xf]  ;;  %v731_v49 = vld [vmem:[#allocation2 + $0x64] sm:$0xf] }
  0x30   : > { %1515 = vrot.lane.b32.xlu0 %v4364_v15, %s4741_s30  ;;  %v760_v31 = vrot.slane %v758_v22, 4  ;;  %v763_v32 = vrot.slane %v761_v23, 5  ;;  %v769_v33 = vrot.slane %v767_v24, 5  ;;  %v974_v34 = vshrl.u32 %v733_v19, 16  ;;  %v732_v60 = vld [vmem:[#allocation2 + $0x68] sm:$0x1] }
  0x31   : > { %v789_v35 = vrot.slane %v788_v25, 4  ;;  %v799_v36 = vrot.slane %v798_v26, 4  ;;  %v773_v37 = vrot.slane %v771_v27, 4  ;;  %v779_v38 = vrot.slane %v777_v28, 5  ;;  %v1780_v63 = vld [vmem:[#allocation2 + $0x6c] sm:$0xf] }
  0x32   : > { %v764_v40 = vor.u32 %v763_v32, %v760_v31  ;;  %v976_v41 = vrot.slane %v974_v34, 4  ;;  %v977_v42 = vshll.u32 %v733_v19, 16  ;;  %v983_v43 = vshll.u32 %v734_v29, 16  ;;  %v1781_v4 = vld [vmem:[#allocation2 + $0x70] sm:$0xf] }
  0x33   : > { %v794_v45 = vsel %vm4890_vm7, %v789_v35, %v793_v17  ;;  %v804_v46 = vsel %vm4890_vm7, %v799_v36, %v803_v20  ;;  %v774_v47 = vor.u32 %v773_v37, %v769_v33  ;;  %v987_v48 = vshrl.u32 %v734_v29, 16  ;;  %v1782_v15 = vld [vmem:[#allocation2 + $0x74] sm:$0x1]  ;;  %v1756_v18 = vld [vmem:[#allocation2 + $0xc] sm:$0xf] }
  0x34   : > { %v4332_v50 = vcombine.low %v794_v45, %v804_v46  ;;  %v765_v51 = vrot.slane %v764_v40, 4  ;;  %v979_v52 = vrot.slane %v977_v42, 5  ;;  %v985_v53 = vrot.slane %v983_v43, 5  ;;  %v1757_v24 = vld [vmem:[#allocation2 + $0x10] sm:$0xf] }
  0x35   : > { %v775_v54 = vrot.slane %v774_v47, 4  ;;  %v989_v55 = vrot.slane %v987_v48, 4  ;;  %v993_v56 = vshll.u32 %v735_v39, 16  ;;  %v950_v57 = vshrl.u32 %v730_v44, 16  ;;  %v1758_v36 = vld [vmem:[#allocation2 + $0x14] sm:$0x1] }
  0x36   : > { %1191 = vrot.lane.b32.xlu1 %v4332_v50, %s4742_s7  ;;  %v770_v58 = vsel %vm4890_vm7, %v765_v51, %v769_v33  ;;  %v980_v59 = vor.u32 %v979_v52, %v976_v41  ;;  %v953_v61 = vshll.u32 %v730_v44, 16  ;;  %v959_v62 = vshll.u32 %v731_v49, 16  ;;  %v1783_v39 = vld [vmem:[#allocation2 + $0x78] sm:$0xf]  ;;  %v1784_v51 = vld [vmem:[#allocation2 + $0x7c] sm:$0xf] }
  0x37   : > { %v780_v0 = vsel %vm4890_vm7, %v775_v54, %v779_v38  ;;  %v990_v1 = vor.u32 %v989_v55, %v985_v53  ;;  %v995_v2 = vrot.slane %v993_v56, 5  ;;  %v952_v3 = vrot.slane %v950_v57, 4  ;;  %v1785_v52 = vld [vmem:[#allocation2 + $0x80] sm:$0x1] }
  0x38   : > { %v4331_v5 = vcombine.low %v770_v58, %v780_v0  ;;  %v981_v6 = vrot.slane %v980_v59, 4  ;;  %v955_v7 = vrot.slane %v953_v61, 5  ;;  %v961_v8 = vrot.slane %v959_v62, 5  ;;  %v1759_v58 = vld [vmem:[#allocation2 + $0x18] sm:$0xf] }
  0x39   : > { %v991_v9 = vrot.slane %v990_v1, 4  ;;  %v963_v10 = vshrl.u32 %v731_v49, 16  ;;  %v969_v11 = vshll.u32 %v732_v60, 16  ;;  %v1997_v12 = vshrl.u32 %v1780_v63, 16 }
  0x3a   : > { %1189 = vrot.lane.b32.xlu0 %v4331_v5, %s4742_s7  ;;  %v986_v13 = vsel %vm4890_vm7, %v981_v6, %v985_v53  ;;  %v956_v14 = vor.u32 %v955_v7, %v952_v3  ;;  %v2000_v16 = vshll.u32 %v1780_v63, 16  ;;  %v2006_v17 = vshll.u32 %v1781_v4, 16  ;;  %v1760_v63 = vld [vmem:[#allocation2 + $0x1c] sm:$0xf] }
  0x3b   : > { %v996_v19 = vsel %vm4890_vm7, %v991_v9, %v995_v2  ;;  %v965_v20 = vrot.slane %v963_v10, 4  ;;  %v971_v22 = vrot.slane %v969_v11, 5  ;;  %v1999_v23 = vrot.slane %v1997_v12, 4  ;;  %v2325_v9 = vld [vmem:[#allocation2 + $0x6c] sm:$0xe] }
  0x3c   : > { %v4340_v25 = vcombine.low %v986_v13, %v996_v19  ;;  %v957_v26 = vrot.slane %v956_v14, 4  ;;  %v2002_v27 = vrot.slane %v2000_v16, 5  ;;  %v2008_v28 = vrot.slane %v2006_v17, 5  ;;  %v2326_v14 = vld [vmem:[#allocation2 + $0x70] sm:$0xf] }
  0x3d   : > { %v966_v29 = vor.u32 %v965_v20, %v961_v8  ;;  %v2010_v31 = vshrl.u32 %v1781_v4, 16  ;;  %v2016_v32 = vshll.u32 %v1782_v15, 16  ;;  %v1805_v33 = vshrl.u32 %v1756_v18, 16  ;;  %v1761_v4 = vld [vmem:[#allocation2 + $0x20] sm:$0x1] }
  0x3e   : > { %1207 = vrot.lane.b32.xlu1 %v4340_v25, %s4742_s7  ;;  %v962_v34 = vsel %vm4890_vm7, %v957_v26, %v961_v8  ;;  %v2003_v35 = vor.u32 %v2002_v27, %v1999_v23  ;;  %v1808_v37 = vshll.u32 %v1756_v18, 16  ;;  %v1814_v38 = vshll.u32 %v1757_v24, 16 }
  0x3f   : > { %v967_v40 = vrot.slane %v966_v29, 4  ;;  %v2012_v41 = vrot.slane %v2010_v31, 4  ;;  %v2018_v42 = vrot.slane %v2016_v32, 5  ;;  %v1807_v43 = vrot.slane %v1805_v33, 4  ;;  %v2301_v29 = vld [vmem:[#allocation2 + $0xc] sm:$0xe] }
  0x40   : > { %v2004_v44 = vrot.slane %v2003_v35, 4  ;;  %v1810_v45 = vrot.slane %v1808_v37, 5  ;;  %v1816_v46 = vrot.slane %v1814_v38, 5  ;;  %v1818_v47 = vshrl.u32 %v1757_v24, 16  ;;  %v2302_v35 = vld [vmem:[#allocation2 + $0x10] sm:$0xf] }
  0x41   : > { %v972_v48 = vsel %vm4890_vm7, %v967_v40, %v971_v22  ;;  %v2013_v49 = vor.u32 %v2012_v41, %v2008_v28  ;;  %v1824_v50 = vshll.u32 %v1758_v36, 16  ;;  %v2021_v53 = vshrl.u32 %v1783_v39, 16  ;;  %v2303_v40 = vld [vmem:[#allocation2 + $0x14] sm:$0x1] }
  0x42   : > { %v4339_v54 = vcombine.low %v962_v34, %v972_v48  ;;  %v2009_v55 = vsel %vm4890_vm7, %v2004_v44, %v2008_v28  ;;  %v1811_v56 = vor.u32 %v1810_v45, %v1807_v43  ;;  %v1820_v57 = vrot.slane %v1818_v47, 4  ;;  %v2327_v28 = vld [vmem:[#allocation2 + $0x74] sm:$0x1]  ;;  %v2328_v45 = vld [vmem:[#allocation2 + $0x78] sm:$0xe] }
  0x43   : > { %v2014_v59 = vrot.slane %v2013_v49, 4  ;;  %v1826_v60 = vrot.slane %v1824_v50, 5  ;;  %v2023_v61 = vrot.slane %v2021_v53, 4  ;;  %v2024_v62 = vshll.u32 %v1783_v39, 16 }
  0x44   : > { %1205 = vrot.lane.b32.xlu0 %v4339_v54, %s4742_s7  ;;  %v1812_v0 = vrot.slane %v1811_v56, 4  ;;  %v1821_v1 = vor.u32 %v1820_v57, %v1816_v46  ;;  %v2030_v2 = vshll.u32 %v1784_v51, 16  ;;  %v2034_v3 = vshrl.u32 %v1784_v51, 16  ;;  %v2330_v51 = vld [vmem:[#allocation2 + $0x80] sm:$0x1] }
  0x45   : > { %v2019_v5 = vsel %vm4890_vm7, %v2014_v59, %v2018_v42  ;;  %v2026_v6 = vrot.slane %v2024_v62, 5  ;;  %v2040_v7 = vshll.u32 %v1785_v52, 16  ;;  %v1829_v8 = vshrl.u32 %v1759_v58, 16  ;;  %v2304_v52 = vld [vmem:[#allocation2 + $0x18] sm:$0xe] }
  0x46   : > { %v4403_v10 = vcombine.low %v2009_v55, %v2019_v5  ;;  %v1817_v11 = vsel %vm4890_vm7, %v1812_v0, %v1816_v46  ;;  %v1822_v12 = vrot.slane %v1821_v1, 4  ;;  %v2032_v13 = vrot.slane %v2030_v2, 5  ;;  %v2329_v46 = vld [vmem:[#allocation2 + $0x7c] sm:$0xf]  ;;  %v2306_v62 = vld [vmem:[#allocation2 + $0x20] sm:$0x1] }
  0x47   : > { %v2027_v15 = vor.u32 %v2026_v6, %v2023_v61  ;;  %v2036_v16 = vrot.slane %v2034_v3, 4  ;;  %v2042_v17 = vrot.slane %v2040_v7, 5  ;;  %v1831_v18 = vrot.slane %v1829_v8, 4  ;;  %v2305_v57 = vld [vmem:[#allocation2 + $0x1c] sm:$0xf] }
  0x48   : > { %2252 = vrot.lane.b32.xlu1 %v4403_v10, %s4743_s8  ;;  %v1827_v19 = vsel %vm4890_vm7, %v1822_v12, %v1826_v60  ;;  %v1832_v20 = vshll.u32 %v1759_v58, 16  ;;  %v1838_v22 = vshll.u32 %v1760_v63, 16  ;;  %v1842_v23 = vshrl.u32 %v1760_v63, 16  ;;  %v460_v63 = vld [vmem:[%s4810_s28 + $0x2c] sm:$0x1] }
  0x49   : > { %v4395_v24 = vcombine.low %v1817_v11, %v1827_v19  ;;  %v2028_v25 = vrot.slane %v2027_v15, 4  ;;  %v2037_v26 = vor.u32 %v2036_v16, %v2032_v13  ;;  %v1848_v27 = vshll.u32 %v1761_v4, 16  ;;  %v2824_v4 = vld [vmem:[#allocation2 + $0x78] sm:$0xf]  ;;  %v2825_v5 = vld [vmem:[#allocation2 + $0x7c] sm:$0xf] }
  0x4a   : > { %v1834_v31 = vrot.slane %v1832_v20, 5  ;;  %v1840_v32 = vrot.slane %v1838_v22, 5  ;;  %v1844_v33 = vrot.slane %v1842_v23, 4  ;;  %v4419_v34 = vrot.slane %v2325_v9, 9  ;;  %510 = vst.msk [vmem:[#allocation2 + $0x2c] sm:$0x1] %vm500_vm1, %v460_v63 }
  0x4b   : > { %2236 = vrot.lane.b32.xlu0 %v4395_v24, %s4743_s8  ;;  %v2033_v36 = vsel %vm4890_vm7, %v2028_v25, %v2032_v13  ;;  %v2038_v37 = vrot.slane %v2037_v26, 4  ;;  %v1850_v38 = vrot.slane %v1848_v27, 5  ;;  %v2455_v39 = vrot.slane %v2326_v14, 5  ;;  %v2826_v14 = vld [vmem:[#allocation2 + $0x80] sm:$0x1] }
  0x4c   : > { %v1835_v41 = vor.u32 %v1834_v31, %v1831_v18  ;;  %v1845_v42 = vor.u32 %v1844_v33, %v1840_v32  ;;  %v2458_v43 = vrot.slane %v2327_v28, 5  ;;  %v4411_v44 = vrot.slane %v2301_v29, 9  ;;  %v2800_v19 = vld [vmem:[#allocation2 + $0x18] sm:$0xf]  ;;  %v2801_v25 = vld [vmem:[#allocation2 + $0x1c] sm:$0xf] }
  0x4d   : > { %v2043_v47 = vsel %vm4890_vm7, %v2038_v37, %v2042_v17  ;;  %v2456_v48 = vsel %vm4853_vm4, %v4419_v34, %v2455_v39  ;;  %v2457_v49 = vrot.slane %v2455_v39, 4  ;;  %v2399_v50 = vrot.slane %v2302_v35, 5  ;;  %v2802_v34 = vld [vmem:[#allocation2 + $0x20] sm:$0x1] }
  0x4e   : > { %v4404_v53 = vcombine.low %v2033_v36, %v2043_v47  ;;  %v1836_v54 = vrot.slane %v1835_v41, 4  ;;  %v1846_v55 = vrot.slane %v1845_v42, 4  ;;  %v2402_v56 = vrot.slane %v2303_v40, 5  ;;  %v2827_v40 = vld [vmem:[#allocation2 + $0x84] sm:$0xf]  ;;  %v4667_v41 = vld [vmem:[#allocation2 + $0x78] sm:$0xff]  }
  0x4f   : > { %v2459_v58 = vsel %vm4853_vm4, %v2457_v49, %v2458_v43  ;;  %v2400_v59 = vsel %vm4853_vm4, %v4411_v44, %v2399_v50  ;;  %v2401_v60 = vrot.slane %v2399_v50, 4  ;;  %v4420_v61 = vrot.slane %v2328_v45, 9 }
  0x50   : > { %2254 = vrot.lane.b32.xlu1 %v4404_v53, %s4743_s8  ;;  %v1841_v0 = vsel %vm4890_vm7, %v1836_v54, %v1840_v32  ;;  %v1851_v1 = vsel %vm4890_vm7, %v1846_v55, %v1850_v38  ;;  %v4435_v2 = vcombine.low %v2456_v48, %v2459_v58  ;;  %v2462_v3 = vrot.slane %v2329_v46, 5  ;;  %v2828_v46 = vld [vmem:[#allocation2 + $0x88] sm:$0xf] }
  0x51   : > { %v4396_v6 = vcombine.low %v1841_v0, %v1851_v1  ;;  %v2403_v7 = vsel %vm4853_vm4, %v2401_v60, %v2402_v56  ;;  %v2465_v8 = vrot.slane %v2330_v51, 5  ;;  %v4412_v9 = vrot.slane %v2304_v52, 9  ;;  %v4668_v51 = vld [vmem:[#allocation2 + $0x18] sm:$0xff]  }
  0x52   : > { %v4427_v10 = vcombine.low %v2400_v59, %v2403_v7  ;;  %v2463_v11 = vsel %vm4853_vm4, %v4420_v61, %v2462_v3  ;;  %v2464_v12 = vrot.slane %v2462_v3, 4  ;;  %v2406_v13 = vrot.slane %v2305_v57, 5  ;;  %v2829_v59 = vld [vmem:[#allocation2 + $0x8c] sm:$0x1]  ;;  %v2803_v61 = vld [vmem:[#allocation2 + $0x24] sm:$0xf] }
  0x53   : > { %2238 = vrot.lane.b32.xlu0 %v4396_v6, %s4743_s8  ;;  %v2409_v15 = vrot.slane %v2306_v62, 5  ;;  %v3041_v16 = vshrl.u32 %v2824_v4, 16  ;;  %v3044_v17 = vshll.u32 %v2824_v4, 16  ;;  %v3050_v18 = vshll.u32 %v2825_v5, 16  ;;  %v4669_v62 = vld [vmem:[#allocation2 + $0x84] sm:$0xff]  }
  0x54   : > { %2573 = vrot.lane.b32.xlu1 %v4435_v2, %s4744_s9  ;;  %v2466_v20 = vsel %vm4853_vm4, %v2464_v12, %v2465_v8  ;;  %v2407_v22 = vsel %vm4853_vm4, %v4412_v9, %v2406_v13  ;;  %v2408_v23 = vrot.slane %v2406_v13, 4  ;;  %v3054_v24 = vshrl.u32 %v2825_v5, 16  ;;  %v2804_v3 = vld [vmem:[#allocation2 + $0x28] sm:$0xf]  ;;  %v3369_v8 = vld [vmem:[#allocation2 + $0x78] sm:$0xe] }
  0x55   : > { %v4436_v26 = vcombine.low %v2463_v11, %v2466_v20  ;;  %v3043_v27 = vrot.slane %v3041_v16, 4  ;;  %v3046_v28 = vrot.slane %v3044_v17, 5  ;;  %v3052_v29 = vrot.slane %v3050_v18, 5  ;;  %v3370_v13 = vld [vmem:[#allocation2 + $0x7c] sm:$0xf] }
  0x56   : > { %v2410_v31 = vsel %vm4853_vm4, %v2408_v23, %v2409_v15  ;;  %v3056_v32 = vrot.slane %v3054_v24, 4  ;;  %v3060_v33 = vshll.u32 %v2826_v14, 16  ;;  %v2849_v35 = vshrl.u32 %v2800_v19, 16  ;;  %v4670_v14 = vld [vmem:[#allocation2 + $0x24] sm:$0xff]   ;;  %v2805_v17 = vld [vmem:[#allocation2 + $0x2c] sm:$0x1] }
  0x57   : > { %2557 = vrot.lane.b32.xlu0 %v4427_v10, %s4744_s9  ;;  %v4428_v36 = vcombine.low %v2407_v22, %v2410_v31  ;;  %v3047_v37 = vor.u32 %v3046_v28, %v3043_v27  ;;  %v2852_v38 = vshll.u32 %v2800_v19, 16  ;;  %v2858_v39 = vshll.u32 %v2801_v25, 16  ;;  %v3345_v31 = vld [vmem:[#allocation2 + $0x18] sm:$0xe] }
  0x58   : > { %2575 = vrot.lane.b32.xlu1 %v4436_v26, %s4744_s9  ;;  %v3057_v42 = vor.u32 %v3056_v32, %v3052_v29  ;;  %v3062_v43 = vrot.slane %v3060_v33, 5  ;;  %v2851_v44 = vrot.slane %v2849_v35, 4  ;;  %v2862_v45 = vshrl.u32 %v2801_v25, 16  ;;  %v3371_v25 = vld [vmem:[#allocation2 + $0x80] sm:$0x1] }
  0x59   : > { %v3048_v47 = vrot.slane %v3047_v37, 4  ;;  %v2854_v48 = vrot.slane %v2852_v38, 5  ;;  %v2860_v49 = vrot.slane %v2858_v39, 5  ;;  %v2868_v50 = vshll.u32 %v2802_v34, 16  ;;  %v3346_v32 = vld [vmem:[#allocation2 + $0x1c] sm:$0xf] }
  0x5a   : > { %v3058_v52 = vrot.slane %v3057_v42, 4  ;;  %v2864_v53 = vrot.slane %v2862_v45, 4  ;;  %v3065_v54 = vshrl.u32 %v2827_v40, 16  ;;  %v3068_v55 = vshll.u32 %v2827_v40, 16 }
  0x5b   : > { %2559 = vrot.lane.b32.xlu0 %v4428_v36, %s4744_s9  ;;  %v3053_v56 = vsel %vm4890_vm7, %v3048_v47, %v3052_v29  ;;  %v2855_v57 = vor.u32 %v2854_v48, %v2851_v44  ;;  %v2870_v58 = vrot.slane %v2868_v50, 5  ;;  %v3074_v60 = vshll.u32 %v2828_v46, 16 }
  0x5c   : > { %2751 = vrot.lane.b32.xlu1 %v4667_v41, %s4745_s10  ;;  %v3063_v63 = vsel %vm4890_vm7, %v3058_v52, %v3062_v43  ;;  %v2865_v0 = vor.u32 %v2864_v53, %v2860_v49  ;;  %v3067_v1 = vrot.slane %v3065_v54, 4  ;;  %v3070_v2 = vrot.slane %v3068_v55, 5  ;;  %v3347_v41 = vld [vmem:[#allocation2 + $0x20] sm:$0x1] }
  0x5d   : > { %v4467_v4 = vcombine.low %v3053_v56, %v3063_v63  ;;  %v2856_v5 = vrot.slane %v2855_v57, 4  ;;  %v3076_v6 = vrot.slane %v3074_v60, 5  ;;  %v3078_v7 = vshrl.u32 %v2828_v46, 16  ;;  %v736_v46 = vld [vmem:[#allocation2 + $0x78] sm:$0xf] }
  0x5e   : > { %v2866_v9 = vrot.slane %v2865_v0, 4  ;;  %v3071_v10 = vor.u32 %v3070_v2, %v3067_v1  ;;  %v3084_v11 = vshll.u32 %v2829_v59, 16  ;;  %v2873_v12 = vshrl.u32 %v2803_v61, 16  ;;  %v738_v56 = vld [vmem:[#allocation2 + $0x80] sm:$0x1] }
  0x5f   : > { %2735 = vrot.lane.b32.xlu0 %v4668_v51, %s4745_s10  ;;  %v2861_v15 = vsel %vm4890_vm7, %v2856_v5, %v2860_v49  ;;  %v3080_v16 = vrot.slane %v3078_v7, 4  ;;  %v2876_v18 = vshll.u32 %v2803_v61, 16  ;;  %v2882_v19 = vshll.u32 %v2804_v3, 16  ;;  %v737_v51 = vld [vmem:[#allocation2 + $0x7c] sm:$0xf] }
  0x60   : > { %2753 = vrot.lane.b32.xlu1 %v4669_v62, %s4745_s10  ;;  %v2871_v20 = vsel %vm4890_vm7, %v2866_v9, %v2870_v58  ;;  %v3072_v22 = vrot.slane %v3071_v10, 4  ;;  %v3086_v23 = vrot.slane %v3084_v11, 5  ;;  %v2875_v24 = vrot.slane %v2873_v12, 4  ;;  %v712_v61 = vld [vmem:[#allocation2 + $0x18] sm:$0xf] }
  0x61   : > { %v4459_v26 = vcombine.low %v2861_v15, %v2871_v20  ;;  %v3081_v27 = vor.u32 %v3080_v16, %v3076_v6  ;;  %v2878_v28 = vrot.slane %v2876_v18, 5  ;;  %v2884_v29 = vrot.slane %v2882_v19, 5  ;;  %v713_v62 = vld [vmem:[#allocation2 + $0x1c] sm:$0xf]  ;;  %v3348_v19 = vld [vmem:[#allocation2 + $0x24] sm:$0xe] }
  0x62   : > { %v3077_v33 = vsel %vm4890_vm7, %v3072_v22, %v3076_v6  ;;  %v2886_v34 = vshrl.u32 %v2804_v3, 16  ;;  %v2892_v35 = vshll.u32 %v2805_v17, 16  ;;  %v4483_v36 = vrot.slane %v3369_v8, 9  ;;  %v714_v3 = vld [vmem:[#allocation2 + $0x20] sm:$0x1] }
  0x63   : > { %2737 = vrot.lane.b32.xlu0 %v4670_v14, %s4745_s10  ;;  %v3082_v37 = vrot.slane %v3081_v27, 4  ;;  %v2879_v38 = vor.u32 %v2878_v28, %v2875_v24  ;;  %v3499_v39 = vrot.slane %v3370_v13, 5  ;;  %v3502_v40 = vrot.slane %v3371_v25, 5  ;;  %v3372_v8 = vld [vmem:[#allocation2 + $0x84] sm:$0xe] }
  0x64   : > { %3296 = vrot.lane.b32.xlu1 %v4467_v4, %s4746_s11  ;;  %v2888_v42 = vrot.slane %v2886_v34, 4  ;;  %v2894_v43 = vrot.slane %v2892_v35, 5  ;;  %v4475_v44 = vrot.slane %v3345_v31, 9  ;;  %v3443_v45 = vrot.slane %v3346_v32, 5  ;;  %v3373_v13 = vld [vmem:[#allocation2 + $0x88] sm:$0xf] }
  0x65   : > { %v3087_v47 = vsel %vm4890_vm7, %v3082_v37, %v3086_v23  ;;  %v2880_v48 = vrot.slane %v2879_v38, 4  ;;  %v3500_v49 = vsel %vm4853_vm4, %v4483_v36, %v3499_v39  ;;  %v3501_v50 = vrot.slane %v3499_v39, 4  ;;  %v3374_v14 = vld [vmem:[#allocation2 + $0x8c] sm:$0x1]  ;;  %v3349_v25 = vld [vmem:[#allocation2 + $0x28] sm:$0xf] }
  0x66   : > { %v4468_v52 = vcombine.low %v3077_v33, %v3087_v47  ;;  %v2889_v53 = vor.u32 %v2888_v42, %v2884_v29  ;;  %v4977_v54 = vsel %vm4853_vm4, %v4475_v44, %v3443_v45  ;;  %v3445_v55 = vrot.slane %v3443_v45, 4  ;;  %v3350_v31 = vld [vmem:[#allocation2 + $0x2c] sm:$0x1]  ;;  %v739_v36 = vld [vmem:[#allocation2 + $0x84] sm:$0xf] }
  0x67   : > { %3280 = vrot.lane.b32.xlu0 %v4459_v26, %s4746_s11  ;;  %v2885_v57 = vsel %vm4890_vm7, %v2880_v48, %v2884_v29  ;;  %v3503_v58 = vsel %vm4853_vm4, %v3501_v50, %v3502_v40  ;;  %v3446_v59 = vrot.slane %v3347_v41, 5  ;;  %v998_v60 = vshrl.u32 %v736_v46, 16  ;;  %v485_v37 = vld [vmem:[%s4810_s28 + $0x90] sm:$0xf]  ;;  %v486_v42 = vld [vmem:[%s4810_s28 + $0x94] sm:$0xf] }
  0x68   : > { %3298 = vrot.lane.b32.xlu1 %v4468_v52, %s4746_s11  ;;  %v2890_v63 = vrot.slane %v2889_v53, 4  ;;  %v4499_v0 = vcombine.low %v3500_v49, %v3503_v58  ;;  %v1001_v1 = vshll.u32 %v736_v46, 16  ;;  %v1007_v2 = vshll.u32 %v737_v51, 16  ;;  %535 = vst.msk [vmem:[#allocation2 + $0x90] sm:$0xf] %vm497_vm0, %v485_v37  ;;  %v4687_v49 = vld [vmem:[%s5901_s3] sm:$0xff]  }
  0x69   : > { %v3447_v4 = vsel %vm4853_vm4, %v3445_v55, %v3446_v59  ;;  %v1000_v5 = vrot.slane %v998_v60, 4  ;;  %v1011_v6 = vshrl.u32 %v737_v51, 16  ;;  %v1017_v7 = vshll.u32 %v738_v56, 16  ;;  %536 = vst.msk [vmem:[#allocation2 + $0x94] sm:$0xf] %vm497_vm0, %v486_v42  ;;  %4574 = vmatprep.subr.bf16.mxu0 %v4687_v49  ;;  %4616 = vmatprep.subr.bf16.mxu1 %v4687_v49  ;;  %v4690_v60 = vld [vmem:[%s5901_s3 + $0x8] sm:$0xff]  }
  0x6a   : > { %v2895_v9 = vsel %vm4890_vm7, %v2890_v63, %v2894_v43  ;;  %v4491_v10 = vcombine.low %v4977_v54, %v3447_v4  ;;  %v1003_v11 = vrot.slane %v1001_v1, 5  ;;  %v1009_v12 = vrot.slane %v1007_v2, 5  ;;  %v461_v47 = vld [vmem:[%s4810_s28 + $0x30] sm:$0xf]  ;;  %v462_v48 = vld [vmem:[%s4810_s28 + $0x34] sm:$0xf]  ;;  %4575 = vmatpush3.bf16.msra.mxu0 %v4687_v49  ;;  %4621 = vmatpush3.bf16.msra.mxu1 %v4687_v49 }
  0x6b   : > { %v4460_v15 = vcombine.low %v2885_v57, %v2895_v9  ;;  %v1013_v16 = vrot.slane %v1011_v6, 4  ;;  %v1019_v17 = vrot.slane %v1017_v7, 5  ;;  %v806_v18 = vshrl.u32 %v712_v61, 16  ;;  %v740_v54 = vld [vmem:[#allocation2 + $0x88] sm:$0xf]  ;;  %4576 = vmatprep.subr.bf16.mxu0 %v4690_v60  ;;  %4617 = vmatprep.subr.bf16.mxu1 %v4690_v60 }
  0x6c   : > { %3617 = vrot.lane.b32.xlu1 %v4499_v0, %s4747_s12  ;;  %v1004_v20 = vor.u32 %v1003_v11, %v1000_v5  ;;  %v809_v22 = vshll.u32 %v712_v61, 16  ;;  %v815_v23 = vshll.u32 %v713_v62, 16  ;;  %v819_v24 = vshrl.u32 %v713_v62, 16  ;;  %511 = vst.msk [vmem:[#allocation2 + $0x30] sm:$0xf] %vm497_vm0, %v461_v47 }
  0x6d   : > { %3282 = vrot.lane.b32.xlu0 %v4460_v15, %s4746_s11  ;;  %v1014_v26 = vor.u32 %v1013_v16, %v1009_v12  ;;  %v808_v27 = vrot.slane %v806_v18, 4  ;;  %v825_v28 = vshll.u32 %v714_v3, 16  ;;  %v4484_v29 = vrot.slane %v3372_v8, 9  ;;  %512 = vst.msk [vmem:[#allocation2 + $0x34] sm:$0xf] %vm497_vm0, %v462_v48 }
  0x6e   : > { %v1005_v32 = vrot.slane %v1004_v20, 4  ;;  %v811_v33 = vrot.slane %v809_v22, 5  ;;  %v817_v34 = vrot.slane %v815_v23, 5  ;;  %v821_v35 = vrot.slane %v819_v24, 4  ;;  %v741_v59 = vld [vmem:[#allocation2 + $0x8c] sm:$0x1]  ;;  %4577 = vmatpush3.bf16.msra.mxu0 %v4690_v60  ;;  %4622 = vmatpush3.bf16.msra.mxu1 %v4690_v60 }
  0x6f   : > { %v1015_v38 = vrot.slane %v1014_v26, 4  ;;  %v827_v39 = vrot.slane %v825_v28, 5  ;;  %v3506_v40 = vrot.slane %v3373_v13, 5  ;;  %v3509_v41 = vrot.slane %v3374_v14, 5  ;;  %v715_v1 = vld [vmem:[#allocation2 + $0x24] sm:$0xf] }
  0x70   : > { %v1010_v43 = vsel %vm4890_vm7, %v1005_v32, %v1009_v12  ;;  %v812_v44 = vor.u32 %v811_v33, %v808_v27  ;;  %v822_v45 = vor.u32 %v821_v35, %v817_v34  ;;  %v4476_v46 = vrot.slane %v3348_v19, 9  ;;  %v716_v2 = vld [vmem:[#allocation2 + $0x28] sm:$0xf]  ;;  %v717_v7 = vld [vmem:[#allocation2 + $0x2c] sm:$0x1] }
  0x71   : > { %3601 = vrot.lane.b32.xlu0 %v4491_v10, %s4747_s12  ;;  %v1020_v50 = vsel %vm4890_vm7, %v1015_v38, %v1019_v17  ;;  %v3507_v51 = vsel %vm4853_vm4, %v4484_v29, %v3506_v40  ;;  %v3508_v52 = vrot.slane %v3506_v40, 4  ;;  %v3450_v53 = vrot.slane %v3349_v25, 5  ;;  %v487_v8 = vld [vmem:[%s4810_s28 + $0x98] sm:$0x1]  ;;  %v1284_v13 = vld [vmem:[#allocation2 + $0x78] sm:$0xe] }
  0x72   : > { %v4341_v55 = vcombine.low %v1010_v43, %v1020_v50  ;;  %v813_v56 = vrot.slane %v812_v44, 4  ;;  %v823_v57 = vrot.slane %v822_v45, 4  ;;  %v3453_v58 = vrot.slane %v3350_v31, 5  ;;  %537 = vst.msk [vmem:[#allocation2 + $0x98] sm:$0x1] %vm500_vm1, %v487_v8 }
  0x73   : > { %v3510_v61 = vsel %vm4853_vm4, %v3508_v52, %v3509_v41  ;;  %v3451_v62 = vsel %vm4853_vm4, %v4476_v46, %v3450_v53  ;;  %v3452_v63 = vrot.slane %v3450_v53, 4  ;;  %v1022_v0 = vshrl.u32 %v739_v36, 16  ;;  %v463_v14 = vld [vmem:[%s4810_s28 + $0x38] sm:$0x1]  ;;  %v1285_v19 = vld [vmem:[#allocation2 + $0x7c] sm:$0xf] }
  0x74   : > { %1209 = vrot.lane.b32.xlu1 %v4341_v55, %s4742_s7  ;;  %v818_v3 = vsel %vm4890_vm7, %v813_v56, %v817_v34  ;;  %v828_v4 = vsel %vm4890_vm7, %v823_v57, %v827_v39  ;;  %v4500_v5 = vcombine.low %v3507_v51, %v3510_v61  ;;  %v1025_v6 = vshll.u32 %v739_v36, 16  ;;  %v1286_v20 = vld [vmem:[#allocation2 + $0x80] sm:$0x1]  ;;  %513 = vst.msk [vmem:[#allocation2 + $0x38] sm:$0x1] %vm500_vm1, %v463_v14  ;;  %v4695_v14 = vld [vmem:[%s5901_s3 + $0x10] sm:$0xff]  }
  0x75   : > { %v4333_v9 = vcombine.low %v818_v3, %v828_v4  ;;  %v3454_v10 = vsel %vm4853_vm4, %v3452_v63, %v3453_v58  ;;  %v1024_v11 = vrot.slane %v1022_v0, 4  ;;  %v1031_v12 = vshll.u32 %v740_v54, 16  ;;  %v1260_v26 = vld [vmem:[#allocation2 + $0x18] sm:$0xe]  ;;  %v1261_v32 = vld [vmem:[#allocation2 + $0x1c] sm:$0xf]  ;;  %4578 = vmatprep.subr.bf16.mxu0 %v4695_v14  ;;  %4618 = vmatprep.subr.bf16.mxu1 %v4695_v14 }
  0x76   : > { %v4492_v15 = vcombine.low %v3451_v62, %v3454_v10  ;;  %v1027_v16 = vrot.slane %v1025_v6, 5  ;;  %v1035_v17 = vshrl.u32 %v740_v54, 16  ;;  %v1041_v18 = vshll.u32 %v741_v59, 16  ;;  %v1262_v41 = vld [vmem:[#allocation2 + $0x20] sm:$0x1]  ;;  %4579 = vmatpush3.bf16.msra.mxu0 %v4695_v14  ;;  %4623 = vmatpush3.bf16.msra.mxu1 %v4695_v14  ;;  %v4674_v14 = vld [vmem:[#allocation2 + $0x30] sm:$0xff]  }
  0x77   : > { %1193 = vrot.lane.b32.xlu0 %v4333_v9, %s4742_s7  ;;  %v1033_v22 = vrot.slane %v1031_v12, 5  ;;  %v830_v23 = vshrl.u32 %v715_v1, 16  ;;  %v833_v24 = vshll.u32 %v715_v1, 16  ;;  %v839_v25 = vshll.u32 %v716_v2, 16  ;;  %v1287_v46 = vld [vmem:[#allocation2 + $0x84] sm:$0xe] }
  0x78   : > { %3619 = vrot.lane.b32.xlu1 %v4500_v5, %s4747_s12  ;;  %v1028_v27 = vor.u32 %v1027_v16, %v1024_v11  ;;  %v1037_v28 = vrot.slane %v1035_v17, 4  ;;  %v1043_v29 = vrot.slane %v1041_v18, 5  ;;  %v843_v31 = vshrl.u32 %v716_v2, 16  ;;  %v1288_v51 = vld [vmem:[#allocation2 + $0x88] sm:$0xf] }
  0x79   : > { %v832_v33 = vrot.slane %v830_v23, 4  ;;  %v835_v34 = vrot.slane %v833_v24, 5  ;;  %v841_v35 = vrot.slane %v839_v25, 5  ;;  %v849_v36 = vshll.u32 %v717_v7, 16  ;;  %v1289_v52 = vld [vmem:[#allocation2 + $0x8c] sm:$0x1] }
  0x7a   : > { %v1029_v37 = vrot.slane %v1028_v27, 4  ;;  %v1038_v38 = vor.u32 %v1037_v28, %v1033_v22  ;;  %v845_v39 = vrot.slane %v843_v31, 4  ;;  %v4357_v40 = vrot.slane %v1284_v13, 9  ;;  %v1263_v57 = vld [vmem:[#allocation2 + $0x24] sm:$0xe] }
  0x7b   : > { %3603 = vrot.lane.b32.xlu0 %v4492_v15, %s4747_s12  ;;  %v836_v42 = vor.u32 %v835_v34, %v832_v33  ;;  %v851_v43 = vrot.slane %v849_v36, 5  ;;  %v1425_v44 = vrot.slane %v1285_v19, 5  ;;  %v1428_v45 = vrot.slane %v1286_v20, 5  ;;  %v1264_v62 = vld [vmem:[#allocation2 + $0x28] sm:$0xf]  ;;  %v4696_v34 = vld [vmem:[%s5901_s3 + $0x18] sm:$0xff]  }
  0x7c   : > { %v1034_v47 = vsel %vm4890_vm7, %v1029_v37, %v1033_v22  ;;  %v1039_v48 = vrot.slane %v1038_v38, 4  ;;  %v846_v49 = vor.u32 %v845_v39, %v841_v35  ;;  %v4349_v50 = vrot.slane %v1260_v26, 9  ;;  %v1265_v3 = vld [vmem:[#allocation2 + $0x2c] sm:$0x1]  ;;  %v1786_v8 = vld [vmem:[#allocation2 + $0x84] sm:$0xf]  ;;  %4580 = vmatprep.subr.bf16.mxu0 %v4696_v34  ;;  %4619 = vmatprep.subr.bf16.mxu1 %v4696_v34 }
  0x7d   : > { %v837_v53 = vrot.slane %v836_v42, 4  ;;  %v1426_v54 = vsel %vm4853_vm4, %v4357_v40, %v1425_v44  ;;  %v1427_v55 = vrot.slane %v1425_v44, 4  ;;  %v1369_v56 = vrot.slane %v1261_v32, 5  ;;  %v1787_v13 = vld [vmem:[#allocation2 + $0x88] sm:$0xf]  ;;  %4581 = vmatpush3.bf16.msra.mxu0 %v4696_v34  ;;  %4624 = vmatpush3.bf16.msra.mxu1 %v4696_v34 }
  0x7e   : > { %v1044_v58 = vsel %vm4890_vm7, %v1039_v48, %v1043_v29  ;;  %v847_v59 = vrot.slane %v846_v49, 4  ;;  %v1372_v60 = vrot.slane %v1262_v41, 5  ;;  %v4358_v61 = vrot.slane %v1287_v46, 9  ;;  %v1788_v19 = vld [vmem:[#allocation2 + $0x8c] sm:$0x1]  ;;  %v4671_v44 = vld [vmem:[#allocation2 + $0x84] sm:$0xff]  }
  0x7f   : > { %v4342_v63 = vcombine.low %v1034_v47, %v1044_v58  ;;  %v842_v0 = vsel %vm4890_vm7, %v837_v53, %v841_v35  ;;  %v1429_v1 = vsel %vm4853_vm4, %v1427_v55, %v1428_v45  ;;  %v1370_v2 = vsel %vm4853_vm4, %v4349_v50, %v1369_v56  ;;  %v1762_v20 = vld [vmem:[#allocation2 + $0x24] sm:$0xf]  ;;  %v1763_v26 = vld [vmem:[#allocation2 + $0x28] sm:$0xf]  ;;  %v1764_v27 = vld [vmem:[#allocation2 + $0x2c] sm:$0x1] }
  0x80   : > { %v852_v4 = vsel %vm4890_vm7, %v847_v59, %v851_v43  ;;  %v4373_v5 = vcombine.low %v1426_v54, %v1429_v1  ;;  %v1371_v6 = vrot.slane %v1369_v56, 4  ;;  %v1432_v7 = vrot.slane %v1288_v51, 5  ;;  %v5058_v33 = vld [vmem:[#allocation2 + $0x90] sm:$0xf]  ;;  %v1790_v43 = vld [vmem:[#allocation2 + $0x94] sm:$0xf] }
  0x81   : > { %1211 = vrot.lane.b32.xlu1 %v4342_v63, %s4742_s7  ;;  %v4334_v9 = vcombine.low %v842_v0, %v852_v4  ;;  %v1435_v10 = vrot.slane %v1289_v52, 5  ;;  %v4350_v11 = vrot.slane %v1263_v57, 9  ;;  %v1376_v12 = vrot.slane %v1264_v62, 5  ;;  %v488_v53 = vld [vmem:[%s4810_s28 + $0x9c] sm:$0xf] }
  0x82   : > { %v1373_v15 = vsel %vm4853_vm4, %v1371_v6, %v1372_v60  ;;  %v1433_v16 = vsel %vm4853_vm4, %v4358_v61, %v1432_v7  ;;  %v1434_v17 = vrot.slane %v1432_v7, 4  ;;  %v1379_v18 = vrot.slane %v1265_v3, 5  ;;  %v489_v54 = vld [vmem:[%s4810_s28 + $0xa0] sm:$0xf]  ;;  %v1791_v58 = vld [vmem:[#allocation2 + $0x98] sm:$0x1] }
  0x83   : > { %1195 = vrot.lane.b32.xlu0 %v4334_v9, %s4742_s7  ;;  %v4365_v22 = vcombine.low %v1370_v2, %v1373_v15  ;;  %v1377_v23 = vsel %vm4853_vm4, %v4350_v11, %v1376_v12  ;;  %v1378_v24 = vrot.slane %v1376_v12, 4  ;;  %v2045_v25 = vshrl.u32 %v1786_v8, 16  ;;  %538 = vst.msk [vmem:[#allocation2 + $0x9c] sm:$0xf] %vm497_vm0, %v488_v53  ;;  %539 = vst.msk [vmem:[#allocation2 + $0xa0] sm:$0xf] %vm497_vm0, %v489_v54 }
  0x84   : > { %v1436_v28 = vsel %vm4853_vm4, %v1434_v17, %v1435_v10  ;;  %v2048_v29 = vshll.u32 %v1786_v8, 16  ;;  %v2054_v31 = vshll.u32 %v1787_v13, 16  ;;  %v2058_v32 = vshrl.u32 %v1787_v13, 16  ;;  %v464_v60 = vld [vmem:[%s4810_s28 + $0x3c] sm:$0xf]  ;;  %v4672_v2 = vld [vmem:[#allocation2 + $0x24] sm:$0xff]  }
  0x85   : > { %1533 = vrot.lane.b32.xlu1 %v4373_v5, %s4741_s30  ;;  %v4374_v35 = vcombine.low %v1433_v16, %v1436_v28  ;;  %v1380_v36 = vsel %vm4853_vm4, %v1378_v24, %v1379_v18  ;;  %v2047_v37 = vrot.slane %v2045_v25, 4  ;;  %v2064_v38 = vshll.u32 %v1788_v19, 16  ;;  %v465_v1 = vld [vmem:[%s4810_s28 + $0x40] sm:$0xf]  ;;  %514 = vst.msk [vmem:[#allocation2 + $0x3c] sm:$0xf] %vm497_vm0, %v464_v60 }
  0x86   : > { %v4366_v39 = vcombine.low %v1377_v23, %v1380_v36  ;;  %v2050_v40 = vrot.slane %v2048_v29, 5  ;;  %v2056_v41 = vrot.slane %v2054_v31, 5  ;;  %v2060_v42 = vrot.slane %v2058_v32, 4  ;;  %v1765_v7 = vld [vmem:[#allocation2 + $0x30] sm:$0xf] }
  0x87   : > { %1517 = vrot.lane.b32.xlu0 %v4365_v22, %s4741_s30  ;;  %v2066_v45 = vrot.slane %v2064_v38, 5  ;;  %v1853_v46 = vshrl.u32 %v1762_v20, 16  ;;  %v1856_v47 = vshll.u32 %v1762_v20, 16  ;;  %v1862_v48 = vshll.u32 %v1763_v26, 16  ;;  %515 = vst.msk [vmem:[#allocation2 + $0x40] sm:$0xf] %vm497_vm0, %v465_v1 }
  0x88   : > { %v2051_v49 = vor.u32 %v2050_v40, %v2047_v37  ;;  %v2061_v50 = vor.u32 %v2060_v42, %v2056_v41  ;;  %v1866_v51 = vshrl.u32 %v1763_v26, 16  ;;  %v1872_v52 = vshll.u32 %v1764_v27, 16  ;;  %v4673_v8 = vld [vmem:[#allocation2 + $0x90] sm:$0xff]   ;;  %v1767_v19 = vld [vmem:[#allocation2 + $0x38] sm:$0x1] }
  0x89   : > { %1535 = vrot.lane.b32.xlu1 %v4374_v35, %s4741_s30  ;;  %v1855_v55 = vrot.slane %v1853_v46, 4  ;;  %v1858_v56 = vrot.slane %v1856_v47, 5  ;;  %v1864_v57 = vrot.slane %v1862_v48, 5  ;;  %v2069_v59 = vshrl.u32 %v5058_v33, 16  ;;  %v1766_v13 = vld [vmem:[#allocation2 + $0x34] sm:$0xf] }
  0x8a   : > { %v2052_v61 = vrot.slane %v2051_v49, 4  ;;  %v2062_v62 = vrot.slane %v2061_v50, 4  ;;  %v1868_v63 = vrot.slane %v1866_v51, 4  ;;  %v1874_v0 = vrot.slane %v1872_v52, 5  ;;  %v2331_v20 = vld [vmem:[#allocation2 + $0x84] sm:$0xe] }
  0x8b   : > { %1519 = vrot.lane.b32.xlu0 %v4366_v39, %s4741_s30  ;;  %v1859_v3 = vor.u32 %v1858_v56, %v1855_v55  ;;  %v2071_v4 = vrot.slane %v2069_v59, 4  ;;  %v2072_v5 = vshll.u32 %v5058_v33, 16  ;;  %v2078_v6 = vshll.u32 %v1790_v43, 16  ;;  %v2332_v26 = vld [vmem:[#allocation2 + $0x88] sm:$0xf] }
  0x8c   : > { %v2057_v9 = vsel %vm4890_vm7, %v2052_v61, %v2056_v41  ;;  %v2067_v10 = vsel %vm4890_vm7, %v2062_v62, %v2066_v45  ;;  %v1869_v11 = vor.u32 %v1868_v63, %v1864_v57  ;;  %v2082_v12 = vshrl.u32 %v1790_v43, 16  ;;  %v2333_v27 = vld [vmem:[#allocation2 + $0x8c] sm:$0x1]  ;;  %v2307_v33 = vld [vmem:[#allocation2 + $0x24] sm:$0xe] }
  0x8d   : > { %1711 = vrot.lane.b32.xlu1 %v4671_v44, %s4740_s29  ;;  %v4405_v15 = vcombine.low %v2057_v9, %v2067_v10  ;;  %v1860_v16 = vrot.slane %v1859_v3, 4  ;;  %v2074_v17 = vrot.slane %v2072_v5, 5  ;;  %v2080_v18 = vrot.slane %v2078_v6, 5  ;;  %v490_v34 = vld [vmem:[%s4810_s28 + $0xa4] sm:$0x1] }
  0x8e   : > { %v1870_v22 = vrot.slane %v1869_v11, 4  ;;  %v2084_v23 = vrot.slane %v2082_v12, 4  ;;  %v2088_v24 = vshll.u32 %v1791_v58, 16  ;;  %v1877_v25 = vshrl.u32 %v1765_v7, 16  ;;  %540 = vst.msk [vmem:[#allocation2 + $0xa4] sm:$0x1] %vm500_vm1, %v490_v34 }
  0x8f   : > { %1695 = vrot.lane.b32.xlu0 %v4672_v2, %s4740_s29  ;;  %v1865_v28 = vsel %vm4890_vm7, %v1860_v16, %v1864_v57  ;;  %v2075_v29 = vor.u32 %v2074_v17, %v2071_v4  ;;  %v1880_v31 = vshll.u32 %v1765_v7, 16  ;;  %v1886_v32 = vshll.u32 %v1766_v13, 16  ;;  %v2308_v43 = vld [vmem:[#allocation2 + $0x28] sm:$0xf]  ;;  %v2309_v44 = vld [vmem:[#allocation2 + $0x2c] sm:$0x1] }
  0x90   : > { %v1875_v35 = vsel %vm4890_vm7, %v1870_v22, %v1874_v0  ;;  %v2085_v36 = vor.u32 %v2084_v23, %v2080_v18  ;;  %v2090_v37 = vrot.slane %v2088_v24, 5  ;;  %v1879_v38 = vrot.slane %v1877_v25, 4  ;;  %v2334_v53 = vld [vmem:[#allocation2 + $0x90] sm:$0xe]  ;;  %v2335_v54 = vld [vmem:[#allocation2 + $0x94] sm:$0xf] }
  0x91   : > { %1713 = vrot.lane.b32.xlu1 %v4673_v8, %s4740_s29  ;;  %v4397_v39 = vcombine.low %v1865_v28, %v1875_v35  ;;  %v2076_v40 = vrot.slane %v2075_v29, 4  ;;  %v1882_v41 = vrot.slane %v1880_v31, 5  ;;  %v1888_v42 = vrot.slane %v1886_v32, 5  ;;  %v2336_v59 = vld [vmem:[#allocation2 + $0x98] sm:$0x1] }
  0x92   : > { %v2086_v45 = vrot.slane %v2085_v36, 4  ;;  %v1890_v46 = vshrl.u32 %v1766_v13, 16  ;;  %v1896_v47 = vshll.u32 %v1767_v19, 16  ;;  %v4421_v48 = vrot.slane %v2331_v20, 9  ;;  %v2310_v0 = vld [vmem:[#allocation2 + $0x30] sm:$0xe] }
  0x93   : > { %1697 = vrot.lane.b32.xlu0 %v4674_v14, %s4740_s29  ;;  %v2081_v49 = vsel %vm4890_vm7, %v2076_v40, %v2080_v18  ;;  %v1883_v50 = vor.u32 %v1882_v41, %v1879_v38  ;;  %v2469_v51 = vrot.slane %v2332_v26, 5  ;;  %v2472_v52 = vrot.slane %v2333_v27, 5  ;;  %v466_v1 = vld [vmem:[%s4810_s28 + $0x44] sm:$0x1]  ;;  %v2311_v6 = vld [vmem:[#allocation2 + $0x34] sm:$0xf] }
  0x94   : > { %v2091_v55 = vsel %vm4890_vm7, %v2086_v45, %v2090_v37  ;;  %v1892_v56 = vrot.slane %v1890_v46, 4  ;;  %v1898_v57 = vrot.slane %v1896_v47, 5  ;;  %v4413_v58 = vrot.slane %v2307_v33, 9  ;;  %516 = vst.msk [vmem:[#allocation2 + $0x44] sm:$0x1] %vm500_vm1, %v466_v1  ;;  %v5109_v17 = vpop.permute.xlu1 %1707 }
  0x95   : > { %2256 = vrot.lane.b32.xlu1 %v4405_v15, %s4743_s8  ;;  %v4406_v60 = vcombine.low %v2081_v49, %v2091_v55  ;;  %v1884_v61 = vrot.slane %v1883_v50, 4  ;;  %v2470_v62 = vsel %vm4853_vm4, %v4421_v48, %v2469_v51  ;;  %v2471_v63 = vrot.slane %v2469_v51, 4  ;;  %v2312_v11 = vld [vmem:[#allocation2 + $0x38] sm:$0x1]  ;;  %v2830_v12 = vld [vmem:[#allocation2 + $0x90] sm:$0xf]  ;;  %v5122_v36 = vpop.permute.xlu0 %1691 }
  0x96   : > { %v1893_v2 = vor.u32 %v1892_v56, %v1888_v42  ;;  %v2413_v3 = vrot.slane %v2308_v43, 5  ;;  %v2416_v4 = vrot.slane %v2309_v44, 5  ;;  %v4422_v5 = vrot.slane %v2334_v53, 9  ;;  %v2831_v23 = vld [vmem:[#allocation2 + $0x94] sm:$0xf] }
  0x97   : > { %2240 = vrot.lane.b32.xlu0 %v4397_v39, %s4743_s8  ;;  %v1889_v7 = vsel %vm4890_vm7, %v1884_v61, %v1888_v42  ;;  %v2473_v8 = vsel %vm4853_vm4, %v2471_v63, %v2472_v52  ;;  %v2476_v9 = vrot.slane %v2335_v54, 5  ;;  %v2479_v10 = vrot.slane %v2336_v59, 5  ;;  %v2832_v27 = vld [vmem:[#allocation2 + $0x98] sm:$0x1]  ;;  %v2806_v29 = vld [vmem:[#allocation2 + $0x30] sm:$0xf] }
  0x98   : > { %v1894_v13 = vrot.slane %v1893_v2, 4  ;;  %v4437_v14 = vcombine.low %v2470_v62, %v2473_v8  ;;  %v2414_v15 = vsel %vm4853_vm4, %v4413_v58, %v2413_v3  ;;  %v2415_v16 = vrot.slane %v2413_v3, 4  ;;  %v2807_v35 = vld [vmem:[#allocation2 + $0x34] sm:$0xf]  ;;  %v2808_v44 = vld [vmem:[#allocation2 + $0x38] sm:$0x1]  ;;  %v5128_v51 = vpop.permute.xlu1 %1709 }
  0x99   : > { %2258 = vrot.lane.b32.xlu1 %v4406_v60, %s4743_s8  ;;  %v2477_v18 = vsel %vm4853_vm4, %v4422_v5, %v2476_v9  ;;  %v2478_v19 = vrot.slane %v2476_v9, 4  ;;  %v4414_v20 = vrot.slane %v2310_v0, 9  ;;  %v2420_v22 = vrot.slane %v2311_v6, 5  ;;  %v2833_v50 = vld [vmem:[#allocation2 + $0x9c] sm:$0xf]  ;;  %v4675_v61 = vld [vmem:[#allocation2 + $0x90] sm:$0xff]   ;;  %v5132_v2 = vpop.permute.xlu0 %1693 }
  0x9a   : > { %v1899_v24 = vsel %vm4890_vm7, %v1894_v13, %v1898_v57  ;;  %v2417_v25 = vsel %vm4853_vm4, %v2415_v16, %v2416_v4  ;;  %v2423_v26 = vrot.slane %v2312_v11, 5  ;;  %v3089_v28 = vshrl.u32 %v2830_v12, 16  ;;  %v2834_v56 = vld [vmem:[#allocation2 + $0xa0] sm:$0xf]  ;;  %v2835_v5 = vld [vmem:[#allocation2 + $0xa4] sm:$0x1] }
  0x9b   : > { %v4398_v31 = vcombine.low %v1889_v7, %v1899_v24  ;;  %v4429_v32 = vcombine.low %v2414_v15, %v2417_v25  ;;  %v2480_v33 = vsel %vm4853_vm4, %v2478_v19, %v2479_v10  ;;  %v2421_v34 = vsel %vm4853_vm4, %v4414_v20, %v2420_v22  ;;  %v4676_v8 = vld [vmem:[#allocation2 + $0x30] sm:$0xff]   ;;  %v2809_v13 = vld [vmem:[#allocation2 + $0x3c] sm:$0xf]  ;;  %v2810_v20 = vld [vmem:[#allocation2 + $0x40] sm:$0xf] }
  0x9c   : > { %v4438_v37 = vcombine.low %v2477_v18, %v2480_v33  ;;  %v2422_v38 = vrot.slane %v2420_v22, 4  ;;  %v3091_v39 = vrot.slane %v3089_v28, 4  ;;  %v3092_v40 = vshll.u32 %v2830_v12, 16  ;;  %v5136_v22 = vpop.permute.xlu1 %1529  ;;  %v3375_v33 = vld [vmem:[#allocation2 + $0x90] sm:$0xe] }
  0x9d   : > { %2242 = vrot.lane.b32.xlu0 %v4398_v31, %s4743_s8  ;;  %2577 = vrot.lane.b32.xlu1 %v4437_v14, %s4744_s9  ;;  %v3098_v41 = vshll.u32 %v2831_v23, 16  ;;  %v3102_v42 = vshrl.u32 %v2831_v23, 16  ;;  %v3108_v43 = vshll.u32 %v2832_v27, 16  ;;  %v2897_v45 = vshrl.u32 %v2806_v29, 16  ;;  %v4677_v14 = vld [vmem:[#allocation2 + $0x9c] sm:$0xff]  }
  0x9e   : > { %v2424_v46 = vsel %vm4853_vm4, %v2422_v38, %v2423_v26  ;;  %v3094_v47 = vrot.slane %v3092_v40, 5  ;;  %v2900_v48 = vshll.u32 %v2806_v29, 16  ;;  %v2906_v49 = vshll.u32 %v2807_v35, 16  ;;  %v2811_v27 = vld [vmem:[#allocation2 + $0x44] sm:$0x1] }
  0x9f   : > { %v4430_v52 = vcombine.low %v2421_v34, %v2424_v46  ;;  %v3100_v53 = vrot.slane %v3098_v41, 5  ;;  %v3104_v54 = vrot.slane %v3102_v42, 4  ;;  %v3110_v55 = vrot.slane %v3108_v43, 5  ;;  %v4678_v34 = vld [vmem:[#allocation2 + $0x3c] sm:$0xff]   ;;  %v3376_v40 = vld [vmem:[#allocation2 + $0x94] sm:$0xf]  ;;  %v5144_v41 = vpop.permute.xlu0 %1513 }
  0xa0   : > { %v3095_v57 = vor.u32 %v3094_v47, %v3091_v39  ;;  %v2899_v58 = vrot.slane %v2897_v45, 4  ;;  %v2902_v59 = vrot.slane %v2900_v48, 5  ;;  %v2908_v60 = vrot.slane %v2906_v49, 5  ;;  %v3377_v46 = vld [vmem:[#allocation2 + $0x98] sm:$0x1] }
  0xa1   : > { %2561 = vrot.lane.b32.xlu0 %v4429_v32, %s4744_s9  ;;  %2579 = vrot.lane.b32.xlu1 %v4438_v37, %s4744_s9  ;;  %v3105_v62 = vor.u32 %v3104_v54, %v3100_v53  ;;  %v2910_v63 = vshrl.u32 %v2807_v35, 16  ;;  %v2916_v0 = vshll.u32 %v2808_v44, 16  ;;  %v3113_v1 = vshrl.u32 %v2833_v50, 16 }
  0xa2   : > { %v3096_v3 = vrot.slane %v3095_v57, 4  ;;  %v2903_v4 = vor.u32 %v2902_v59, %v2899_v58  ;;  %v3116_v6 = vshll.u32 %v2833_v50, 16  ;;  %v3122_v7 = vshll.u32 %v2834_v56, 16  ;;  %v3353_v58 = vld [vmem:[#allocation2 + $0x38] sm:$0x1] }
  0xa3   : > { %v3106_v9 = vrot.slane %v3105_v62, 4  ;;  %v2912_v10 = vrot.slane %v2910_v63, 4  ;;  %v2918_v11 = vrot.slane %v2916_v0, 5  ;;  %v3115_v12 = vrot.slane %v3113_v1, 4  ;;  %v742_v59 = vld [vmem:[#allocation2 + $0x90] sm:$0xf] }
  0xa4   : > { %v3101_v15 = vsel %vm4890_vm7, %v3096_v3, %v3100_v53  ;;  %v2904_v16 = vrot.slane %v2903_v4, 4  ;;  %v3118_v18 = vrot.slane %v3116_v6, 5  ;;  %v3124_v19 = vrot.slane %v3122_v7, 5  ;;  %v3352_v53 = vld [vmem:[#allocation2 + $0x34] sm:$0xf] }
  0xa5   : > { %2563 = vrot.lane.b32.xlu0 %v4430_v52, %s4744_s9  ;;  %2755 = vrot.lane.b32.xlu1 %v4675_v61, %s4745_s10  ;;  %v3111_v23 = vsel %vm4890_vm7, %v3106_v9, %v3110_v55  ;;  %v2913_v24 = vor.u32 %v2912_v10, %v2908_v60  ;;  %v3126_v25 = vshrl.u32 %v2834_v56, 16  ;;  %v3132_v26 = vshll.u32 %v2835_v5, 16  ;;  %v3351_v52 = vld [vmem:[#allocation2 + $0x30] sm:$0xe]  ;;  %v743_v1 = vld [vmem:[#allocation2 + $0x94] sm:$0xf] }
  0xa6   : > { %v4469_v28 = vcombine.low %v3101_v15, %v3111_v23  ;;  %v2909_v29 = vsel %vm4890_vm7, %v2904_v16, %v2908_v60  ;;  %v3119_v31 = vor.u32 %v3118_v18, %v3115_v12  ;;  %v2921_v32 = vshrl.u32 %v2809_v13, 16  ;;  %v5152_v60 = vpop.permute.xlu1 %1531 }
  0xa7   : > { %v2914_v35 = vrot.slane %v2913_v24, 4  ;;  %v3128_v37 = vrot.slane %v3126_v25, 4  ;;  %v3134_v38 = vrot.slane %v3132_v26, 5  ;;  %v2924_v39 = vshll.u32 %v2809_v13, 16 }
  0xa8   : > { %v3120_v42 = vrot.slane %v3119_v31, 4  ;;  %v2923_v43 = vrot.slane %v2921_v32, 4  ;;  %v2930_v44 = vshll.u32 %v2810_v20, 16  ;;  %v2934_v45 = vshrl.u32 %v2810_v20, 16  ;;  %v744_v20 = vld [vmem:[#allocation2 + $0x98] sm:$0x1] }
  0xa9   : > { %2739 = vrot.lane.b32.xlu0 %v4676_v8, %s4745_s10  ;;  %2757 = vrot.lane.b32.xlu1 %v4677_v14, %s4745_s10  ;;  %v2919_v47 = vsel %vm4890_vm7, %v2914_v35, %v2918_v11  ;;  %v3129_v48 = vor.u32 %v3128_v37, %v3124_v19  ;;  %v2926_v49 = vrot.slane %v2924_v39, 5  ;;  %v2940_v50 = vshll.u32 %v2811_v27, 16  ;;  %v5158_v11 = vpop.permute.xlu0 %1515  ;;  %v720_v37 = vld [vmem:[#allocation2 + $0x38] sm:$0x1] }
  0xaa   : > { %v4461_v54 = vcombine.low %v2909_v29, %v2919_v47  ;;  %v3125_v55 = vsel %vm4890_vm7, %v3120_v42, %v3124_v19  ;;  %v2932_v56 = vrot.slane %v2930_v44, 5  ;;  %v2936_v57 = vrot.slane %v2934_v45, 4  ;;  %v719_v29 = vld [vmem:[#allocation2 + $0x34] sm:$0xf]  ;;  %v5172_v31 = vpop.permute.xlu1 %1191 }
  0xab   : > { %v3130_v61 = vrot.slane %v3129_v48, 4  ;;  %v2927_v62 = vor.u32 %v2926_v49, %v2923_v43  ;;  %v2942_v63 = vrot.slane %v2940_v50, 5  ;;  %v4485_v0 = vrot.slane %v3375_v33, 9  ;;  %v3378_v43 = vld [vmem:[#allocation2 + $0x9c] sm:$0xe] }
  0xac   : > { %v2937_v3 = vor.u32 %v2936_v57, %v2932_v56  ;;  %v3513_v4 = vrot.slane %v3376_v40, 5  ;;  %v3516_v5 = vrot.slane %v3377_v46, 5  ;;  %v4477_v6 = vrot.slane %v3351_v52, 9  ;;  %v3379_v48 = vld [vmem:[#allocation2 + $0xa0] sm:$0xf] }
  0xad   : > { %2741 = vrot.lane.b32.xlu0 %v4678_v34, %s4745_s10  ;;  %3300 = vrot.lane.b32.xlu1 %v4469_v28, %s4746_s11  ;;  %v3135_v7 = vsel %vm4890_vm7, %v3130_v61, %v3134_v38  ;;  %v2928_v8 = vrot.slane %v2927_v62, 4  ;;  %v3457_v9 = vrot.slane %v3352_v53, 5  ;;  %v3460_v10 = vrot.slane %v3353_v58, 5  ;;  %v718_v28 = vld [vmem:[#allocation2 + $0x30] sm:$0xf]  ;;  %v5179_v49 = vpop.permute.xlu0 %1189 }
  0xae   : > { %v4470_v12 = vcombine.low %v3125_v55, %v3135_v7  ;;  %v2938_v13 = vrot.slane %v2937_v3, 4  ;;  %v3514_v14 = vsel %vm4853_vm4, %v4485_v0, %v3513_v4  ;;  %v3515_v15 = vrot.slane %v3513_v4, 4  ;;  %v3380_v55 = vld [vmem:[#allocation2 + $0xa4] sm:$0x1]  ;;  %v3354_v61 = vld [vmem:[#allocation2 + $0x3c] sm:$0xe] }
  0xaf   : > { %v2933_v16 = vsel %vm4890_vm7, %v2928_v8, %v2932_v56  ;;  %v5166_v18 = vsel %vm4853_vm4, %v4477_v6, %v3457_v9  ;;  %v3459_v19 = vrot.slane %v3457_v9, 4  ;;  %v1046_v23 = vshrl.u32 %v742_v59, 16  ;;  %v4679_v62 = vld [vmem:[#allocation2 + $0xc] sm:$0xff]   ;;  %v4693_v3 = vld [vmem:[#allocation2 + $0x78] sm:$0xff]   ;;  %v3355_v9 = vld [vmem:[#allocation2 + $0x40] sm:$0xf] }
  0xb0   : > { %v2943_v24 = vsel %vm4890_vm7, %v2938_v13, %v2942_v63  ;;  %v3517_v25 = vsel %vm4853_vm4, %v3515_v15, %v3516_v5  ;;  %v1049_v26 = vshll.u32 %v742_v59, 16  ;;  %v1055_v27 = vshll.u32 %v743_v1, 16  ;;  %v4680_v63 = vld [vmem:[#allocation2] sm:$0xff]   ;;  %v4681_v0 = vld [vmem:[#allocation2 + $0x6c] sm:$0xff]   ;;  %v4694_v4 = vld [vmem:[#allocation2 + $0x18] sm:$0xff]   ;;  %691 = vst.msk [vmem:[#allocation3 + $0x8] sm:$0xff] %vm689_vm8, %v4679_v62 }
  0xb1   : > { %3284 = vrot.lane.b32.xlu0 %v4461_v54, %s4746_s11  ;;  %3302 = vrot.lane.b32.xlu1 %v4470_v12, %s4746_s11  ;;  %v4462_v32 = vcombine.low %v2933_v16, %v2943_v24  ;;  %v4501_v33 = vcombine.low %v3514_v14, %v3517_v25  ;;  %v3461_v34 = vsel %vm4853_vm4, %v3459_v19, %v3460_v10  ;;  %v1048_v35 = vrot.slane %v1046_v23, 4  ;;  %v1208_v10 = vpop.permute.xlu1 %1207  ;;  %v4697_v12 = vld [vmem:[#allocation2 + $0x84] sm:$0xff]  }
  0xb2   : > { %v4493_v38 = vcombine.low %v5166_v18, %v3461_v34  ;;  %v1051_v39 = vrot.slane %v1049_v26, 5  ;;  %v1057_v40 = vrot.slane %v1055_v27, 5  ;;  %v1059_v42 = vshrl.u32 %v743_v1, 16  ;;  %v4682_v1 = vld [vmem:[#allocation2 + $0x60] sm:$0xff]   ;;  %v745_v26 = vld [vmem:[#allocation2 + $0x9c] sm:$0xf] }
  0xb3   : > { %v1065_v44 = vshll.u32 %v744_v20, 16  ;;  %v854_v45 = vshrl.u32 %v718_v28, 16  ;;  %v857_v46 = vshll.u32 %v718_v28, 16  ;;  %v863_v47 = vshll.u32 %v719_v29, 16  ;;  %v3356_v18 = vld [vmem:[#allocation2 + $0x44] sm:$0x1] }
  0xb4   : > { %v1052_v50 = vor.u32 %v1051_v39, %v1048_v35  ;;  %v1061_v52 = vrot.slane %v1059_v42, 4  ;;  %v867_v53 = vshrl.u32 %v719_v29, 16  ;;  %v873_v54 = vshll.u32 %v720_v37, 16  ;;  %v4698_v19 = vld [vmem:[#allocation2 + $0x24] sm:$0xff]   ;;  %690 = vst.msk [vmem:[#allocation3] sm:$0xff] %vm689_vm8, %v4680_v63  ;;  %699 = vst.msk [vmem:[#allocation3 + $0x48] sm:$0xff] %vm689_vm8, %v4681_v0 }
  0xb5   : > { %3286 = vrot.lane.b32.xlu0 %v4462_v32, %s4746_s11  ;;  %3621 = vrot.lane.b32.xlu1 %v4501_v33, %s4747_s12  ;;  %v1067_v56 = vrot.slane %v1065_v44, 5  ;;  %v856_v57 = vrot.slane %v854_v45, 4  ;;  %v859_v58 = vrot.slane %v857_v46, 5  ;;  %v5183_v59 = vrot.slane %v863_v47, 5  ;;  %v746_v33 = vld [vmem:[#allocation2 + $0xa0] sm:$0xf] }
  0xb6   : > { %v1053_v5 = vrot.slane %v1052_v50, 4  ;;  %v1062_v6 = vor.u32 %v1061_v52, %v1057_v40  ;;  %v869_v7 = vrot.slane %v867_v53, 4  ;;  %v875_v8 = vrot.slane %v873_v54, 5  ;;  %v747_v34 = vld [vmem:[#allocation2 + $0xa4] sm:$0x1]  ;;  %v1206_v35 = vpop.permute.xlu0 %1205  ;;  %698 = vst.msk [vmem:[#allocation3 + $0x40] sm:$0xff] %vm689_vm8, %v4682_v1 }
  0xb7   : > { %v860_v13 = vor.u32 %v859_v58, %v856_v57  ;;  %v4486_v14 = vrot.slane %v3378_v43, 9  ;;  %v3520_v15 = vrot.slane %v3379_v48, 5  ;;  %v3523_v16 = vrot.slane %v3380_v55, 5  ;;  %v491_v46 = vld [vmem:[%s4810_s28 + $0xa8] sm:$0xf]  ;;  %700 = vst.msk [vmem:[#allocation3 + $0x50] sm:$0xff] %vm689_vm8, %v4693_v3 }
  0xb8   : > { %v1058_v20 = vsel %vm4890_vm7, %v1053_v5, %v1057_v40  ;;  %v1063_v23 = vrot.slane %v1062_v6, 4  ;;  %v870_v24 = vor.u32 %v869_v7, %v5183_v59  ;;  %v4478_v25 = vrot.slane %v3354_v61, 9  ;;  %v492_v47 = vld [vmem:[%s4810_s28 + $0xac] sm:$0xf]  ;;  %v467_v48 = vld [vmem:[%s4810_s28 + $0x48] sm:$0xf] }
  0xb9   : > { %3605 = vrot.lane.b32.xlu0 %v4493_v38, %s4747_s12  ;;  %v861_v27 = vrot.slane %v860_v13, 4  ;;  %v5191_v28 = vsel %vm4853_vm4, %v4486_v14, %v3520_v15  ;;  %v3522_v29 = vrot.slane %v3520_v15, 4  ;;  %v3464_v32 = vrot.slane %v3355_v9, 5  ;;  %v5195_v38 = vld [vmem:[#allocation2 + $0x3c] sm:$0xf]  ;;  %692 = vst.msk [vmem:[#allocation3 + $0x10] sm:$0xff] %vm689_vm8, %v4694_v4 }
  0xba   : > { %v1068_v37 = vsel %vm4890_vm7, %v1063_v23, %v1067_v56  ;;  %v871_v39 = vrot.slane %v870_v24, 4  ;;  %v3467_v40 = vrot.slane %v3356_v18, 5  ;;  %701 = vst.msk [vmem:[#allocation3 + $0x58] sm:$0xff] %vm689_vm8, %v4697_v12  ;;  %693 = vst.msk [vmem:[#allocation3 + $0x18] sm:$0xff] %vm689_vm8, %v4698_v19  ;;  %v722_v54 = vld [vmem:[#allocation2 + $0x40] sm:$0xf]  ;;  %v5220_v55 = vpop.permute.xlu1 %2252 }
  0xbb   : > { %v4343_v42 = vcombine.low %v1058_v20, %v1068_v37  ;;  %v866_v43 = vsel %vm4890_vm7, %v861_v27, %v5183_v59  ;;  %v3524_v44 = vsel %vm4853_vm4, %v3522_v29, %v3523_v16  ;;  %v5204_v45 = vsel %vm4853_vm4, %v4478_v25, %v3464_v32  ;;  %541 = vst.msk [vmem:[#allocation2 + $0xa8] sm:$0xf] %vm497_vm0, %v491_v46  ;;  %v468_v56 = vld [vmem:[%s4810_s28 + $0x4c] sm:$0xf]  ;;  %v723_v61 = vld [vmem:[#allocation2 + $0x44] sm:$0x1] }
  0xbc   : > { %v876_v50 = vsel %vm4890_vm7, %v871_v39, %v875_v8  ;;  %v4502_v52 = vcombine.low %v5191_v28, %v3524_v44  ;;  %v3466_v53 = vrot.slane %v3464_v32, 4  ;;  %542 = vst.msk [vmem:[#allocation2 + $0xac] sm:$0xf] %vm497_vm0, %v492_v47  ;;  %517 = vst.msk [vmem:[#allocation2 + $0x48] sm:$0xf] %vm497_vm0, %v467_v48  ;;  %v1070_v58 = vshrl.u32 %v745_v26, 16 }
  0xbd   : > { %1213 = vrot.lane.b32.xlu1 %v4343_v42, %s4742_s7  ;;  %v4335_v57 = vcombine.low %v866_v43, %v876_v50  ;;  %1239 = vst.msk [vmem:[#allocation3 + $0x8] sm:$0xff] %vm1237_vm9, %v5172_v31  ;;  %1238 = vst.msk [vmem:[#allocation3] sm:$0xff] %vm1237_vm9, %v5179_v49  ;;  %v1073_v59 = vshll.u32 %v745_v26, 16  ;;  %v1079_v31 = vshll.u32 %v746_v33, 16  ;;  %v1083_v49 = vshrl.u32 %v746_v33, 16  ;;  %v4708_v16 = vld [vmem:[#allocation2 + $0x90] sm:$0xff]  }
  0xbe   : > { %1247 = vst.msk [vmem:[#allocation3 + $0x48] sm:$0xff] %vm1237_vm9, %v1208_v10  ;;  %1246 = vst.msk [vmem:[#allocation3 + $0x40] sm:$0xff] %vm1237_vm9, %v1206_v35  ;;  %v3468_v62 = vsel %vm4853_vm4, %v3466_v53, %v3467_v40  ;;  %v1089_v63 = vshll.u32 %v747_v34, 16  ;;  %v1290_v0 = vld [vmem:[#allocation2 + $0x90] sm:$0xe]  ;;  %v1072_v3 = vrot.slane %v1070_v58, 4 }
  0xbf   : > { %518 = vst.msk [vmem:[#allocation2 + $0x4c] sm:$0xf] %vm497_vm0, %v468_v56  ;;  %1197 = vrot.lane.b32.xlu0 %v4335_v57, %s4742_s7  ;;  %v4494_v1 = vcombine.low %v5204_v45, %v3468_v62  ;;  %v1075_v4 = vrot.slane %v1073_v59, 5  ;;  %v1291_v5 = vld [vmem:[#allocation2 + $0x94] sm:$0xf]  ;;  %v1081_v6 = vrot.slane %v1079_v31, 5 }
  0xc0   : > { %1563 = vst.msk [vmem:[#allocation3 + $0x8] sm:$0xff] %vm1561_vm10, %v5158_v11  ;;  %1562 = vst.msk [vmem:[#allocation3] sm:$0xff] %vm1561_vm10, %v5144_v41  ;;  %v878_v11 = vshrl.u32 %v5195_v38, 16  ;;  %v5247_v41 = vpop.permute.xlu0 %2236  ;;  %v1085_v7 = vrot.slane %v1083_v49, 4  ;;  %v1091_v8 = vrot.slane %v1089_v63, 5  ;;  %v887_v12 = vshll.u32 %v722_v54, 16 }
  0xc1   : > { %1571 = vst.msk [vmem:[#allocation3 + $0x48] sm:$0xff] %vm1561_vm10, %v5152_v60  ;;  %1570 = vst.msk [vmem:[#allocation3 + $0x40] sm:$0xff] %vm1561_vm10, %v5136_v22  ;;  %v881_v60 = vshll.u32 %v5195_v38, 16  ;;  %v1292_v9 = vld [vmem:[#allocation2 + $0x98] sm:$0x1]  ;;  %3623 = vrot.lane.b32.xlu1 %v4502_v52, %s4747_s12  ;;  %v1076_v22 = vor.u32 %v1075_v4, %v1072_v3  ;;  %v891_v13 = vshrl.u32 %v722_v54, 16 }
  0xc2   : > { %v880_v10 = vrot.slane %v878_v11, 4  ;;  %v1266_v14 = vld [vmem:[#allocation2 + $0x30] sm:$0xe]  ;;  %v1267_v15 = vld [vmem:[#allocation2 + $0x34] sm:$0xf]  ;;  %v1086_v18 = vor.u32 %v1085_v7, %v1081_v6  ;;  %v897_v20 = vshll.u32 %v723_v61, 16  ;;  %v5251_v25 = vpop.permute.xlu1 %2254 }
  0xc3   : > { %v883_v19 = vrot.slane %v881_v60, 5  ;;  %v4359_v23 = vrot.slane %v1290_v0, 9  ;;  %v1268_v24 = vld [vmem:[#allocation2 + $0x38] sm:$0x1]  ;;  %v493_v26 = vld [vmem:[%s4810_s28 + $0xb0] sm:$0x1]  ;;  %3607 = vrot.lane.b32.xlu0 %v4494_v1, %s4747_s12 }
  0xc4   : > { %v4709_v27 = vld [vmem:[#allocation2 + $0x30] sm:$0xff]   ;;  %v1077_v28 = vrot.slane %v1076_v22, 4  ;;  %v889_v29 = vrot.slane %v887_v12, 5  ;;  %v893_v32 = vrot.slane %v891_v13, 4  ;;  %v1439_v33 = vrot.slane %v1291_v5, 5  ;;  %702 = vst.msk [vmem:[#allocation3 + $0x60] sm:$0xff] %vm689_vm8, %v4708_v16 }
  0xc5   : > { %543 = vst.msk [vmem:[#allocation2 + $0xb0] sm:$0x1] %vm500_vm1, %v493_v26  ;;  %v1087_v34 = vrot.slane %v1086_v18, 4  ;;  %v884_v35 = vor.u32 %v883_v19, %v880_v10  ;;  %v899_v37 = vrot.slane %v897_v20, 5  ;;  %v1442_v39 = vrot.slane %v1292_v9, 5  ;;  %v2239_v46 = vpop.permute.xlu0 %2238  ;;  %v4710_v7 = vld [vmem:[#allocation2 + $0x9c] sm:$0xff]  }
  0xc6   : > { %v1293_v40 = vld [vmem:[#allocation2 + $0x9c] sm:$0xe]  ;;  %694 = vst.msk [vmem:[#allocation3 + $0x20] sm:$0xff] %vm689_vm8, %v4709_v27  ;;  %v1082_v38 = vsel %vm4890_vm7, %v1077_v28, %v1081_v6  ;;  %v894_v42 = vor.u32 %v893_v32, %v889_v29  ;;  %v1440_v43 = vsel %vm4853_vm4, %v4359_v23, %v1439_v33  ;;  %v1441_v44 = vrot.slane %v1439_v33, 4  ;;  %v1294_v45 = vld [vmem:[#allocation2 + $0xa0] sm:$0xf]  ;;  %v2574_v54 = vpop.permute.xlu1 %2573 }
  0xc7   : > { %v1092_v47 = vsel %vm4890_vm7, %v1087_v34, %v1091_v8  ;;  %v885_v48 = vrot.slane %v884_v35, 4  ;;  %v4351_v50 = vrot.slane %v1266_v14, 9  ;;  %v1383_v52 = vrot.slane %v1267_v15, 5  ;;  %v1295_v53 = vld [vmem:[#allocation2 + $0xa4] sm:$0x1]  ;;  %1748 = vst.msk [vmem:[#allocation3 + $0x40] sm:$0xff] %vm1739_vm11, %v5109_v17 }
  0xc8   : > { %v4344_v56 = vcombine.low %v1082_v38, %v1092_v47  ;;  %v895_v57 = vrot.slane %v894_v42, 4  ;;  %v1443_v58 = vsel %vm4853_vm4, %v1441_v44, %v1442_v39  ;;  %v1386_v59 = vrot.slane %v1268_v24, 5  ;;  %v1269_v61 = vld [vmem:[#allocation2 + $0x3c] sm:$0xe]  ;;  %v469_v62 = vld [vmem:[%s4810_s28 + $0x50] sm:$0x1] }
  0xc9   : > { %v890_v31 = vsel %vm4890_vm7, %v885_v48, %v889_v29  ;;  %v4375_v49 = vcombine.low %v1440_v43, %v1443_v58  ;;  %v1384_v63 = vsel %vm4853_vm4, %v4351_v50, %v1383_v52  ;;  %v1385_v0 = vrot.slane %v1383_v52, 4  ;;  %v1270_v1 = vld [vmem:[#allocation2 + $0x40] sm:$0xf]  ;;  %v1271_v3 = vld [vmem:[#allocation2 + $0x44] sm:$0x1]  ;;  %v2558_v5 = vpop.permute.xlu0 %2557  ;;  %1740 = vst.msk [vmem:[#allocation3] sm:$0xff] %vm1739_vm11, %v5122_v36 }
  0xca   : > { %519 = vst.msk [vmem:[#allocation2 + $0x50] sm:$0x1] %vm500_vm1, %v469_v62  ;;  %1215 = vrot.lane.b32.xlu1 %v4344_v56, %s4742_s7  ;;  %v900_v4 = vsel %vm4890_vm7, %v895_v57, %v899_v37  ;;  %v4360_v11 = vrot.slane %v1293_v40, 9  ;;  %v1792_v6 = vld [vmem:[#allocation2 + $0x9c] sm:$0xf]  ;;  %v1446_v9 = vrot.slane %v1294_v45, 5  ;;  %v2576_v10 = vpop.permute.xlu1 %2575 }
  0xcb   : > { %v4336_v8 = vcombine.low %v890_v31, %v900_v4  ;;  %v1387_v60 = vsel %vm4853_vm4, %v1385_v0, %v1386_v59  ;;  %1741 = vst.msk [vmem:[#allocation3 + $0x8] sm:$0xff] %vm1739_vm11, %v5132_v2  ;;  %1749 = vst.msk [vmem:[#allocation3 + $0x48] sm:$0xff] %vm1739_vm11, %v5128_v51  ;;  %v1449_v22 = vrot.slane %v1295_v53, 5  ;;  %v1793_v12 = vld [vmem:[#allocation2 + $0xa0] sm:$0xf]  ;;  %v4352_v17 = vrot.slane %v1269_v61, 9 }
  0xcc   : > { %v4367_v13 = vcombine.low %v1384_v63, %v1387_v60  ;;  %2293 = vst.msk [vmem:[#allocation3 + $0x40] sm:$0xff] %vm2284_vm12, %v5220_v55  ;;  %2285 = vst.msk [vmem:[#allocation3] sm:$0xff] %vm2284_vm12, %v5247_v41  ;;  %v1390_v14 = vrot.slane %v1270_v1, 5  ;;  %v1393_v36 = vrot.slane %v1271_v3, 5  ;;  %v1794_v51 = vld [vmem:[#allocation2 + $0xa4] sm:$0x1]  ;;  %v1447_v55 = vsel %vm4853_vm4, %v4360_v11, %v1446_v9 }
  0xcd   : > { %2294 = vst.msk [vmem:[#allocation3 + $0x48] sm:$0xff] %vm2284_vm12, %v5251_v25  ;;  %2286 = vst.msk [vmem:[#allocation3 + $0x8] sm:$0xff] %vm2284_vm12, %v2239_v46  ;;  %v4711_v2 = vld [vmem:[#allocation2 + $0x3c] sm:$0xff]   ;;  %1199 = vrot.lane.b32.xlu0 %v4336_v8, %s4742_s7  ;;  %v1448_v15 = vrot.slane %v1446_v9, 4  ;;  %v2093_v41 = vshrl.u32 %v1792_v6, 16  ;;  %v2560_v19 = vpop.permute.xlu0 %2559  ;;  %v2096_v20 = vshll.u32 %v1792_v6, 16 }
  0xce   : > { %703 = vst.msk [vmem:[#allocation3 + $0x68] sm:$0xff] %vm689_vm8, %v4710_v7  ;;  %1537 = vrot.lane.b32.xlu1 %v4375_v49, %s4741_s30  ;;  %v1391_v16 = vsel %vm4853_vm4, %v4352_v17, %v1390_v14  ;;  %v1392_v18 = vrot.slane %v1390_v14, 4  ;;  %v2102_v23 = vshll.u32 %v1793_v12, 16  ;;  %v1768_v24 = vld [vmem:[#allocation2 + $0x3c] sm:$0xf]  ;;  %695 = vst.msk [vmem:[#allocation3 + $0x28] sm:$0xff] %vm689_vm8, %v4711_v2  ;;  %v2752_v32 = vpop.permute.xlu1 %2751 }
  0xcf   : > { %2614 = vst.msk [vmem:[#allocation3 + $0x40] sm:$0xff] %vm2605_vm13, %v2574_v54  ;;  %2606 = vst.msk [vmem:[#allocation3] sm:$0xff] %vm2605_vm13, %v2558_v5  ;;  %v1450_v25 = vsel %vm4853_vm4, %v1448_v15, %v1449_v22  ;;  %v2095_v26 = vrot.slane %v2093_v41, 4  ;;  %v2106_v27 = vshrl.u32 %v1793_v12, 16  ;;  %v2112_v28 = vshll.u32 %v1794_v51, 16  ;;  %v4683_v44 = vld [vmem:[#allocation2 + $0x9c] sm:$0xff]  }
  0xd0   : > { %2615 = vst.msk [vmem:[#allocation3 + $0x48] sm:$0xff] %vm2605_vm13, %v2576_v10  ;;  %2607 = vst.msk [vmem:[#allocation3 + $0x8] sm:$0xff] %vm2605_vm13, %v2560_v19  ;;  %v1769_v29 = vld [vmem:[#allocation2 + $0x40] sm:$0xf]  ;;  %v4376_v33 = vcombine.low %v1447_v55, %v1450_v25  ;;  %v1394_v34 = vsel %vm4853_vm4, %v1392_v18, %v1393_v36  ;;  %v2098_v35 = vrot.slane %v2096_v20, 5  ;;  %v2104_v37 = vrot.slane %v2102_v23, 5 }
  0xd1   : > { %v1770_v39 = vld [vmem:[#allocation2 + $0x44] sm:$0x1]  ;;  %1521 = vrot.lane.b32.xlu0 %v4367_v13, %s4741_s30  ;;  %v4368_v40 = vcombine.low %v1391_v16, %v1394_v34  ;;  %v2108_v38 = vrot.slane %v2106_v27, 4  ;;  %v2114_v42 = vrot.slane %v2112_v28, 5  ;;  %v1901_v43 = vshrl.u32 %v1768_v24, 16  ;;  %v2736_v50 = vpop.permute.xlu0 %2735  ;;  %v4684_v53 = vld [vmem:[#allocation2 + $0x3c] sm:$0xff]  }
  0xd2   : > { %1539 = vrot.lane.b32.xlu1 %v4376_v33, %s4741_s30  ;;  %v2099_v45 = vor.u32 %v2098_v35, %v2095_v26  ;;  %v1904_v46 = vshll.u32 %v1768_v24, 16  ;;  %v1910_v47 = vshll.u32 %v1769_v29, 16  ;;  %v1914_v48 = vshrl.u32 %v1769_v29, 16  ;;  %v1795_v52 = vld [vmem:[#allocation2 + $0xa8] sm:$0xf]  ;;  %v2754_v59 = vpop.permute.xlu1 %2753  ;;  %2792 = vst.msk [vmem:[#allocation3 + $0x40] sm:$0xff] %vm2783_vm14, %v2752_v32 }
  0xd3   : > { %v2109_v54 = vor.u32 %v2108_v38, %v2104_v37  ;;  %v1903_v56 = vrot.slane %v1901_v43, 4  ;;  %v1920_v57 = vshll.u32 %v1770_v39, 16  ;;  %v1796_v58 = vld [vmem:[#allocation2 + $0xac] sm:$0xf]  ;;  %2784 = vst.msk [vmem:[#allocation3] sm:$0xff] %vm2783_vm14, %v2736_v50  ;;  %2793 = vst.msk [vmem:[#allocation3 + $0x48] sm:$0xff] %vm2783_vm14, %v2754_v59 }
  0xd4   : > { %v2100_v61 = vrot.slane %v2099_v45, 4  ;;  %v1906_v62 = vrot.slane %v1904_v46, 5  ;;  %v1912_v31 = vrot.slane %v1910_v47, 5  ;;  %v1916_v49 = vrot.slane %v1914_v48, 4  ;;  %v1771_v63 = vld [vmem:[#allocation2 + $0x48] sm:$0xf] }
  0xd5   : > { %1523 = vrot.lane.b32.xlu0 %v4368_v40, %s4741_s30  ;;  %v2110_v0 = vrot.slane %v2109_v54, 4  ;;  %v1922_v1 = vrot.slane %v1920_v57, 5  ;;  %v1797_v3 = vld [vmem:[#allocation2 + $0xb0] sm:$0x1]  ;;  %v2117_v4 = vshrl.u32 %v1795_v52, 16  ;;  %v2120_v11 = vshll.u32 %v1795_v52, 16  ;;  %v2738_v22 = vpop.permute.xlu0 %2737 }
  0xd6   : > { %v1772_v5 = vld [vmem:[#allocation2 + $0x4c] sm:$0xf]  ;;  %1715 = vrot.lane.b32.xlu1 %v4683_v44, %s4740_s29  ;;  %v2105_v7 = vsel %vm4890_vm7, %v2100_v61, %v2104_v37  ;;  %v1907_v8 = vor.u32 %v1906_v62, %v1903_v56  ;;  %v1917_v60 = vor.u32 %v1916_v49, %v1912_v31  ;;  %v2126_v9 = vshll.u32 %v1796_v58, 16  ;;  %2785 = vst.msk [vmem:[#allocation3 + $0x8] sm:$0xff] %vm2783_vm14, %v2738_v22  ;;  %v5320_v14 = vpop.permute.xlu1 %3296  ;;  %v1773_v15 = vld [vmem:[#allocation2 + $0x50] sm:$0x1] }
  0xd7   : > { %v4685_v6 = vld [vmem:[#allocation2 + $0xa8] sm:$0xff]   ;;  %v2115_v10 = vsel %vm4890_vm7, %v2110_v0, %v2114_v42  ;;  %v2119_v12 = vrot.slane %v2117_v4, 4  ;;  %v2122_v13 = vrot.slane %v2120_v11, 5  ;;  %v2130_v17 = vshrl.u32 %v1796_v58, 16  ;;  %v2337_v41 = vld [vmem:[#allocation2 + $0x9c] sm:$0xe] }
  0xd8   : > { %v4407_v36 = vcombine.low %v2105_v7, %v2115_v10  ;;  %v1908_v51 = vrot.slane %v1907_v8, 4  ;;  %v1918_v2 = vrot.slane %v1917_v60, 4  ;;  %v2128_v55 = vrot.slane %v2126_v9, 5  ;;  %v4686_v16 = vld [vmem:[#allocation2 + $0x48] sm:$0xff]   ;;  %v2338_v24 = vld [vmem:[#allocation2 + $0xa0] sm:$0xf] }
  0xd9   : > { %1699 = vrot.lane.b32.xlu0 %v4684_v53, %s4740_s29  ;;  %v2123_v18 = vor.u32 %v2122_v13, %v2119_v12  ;;  %v2132_v19 = vrot.slane %v2130_v17, 4  ;;  %v2136_v20 = vshll.u32 %v1797_v3, 16  ;;  %v1925_v23 = vshrl.u32 %v1771_v63, 16  ;;  %v5323_v25 = vld [vmem:[#allocation2 + $0xa4] sm:$0x1]  ;;  %v3281_v35 = vpop.permute.xlu0 %3280  ;;  %3337 = vst.msk [vmem:[#allocation3 + $0x40] sm:$0xff] %vm3328_vm15, %v5320_v14 }
  0xda   : > { %v494_v26 = vld [vmem:[%s4810_s28 + $0xb4] sm:$0xf]  ;;  %1717 = vrot.lane.b32.xlu1 %v4685_v6, %s4740_s29  ;;  %v1913_v27 = vsel %vm4890_vm7, %v1908_v51, %v1912_v31  ;;  %v1923_v28 = vsel %vm4890_vm7, %v1918_v2, %v1922_v1  ;;  %v1928_v29 = vshll.u32 %v1771_v63, 16  ;;  %v1934_v32 = vshll.u32 %v1772_v5, 16  ;;  %v2313_v33 = vld [vmem:[#allocation2 + $0x3c] sm:$0xe]  ;;  %v3299_v44 = vpop.permute.xlu1 %3298 }
  0xdb   : > { %v2314_v34 = vld [vmem:[#allocation2 + $0x40] sm:$0xf]  ;;  %v495_v37 = vld [vmem:[%s4810_s28 + $0xb8] sm:$0xf]  ;;  %544 = vst.msk [vmem:[#allocation2 + $0xb4] sm:$0xf] %vm497_vm0, %v494_v26  ;;  %v4399_v40 = vcombine.low %v1913_v27, %v1923_v28  ;;  %v2133_v42 = vor.u32 %v2132_v19, %v2128_v55 }
  0xdc   : > { %v470_v39 = vld [vmem:[%s4810_s28 + $0x54] sm:$0xf]  ;;  %v2124_v38 = vrot.slane %v2123_v18, 4  ;;  %v2138_v43 = vrot.slane %v2136_v20, 5  ;;  %545 = vst.msk [vmem:[#allocation2 + $0xb8] sm:$0xf] %vm497_vm0, %v495_v37 }
  0xdd   : > { %v471_v45 = vld [vmem:[%s4810_s28 + $0x58] sm:$0xf]  ;;  %520 = vst.msk [vmem:[#allocation2 + $0x54] sm:$0xf] %vm497_vm0, %v470_v39  ;;  %v1927_v46 = vrot.slane %v1925_v23, 4  ;;  %v1930_v47 = vrot.slane %v1928_v29, 5  ;;  %1701 = vrot.lane.b32.xlu0 %v4686_v16, %s4740_s29 }
  0xde   : > { %v1936_v48 = vrot.slane %v1934_v32, 5  ;;  %v1938_v50 = vshrl.u32 %v1772_v5, 16  ;;  %v2315_v52 = vld [vmem:[#allocation2 + $0x44] sm:$0x1]  ;;  %521 = vst.msk [vmem:[#allocation2 + $0x58] sm:$0xf] %vm497_vm0, %v471_v45  ;;  %v2129_v53 = vsel %vm4890_vm7, %v2124_v38, %v2128_v55  ;;  %2260 = vrot.lane.b32.xlu1 %v4407_v36, %s4743_s8  ;;  %v3618_v36 = vpop.permute.xlu1 %3617 }
  0xdf   : > { %v2134_v54 = vrot.slane %v2133_v42, 4  ;;  %v1944_v56 = vshll.u32 %v1773_v15, 16  ;;  %v4423_v57 = vrot.slane %v2337_v41, 9  ;;  %v2340_v58 = vld [vmem:[#allocation2 + $0xa8] sm:$0xe]  ;;  %v1931_v59 = vor.u32 %v1930_v47, %v1927_v46  ;;  %v3283_v9 = vpop.permute.xlu0 %3282  ;;  %3329 = vst.msk [vmem:[#allocation3] sm:$0xff] %vm3328_vm15, %v3281_v35 }
  0xe0   : > { %v1940_v61 = vrot.slane %v1938_v50, 4  ;;  %v2483_v62 = vrot.slane %v2338_v24, 5  ;;  %v2486_v31 = vrot.slane %v5323_v25, 5  ;;  %v2341_v49 = vld [vmem:[#allocation2 + $0xac] sm:$0xf]  ;;  %v4415_v1 = vrot.slane %v2313_v33, 9 }
  0xe1   : > { %v2139_v63 = vsel %vm4890_vm7, %v2134_v54, %v2138_v43  ;;  %v1946_v0 = vrot.slane %v1944_v56, 5  ;;  %v2427_v3 = vrot.slane %v2314_v34, 5  ;;  %v2342_v4 = vld [vmem:[#allocation2 + $0xb0] sm:$0x1]  ;;  %v1932_v5 = vrot.slane %v1931_v59, 4  ;;  %2244 = vrot.lane.b32.xlu0 %v4399_v40, %s4743_s8  ;;  %3338 = vst.msk [vmem:[#allocation3 + $0x48] sm:$0xff] %vm3328_vm15, %v3299_v44 }
  0xe2   : > { %v4408_v11 = vcombine.low %v2129_v53, %v2139_v63  ;;  %v1941_v6 = vor.u32 %v1940_v61, %v1936_v48  ;;  %v2484_v7 = vsel %vm4853_vm4, %v4423_v57, %v2483_v62  ;;  %v2316_v8 = vld [vmem:[#allocation2 + $0x48] sm:$0xe]  ;;  %v2317_v60 = vld [vmem:[#allocation2 + $0x4c] sm:$0xf]  ;;  %v2485_v22 = vrot.slane %v2483_v62, 4  ;;  %3330 = vst.msk [vmem:[#allocation3 + $0x8] sm:$0xff] %vm3328_vm15, %v3283_v9 }
  0xe3   : > { %v5350_v10 = vsel %vm4853_vm4, %v4415_v1, %v2427_v3  ;;  %v2429_v12 = vrot.slane %v2427_v3, 4  ;;  %v2430_v13 = vrot.slane %v2315_v52, 5  ;;  %v2318_v17 = vld [vmem:[#allocation2 + $0x50] sm:$0x1]  ;;  %v2836_v51 = vld [vmem:[#allocation2 + $0xa8] sm:$0xf]  ;;  %v1937_v2 = vsel %vm4890_vm7, %v1932_v5, %v1936_v48  ;;  %v3602_v26 = vpop.permute.xlu0 %3601 }
  0xe4   : > { %2262 = vrot.lane.b32.xlu1 %v4408_v11, %s4743_s8  ;;  %v1942_v55 = vrot.slane %v1941_v6, 4  ;;  %v4424_v15 = vrot.slane %v2340_v58, 9  ;;  %v2487_v41 = vsel %vm4853_vm4, %v2485_v22, %v2486_v31  ;;  %v2490_v18 = vrot.slane %v2341_v49, 5  ;;  %v2837_v27 = vld [vmem:[#allocation2 + $0xac] sm:$0xf]  ;;  %3658 = vst.msk [vmem:[#allocation3 + $0x40] sm:$0xff] %vm3649_vm2, %v3618_v36 }
  0xe5   : > { %v2431_v16 = vsel %vm4853_vm4, %v2429_v12, %v2430_v13  ;;  %v2493_v19 = vrot.slane %v2342_v4, 5  ;;  %v4439_v23 = vcombine.low %v2484_v7, %v2487_v41  ;;  %v4416_v25 = vrot.slane %v2316_v8, 9  ;;  %v2838_v33 = vld [vmem:[#allocation2 + $0xb0] sm:$0x1]  ;;  %v496_v34 = vld [vmem:[%s4810_s28 + $0xbc] sm:$0x1] }
  0xe6   : > { %v1947_v20 = vsel %vm4890_vm7, %v1942_v55, %v1946_v0  ;;  %v4431_v24 = vcombine.low %v5350_v10, %v2431_v16  ;;  %v2491_v14 = vsel %vm4853_vm4, %v4424_v15, %v2490_v18  ;;  %v2492_v29 = vrot.slane %v2490_v18, 4  ;;  %v2812_v40 = vld [vmem:[#allocation2 + $0x48] sm:$0xf]  ;;  %546 = vst.msk [vmem:[#allocation2 + $0xbc] sm:$0x1] %vm500_vm1, %v496_v34  ;;  %v1210_v44 = vpop.permute.xlu1 %1209  ;;  %v4691_v36 = vld [vmem:[#allocation2 + $0xb4] sm:$0xff]  }
  0xe7   : > { %v4400_v28 = vcombine.low %v1937_v2, %v1947_v20  ;;  %v2434_v32 = vrot.slane %v2317_v60, 5  ;;  %v2437_v35 = vrot.slane %v2318_v17, 5  ;;  %v3137_v37 = vshrl.u32 %v2836_v51, 16  ;;  %3650 = vst.msk [vmem:[#allocation3] sm:$0xff] %vm3649_vm2, %v3602_v26  ;;  %v2813_v46 = vld [vmem:[#allocation2 + $0x4c] sm:$0xf] }
  0xe8   : > { %2581 = vrot.lane.b32.xlu1 %v4439_v23, %s4744_s9  ;;  %v3140_v39 = vshll.u32 %v2836_v51, 16  ;;  %v2494_v38 = vsel %vm4853_vm4, %v2492_v29, %v2493_v19  ;;  %v3146_v45 = vshll.u32 %v2837_v27, 16  ;;  %v472_v47 = vld [vmem:[%s4810_s28 + $0x5c] sm:$0x1]  ;;  %1248 = vst.msk [vmem:[#allocation3 + $0x50] sm:$0xff] %vm1237_vm9, %v1210_v44  ;;  %v3150_v53 = vshrl.u32 %v2837_v27, 16 }
  0xe9   : > { %2246 = vrot.lane.b32.xlu0 %v4400_v28, %s4743_s8  ;;  %v2435_v42 = vsel %vm4853_vm4, %v4416_v25, %v2434_v32  ;;  %v2436_v43 = vrot.slane %v2434_v32, 4  ;;  %v4440_v48 = vcombine.low %v2491_v14, %v2494_v38  ;;  %v3139_v50 = vrot.slane %v3137_v37, 4  ;;  %v2814_v54 = vld [vmem:[#allocation2 + $0x50] sm:$0x1]  ;;  %522 = vst.msk [vmem:[#allocation2 + $0x5c] sm:$0x1] %vm500_vm1, %v472_v47  ;;  %v1194_v49 = vpop.permute.xlu0 %1193 }
  0xea   : > { %v3142_v52 = vrot.slane %v3140_v39, 5  ;;  %v4688_v57 = vld [vmem:[#allocation2 + $0xa8] sm:$0xff]   ;;  %v3148_v58 = vrot.slane %v3146_v45, 5  ;;  %v3156_v59 = vshll.u32 %v2838_v33, 16  ;;  %v2945_v61 = vshrl.u32 %v2812_v40, 16  ;;  %1240 = vst.msk [vmem:[#allocation3 + $0x10] sm:$0xff] %vm1237_vm9, %v1194_v49  ;;  %v3620_v7 = vpop.permute.xlu1 %3619 }
  0xeb   : > { %v2438_v56 = vsel %vm4853_vm4, %v2436_v43, %v2437_v35  ;;  %v2839_v62 = vld [vmem:[#allocation2 + $0xb4] sm:$0xf]  ;;  %v3152_v0 = vrot.slane %v3150_v53, 4  ;;  %v2948_v1 = vshll.u32 %v2812_v40, 16  ;;  %v2840_v3 = vld [vmem:[#allocation2 + $0xb8] sm:$0xf] }
  0xec   : > { %2583 = vrot.lane.b32.xlu1 %v4440_v48, %s4744_s9  ;;  %v4432_v31 = vcombine.low %v2435_v42, %v2438_v56  ;;  %v3143_v63 = vor.u32 %v3142_v52, %v3139_v50  ;;  %v3158_v4 = vrot.slane %v3156_v59, 5  ;;  %v2947_v11 = vrot.slane %v2945_v61, 4  ;;  %3659 = vst.msk [vmem:[#allocation3 + $0x48] sm:$0xff] %vm3649_vm2, %v3620_v7  ;;  %v3674_v18 = vld [vmem:[#allocation3 + $0x40] sm:$0xff]  ;;  %v4689_v19 = vld [vmem:[#allocation2 + $0x48] sm:$0xff]   ;;  %s4548_s28 = sadd.s32 192, %s4804_s25 }
  0xed   : > { %2565 = vrot.lane.b32.xlu0 %v4431_v24, %s4744_s9  ;;  %v2954_v5 = vshll.u32 %v2813_v46, 16  ;;  %v2958_v6 = vshrl.u32 %v2813_v46, 16  ;;  %v3153_v60 = vor.u32 %v3152_v0, %v3148_v58  ;;  %v2950_v9 = vrot.slane %v2948_v1, 5  ;;  %v2841_v13 = vld [vmem:[#allocation2 + $0xbc] sm:$0x1]  ;;  %v3604_v41 = vpop.permute.xlu0 %3603  ;;  %4600 = vmatprep.mubr.msk.bf16.mxu1 %vm3725_vm3, %v3674_v18  ;;  %v4692_v40 = vld [vmem:[#allocation2 + $0x54] sm:$0xff]   ;;  %s5470_s15 = scalar_lea.vmem %s5899_s1, %s4548_s28 }
  0xee   : > { %v3144_v8 = vrot.slane %v3143_v63, 4  ;;  %v2964_v22 = vshll.u32 %v2814_v54, 16  ;;  %v3161_v17 = vshrl.u32 %v2839_v62, 16  ;;  %v3666_v16 = vld [vmem:[#allocation3] sm:$0xff]  ;;  %3651 = vst.msk [vmem:[#allocation3 + $0x8] sm:$0xff] %vm3649_vm2, %v3604_v41  ;;  %v3164_v24 = vshll.u32 %v2839_v62, 16 }
  0xef   : > { %v2956_v10 = vrot.slane %v2954_v5, 5  ;;  %v2960_v12 = vrot.slane %v2958_v6, 4  ;;  %v3154_v2 = vrot.slane %v3153_v60, 4  ;;  %v2951_v55 = vor.u32 %v2950_v9, %v2947_v11  ;;  %4584 = vmatprep.mubr.msk.bf16.mxu0 %vm3725_vm3, %v3666_v16  ;;  %v2815_v26 = vld [vmem:[#allocation2 + $0x54] sm:$0xf]  ;;  %v4712_v6 = vld [vmem:[#allocation2 + $0xa8] sm:$0xff]  }
  0xf0   : > { %2759 = vrot.lane.b32.xlu1 %v4688_v57, %s4745_s10  ;;  %v3149_v51 = vsel %vm4890_vm7, %v3144_v8, %v3148_v58  ;;  %v2966_v15 = vrot.slane %v2964_v22, 5  ;;  %v3163_v23 = vrot.slane %v3161_v17, 4  ;;  %v3170_v25 = vshll.u32 %v2840_v3, 16  ;;  %v2816_v32 = vld [vmem:[#allocation2 + $0x58] sm:$0xf]  ;;  %704 = vst.msk [vmem:[#allocation3 + $0x70] sm:$0xff] %vm689_vm8, %v4712_v6 }
  0xf1   : > { %2567 = vrot.lane.b32.xlu0 %v4432_v31, %s4744_s9  ;;  %v2961_v20 = vor.u32 %v2960_v12, %v2956_v10  ;;  %v3159_v27 = vsel %vm4890_vm7, %v3154_v2, %v3158_v4  ;;  %v2952_v28 = vrot.slane %v2951_v55, 4  ;;  %v3174_v14 = vshrl.u32 %v2840_v3, 16  ;;  %v4699_v39 = vld [vmem:[%s5901_s3 + $0x20] ss:$0 sps:$4 sm:$0xff]   ;;  %v2817_v44 = vld [vmem:[#allocation2 + $0x5c] sm:$0x1] }
  0xf2   : > { %v3180_v29 = vshll.u32 %v2841_v13, 16  ;;  %v4471_v33 = vcombine.low %v3149_v51, %v3159_v27  ;;  %v3166_v35 = vrot.slane %v3164_v24, 5  ;;  %v3172_v37 = vrot.slane %v3170_v25, 5  ;;  %v3381_v52 = vld [vmem:[#allocation2 + $0xa8] sm:$0xe]  ;;  %4626 = vmatprep.subr.msk.bf16.mxu0 %vm3774_vm5, %v4699_v39  ;;  %4627 = vmatprep.subr.msk.bf16.mxu1 %vm3774_vm5, %v4699_v39 }
  0xf3   : > { %v2962_v34 = vrot.slane %v2961_v20, 4  ;;  %v2957_v38 = vsel %vm4890_vm7, %v2952_v28, %v2956_v10  ;;  %v3176_v42 = vrot.slane %v3174_v14, 4  ;;  %v2969_v45 = vshrl.u32 %v2815_v26, 16  ;;  %v3382_v53 = vld [vmem:[#allocation2 + $0xac] sm:$0xf]  ;;  %v1212_v59 = vpop.permute.xlu1 %1211  ;;  %v3675_v51 = vld [vmem:[#allocation3 + $0x48] sm:$0xff] }
  0xf4   : > { %2761 = vrot.lane.b32.xlu1 %v4691_v36, %s4745_s10  ;;  %v3182_v43 = vrot.slane %v3180_v29, 5  ;;  %v3167_v47 = vor.u32 %v3166_v35, %v3163_v23  ;;  %v2972_v48 = vshll.u32 %v2815_v26, 16  ;;  %v2978_v50 = vshll.u32 %v2816_v32, 16  ;;  %v3383_v61 = vld [vmem:[#allocation2 + $0xb0] sm:$0x1]  ;;  %1249 = vst.msk [vmem:[#allocation3 + $0x58] sm:$0xff] %vm1237_vm9, %v1212_v59 }
  0xf5   : > { %2743 = vrot.lane.b32.xlu0 %v4689_v19, %s4745_s10  ;;  %v2967_v46 = vsel %vm4890_vm7, %v2962_v34, %v2966_v15  ;;  %v3177_v56 = vor.u32 %v3176_v42, %v3172_v37  ;;  %v2971_v57 = vrot.slane %v2969_v45, 4  ;;  %v2982_v58 = vshrl.u32 %v2816_v32, 16  ;;  %v3357_v62 = vld [vmem:[#allocation2 + $0x48] sm:$0xe]  ;;  %v3358_v1 = vld [vmem:[#allocation2 + $0x4c] sm:$0xf]  ;;  %v1196_v11 = vpop.permute.xlu0 %1195 }
  0xf6   : > { %v4463_v54 = vcombine.low %v2957_v38, %v2967_v46  ;;  %v3168_v31 = vrot.slane %v3167_v47, 4  ;;  %v2974_v49 = vrot.slane %v2972_v48, 5  ;;  %v2980_v63 = vrot.slane %v2978_v50, 5  ;;  %1241 = vst.msk [vmem:[#allocation3 + $0x18] sm:$0xff] %vm1237_vm9, %v1196_v11  ;;  %v3359_v22 = vld [vmem:[#allocation2 + $0x50] sm:$0x1] }
  0xf7   : > { %v2988_v0 = vshll.u32 %v2817_v44, 16  ;;  %v3178_v3 = vrot.slane %v3177_v56, 4  ;;  %v2984_v4 = vrot.slane %v2982_v58, 4  ;;  %v4487_v5 = vrot.slane %v3381_v52, 9  ;;  %v1534_v36 = vpop.permute.xlu1 %1533  ;;  %v748_v2 = vld [vmem:[#allocation2 + $0xa8] sm:$0xf] }
  0xf8   : > { %3304 = vrot.lane.b32.xlu1 %v4471_v33, %s4746_s11  ;;  %v3173_v7 = vsel %vm4890_vm7, %v3168_v31, %v3172_v37  ;;  %v2975_v8 = vor.u32 %v2974_v49, %v2971_v57  ;;  %v3776_v9 = vsel %vm3774_vm5, %v4699_v39, 0  ;;  %v3527_v13 = vrot.slane %v3382_v53, 5  ;;  %1572 = vst.msk [vmem:[#allocation3 + $0x50] sm:$0xff] %vm1561_vm10, %v1534_v36  ;;  %v3667_v18 = vld [vmem:[#allocation3 + $0x8] sm:$0xff]  ;;  %v749_v19 = vld [vmem:[#allocation2 + $0xac] sm:$0xf] }
  0xf9   : > { %2745 = vrot.lane.b32.xlu0 %v4692_v40, %s4745_s10  ;;  %v2990_v60 = vrot.slane %v2988_v0, 5  ;;  %v3183_v10 = vsel %vm4890_vm7, %v3178_v3, %v3182_v43  ;;  %v2985_v12 = vor.u32 %v2984_v4, %v2980_v63  ;;  %4583 = vmatpush3.bf16.msra.mxu0 %v3776_v9  ;;  %v3530_v17 = vrot.slane %v3383_v61, 5  ;;  %v1518_v26 = vpop.permute.xlu0 %1517  ;;  %v750_v29 = vld [vmem:[#allocation2 + $0xb0] sm:$0x1]  ;;  %v724_v39 = vld [vmem:[#allocation2 + $0x48] sm:$0xf] }
  0xfa   : > { %v4472_v55 = vcombine.low %v3173_v7, %v3183_v10  ;;  %v2976_v15 = vrot.slane %v2975_v8, 4  ;;  %4625 = vmatpush3.bf16.msra.mxu1 %v3776_v9  ;;  %v4479_v41 = vrot.slane %v3357_v62, 9  ;;  %v3471_v16 = vrot.slane %v3358_v1, 5  ;;  %1564 = vst.msk [vmem:[#allocation3 + $0x10] sm:$0xff] %vm1561_vm10, %v1518_v26  ;;  %v725_v40 = vld [vmem:[#allocation2 + $0x4c] sm:$0xf] }
  0xfb   : > { %v2986_v20 = vrot.slane %v2985_v12, 4  ;;  %v3528_v23 = vsel %vm4853_vm4, %v4487_v5, %v3527_v13  ;;  %v3529_v24 = vrot.slane %v3527_v13, 4  ;;  %v3474_v25 = vrot.slane %v3359_v22, 5  ;;  %v1536_v38 = vpop.permute.xlu1 %1535  ;;  %v726_v46 = vld [vmem:[#allocation2 + $0x50] sm:$0x1]  ;;  %v4713_v47 = vld [vmem:[#allocation2 + $0x48] sm:$0xff]  }
  0xfc   : > { %3306 = vrot.lane.b32.xlu1 %v4472_v55, %s4746_s11  ;;  %v2981_v27 = vsel %vm4890_vm7, %v2976_v15, %v2980_v63  ;;  %v3472_v28 = vsel %vm4853_vm4, %v4479_v41, %v3471_v16  ;;  %v3473_v14 = vrot.slane %v3471_v16, 4  ;;  %v1094_v32 = vshrl.u32 %v748_v2, 16  ;;  %4585 = vmatmul.mubr.msk.bf16.vlgmr.msra.gmra.mrb[0].mxu0 %vm3725_vm3, %v3667_v18  ;;  %1573 = vst.msk [vmem:[#allocation3 + $0x58] sm:$0xff] %vm1561_vm10, %v1536_v38  ;;  %v3384_v56 = vld [vmem:[#allocation2 + $0xb4] sm:$0xe] }
  0xfd   : > { %3288 = vrot.lane.b32.xlu0 %v4463_v54, %s4746_s11  ;;  %v2991_v33 = vsel %vm4890_vm7, %v2986_v20, %v2990_v60  ;;  %v3531_v34 = vsel %vm4853_vm4, %v3529_v24, %v3530_v17  ;;  %4601 = vmatmul.mubr.msk.bf16.vlgmr.msra.gmra.mrb[0].mxu1 %vm3725_vm3, %v3675_v51  ;;  %v1097_v35 = vshll.u32 %v748_v2, 16  ;;  %v1103_v37 = vshll.u32 %v749_v19, 16  ;;  %v1520_v54 = vpop.permute.xlu0 %1519  ;;  %v3385_v57 = vld [vmem:[#allocation2 + $0xb8] sm:$0xf]  ;;  %v3386_v31 = vld [vmem:[#allocation2 + $0xbc] sm:$0x1] }
  0xfe   : > { %v4464_v42 = vcombine.low %v2981_v27, %v2991_v33  ;;  %v4503_v43 = vcombine.low %v3528_v23, %v3531_v34  ;;  %v3475_v44 = vsel %vm4853_vm4, %v3473_v14, %v3474_v25  ;;  %v1096_v45 = vrot.slane %v1094_v32, 4  ;;  %1565 = vst.msk [vmem:[#allocation3 + $0x18] sm:$0xff] %vm1561_vm10, %v1520_v54  ;;  %v3360_v3 = vld [vmem:[#allocation2 + $0x54] sm:$0xe]  ;;  %v3361_v8 = vld [vmem:[#allocation2 + $0x58] sm:$0xf] }
  0xff   : > { %v4495_v48 = vcombine.low %v3472_v28, %v3475_v44  ;;  %v1099_v50 = vrot.slane %v1097_v35, 5  ;;  %v1105_v52 = vrot.slane %v1103_v37, 5  ;;  %v1107_v53 = vshrl.u32 %v749_v19, 16  ;;  %696 = vst.msk [vmem:[#allocation3 + $0x30] sm:$0xff] %vm689_vm8, %v4713_v47  ;;  %v1712_v4 = vpop.permute.xlu1 %1711  ;;  %v3362_v12 = vld [vmem:[#allocation2 + $0x5c] sm:$0x1] }
 0x100   : > { %3625 = vrot.lane.b32.xlu1 %v4503_v43, %s4747_s12  ;;  %v1113_v58 = vshll.u32 %v750_v29, 16  ;;  %v902_v59 = vshrl.u32 %v724_v39, 16  ;;  %v905_v61 = vshll.u32 %v724_v39, 16  ;;  %v911_v62 = vshll.u32 %v725_v40, 16  ;;  %1750 = vst.msk [vmem:[#allocation3 + $0x50] sm:$0xff] %vm1739_vm11, %v1712_v4  ;;  %v4714_v17 = vld [vmem:[#allocation2 + $0xb4] sm:$0xff]  }
 0x101   : > { %3290 = vrot.lane.b32.xlu0 %v4464_v42, %s4746_s11  ;;  %v1100_v49 = vor.u32 %v1099_v50, %v1096_v45  ;;  %v1109_v63 = vrot.slane %v1107_v53, 4  ;;  %v915_v0 = vshrl.u32 %v725_v40, 16  ;;  %v921_v1 = vshll.u32 %v726_v46, 16  ;;  %v1696_v13 = vpop.permute.xlu0 %1695  ;;  %v751_v15 = vld [vmem:[#allocation2 + $0xb4] sm:$0xf]  ;;  %705 = vst.msk [vmem:[#allocation3 + $0x78] sm:$0xff] %vm689_vm8, %v4714_v17 }
 0x102   : > { %v1115_v11 = vrot.slane %v1113_v58, 5  ;;  %v904_v5 = vrot.slane %v902_v59, 4  ;;  %v907_v6 = vrot.slane %v905_v61, 5  ;;  %v913_v7 = vrot.slane %v911_v62, 5  ;;  %1742 = vst.msk [vmem:[#allocation3 + $0x10] sm:$0xff] %vm1739_vm11, %v1696_v13 }
 0x103   : > { %v1101_v60 = vrot.slane %v1100_v49, 4  ;;  %v1110_v9 = vor.u32 %v1109_v63, %v1105_v52  ;;  %v917_v22 = vrot.slane %v915_v0, 4  ;;  %v923_v10 = vrot.slane %v921_v1, 5  ;;  %v1714_v20 = vpop.permute.xlu1 %1713  ;;  %v752_v29 = vld [vmem:[#allocation2 + $0xb8] sm:$0xf] }
 0x104   : > { %v908_v36 = vor.u32 %v907_v6, %v904_v5  ;;  %v4488_v51 = vrot.slane %v3384_v56, 9  ;;  %v3534_v2 = vrot.slane %v3385_v57, 5  ;;  %v3537_v55 = vrot.slane %v3386_v31, 5  ;;  %1751 = vst.msk [vmem:[#allocation3 + $0x58] sm:$0xff] %vm1739_vm11, %v1714_v20  ;;  %v753_v40 = vld [vmem:[#allocation2 + $0xbc] sm:$0x1] }
 0x105   : > { %3609 = vrot.lane.b32.xlu0 %v4495_v48, %s4747_s12  ;;  %v1106_v41 = vsel %vm4890_vm7, %v1101_v60, %v1105_v52  ;;  %v1111_v16 = vrot.slane %v1110_v9, 4  ;;  %v918_v18 = vor.u32 %v917_v22, %v913_v7  ;;  %v4480_v19 = vrot.slane %v3360_v3, 9  ;;  %v1698_v33 = vpop.permute.xlu0 %1697  ;;  %v727_v38 = vld [vmem:[#allocation2 + $0x54] sm:$0xf]  ;;  %v728_v46 = vld [vmem:[#allocation2 + $0x58] sm:$0xf] }
 0x106   : > { %v909_v23 = vrot.slane %v908_v36, 4  ;;  %v3535_v24 = vsel %vm4853_vm4, %v4488_v51, %v3534_v2  ;;  %v3536_v25 = vrot.slane %v3534_v2, 4  ;;  %v3478_v26 = vrot.slane %v3361_v8, 5  ;;  %1743 = vst.msk [vmem:[#allocation3 + $0x18] sm:$0xff] %vm1739_vm11, %v1698_v33  ;;  %v729_v47 = vld [vmem:[#allocation2 + $0x5c] sm:$0x1] }
 0x107   : > { %v1116_v27 = vsel %vm4890_vm7, %v1111_v16, %v1115_v11  ;;  %v919_v28 = vrot.slane %v918_v18, 4  ;;  %v3481_v14 = vrot.slane %v3362_v12, 5  ;;  %v1118_v32 = vshrl.u32 %v751_v15, 16  ;;  %v2257_v48 = vpop.permute.xlu1 %2256  ;;  %v1296_v56 = vld [vmem:[#allocation2 + $0xa8] sm:$0xe]  ;;  %v4715_v57 = vld [vmem:[#allocation2 + $0x54] sm:$0xff]  }
 0x108   : > { %v4345_v34 = vcombine.low %v1106_v41, %v1116_v27  ;;  %v914_v35 = vsel %vm4890_vm7, %v909_v23, %v913_v7  ;;  %v3538_v37 = vsel %vm4853_vm4, %v3536_v25, %v3537_v55  ;;  %v3479_v39 = vsel %vm4853_vm4, %v4480_v19, %v3478_v26  ;;  %2295 = vst.msk [vmem:[#allocation3 + $0x50] sm:$0xff] %vm2284_vm12, %v2257_v48  ;;  %v1297_v31 = vld [vmem:[#allocation2 + $0xac] sm:$0xf]  ;;  %v1298_v4 = vld [vmem:[#allocation2 + $0xb0] sm:$0x1] }
 0x109   : > { %v924_v42 = vsel %vm4890_vm7, %v919_v28, %v923_v10  ;;  %v4504_v43 = vcombine.low %v3535_v24, %v3538_v37  ;;  %v3480_v44 = vrot.slane %v3478_v26, 4  ;;  %v1120_v45 = vrot.slane %v1118_v32, 4  ;;  %v2241_v49 = vpop.permute.xlu0 %2240  ;;  %697 = vst.msk [vmem:[#allocation3 + $0x38] sm:$0xff] %vm689_vm8, %v4715_v57  ;;  %v1272_v8 = vld [vmem:[#allocation2 + $0x48] sm:$0xe] }
 0x10a   : > { %1217 = vrot.lane.b32.xlu1 %v4345_v34, %s4742_s7  ;;  %v4337_v50 = vcombine.low %v914_v35, %v924_v42  ;;  %v1121_v52 = vshll.u32 %v751_v15, 16  ;;  %v1127_v53 = vshll.u32 %v752_v29, 16  ;;  %v1131_v54 = vshrl.u32 %v752_v29, 16  ;;  %2287 = vst.msk [vmem:[#allocation3 + $0x10] sm:$0xff] %vm2284_vm12, %v2241_v49  ;;  %v1273_v13 = vld [vmem:[#allocation2 + $0x4c] sm:$0xf] }
 0x10b   : > { %v3482_v58 = vsel %vm4853_vm4, %v3480_v44, %v3481_v14  ;;  %v1137_v59 = vshll.u32 %v753_v40, 16  ;;  %v926_v61 = vshrl.u32 %v727_v38, 16  ;;  %v929_v62 = vshll.u32 %v727_v38, 16  ;;  %v2259_v60 = vpop.permute.xlu1 %2258  ;;  %v1274_v55 = vld [vmem:[#allocation2 + $0x50] sm:$0x1] }
 0x10c   : > { %1201 = vrot.lane.b32.xlu0 %v4337_v50, %s4742_s7  ;;  %v4496_v63 = vcombine.low %v3479_v39, %v3482_v58  ;;  %v1123_v0 = vrot.slane %v1121_v52, 5  ;;  %v1129_v1 = vrot.slane %v1127_v53, 5  ;;  %v1133_v3 = vrot.slane %v1131_v54, 4  ;;  %2296 = vst.msk [vmem:[#allocation3 + $0x58] sm:$0xff] %vm2284_vm12, %v2259_v60  ;;  %v1299_v15 = vld [vmem:[#allocation2 + $0xb4] sm:$0xe] }
 0x10d   : > { %v1139_v11 = vrot.slane %v1137_v59, 5  ;;  %v928_v5 = vrot.slane %v926_v61, 4  ;;  %v931_v6 = vrot.slane %v929_v62, 5  ;;  %v935_v7 = vshll.u32 %v728_v46, 16  ;;  %v547_v41 = vld [vmem:[%s5470_s15] sm:$0xf] }
 0x10e   : > { %3627 = vrot.lane.b32.xlu1 %v4504_v43, %s4747_s12  ;;  %v1124_v9 = vor.u32 %v1123_v0, %v1120_v45  ;;  %v1134_v22 = vor.u32 %v1133_v3, %v1129_v1  ;;  %v939_v10 = vshrl.u32 %v728_v46, 16  ;;  %v945_v12 = vshll.u32 %v729_v47, 16  ;;  %v1300_v23 = vld [vmem:[#allocation2 + $0xb8] sm:$0xf]  ;;  %v1301_v24 = vld [vmem:[#allocation2 + $0xbc] sm:$0x1] }
 0x10f   : > { %v932_v17 = vor.u32 %v931_v6, %v928_v5  ;;  %v937_v36 = vrot.slane %v935_v7, 5  ;;  %v4361_v51 = vrot.slane %v1296_v56, 9  ;;  %v1453_v2 = vrot.slane %v1297_v31, 5  ;;  %v548_v25 = vld [vmem:[%s5470_s15 + $0x4] sm:$0xf]  ;;  %v2243_v32 = vpop.permute.xlu0 %2242  ;;  %v2578_v33 = vpop.permute.xlu1 %2577 }
 0x110   : > { %3611 = vrot.lane.b32.xlu0 %v4496_v63, %s4747_s12  ;;  %v1125_v16 = vrot.slane %v1124_v9, 4  ;;  %v1135_v18 = vrot.slane %v1134_v22, 4  ;;  %v941_v19 = vrot.slane %v939_v10, 4  ;;  %v947_v20 = vrot.slane %v945_v12, 5  ;;  %551 = vst.msk [vmem:[#allocation2 + $0xc0] sm:$0xf] %vm497_vm0, %v547_v41 }
 0x111   : > { %v933_v26 = vrot.slane %v932_v17, 4  ;;  %v1454_v27 = vsel %vm4853_vm4, %v4361_v51, %v1453_v2  ;;  %v1455_v28 = vrot.slane %v1453_v2, 4  ;;  %v1456_v14 = vrot.slane %v1298_v4, 5  ;;  %v1275_v29 = vld [vmem:[#allocation2 + $0x54] sm:$0xe]  ;;  %2288 = vst.msk [vmem:[#allocation3 + $0x18] sm:$0xff] %vm2284_vm12, %v2243_v32 }
 0x112   : > { %v549_v34 = vld [vmem:[%s5470_s15 + $0x8] sm:$0x1]  ;;  %552 = vst.msk [vmem:[#allocation2 + $0xc4] sm:$0xf] %vm497_vm0, %v548_v25  ;;  %v1130_v35 = vsel %vm4890_vm7, %v1125_v16, %v1129_v1  ;;  %v1140_v37 = vsel %vm4890_vm7, %v1135_v18, %v1139_v11  ;;  %v942_v39 = vor.u32 %v941_v19, %v937_v36  ;;  %v4353_v40 = vrot.slane %v1272_v8, 9 }
 0x113   : > { %2616 = vst.msk [vmem:[#allocation3 + $0x50] sm:$0xff] %vm2605_vm13, %v2578_v33  ;;  %v4346_v38 = vcombine.low %v1130_v35, %v1140_v37  ;;  %v938_v42 = vsel %vm4890_vm7, %v933_v26, %v937_v36  ;;  %v1457_v43 = vsel %vm4853_vm4, %v1455_v28, %v1456_v14  ;;  %v1397_v44 = vrot.slane %v1273_v13, 5  ;;  %v1276_v45 = vld [vmem:[#allocation2 + $0x58] sm:$0xf]  ;;  %v1277_v46 = vld [vmem:[#allocation2 + $0x5c] sm:$0x1]  ;;  %v2562_v58 = vpop.permute.xlu0 %2561  ;;  %v2580_v59 = vpop.permute.xlu1 %2579 }
 0x114   : > { %553 = vst.msk [vmem:[#allocation2 + $0xc8] sm:$0x1] %vm500_vm1, %v549_v34  ;;  %v943_v47 = vrot.slane %v942_v39, 4  ;;  %v4377_v48 = vcombine.low %v1454_v27, %v1457_v43  ;;  %v1400_v50 = vrot.slane %v1274_v55, 5  ;;  %v4362_v52 = vrot.slane %v1299_v15, 9  ;;  %v4700_v14 = vld [vmem:[#allocation2 + $0xb4] sm:$0xff]  }
 0x115   : > { %1219 = vrot.lane.b32.xlu1 %v4346_v38, %s4742_s7  ;;  %v1398_v53 = vsel %vm4853_vm4, %v4353_v40, %v1397_v44  ;;  %v1399_v54 = vrot.slane %v1397_v44, 4  ;;  %v1460_v56 = vrot.slane %v1300_v23, 5  ;;  %v1463_v57 = vrot.slane %v1301_v24, 5  ;;  %v1798_v61 = vld [vmem:[#allocation2 + $0xb4] sm:$0xf]  ;;  %2608 = vst.msk [vmem:[#allocation3 + $0x10] sm:$0xff] %vm2605_vm13, %v2562_v58 }
 0x116   : > { %v948_v62 = vsel %vm4890_vm7, %v943_v47, %v947_v20  ;;  %v4354_v31 = vrot.slane %v1275_v29, 9  ;;  %v1404_v49 = vrot.slane %v1276_v45, 5  ;;  %v1407_v63 = vrot.slane %v1277_v46, 5  ;;  %2617 = vst.msk [vmem:[#allocation3 + $0x58] sm:$0xff] %vm2605_vm13, %v2580_v59  ;;  %v1799_v0 = vld [vmem:[#allocation2 + $0xb8] sm:$0xf] }
 0x117   : > { %v4338_v1 = vcombine.low %v938_v42, %v948_v62  ;;  %v1401_v3 = vsel %vm4853_vm4, %v1399_v54, %v1400_v50  ;;  %v1461_v4 = vsel %vm4853_vm4, %v4362_v52, %v1460_v56  ;;  %v1462_v11 = vrot.slane %v1460_v56, 4  ;;  %v1800_v5 = vld [vmem:[#allocation2 + $0xbc] sm:$0x1]  ;;  %v1774_v9 = vld [vmem:[#allocation2 + $0x54] sm:$0xf]  ;;  %v2564_v10 = vpop.permute.xlu0 %2563  ;;  %v2756_v51 = vpop.permute.xlu1 %2755 }
 0x118   : > { %v4369_v6 = vcombine.low %v1398_v53, %v1401_v3  ;;  %v1405_v7 = vsel %vm4853_vm4, %v4354_v31, %v1404_v49  ;;  %v1406_v8 = vrot.slane %v1404_v49, 4  ;;  %v2141_v60 = vshrl.u32 %v1798_v61, 16  ;;  %v1775_v36 = vld [vmem:[#allocation2 + $0x58] sm:$0xf]  ;;  %2609 = vst.msk [vmem:[#allocation3 + $0x18] sm:$0xff] %vm2605_vm13, %v2564_v10 }
 0x119   : > { %1203 = vrot.lane.b32.xlu0 %v4338_v1, %s4742_s7  ;;  %1541 = vrot.lane.b32.xlu1 %v4377_v48, %s4741_s30  ;;  %v1464_v22 = vsel %vm4853_vm4, %v1462_v11, %v1463_v57  ;;  %v2144_v12 = vshll.u32 %v1798_v61, 16  ;;  %v2150_v13 = vshll.u32 %v1799_v0, 16  ;;  %v2154_v17 = vshrl.u32 %v1799_v0, 16  ;;  %v1776_v16 = vld [vmem:[#allocation2 + $0x5c] sm:$0x1]  ;;  %2794 = vst.msk [vmem:[#allocation3 + $0x50] sm:$0xff] %vm2783_vm14, %v2756_v51 }
 0x11a   : > { %v4378_v2 = vcombine.low %v1461_v4, %v1464_v22  ;;  %v1408_v55 = vsel %vm4853_vm4, %v1406_v8, %v1407_v63  ;;  %v2143_v15 = vrot.slane %v2141_v60, 4  ;;  %v2160_v41 = vshll.u32 %v1800_v5, 16  ;;  %v1801_v24 = vld [vmem:[#allocation2 + $0xc0] sm:$0xf]  ;;  %v1802_v37 = vld [vmem:[#allocation2 + $0xc4] sm:$0xf] }
 0x11b   : > { %v4370_v18 = vcombine.low %v1405_v7, %v1408_v55  ;;  %v2146_v19 = vrot.slane %v2144_v12, 5  ;;  %v2152_v20 = vrot.slane %v2150_v13, 5  ;;  %v2156_v23 = vrot.slane %v2154_v17, 4  ;;  %v2740_v35 = vpop.permute.xlu0 %2739  ;;  %v2758_v39 = vpop.permute.xlu1 %2757  ;;  %v1803_v48 = vld [vmem:[#allocation2 + $0xc8] sm:$0x1]  ;;  %v4701_v57 = vld [vmem:[#allocation2 + $0x54] sm:$0xff]  }
 0x11c   : > { %v2162_v25 = vrot.slane %v2160_v41, 5  ;;  %v1949_v26 = vshrl.u32 %v1774_v9, 16  ;;  %v1952_v27 = vshll.u32 %v1774_v9, 16  ;;  %v1958_v28 = vshll.u32 %v1775_v36, 16  ;;  %2786 = vst.msk [vmem:[#allocation3 + $0x10] sm:$0xff] %vm2783_vm14, %v2740_v35  ;;  %2795 = vst.msk [vmem:[#allocation3 + $0x58] sm:$0xff] %vm2783_vm14, %v2758_v39 }
 0x11d   : > { %1525 = vrot.lane.b32.xlu0 %v4369_v6, %s4741_s30  ;;  %1543 = vrot.lane.b32.xlu1 %v4378_v2, %s4741_s30  ;;  %v2147_v29 = vor.u32 %v2146_v19, %v2143_v15  ;;  %v2157_v32 = vor.u32 %v2156_v23, %v2152_v20  ;;  %v1962_v33 = vshrl.u32 %v1775_v36, 16  ;;  %v1968_v34 = vshll.u32 %v1776_v16, 16  ;;  %v1777_v56 = vld [vmem:[#allocation2 + $0x60] sm:$0xf]  ;;  %v1778_v49 = vld [vmem:[#allocation2 + $0x64] sm:$0xf] }
 0x11e   : > { %v1951_v40 = vrot.slane %v1949_v26, 4  ;;  %v1954_v38 = vrot.slane %v1952_v27, 5  ;;  %v1960_v42 = vrot.slane %v1958_v28, 5  ;;  %v2165_v43 = vshrl.u32 %v1801_v24, 16  ;;  %v4702_v58 = vld [vmem:[#allocation2 + $0xc0] sm:$0xff]  }
 0x11f   : > { %v2148_v44 = vrot.slane %v2147_v29, 4  ;;  %v2158_v45 = vrot.slane %v2157_v32, 4  ;;  %v1964_v46 = vrot.slane %v1962_v33, 4  ;;  %v1970_v47 = vrot.slane %v1968_v34, 5  ;;  %v2742_v63 = vpop.permute.xlu0 %2741  ;;  %v3301_v0 = vpop.permute.xlu1 %3300  ;;  %v4703_v5 = vld [vmem:[#allocation2 + $0x60] sm:$0xff]  }
 0x120   : > { %v1955_v50 = vor.u32 %v1954_v38, %v1951_v40  ;;  %v2167_v52 = vrot.slane %v2165_v43, 4  ;;  %v2168_v53 = vshll.u32 %v1801_v24, 16  ;;  %v2174_v54 = vshll.u32 %v1802_v37, 16  ;;  %2787 = vst.msk [vmem:[#allocation3 + $0x18] sm:$0xff] %vm2783_vm14, %v2742_v63  ;;  %v1779_v60 = vld [vmem:[#allocation2 + $0x68] sm:$0x1] }
 0x121   : > { %1527 = vrot.lane.b32.xlu0 %v4370_v18, %s4741_s30  ;;  %1719 = vrot.lane.b32.xlu1 %v4700_v14, %s4740_s29  ;;  %v2153_v59 = vsel %vm4890_vm7, %v2148_v44, %v2152_v20  ;;  %v2163_v61 = vsel %vm4890_vm7, %v2158_v45, %v2162_v25  ;;  %v1965_v62 = vor.u32 %v1964_v46, %v1960_v42  ;;  %v2178_v31 = vshrl.u32 %v1802_v37, 16  ;;  %s4550_s30 = sadd.s32 204, %s4804_s25  ;;  %v2343_v17 = vld [vmem:[#allocation2 + $0xb4] sm:$0xe]  ;;  %v2344_v36 = vld [vmem:[#allocation2 + $0xb8] sm:$0xf] }
 0x122   : > { %v4409_v1 = vcombine.low %v2153_v59, %v2163_v61  ;;  %v1956_v3 = vrot.slane %v1955_v50, 4  ;;  %v2170_v4 = vrot.slane %v2168_v53, 5  ;;  %v2176_v11 = vrot.slane %v2174_v54, 5  ;;  %3339 = vst.msk [vmem:[#allocation3 + $0x50] sm:$0xff] %vm3328_vm15, %v3301_v0  ;;  %v2345_v41 = vld [vmem:[#allocation2 + $0xbc] sm:$0x1]  ;;  %s423_s17 = scalar_lea.vmem %s5900_s2, %s4550_s30 }
 0x123   : > { %v1966_v6 = vrot.slane %v1965_v62, 4  ;;  %v2180_v7 = vrot.slane %v2178_v31, 4  ;;  %v2184_v8 = vshll.u32 %v1803_v48, 16  ;;  %v1973_v9 = vshrl.u32 %v1777_v56, 16  ;;  %v5534_v16 = vld [vmem:[#allocation2 + $0x54] sm:$0xe]  ;;  %v3285_v18 = vpop.permute.xlu0 %3284  ;;  %v3303_v19 = vpop.permute.xlu1 %3302 }
 0x124   : > { %v1961_v22 = vsel %vm4890_vm7, %v1956_v3, %v1960_v42  ;;  %v2171_v10 = vor.u32 %v2170_v4, %v2167_v52  ;;  %v1976_v12 = vshll.u32 %v1777_v56, 16  ;;  %v1982_v13 = vshll.u32 %v1778_v49, 16  ;;  %v2320_v26 = vld [vmem:[#allocation2 + $0x58] sm:$0xf]  ;;  %v2321_v27 = vld [vmem:[#allocation2 + $0x5c] sm:$0x1] }
 0x125   : > { %1703 = vrot.lane.b32.xlu0 %v4701_v57, %s4740_s29  ;;  %1721 = vrot.lane.b32.xlu1 %v4702_v58, %s4740_s29  ;;  %v1971_v51 = vsel %vm4890_vm7, %v1966_v6, %v1970_v47  ;;  %v2181_v2 = vor.u32 %v2180_v7, %v2176_v11  ;;  %v2186_v55 = vrot.slane %v2184_v8, 5  ;;  %v1975_v15 = vrot.slane %v1973_v9, 4  ;;  %3331 = vst.msk [vmem:[#allocation3 + $0x10] sm:$0xff] %vm3328_vm15, %v3285_v18  ;;  %v2346_v28 = vld [vmem:[#allocation2 + $0xc0] sm:$0xe] }
 0x126   : > { %v4401_v20 = vcombine.low %v1961_v22, %v1971_v51  ;;  %v2172_v23 = vrot.slane %v2171_v10, 4  ;;  %v1978_v24 = vrot.slane %v1976_v12, 5  ;;  %v5536_v25 = vrot.slane %v1982_v13, 5  ;;  %3340 = vst.msk [vmem:[#allocation3 + $0x58] sm:$0xff] %vm3328_vm15, %v3303_v19  ;;  %v2347_v34 = vld [vmem:[#allocation2 + $0xc4] sm:$0xf] }
 0x127   : > { %v2182_v14 = vrot.slane %v2181_v2, 4  ;;  %v1986_v29 = vshrl.u32 %v1778_v49, 16  ;;  %v1992_v32 = vshll.u32 %v1779_v60, 16  ;;  %v4425_v33 = vrot.slane %v2343_v17, 9  ;;  %v2348_v35 = vld [vmem:[#allocation2 + $0xc8] sm:$0x1]  ;;  %v3287_v48 = vpop.permute.xlu0 %3286  ;;  %v3622_v50 = vpop.permute.xlu1 %3621 }
 0x128   : > { %v2177_v37 = vsel %vm4890_vm7, %v2172_v23, %v2176_v11  ;;  %v1979_v39 = vor.u32 %v1978_v24, %v1975_v15  ;;  %v2497_v40 = vrot.slane %v2344_v36, 5  ;;  %v2500_v38 = vrot.slane %v2345_v41, 5  ;;  %v2322_v46 = vld [vmem:[#allocation2 + $0x60] sm:$0xe]  ;;  %v2323_v47 = vld [vmem:[#allocation2 + $0x64] sm:$0xf] }
 0x129   : > { %1705 = vrot.lane.b32.xlu0 %v4703_v5, %s4740_s29  ;;  %2264 = vrot.lane.b32.xlu1 %v4409_v1, %s4743_s8  ;;  %v2187_v42 = vsel %vm4890_vm7, %v2182_v14, %v2186_v55  ;;  %v1988_v43 = vrot.slane %v1986_v29, 4  ;;  %v1994_v44 = vrot.slane %v1992_v32, 5  ;;  %v4417_v45 = vrot.slane %v5534_v16, 9  ;;  %v554_v52 = vld [vmem:[%s423_s17] sm:$0xf]  ;;  %3332 = vst.msk [vmem:[#allocation3 + $0x18] sm:$0xff] %vm3328_vm15, %v3287_v48 }
 0x12a   : > { %v4410_v53 = vcombine.low %v2177_v37, %v2187_v42  ;;  %v1980_v54 = vrot.slane %v1979_v39, 4  ;;  %v2498_v56 = vsel %vm4853_vm4, %v4425_v33, %v2497_v40  ;;  %v2499_v57 = vrot.slane %v2497_v40, 4  ;;  %v2324_v58 = vld [vmem:[#allocation2 + $0x68] sm:$0x1]  ;;  %3660 = vst.msk [vmem:[#allocation3 + $0x50] sm:$0xff] %vm3649_vm2, %v3622_v50 }
 0x12b   : > { %v555_v59 = vld [vmem:[%s423_s17 + $0x4] sm:$0xf]  ;;  %v556_v61 = vld [vmem:[%s423_s17 + $0x8] sm:$0x1]  ;;  %558 = vst.msk [vmem:[#allocation2 + $0xcc] sm:$0xf] %vm497_vm0, %v554_v52  ;;  %v1989_v62 = vor.u32 %v1988_v43, %v5536_v25  ;;  %v3606_v7 = vpop.permute.xlu0 %3605 }
 0x12c   : > { %v2441_v31 = vrot.slane %v2320_v26, 5  ;;  %v2444_v49 = vrot.slane %v2321_v27, 5  ;;  %v4426_v63 = vrot.slane %v2346_v28, 9  ;;  %559 = vst.msk [vmem:[#allocation2 + $0xd0] sm:$0xf] %vm497_vm0, %v555_v59  ;;  %v2501_v0 = vsel %vm4853_vm4, %v2499_v57, %v2500_v38 }
 0x12d   : > { %560 = vst.msk [vmem:[#allocation2 + $0xd4] sm:$0x1] %vm500_vm1, %v556_v61  ;;  %v2504_v1 = vrot.slane %v2347_v34, 5  ;;  %v2507_v3 = vrot.slane %v2348_v35, 5  ;;  %2248 = vrot.lane.b32.xlu0 %v4401_v20, %s4743_s8  ;;  %2266 = vrot.lane.b32.xlu1 %v4410_v53, %s4743_s8  ;;  %v1985_v4 = vsel %vm4890_vm7, %v1980_v54, %v5536_v25  ;;  %v1990_v11 = vrot.slane %v1989_v62, 4 }
 0x12e   : > { %v4441_v5 = vcombine.low %v2498_v56, %v2501_v0  ;;  %v2443_v6 = vrot.slane %v2441_v31, 4  ;;  %v4418_v9 = vrot.slane %v2322_v46, 9  ;;  %v2448_v22 = vrot.slane %v2323_v47, 5  ;;  %3652 = vst.msk [vmem:[#allocation3 + $0x10] sm:$0xff] %vm3649_vm2, %v3606_v7  ;;  %v2842_v36 = vld [vmem:[#allocation2 + $0xc0] sm:$0xf] }
 0x12f   : > { %v2505_v8 = vsel %vm4853_vm4, %v4426_v63, %v2504_v1  ;;  %v2506_v60 = vrot.slane %v2504_v1, 4  ;;  %v1995_v10 = vsel %vm4890_vm7, %v1990_v11, %v1994_v44  ;;  %v2442_v12 = vsel %vm4853_vm4, %v4417_v45, %v2441_v31  ;;  %v2843_v51 = vld [vmem:[#allocation2 + $0xc4] sm:$0xf]  ;;  %v2844_v41 = vld [vmem:[#allocation2 + $0xc8] sm:$0x1]  ;;  %v1214_v23 = vpop.permute.xlu1 %1213 }
 0x130   : > { %v2445_v13 = vsel %vm4853_vm4, %v2443_v6, %v2444_v49  ;;  %v2451_v17 = vrot.slane %v2324_v58, 5  ;;  %v4402_v2 = vcombine.low %v1985_v4, %v1995_v10  ;;  %v5580_v15 = vsel %vm4853_vm4, %v4418_v9, %v2448_v22  ;;  %v2818_v16 = vld [vmem:[#allocation2 + $0x60] sm:$0xf]  ;;  %v2819_v18 = vld [vmem:[#allocation2 + $0x64] sm:$0xf]  ;;  %1250 = vst.msk [vmem:[#allocation3 + $0x60] sm:$0xff] %vm1237_vm9, %v1214_v23 }
 0x131   : > { %v2508_v55 = vsel %vm4853_vm4, %v2506_v60, %v2507_v3  ;;  %2585 = vrot.lane.b32.xlu1 %v4441_v5, %s4744_s9  ;;  %v2450_v20 = vrot.slane %v2448_v22, 4  ;;  %v3185_v24 = vshrl.u32 %v2842_v36, 16  ;;  %v3188_v25 = vshll.u32 %v2842_v36, 16  ;;  %v3676_v26 = vld [vmem:[#allocation3 + $0x50] sm:$0xff]  ;;  %v1198_v33 = vpop.permute.xlu0 %1197  ;;  %v4704_v45 = vld [vmem:[#allocation2 + $0xc0] sm:$0xff]  }
 0x132   : > { %v4442_v19 = vcombine.low %v2505_v8, %v2508_v55  ;;  %2250 = vrot.lane.b32.xlu0 %v4402_v2, %s4743_s8  ;;  %v4433_v27 = vcombine.low %v2442_v12, %v2445_v13  ;;  %v3194_v28 = vshll.u32 %v2843_v51, 16  ;;  %v3198_v14 = vshrl.u32 %v2843_v51, 16  ;;  %4604 = vmatprep.mubr.msk.bf16.mxu1 %vm3725_vm3, %v3676_v26  ;;  %v2820_v37 = vld [vmem:[#allocation2 + $0x68] sm:$0x1]  ;;  %1242 = vst.msk [vmem:[#allocation3 + $0x20] sm:$0xff] %vm1237_vm9, %v1198_v33  ;;  %v4705_v3 = vld [vmem:[#allocation2 + $0x60] sm:$0xff]  }
 0x133   : > { %v3204_v29 = vshll.u32 %v2844_v41, 16  ;;  %v2452_v32 = vsel %vm4853_vm4, %v2450_v20, %v2451_v17  ;;  %v3187_v34 = vrot.slane %v3185_v24, 4  ;;  %v3190_v35 = vrot.slane %v3188_v25, 5  ;;  %v2845_v44 = vld [vmem:[#allocation2 + $0xcc] sm:$0xf]  ;;  %v3624_v52 = vpop.permute.xlu1 %3623  ;;  %s4551_s8 = sshll.u32 %s5914_s21, 8 }
 0x134   : > { %v2993_v39 = vshrl.u32 %v2818_v16, 16  ;;  %v4434_v40 = vcombine.low %v5580_v15, %v2452_v32  ;;  %v3196_v38 = vrot.slane %v3194_v28, 5  ;;  %v3200_v42 = vrot.slane %v3198_v14, 4  ;;  %3661 = vst.msk [vmem:[#allocation3 + $0x58] sm:$0xff] %vm3649_vm2, %v3624_v52  ;;  %v2846_v58 = vld [vmem:[#allocation2 + $0xd0] sm:$0xf] }
 0x135   : > { %v3206_v43 = vrot.slane %v3204_v29, 5  ;;  %2587 = vrot.lane.b32.xlu1 %v4442_v19, %s4744_s9  ;;  %v3191_v46 = vor.u32 %v3190_v35, %v3187_v34  ;;  %v2996_v48 = vshll.u32 %v2818_v16, 16  ;;  %v3002_v50 = vshll.u32 %v2819_v18, 16  ;;  %v3668_v53 = vld [vmem:[#allocation3 + $0x10] sm:$0xff]  ;;  %v3608_v63 = vpop.permute.xlu0 %3607  ;;  %v2847_v0 = vld [vmem:[#allocation2 + $0xd4] sm:$0x1] }
 0x136   : > { %v2995_v47 = vrot.slane %v2993_v39, 4  ;;  %2569 = vrot.lane.b32.xlu0 %v4433_v27, %s4744_s9  ;;  %v3201_v54 = vor.u32 %v3200_v42, %v3196_v38  ;;  %v3006_v56 = vshrl.u32 %v2819_v18, 16  ;;  %v3012_v57 = vshll.u32 %v2820_v37, 16  ;;  %4588 = vmatprep.mubr.msk.bf16.mxu0 %vm3725_vm3, %v3668_v53  ;;  %v4706_v61 = vld [vmem:[#allocation2 + $0xcc] sm:$0xff]   ;;  %3653 = vst.msk [vmem:[#allocation3 + $0x18] sm:$0xff] %vm3649_vm2, %v3608_v63 }
 0x137   : > { %v3209_v59 = vshrl.u32 %v2845_v44, 16  ;;  %v3192_v62 = vrot.slane %v3191_v46, 4  ;;  %v2998_v31 = vrot.slane %v2996_v48, 5  ;;  %v3004_v49 = vrot.slane %v3002_v50, 5  ;;  %v2821_v7 = vld [vmem:[#allocation2 + $0x6c] sm:$0xf] }
 0x138   : > { %v3212_v1 = vshll.u32 %v2845_v44, 16  ;;  %v3202_v4 = vrot.slane %v3201_v54, 4  ;;  %v3008_v11 = vrot.slane %v3006_v56, 4  ;;  %v3014_v5 = vrot.slane %v3012_v57, 5  ;;  %v2822_v10 = vld [vmem:[#allocation2 + $0x70] sm:$0xf] }
 0x139   : > { %v3211_v6 = vrot.slane %v3209_v59, 4  ;;  %2763 = vrot.lane.b32.xlu1 %v4704_v45, %s4745_s10  ;;  %v3197_v8 = vsel %vm4890_vm7, %v3192_v62, %v3196_v38  ;;  %v2999_v60 = vor.u32 %v2998_v31, %v2995_v47  ;;  %v3218_v22 = vshll.u32 %v2846_v58, 16  ;;  %v2823_v41 = vld [vmem:[#allocation2 + $0x74] sm:$0x1]  ;;  %v4707_v16 = vld [vmem:[#allocation2 + $0x6c] sm:$0xff]  }
 0x13a   : > { %v3214_v9 = vrot.slane %v3212_v1, 5  ;;  %2571 = vrot.lane.b32.xlu0 %v4434_v40, %s4744_s9  ;;  %v3207_v12 = vsel %vm4890_vm7, %v3202_v4, %v3206_v43  ;;  %v3009_v13 = vor.u32 %v3008_v11, %v3004_v49  ;;  %v3222_v17 = vshrl.u32 %v2846_v58, 16  ;;  %v3387_v24 = vld [vmem:[#allocation2 + $0xc0] sm:$0xe]  ;;  %v3388_v29 = vld [vmem:[#allocation2 + $0xc4] sm:$0xf] }
 0x13b   : > { %v3228_v36 = vshll.u32 %v2847_v0, 16  ;;  %v4473_v51 = vcombine.low %v3197_v8, %v3207_v12  ;;  %v3000_v2 = vrot.slane %v2999_v60, 4  ;;  %v3220_v15 = vrot.slane %v3218_v22, 5  ;;  %v3677_v32 = vld [vmem:[#allocation3 + $0x58] sm:$0xff]  ;;  %v3389_v39 = vld [vmem:[#allocation2 + $0xc8] sm:$0x1] }
 0x13c   : > { %v3215_v55 = vor.u32 %v3214_v9, %v3211_v6  ;;  %v3010_v18 = vrot.slane %v3009_v13, 4  ;;  %v3224_v19 = vrot.slane %v3222_v17, 4  ;;  %v3017_v23 = vshrl.u32 %v2821_v7, 16  ;;  %v1216_v14 = vpop.permute.xlu1 %1215  ;;  %v3363_v40 = vld [vmem:[#allocation2 + $0x60] sm:$0xe]  ;;  %4605 = vmatmul.mubr.msk.bf16.gmra.mrb[4].mxu1 %vm3725_vm3, %v3677_v32 }
 0x13d   : > { %v3230_v20 = vrot.slane %v3228_v36, 5  ;;  %2765 = vrot.lane.b32.xlu1 %v4706_v61, %s4745_s10  ;;  %v3005_v25 = vsel %vm4890_vm7, %v3000_v2, %v3004_v49  ;;  %v3020_v27 = vshll.u32 %v2821_v7, 16  ;;  %v3026_v28 = vshll.u32 %v2822_v10, 16  ;;  %1251 = vst.msk [vmem:[#allocation3 + $0x68] sm:$0xff] %vm1237_vm9, %v1216_v14  ;;  %v3364_v45 = vld [vmem:[#allocation2 + $0x64] sm:$0xf] }
 0x13e   : > { %v3216_v26 = vrot.slane %v3215_v55, 4  ;;  %2747 = vrot.lane.b32.xlu0 %v4705_v3, %s4745_s10  ;;  %v3015_v33 = vsel %vm4890_vm7, %v3010_v18, %v3014_v5  ;;  %v3225_v34 = vor.u32 %v3224_v19, %v3220_v15  ;;  %v3019_v35 = vrot.slane %v3017_v23, 4  ;;  %v3669_v46 = vld [vmem:[#allocation3 + $0x18] sm:$0xff]  ;;  %v3365_v54 = vld [vmem:[#allocation2 + $0x68] sm:$0x1] }
 0x13f   : > { %v3030_v37 = vshrl.u32 %v2822_v10, 16  ;;  %v4465_v38 = vcombine.low %v3005_v25, %v3015_v33  ;;  %v3022_v43 = vrot.slane %v3020_v27, 5  ;;  %v3028_v44 = vrot.slane %v3026_v28, 5  ;;  %v1200_v52 = vpop.permute.xlu0 %1199  ;;  %4589 = vmatmul.mubr.msk.bf16.gmra.mrb[4].mxu0 %vm3725_vm3, %v3669_v46  ;;  %v3390_v62 = vld [vmem:[#allocation2 + $0xcc] sm:$0xe] }
 0x140   : > { %v3221_v42 = vsel %vm4890_vm7, %v3216_v26, %v3220_v15  ;;  %v3226_v47 = vrot.slane %v3225_v34, 4  ;;  %v3036_v50 = vshll.u32 %v2823_v41, 16  ;;  %v4489_v53 = vrot.slane %v3387_v24, 9  ;;  %1243 = vst.msk [vmem:[#allocation3 + $0x28] sm:$0xff] %vm1237_vm9, %v1200_v52  ;;  %v1538_v61 = vpop.permute.xlu1 %1537  ;;  %v3391_v1 = vld [vmem:[#allocation2 + $0xd0] sm:$0xf] }
 0x141   : > { %v3032_v48 = vrot.slane %v3030_v37, 4  ;;  %3308 = vrot.lane.b32.xlu1 %v4473_v51, %s4746_s11  ;;  %v3023_v56 = vor.u32 %v3022_v43, %v3019_v35  ;;  %v3541_v57 = vrot.slane %v3388_v29, 5  ;;  %v3544_v58 = vrot.slane %v3389_v39, 5  ;;  %1574 = vst.msk [vmem:[#allocation3 + $0x60] sm:$0xff] %vm1561_vm10, %v1538_v61  ;;  %v3392_v3 = vld [vmem:[#allocation2 + $0xd4] sm:$0x1] }
 0x142   : > { %v4481_v59 = vrot.slane %v3363_v40, 9  ;;  %2749 = vrot.lane.b32.xlu0 %v4707_v16, %s4745_s10  ;;  %v3231_v31 = vsel %vm4890_vm7, %v3226_v47, %v3230_v20  ;;  %v3038_v63 = vrot.slane %v3036_v50, 5  ;;  %v3485_v0 = vrot.slane %v3364_v45, 5  ;;  %v3366_v7 = vld [vmem:[#allocation2 + $0x6c] sm:$0xe] }
 0x143   : > { %v3033_v49 = vor.u32 %v3032_v48, %v3028_v44  ;;  %v4474_v4 = vcombine.low %v3221_v42, %v3231_v31  ;;  %v3024_v11 = vrot.slane %v3023_v56, 4  ;;  %v3542_v5 = vsel %vm4853_vm4, %v4489_v53, %v3541_v57  ;;  %v3367_v8 = vld [vmem:[#allocation2 + $0x70] sm:$0xf]  ;;  %v3368_v60 = vld [vmem:[#allocation2 + $0x74] sm:$0x1]  ;;  %v1522_v12 = vpop.permute.xlu0 %1521 }
 0x144   : > { %v3543_v6 = vrot.slane %v3541_v57, 4  ;;  %v3487_v22 = vrot.slane %v3485_v0, 4  ;;  %v3488_v10 = vrot.slane %v3365_v54, 5  ;;  %1566 = vst.msk [vmem:[#allocation3 + $0x20] sm:$0xff] %vm1561_vm10, %v1522_v12  ;;  %v4490_v36 = vrot.slane %v3390_v62, 9  ;;  %v1540_v2 = vpop.permute.xlu1 %1539 }
 0x145   : > { %v3034_v9 = vrot.slane %v3033_v49, 4  ;;  %3310 = vrot.lane.b32.xlu1 %v4474_v4, %s4746_s11  ;;  %v3029_v13 = vsel %vm4890_vm7, %v3024_v11, %v3028_v44  ;;  %v3548_v51 = vrot.slane %v3391_v1, 5  ;;  %v3486_v41 = vsel %vm4853_vm4, %v4481_v59, %v3485_v0  ;;  %1575 = vst.msk [vmem:[#allocation3 + $0x68] sm:$0xff] %vm1561_vm10, %v1540_v2 }
 0x146   : > { %v3545_v17 = vsel %vm4853_vm4, %v3543_v6, %v3544_v58  ;;  %3292 = vrot.lane.b32.xlu0 %v4465_v38, %s4746_s11  ;;  %v3551_v16 = vrot.slane %v3392_v3, 5  ;;  %v3489_v19 = vsel %vm4853_vm4, %v3487_v22, %v3488_v10  ;;  %v4482_v24 = vrot.slane %v3366_v7, 9 }
 0x147   : > { %v3039_v55 = vsel %vm4890_vm7, %v3034_v9, %v3038_v63  ;;  %v4505_v15 = vcombine.low %v3542_v5, %v3545_v17  ;;  %v3549_v20 = vsel %vm4853_vm4, %v4490_v36, %v3548_v51  ;;  %v3550_v23 = vrot.slane %v3548_v51, 4  ;;  %v1524_v30 = vpop.permute.xlu0 %1523 }
 0x148   : > { %v4466_v18 = vcombine.low %v3029_v13, %v3039_v55  ;;  %v3492_v25 = vrot.slane %v3367_v8, 5  ;;  %v3495_v26 = vrot.slane %v3368_v60, 5  ;;  %1567 = vst.msk [vmem:[#allocation3 + $0x28] sm:$0xff] %vm1561_vm10, %v1524_v30  ;;  %v1716_v28 = vpop.permute.xlu1 %1715  ;;  %v4497_v14 = vcombine.low %v3486_v41, %v3489_v19 }
 0x149   : > { %3629 = vrot.lane.b32.xlu1 %v4505_v15, %s4747_s12  ;;  %v3552_v27 = vsel %vm4853_vm4, %v3550_v23, %v3551_v16  ;;  %1752 = vst.msk [vmem:[#allocation3 + $0x60] sm:$0xff] %vm1739_vm11, %v1716_v28 }
 0x14a   : > { %3294 = vrot.lane.b32.xlu0 %v4466_v18, %s4746_s11  ;;  %v4506_v29 = vcombine.low %v3549_v20, %v3552_v27  ;;  %v3494_v32 = vrot.slane %v3492_v25, 4  ;;  %v3493_v33 = vsel %vm4853_vm4, %v4482_v24, %v3492_v25  ;;  %s5723_s11 = scalar_lea.vmem %s5903_s5, %s4551_s8 }
 0x14b   : > { %v1700_v35 = vpop.permute.xlu0 %1699 }
 0x14c   : > { %v3496_v34 = vsel %vm4853_vm4, %v3494_v32, %v3495_v26  ;;  %1744 = vst.msk [vmem:[#allocation3 + $0x20] sm:$0xff] %vm1739_vm11, %v1700_v35  ;;  %v1718_v37 = vpop.permute.xlu1 %1717  ;;  %v5715_v35 = vld [vmem:[%s5902_s4] ss:$0 sm:$0xff] }
 0x14d   : > { %3631 = vrot.lane.b32.xlu1 %v4506_v29, %s4747_s12  ;;  %v4498_v39 = vcombine.low %v3493_v33, %v3496_v34  ;;  %1753 = vst.msk [vmem:[#allocation3 + $0x68] sm:$0xff] %vm1739_vm11, %v1718_v37 }
 0x14e   : > { %3613 = vrot.lane.b32.xlu0 %v4497_v14, %s4747_s12 }
 0x14f   : > { %v1702_v40 = vpop.permute.xlu0 %1701 }
 0x150   : > { %1745 = vst.msk [vmem:[#allocation3 + $0x28] sm:$0xff] %vm1739_vm11, %v1702_v40  ;;  %v2261_v38 = vpop.permute.xlu1 %2260 }
 0x151   : > { %2297 = vst.msk [vmem:[#allocation3 + $0x60] sm:$0xff] %vm2284_vm12, %v2261_v38 }
 0x152   : > { %3615 = vrot.lane.b32.xlu0 %v4498_v39, %s4747_s12  ;;  %s4552_s12 = sshll.u32 %s5914_s21, 6 }
 0x153   : > { %v2245_v21 = vpop.permute.xlu0 %2244  ;;  %s5763_s20 = scalar_lea.vmem %s5904_s6, %s4552_s12 }
 0x154   : > { %2289 = vst.msk [vmem:[#allocation3 + $0x20] sm:$0xff] %vm2284_vm12, %v2245_v21 }
 0x156   : > { %v2263_v42 = vpop.permute.xlu1 %2262 }
 0x157   : > { %2298 = vst.msk [vmem:[#allocation3 + $0x68] sm:$0xff] %vm2284_vm12, %v2263_v42 }
 0x15a   : > { %v2582_v43 = vpop.permute.xlu1 %2581 }
 0x15b   : > { %v2247_v44 = vpop.permute.xlu0 %2246  ;;  %2618 = vst.msk [vmem:[#allocation3 + $0x60] sm:$0xff] %vm2605_vm13, %v2582_v43 }
 0x15c   : > { %2290 = vst.msk [vmem:[#allocation3 + $0x28] sm:$0xff] %vm2284_vm12, %v2247_v44 }
 0x15e   : > { %v2584_v45 = vpop.permute.xlu1 %2583 }
 0x15f   : > { %v2566_v46 = vpop.permute.xlu0 %2565  ;;  %2619 = vst.msk [vmem:[#allocation3 + $0x68] sm:$0xff] %vm2605_vm13, %v2584_v45 }
 0x160   : > { %2610 = vst.msk [vmem:[#allocation3 + $0x20] sm:$0xff] %vm2605_vm13, %v2566_v46 }
 0x162   : > { %v2760_v47 = vpop.permute.xlu1 %2759 }
 0x163   : > { %v2568_v48 = vpop.permute.xlu0 %2567  ;;  %2796 = vst.msk [vmem:[#allocation3 + $0x60] sm:$0xff] %vm2783_vm14, %v2760_v47 }
 0x164   : > { %2611 = vst.msk [vmem:[#allocation3 + $0x28] sm:$0xff] %vm2605_vm13, %v2568_v48 }
 0x166   : > { %v2762_v50 = vpop.permute.xlu1 %2761 }
 0x167   : > { %v2744_v52 = vpop.permute.xlu0 %2743  ;;  %2797 = vst.msk [vmem:[#allocation3 + $0x68] sm:$0xff] %vm2783_vm14, %v2762_v50 }
 0x168   : > { %2788 = vst.msk [vmem:[#allocation3 + $0x20] sm:$0xff] %vm2783_vm14, %v2744_v52 }
 0x16a   : > { %v3305_v53 = vpop.permute.xlu1 %3304 }
 0x16b   : > { %v2746_v54 = vpop.permute.xlu0 %2745  ;;  %3341 = vst.msk [vmem:[#allocation3 + $0x60] sm:$0xff] %vm3328_vm15, %v3305_v53 }
 0x16c   : > { %2789 = vst.msk [vmem:[#allocation3 + $0x28] sm:$0xff] %vm2783_vm14, %v2746_v54 }
 0x16e   : > { %v3307_v57 = vpop.permute.xlu1 %3306 }
 0x16f   : > { %v3289_v56 = vpop.permute.xlu0 %3288  ;;  %3342 = vst.msk [vmem:[#allocation3 + $0x68] sm:$0xff] %vm3328_vm15, %v3307_v57 }
 0x170   : > { %3333 = vst.msk [vmem:[#allocation3 + $0x20] sm:$0xff] %vm3328_vm15, %v3289_v56 }
 0x172   : > { %v3626_v59 = vpop.permute.xlu1 %3625 }
 0x173   : > { %v3291_v58 = vpop.permute.xlu0 %3290  ;;  %3662 = vst.msk [vmem:[#allocation3 + $0x60] sm:$0xff] %vm3649_vm2, %v3626_v59 }
 0x174   : > { %3334 = vst.msk [vmem:[#allocation3 + $0x28] sm:$0xff] %vm3328_vm15, %v3291_v58 }
 0x177   : > { %v3610_v61 = vpop.permute.xlu0 %3609 }
 0x178   : > { %3654 = vst.msk [vmem:[#allocation3 + $0x20] sm:$0xff] %vm3649_vm2, %v3610_v61 }
 0x17a   : > { %v3678_v62 = vld [vmem:[#allocation3 + $0x60] sm:$0xff] }
 0x17b   : > { %4608 = vmatprep.mubr.msk.bf16.mxu1 %vm3725_vm3, %v3678_v62 }
 0x17c   : > { %v1218_v31 = vpop.permute.xlu1 %1217 }
 0x17d   : > { %1252 = vst.msk [vmem:[#allocation3 + $0x70] sm:$0xff] %vm1237_vm9, %v1218_v31 }
 0x17e   : > { %v1202_v49 = vpop.permute.xlu0 %1201 }
 0x17f   : > { %v3670_v63 = vld [vmem:[#allocation3 + $0x20] sm:$0xff]  ;;  %1244 = vst.msk [vmem:[#allocation3 + $0x30] sm:$0xff] %vm1237_vm9, %v1202_v49 }
 0x180   : > { %4592 = vmatprep.mubr.msk.bf16.mxu0 %vm3725_vm3, %v3670_v63  ;;  %v3628_v0 = vpop.permute.xlu1 %3627 }
 0x181   : > { %3663 = vst.msk [vmem:[#allocation3 + $0x68] sm:$0xff] %vm3649_vm2, %v3628_v0 }
 0x182   : > { %v3612_v1 = vpop.permute.xlu0 %3611 }
 0x183   : > { %3655 = vst.msk [vmem:[#allocation3 + $0x28] sm:$0xff] %vm3649_vm2, %v3612_v1 }
 0x187   : > { %v1220_v3 = vpop.permute.xlu1 %1219 }
 0x188   : > { %1253 = vst.msk [vmem:[#allocation3 + $0x78] sm:$0xff] %vm1237_vm9, %v1220_v3  ;;  %v3679_v4 = vld [vmem:[#allocation3 + $0x68] sm:$0xff] }
 0x189   : > { %4609 = vmatmul.mubr.msk.bf16.gmra.mrb[8].mxu1 %vm3725_vm3, %v3679_v4 }
 0x18a   : > { %v3671_v11 = vld [vmem:[#allocation3 + $0x28] sm:$0xff] }
 0x18b   : > { %v1204_v5 = vpop.permute.xlu0 %1203  ;;  %v1542_v6 = vpop.permute.xlu1 %1541  ;;  %4593 = vmatmul.mubr.msk.bf16.gmra.mrb[8].mxu0 %vm3725_vm3, %v3671_v11 }
 0x18c   : > { %1245 = vst.msk [vmem:[#allocation3 + $0x38] sm:$0xff] %vm1237_vm9, %v1204_v5 }
 0x18d   : > { %1576 = vst.msk [vmem:[#allocation3 + $0x70] sm:$0xff] %vm1561_vm10, %v1542_v6 }
 0x18f   : > { %v1526_v7 = vpop.permute.xlu0 %1525  ;;  %v1544_v8 = vpop.permute.xlu1 %1543 }
 0x190   : > { %1568 = vst.msk [vmem:[#allocation3 + $0x30] sm:$0xff] %vm1561_vm10, %v1526_v7  ;;  %1577 = vst.msk [vmem:[#allocation3 + $0x78] sm:$0xff] %vm1561_vm10, %v1544_v8 }
 0x193   : > { %v1528_v60 = vpop.permute.xlu0 %1527  ;;  %v1720_v9 = vpop.permute.xlu1 %1719 }
 0x194   : > { %1569 = vst.msk [vmem:[#allocation3 + $0x38] sm:$0xff] %vm1561_vm10, %v1528_v60 }
 0x195   : > { %1754 = vst.msk [vmem:[#allocation3 + $0x70] sm:$0xff] %vm1739_vm11, %v1720_v9 }
 0x197   : > { %v1704_v22 = vpop.permute.xlu0 %1703  ;;  %v1722_v10 = vpop.permute.xlu1 %1721 }
 0x198   : > { %1746 = vst.msk [vmem:[#allocation3 + $0x30] sm:$0xff] %vm1739_vm11, %v1704_v22  ;;  %1755 = vst.msk [vmem:[#allocation3 + $0x78] sm:$0xff] %vm1739_vm11, %v1722_v10 }
 0x19b   : > { %v1706_v12 = vpop.permute.xlu0 %1705  ;;  %v2265_v13 = vpop.permute.xlu1 %2264 }
 0x19c   : > { %1747 = vst.msk [vmem:[#allocation3 + $0x38] sm:$0xff] %vm1739_vm11, %v1706_v12 }
 0x19d   : > { %2299 = vst.msk [vmem:[#allocation3 + $0x70] sm:$0xff] %vm2284_vm12, %v2265_v13 }
 0x19f   : > { %v2249_v17 = vpop.permute.xlu0 %2248  ;;  %v2267_v36 = vpop.permute.xlu1 %2266 }
 0x1a0   : > { %2291 = vst.msk [vmem:[#allocation3 + $0x30] sm:$0xff] %vm2284_vm12, %v2249_v17  ;;  %2300 = vst.msk [vmem:[#allocation3 + $0x78] sm:$0xff] %vm2284_vm12, %v2267_v36 }
 0x1a3   : > { %v2586_v51 = vpop.permute.xlu1 %2585 }
 0x1a4   : > { %v2251_v2 = vpop.permute.xlu0 %2250  ;;  %2620 = vst.msk [vmem:[#allocation3 + $0x70] sm:$0xff] %vm2605_vm13, %v2586_v51 }
 0x1a5   : > { %2292 = vst.msk [vmem:[#allocation3 + $0x38] sm:$0xff] %vm2284_vm12, %v2251_v2 }
 0x1a7   : > { %v2588_v55 = vpop.permute.xlu1 %2587 }
 0x1a8   : > { %v2570_v15 = vpop.permute.xlu0 %2569  ;;  %2621 = vst.msk [vmem:[#allocation3 + $0x78] sm:$0xff] %vm2605_vm13, %v2588_v55 }
 0x1a9   : > { %2612 = vst.msk [vmem:[#allocation3 + $0x30] sm:$0xff] %vm2605_vm13, %v2570_v15 }
 0x1ab   : > { %v2764_v41 = vpop.permute.xlu1 %2763 }
 0x1ac   : > { %v2572_v16 = vpop.permute.xlu0 %2571  ;;  %2798 = vst.msk [vmem:[#allocation3 + $0x70] sm:$0xff] %vm2783_vm14, %v2764_v41 }
 0x1ad   : > { %2613 = vst.msk [vmem:[#allocation3 + $0x38] sm:$0xff] %vm2605_vm13, %v2572_v16 }
 0x1af   : > { %v2766_v18 = vpop.permute.xlu1 %2765 }
 0x1b0   : > { %v2748_v19 = vpop.permute.xlu0 %2747  ;;  %2799 = vst.msk [vmem:[#allocation3 + $0x78] sm:$0xff] %vm2783_vm14, %v2766_v18 }
 0x1b1   : > { %2790 = vst.msk [vmem:[#allocation3 + $0x30] sm:$0xff] %vm2783_vm14, %v2748_v19 }
 0x1b3   : > { %v3309_v20 = vpop.permute.xlu1 %3308 }
 0x1b4   : > { %v2750_v23 = vpop.permute.xlu0 %2749  ;;  %3343 = vst.msk [vmem:[#allocation3 + $0x70] sm:$0xff] %vm3328_vm15, %v3309_v20 }
 0x1b5   : > { %2791 = vst.msk [vmem:[#allocation3 + $0x38] sm:$0xff] %vm2783_vm14, %v2750_v23 }
 0x1b7   : > { %v3311_v24 = vpop.permute.xlu1 %3310 }
 0x1b8   : > { %v3293_v25 = vpop.permute.xlu0 %3292  ;;  %3344 = vst.msk [vmem:[#allocation3 + $0x78] sm:$0xff] %vm3328_vm15, %v3311_v24 }
 0x1b9   : > { %3335 = vst.msk [vmem:[#allocation3 + $0x30] sm:$0xff] %vm3328_vm15, %v3293_v25 }
 0x1bb   : > { %v3630_v26 = vpop.permute.xlu1 %3629 }
 0x1bc   : > { %v3295_v30 = vpop.permute.xlu0 %3294  ;;  %3664 = vst.msk [vmem:[#allocation3 + $0x70] sm:$0xff] %vm3649_vm2, %v3630_v26 }
 0x1bd   : > { %3336 = vst.msk [vmem:[#allocation3 + $0x38] sm:$0xff] %vm3328_vm15, %v3295_v30 }
 0x1bf   : > { %v3632_v27 = vpop.permute.xlu1 %3631 }
 0x1c0   : > { %v3614_v28 = vpop.permute.xlu0 %3613  ;;  %3665 = vst.msk [vmem:[#allocation3 + $0x78] sm:$0xff] %vm3649_vm2, %v3632_v27 }
 0x1c1   : > { %3656 = vst.msk [vmem:[#allocation3 + $0x30] sm:$0xff] %vm3649_vm2, %v3614_v28 }
 0x1c3   : > { %v3680_v14 = vld [vmem:[#allocation3 + $0x70] sm:$0xff] }
 0x1c4   : > { %v3616_v29 = vpop.permute.xlu0 %3615  ;;  %4612 = vmatprep.mubr.msk.bf16.mxu1 %vm3725_vm3, %v3680_v14 }
 0x1c5   : > { %3657 = vst.msk [vmem:[#allocation3 + $0x38] sm:$0xff] %vm3649_vm2, %v3616_v29 }
 0x1c7   : > { %v3681_v32 = vld [vmem:[#allocation3 + $0x78] sm:$0xff] }
 0x1c8   : > { %v3672_v33 = vld [vmem:[#allocation3 + $0x30] sm:$0xff]  ;;  %4613 = vmatmul.mubr.msk.bf16.gmra.mrb[12].mxu1 %vm3725_vm3, %v3681_v32 }
 0x1c9   : > { %4596 = vmatprep.mubr.msk.bf16.mxu0 %vm3725_vm3, %v3672_v33 }
 0x1cc   : > { %v3673_v34 = vld [vmem:[#allocation3 + $0x38] sm:$0xff] }
 0x1cd   : > { %4597 = vmatmul.mubr.msk.bf16.gmra.mrb[12].mxu0 %vm3725_vm3, %v3673_v34 }
 0x1cf   : > { %v4586_v37 = vpop.f32.mrb[0].mxu0 }
 0x1d0   : > { %v4602_v39 = vpop.f32.mrb[0].mxu1  ;;  %v3821_v40 = vadd.f32 %v4586_v37, %v5715_v35  ;;  %v3812_v21 = vpop.f32.mrb[1].mxu0 }
 0x1d1   : > { %v3885_v38 = vadd.f32 %v4602_v39, %v5715_v35  ;;  %v3876_v42 = vpop.f32.mrb[1].mxu1  ;;  %v3813_v43 = vadd.f32 %v5715_v35, %v3812_v21  ;;  %v4587_v45 = vpop.f32.mrb[2].mxu0 }
 0x1d2   : > { %v3877_v44 = vadd.f32 %v5715_v35, %v3876_v42  ;;  %v4603_v46 = vpop.f32.mrb[2].mxu1  ;;  %v3941_v47 = vmax.f32 %v3821_v40, 0.0  ;;  %v3824_v50 = vadd.f32 %v4587_v45, %v5715_v35  ;;  %v3815_v53 = vpop.f32.mrb[3].mxu0 }
 0x1d3   : > { %v3957_v48 = vmax.f32 %v3885_v38, 0.0  ;;  %v3888_v52 = vadd.f32 %v4603_v46, %v5715_v35  ;;  %v3879_v54 = vpop.f32.mrb[3].mxu1  ;;  %v3939_v56 = vmax.f32 %v3813_v43, 0.0  ;;  %v3816_v58 = vadd.f32 %v5715_v35, %v3815_v53 }
 0x1d4   : > { %v3955_v57 = vmax.f32 %v3877_v44, 0.0  ;;  %v3880_v59 = vadd.f32 %v5715_v35, %v3879_v54  ;;  %3973 = vst.msk [vmem:[%s5723_s11 + $0x10] sm:$0xff] %vm689_vm8, %v3941_v47  ;;  %v3942_v61 = vmax.f32 %v3824_v50, 0.0 }
 0x1d5   : > { %3989 = vst.msk [vmem:[%s5723_s11 + $0x90] sm:$0xff] %vm689_vm8, %v3957_v48  ;;  %v3958_v62 = vmax.f32 %v3888_v52, 0.0  ;;  %3971 = vst.msk [vmem:[%s5723_s11] sm:$0xff] %vm689_vm8, %v3939_v56  ;;  %v3940_v31 = vmax.f32 %v3816_v58, 0.0 }
 0x1d6   : > { %3987 = vst.msk [vmem:[%s5723_s11 + $0x80] sm:$0xff] %vm689_vm8, %v3955_v57  ;;  %v3956_v49 = vmax.f32 %v3880_v59, 0.0  ;;  %3974 = vst.msk [vmem:[%s5723_s11 + $0x18] sm:$0xff] %vm689_vm8, %v3942_v61 }
 0x1d7   : > { %3990 = vst.msk [vmem:[%s5723_s11 + $0x98] sm:$0xff] %vm689_vm8, %v3958_v62  ;;  %3972 = vst.msk [vmem:[%s5723_s11 + $0x8] sm:$0xff] %vm689_vm8, %v3940_v31 }
 0x1d8   : > { %3988 = vst.msk [vmem:[%s5723_s11 + $0x88] sm:$0xff] %vm689_vm8, %v3956_v49 }
 0x1db   : > { %v4529_v63 = vld [vmem:[%s5723_s11 + $0x10] sm:$0xff] }
 0x1dc   : > { %v4537_v0 = vld [vmem:[%s5723_s11 + $0x90] sm:$0xff]  ;;  %v4003_v1 = vld [vmem:[%s5723_s11] sm:$0xff] }
 0x1dd   : > { %v4011_v3 = vld [vmem:[%s5723_s11 + $0x80] sm:$0xff]  ;;  %v4036_v4 = vmax.f32 %v4003_v1, %v4529_v63  ;;  %v4530_v5 = vld [vmem:[%s5723_s11 + $0x18] sm:$0xff] }
 0x1de   : > { %v4044_v11 = vmax.f32 %v4011_v3, %v4537_v0  ;;  %v4538_v6 = vld [vmem:[%s5723_s11 + $0x98] sm:$0xff]  ;;  %v4004_v7 = vld [vmem:[%s5723_s11 + $0x8] sm:$0xff] }
 0x1df   : > { %v4012_v8 = vld [vmem:[%s5723_s11 + $0x88] sm:$0xff]  ;;  %4052 = vst.msk [vmem:[#allocation4] sm:$0xff] %vm689_vm8, %v4036_v4  ;;  %v4037_v60 = vmax.f32 %v4004_v7, %v4530_v5 }
 0x1e0   : > { %4060 = vst.msk [vmem:[#allocation4 + $0x40] sm:$0xff] %vm689_vm8, %v4044_v11  ;;  %v4045_v9 = vmax.f32 %v4012_v8, %v4538_v6 }
 0x1e1   : > { %4053 = vst.msk [vmem:[#allocation4 + $0x8] sm:$0xff] %vm689_vm8, %v4037_v60 }
 0x1e2   : > { %4061 = vst.msk [vmem:[#allocation4 + $0x48] sm:$0xff] %vm689_vm8, %v4045_v9 }
 0x1e8   : > { %v4068_v22 = vld [vmem:[#allocation4] ss:$2 sm:$0xff]  ;;  %v4084_v10 = vld [vmem:[#allocation4 + $0x1] ss:$2 sm:$0xff] }
 0x1e9   : > { %v4076_v12 = vld [vmem:[#allocation4 + $0x40] ss:$2 sm:$0xff]  ;;  %v4099_v13 = vmax.f32 %v4068_v22, %v4084_v10  ;;  %v4092_v17 = vld [vmem:[#allocation4 + $0x41] ss:$2 sm:$0xff] }
 0x1ea   : > { %v4103_v36 = vmax.f32 %v4076_v12, %v4092_v17 }
 0x1eb   : > { %4107 = vst.msk [vmem:[%s5763_s20] sm:$0xff] %vm689_vm8, %v4099_v13 }
 0x1ec   : > { %4111 = vst.msk [vmem:[%s5763_s20 + $0x20] sm:$0xff] %vm689_vm8, %v4103_v36 }
 0x20f   : > { %v4606_v51 = vpop.f32.mrb[4].mxu1 }
 0x210   : > { %v3901_v2 = vadd.f32 %v4606_v51, %v5715_v35  ;;  %v3892_v55 = vpop.f32.mrb[5].mxu1 }
 0x211   : > { %v3893_v41 = vadd.f32 %v5715_v35, %v3892_v55  ;;  %v4607_v16 = vpop.f32.mrb[6].mxu1 }
 0x212   : > { %v4590_v15 = vpop.f32.mrb[4].mxu0  ;;  %v3961_v19 = vmax.f32 %v3901_v2, 0.0  ;;  %v3904_v23 = vadd.f32 %v4607_v16, %v5715_v35  ;;  %v3895_v24 = vpop.f32.mrb[7].mxu1 }
 0x213   : > { %v3837_v18 = vadd.f32 %v4590_v15, %v5715_v35  ;;  %v3828_v20 = vpop.f32.mrb[5].mxu0  ;;  %v3959_v26 = vmax.f32 %v3893_v41, 0.0  ;;  %v3896_v27 = vadd.f32 %v5715_v35, %v3895_v24 }
 0x214   : > { %v3829_v25 = vadd.f32 %v5715_v35, %v3828_v20  ;;  %v4591_v30 = vpop.f32.mrb[6].mxu0  ;;  %3993 = vst.msk [vmem:[%s5723_s11 + $0xb0] sm:$0xff] %vm689_vm8, %v3961_v19  ;;  %v3962_v29 = vmax.f32 %v3904_v23, 0.0 }
 0x215   : > { %v3945_v28 = vmax.f32 %v3837_v18, 0.0  ;;  %v3840_v14 = vadd.f32 %v4591_v30, %v5715_v35  ;;  %v3831_v32 = vpop.f32.mrb[7].mxu0  ;;  %3991 = vst.msk [vmem:[%s5723_s11 + $0xa0] sm:$0xff] %vm689_vm8, %v3959_v26  ;;  %v3960_v37 = vmax.f32 %v3896_v27, 0.0 }
 0x216   : > { %v3943_v33 = vmax.f32 %v3829_v25, 0.0  ;;  %v3832_v34 = vadd.f32 %v5715_v35, %v3831_v32  ;;  %3994 = vst.msk [vmem:[%s5723_s11 + $0xb8] sm:$0xff] %vm689_vm8, %v3962_v29 }
 0x217   : > { %3977 = vst.msk [vmem:[%s5723_s11 + $0x30] sm:$0xff] %vm689_vm8, %v3945_v28  ;;  %v3946_v39 = vmax.f32 %v3840_v14, 0.0  ;;  %3992 = vst.msk [vmem:[%s5723_s11 + $0xa8] sm:$0xff] %vm689_vm8, %v3960_v37 }
 0x218   : > { %3975 = vst.msk [vmem:[%s5723_s11 + $0x20] sm:$0xff] %vm689_vm8, %v3943_v33  ;;  %v3944_v40 = vmax.f32 %v3832_v34, 0.0 }
 0x219   : > { %3978 = vst.msk [vmem:[%s5723_s11 + $0x38] sm:$0xff] %vm689_vm8, %v3946_v39 }
 0x21a   : > { %3976 = vst.msk [vmem:[%s5723_s11 + $0x28] sm:$0xff] %vm689_vm8, %v3944_v40 }
 0x21b   : > { %v4539_v38 = vld [vmem:[%s5723_s11 + $0xb0] sm:$0xff] }
 0x21c   : > { %v4013_v21 = vld [vmem:[%s5723_s11 + $0xa0] sm:$0xff] }
 0x21d   : > { %v4046_v43 = vmax.f32 %v4013_v21, %v4539_v38  ;;  %v4540_v44 = vld [vmem:[%s5723_s11 + $0xb8] sm:$0xff] }
 0x21e   : > { %v4531_v42 = vld [vmem:[%s5723_s11 + $0x30] sm:$0xff]  ;;  %v4014_v46 = vld [vmem:[%s5723_s11 + $0xa8] sm:$0xff] }
 0x21f   : > { %v4005_v45 = vld [vmem:[%s5723_s11 + $0x20] sm:$0xff]  ;;  %4062 = vst.msk [vmem:[#allocation4 + $0x50] sm:$0xff] %vm689_vm8, %v4046_v43  ;;  %v4047_v50 = vmax.f32 %v4014_v46, %v4540_v44 }
 0x220   : > { %v4038_v47 = vmax.f32 %v4005_v45, %v4531_v42  ;;  %v4532_v48 = vld [vmem:[%s5723_s11 + $0x38] sm:$0xff] }
 0x221   : > { %v4006_v52 = vld [vmem:[%s5723_s11 + $0x28] sm:$0xff]  ;;  %4063 = vst.msk [vmem:[#allocation4 + $0x58] sm:$0xff] %vm689_vm8, %v4047_v50 }
 0x222   : > { %4054 = vst.msk [vmem:[#allocation4 + $0x10] sm:$0xff] %vm689_vm8, %v4038_v47  ;;  %v4039_v53 = vmax.f32 %v4006_v52, %v4532_v48 }
 0x224   : > { %4055 = vst.msk [vmem:[#allocation4 + $0x18] sm:$0xff] %vm689_vm8, %v4039_v53 }
 0x228   : > { %v4078_v54 = vld [vmem:[#allocation4 + $0x50] ss:$2 sm:$0xff]  ;;  %v4094_v56 = vld [vmem:[#allocation4 + $0x51] ss:$2 sm:$0xff] }
 0x229   : > { %v4104_v57 = vmax.f32 %v4078_v54, %v4094_v56 }
 0x22b   : > { %v4070_v58 = vld [vmem:[#allocation4 + $0x10] ss:$2 sm:$0xff]  ;;  %v4086_v59 = vld [vmem:[#allocation4 + $0x11] ss:$2 sm:$0xff]  ;;  %4112 = vst.msk [vmem:[%s5763_s20 + $0x28] sm:$0xff] %vm689_vm8, %v4104_v57 }
 0x22c   : > { %v4100_v61 = vmax.f32 %v4070_v58, %v4086_v59 }
 0x22e   : > { %4108 = vst.msk [vmem:[%s5763_s20 + $0x8] sm:$0xff] %vm689_vm8, %v4100_v61 }
 0x25c   : > { %v4610_v62 = vpop.f32.mrb[8].mxu1 }
 0x25d   : > { %v3917_v31 = vadd.f32 %v4610_v62, %v5715_v35  ;;  %v3908_v49 = vpop.f32.mrb[9].mxu1 }
 0x25e   : > { %v4594_v63 = vpop.f32.mrb[8].mxu0  ;;  %v3909_v0 = vadd.f32 %v5715_v35, %v3908_v49  ;;  %v4611_v1 = vpop.f32.mrb[10].mxu1 }
 0x25f   : > { %v3853_v3 = vadd.f32 %v4594_v63, %v5715_v35  ;;  %v3965_v4 = vmax.f32 %v3917_v31, 0.0  ;;  %v3844_v11 = vpop.f32.mrb[9].mxu0  ;;  %v3920_v5 = vadd.f32 %v4611_v1, %v5715_v35  ;;  %v3911_v6 = vpop.f32.mrb[11].mxu1 }
 0x260   : > { %v3845_v7 = vadd.f32 %v5715_v35, %v3844_v11  ;;  %v3963_v8 = vmax.f32 %v3909_v0, 0.0  ;;  %v4595_v60 = vpop.f32.mrb[10].mxu0  ;;  %v3912_v9 = vadd.f32 %v5715_v35, %v3911_v6 }
 0x261   : > { %v3949_v22 = vmax.f32 %v3853_v3, 0.0  ;;  %3997 = vst.msk [vmem:[%s5723_s11 + $0xd0] sm:$0xff] %vm689_vm8, %v3965_v4  ;;  %v3856_v10 = vadd.f32 %v4595_v60, %v5715_v35  ;;  %v3966_v12 = vmax.f32 %v3920_v5, 0.0  ;;  %v3847_v13 = vpop.f32.mrb[11].mxu0 }
 0x262   : > { %v3947_v17 = vmax.f32 %v3845_v7, 0.0  ;;  %3995 = vst.msk [vmem:[%s5723_s11 + $0xc0] sm:$0xff] %vm689_vm8, %v3963_v8  ;;  %v3848_v36 = vadd.f32 %v5715_v35, %v3847_v13  ;;  %v3964_v51 = vmax.f32 %v3912_v9, 0.0 }
 0x263   : > { %3981 = vst.msk [vmem:[%s5723_s11 + $0x50] sm:$0xff] %vm689_vm8, %v3949_v22  ;;  %v3950_v2 = vmax.f32 %v3856_v10, 0.0  ;;  %3998 = vst.msk [vmem:[%s5723_s11 + $0xd8] sm:$0xff] %vm689_vm8, %v3966_v12 }
 0x264   : > { %3979 = vst.msk [vmem:[%s5723_s11 + $0x40] sm:$0xff] %vm689_vm8, %v3947_v17  ;;  %v3948_v55 = vmax.f32 %v3848_v36, 0.0  ;;  %3996 = vst.msk [vmem:[%s5723_s11 + $0xc8] sm:$0xff] %vm689_vm8, %v3964_v51 }
 0x265   : > { %3982 = vst.msk [vmem:[%s5723_s11 + $0x58] sm:$0xff] %vm689_vm8, %v3950_v2 }
 0x266   : > { %3980 = vst.msk [vmem:[%s5723_s11 + $0x48] sm:$0xff] %vm689_vm8, %v3948_v55 }
 0x268   : > { %v4541_v15 = vld [vmem:[%s5723_s11 + $0xd0] sm:$0xff] }
 0x269   : > { %v4015_v41 = vld [vmem:[%s5723_s11 + $0xc0] sm:$0xff] }
 0x26a   : > { %v4533_v16 = vld [vmem:[%s5723_s11 + $0x50] sm:$0xff]  ;;  %v4048_v18 = vmax.f32 %v4015_v41, %v4541_v15  ;;  %v4542_v19 = vld [vmem:[%s5723_s11 + $0xd8] sm:$0xff] }
 0x26b   : > { %v4007_v20 = vld [vmem:[%s5723_s11 + $0x40] sm:$0xff]  ;;  %v4016_v23 = vld [vmem:[%s5723_s11 + $0xc8] sm:$0xff] }
 0x26c   : > { %v4040_v24 = vmax.f32 %v4007_v20, %v4533_v16  ;;  %4064 = vst.msk [vmem:[#allocation4 + $0x60] sm:$0xff] %vm689_vm8, %v4048_v18  ;;  %v4534_v25 = vld [vmem:[%s5723_s11 + $0x58] sm:$0xff]  ;;  %v4049_v26 = vmax.f32 %v4016_v23, %v4542_v19 }
 0x26d   : > { %v4008_v30 = vld [vmem:[%s5723_s11 + $0x48] sm:$0xff] }
 0x26e   : > { %4056 = vst.msk [vmem:[#allocation4 + $0x20] sm:$0xff] %vm689_vm8, %v4040_v24  ;;  %v4041_v27 = vmax.f32 %v4008_v30, %v4534_v25  ;;  %4065 = vst.msk [vmem:[#allocation4 + $0x68] sm:$0xff] %vm689_vm8, %v4049_v26 }
 0x270   : > { %4057 = vst.msk [vmem:[#allocation4 + $0x28] sm:$0xff] %vm689_vm8, %v4041_v27 }
 0x275   : > { %v4080_v28 = vld [vmem:[#allocation4 + $0x60] ss:$2 sm:$0xff]  ;;  %v4096_v14 = vld [vmem:[#allocation4 + $0x61] ss:$2 sm:$0xff] }
 0x276   : > { %v4105_v29 = vmax.f32 %v4080_v28, %v4096_v14 }
 0x277   : > { %v4072_v32 = vld [vmem:[#allocation4 + $0x20] ss:$2 sm:$0xff]  ;;  %v4088_v33 = vld [vmem:[#allocation4 + $0x21] ss:$2 sm:$0xff] }
 0x278   : > { %v4101_v34 = vmax.f32 %v4072_v32, %v4088_v33  ;;  %4113 = vst.msk [vmem:[%s5763_s20 + $0x30] sm:$0xff] %vm689_vm8, %v4105_v29 }
 0x27a   : > { %4109 = vst.msk [vmem:[%s5763_s20 + $0x10] sm:$0xff] %vm689_vm8, %v4101_v34 }
 0x29b   : > { %v4614_v37 = vpop.f32.mrb[12].mxu1 }
 0x29c   : > { %v3933_v39 = vadd.f32 %v4614_v37, %v5715_v35  ;;  %v3924_v40 = vpop.f32.mrb[13].mxu1 }
 0x29d   : > { %v3925_v38 = vadd.f32 %v5715_v35, %v3924_v40  ;;  %v4615_v21 = vpop.f32.mrb[14].mxu1 }
 0x29e   : > { %v3969_v42 = vmax.f32 %v3933_v39, 0.0  ;;  %v3936_v43 = vadd.f32 %v4615_v21, %v5715_v35  ;;  %v3927_v44 = vpop.f32.mrb[15].mxu1 }
 0x29f   : > { %v3967_v45 = vmax.f32 %v3925_v38, 0.0  ;;  %v3928_v46 = vadd.f32 %v5715_v35, %v3927_v44 }
 0x2a0   : > { %v4598_v47 = vpop.f32.mrb[12].mxu0  ;;  %4001 = vst.msk [vmem:[%s5723_s11 + $0xf0] sm:$0xff] %vm689_vm8, %v3969_v42  ;;  %v3970_v48 = vmax.f32 %v3936_v43, 0.0 }
 0x2a1   : > { %v3869_v50 = vadd.f32 %v4598_v47, %v5715_v35  ;;  %v3860_v52 = vpop.f32.mrb[13].mxu0  ;;  %3999 = vst.msk [vmem:[%s5723_s11 + $0xe0] sm:$0xff] %vm689_vm8, %v3967_v45  ;;  %v3968_v53 = vmax.f32 %v3928_v46, 0.0 }
 0x2a2   : > { %v3861_v54 = vadd.f32 %v5715_v35, %v3860_v52  ;;  %v4599_v56 = vpop.f32.mrb[14].mxu0  ;;  %4002 = vst.msk [vmem:[%s5723_s11 + $0xf8] sm:$0xff] %vm689_vm8, %v3970_v48 }
 0x2a3   : > { %v3953_v57 = vmax.f32 %v3869_v50, 0.0  ;;  %v3872_v58 = vadd.f32 %v4599_v56, %v5715_v35  ;;  %v3863_v59 = vpop.f32.mrb[15].mxu0  ;;  %4000 = vst.msk [vmem:[%s5723_s11 + $0xe8] sm:$0xff] %vm689_vm8, %v3968_v53 }
 0x2a4   : > { %v3951_v61 = vmax.f32 %v3861_v54, 0.0  ;;  %v3864_v62 = vadd.f32 %v5715_v35, %v3863_v59 }
 0x2a5   : > { %3985 = vst.msk [vmem:[%s5723_s11 + $0x70] sm:$0xff] %vm689_vm8, %v3953_v57  ;;  %v3954_v31 = vmax.f32 %v3872_v58, 0.0 }
 0x2a6   : > { %3983 = vst.msk [vmem:[%s5723_s11 + $0x60] sm:$0xff] %vm689_vm8, %v3951_v61  ;;  %v3952_v49 = vmax.f32 %v3864_v62, 0.0 }
 0x2a7   : > { %v4543_v63 = vld [vmem:[%s5723_s11 + $0xf0] sm:$0xff]  ;;  %3986 = vst.msk [vmem:[%s5723_s11 + $0x78] sm:$0xff] %vm689_vm8, %v3954_v31 }
 0x2a8   : > { %v4017_v0 = vld [vmem:[%s5723_s11 + $0xe0] sm:$0xff]  ;;  %3984 = vst.msk [vmem:[%s5723_s11 + $0x68] sm:$0xff] %vm689_vm8, %v3952_v49 }
 0x2a9   : > { %v4050_v1 = vmax.f32 %v4017_v0, %v4543_v63  ;;  %v4544_v3 = vld [vmem:[%s5723_s11 + $0xf8] sm:$0xff] }
 0x2aa   : > { %v4018_v4 = vld [vmem:[%s5723_s11 + $0xe8] sm:$0xff] }
 0x2ab   : > { %4066 = vst.msk [vmem:[#allocation4 + $0x70] sm:$0xff] %vm689_vm8, %v4050_v1  ;;  %v4051_v35 = vmax.f32 %v4018_v4, %v4544_v3 }
 0x2ac   : > { %v4535_v11 = vld [vmem:[%s5723_s11 + $0x70] sm:$0xff] }
 0x2ad   : > { %v4009_v5 = vld [vmem:[%s5723_s11 + $0x60] sm:$0xff]  ;;  %4067 = vst.msk [vmem:[#allocation4 + $0x78] sm:$0xff] %vm689_vm8, %v4051_v35 }
 0x2ae   : > { %v4042_v6 = vmax.f32 %v4009_v5, %v4535_v11  ;;  %v4536_v7 = vld [vmem:[%s5723_s11 + $0x78] sm:$0xff] }
 0x2af   : > { %v4010_v8 = vld [vmem:[%s5723_s11 + $0x68] sm:$0xff] }
 0x2b0   : > { %4058 = vst.msk [vmem:[#allocation4 + $0x30] sm:$0xff] %vm689_vm8, %v4042_v6  ;;  %v4043_v60 = vmax.f32 %v4010_v8, %v4536_v7 }
 0x2b2   : > { %4059 = vst.msk [vmem:[#allocation4 + $0x38] sm:$0xff] %vm689_vm8, %v4043_v60 }
 0x2b4   : > { %v4082_v9 = vld [vmem:[#allocation4 + $0x70] ss:$2 sm:$0xff]  ;;  %v4098_v22 = vld [vmem:[#allocation4 + $0x71] ss:$2 sm:$0xff] }
 0x2b5   : > { %v4106_v10 = vmax.f32 %v4082_v9, %v4098_v22 }
 0x2b7   : > { %4114 = vst.msk [vmem:[%s5763_s20 + $0x38] sm:$0xff] %vm689_vm8, %v4106_v10 }
 0x2b9   : > { %v4074_v12 = vld [vmem:[#allocation4 + $0x30] ss:$2 sm:$0xff]  ;;  %v4090_v13 = vld [vmem:[#allocation4 + $0x31] ss:$2 sm:$0xff] }
 0x2ba   : > { %v4102_v17 = vmax.f32 %v4074_v12, %v4090_v13 }
 0x2bc   : > { %4110 = vst.msk [vmem:[%s5763_s20 + $0x18] sm:$0xff] %vm689_vm8, %v4102_v17 }
 0x2bd PF: > { %s17_s23 = sadd.s32 1, %s4738_s23   ;;  %s5909_s21 = smov %s4734_s22 }
 0x2be   : > { %p14_p5 = scmp.ge.s32.totalorder %s17_s23, 4   ;;  %s5910_s22 = smov %s5912_s24 }
 0x2c0   :  { %16 = sbr.rel (!%p14_p5) target bundleno = 2 (0x2), region = 108 }

</bundles_post_ra>
